<compile_context>
chip_gen: v7x
topology: tpu7x:2x2x1
jax: 0.10.0
libtpu: 0.0.40
codegen_flags: <defaults>
</compile_context>

<pallas_src>
import functools

import jax
import jax.numpy as jnp
from jax.experimental import pallas as pl
from jax.experimental.pallas import tpu as pltpu


def _round_up(x, m):
    return (x + m - 1) // m * m


_VMEM_LIMIT = 32 * 1024 * 1024   # safe on v5e/v6e (128 MiB phys) and v7x (64 MiB phys)


# ----------------------------- GEMM (im2col conv) ----------------------------

def _gemm_epilogue_kernel(a_ref, b_ref, bias_ref, scale_ref, shift_ref, o_ref, *,
                          relu):
    """One (tm, N) output tile: A@B (single K block) with bias + optional ReLU +
    folded eval-mode BatchNorm fused in the epilogue."""
    y = jnp.dot(a_ref[...], b_ref[...], preferred_element_type=jnp.float32)
    y = y + bias_ref[...]
    if relu:
        y = jnp.maximum(y, 0.0)
    o_ref[...] = y * scale_ref[...] + shift_ref[...]


def pallas_gemm_fused(a, b, bias, scale, shift, *, relu=False, tm=1024):
    """(M, K) @ (K, N) + bias [, ReLU], then per-column scale/shift (f32 out).

    K and N stay single full-extent blocks (K <= 72, N <= 32 in this model), so no
    accumulator scratch is needed.  M is split into >= 2 tiles whenever possible so
    v7x's two TensorCores both get work; partial last tiles are handled by Pallas.
    TODO(synk): a transposed (N, M) lane-dense output variant would further cut
    masked vst's for the narrow-N decoder GEMMs (mostly a v5e store-slot win)."""
    M, K = a.shape
    Kb, N = b.shape
    assert K == Kb
    tm_eff = min(tm, _round_up(M, 8))
    if M >= 16:
        tm_eff = min(tm_eff, _round_up(pl.cdiv(M, 2), 8))
    grid = (pl.cdiv(M, tm_eff),)
    return pl.pallas_call(
        functools.partial(_gemm_epilogue_kernel, relu=relu),
        out_shape=jax.ShapeDtypeStruct((M, N), jnp.float32),
        grid=grid,
        in_specs=[
            pl.BlockSpec((tm_eff, K), lambda i: (i, 0)),
            pl.BlockSpec((K, N), lambda i: (0, 0)),
            pl.BlockSpec((1, N), lambda i: (0, 0)),
            pl.BlockSpec((1, N), lambda i: (0, 0)),
            pl.BlockSpec((1, N), lambda i: (0, 0)),
        ],
        out_specs=pl.BlockSpec((tm_eff, N), lambda i: (i, 0)),
        compiler_params=pltpu.CompilerParams(
            dimension_semantics=("parallel",),
            vmem_limit_bytes=_VMEM_LIMIT),
    )(a, b, bias, scale, shift)


# ------------------- fused ConvLSTM sequence (whole time loop) ---------------

def _convlstm_seq_kernel(h0_ref, c0_ref, xg_ref, wh_ref, mask_ref,
                         h_all_ref, c_out_ref, h_buf, *, k, Wp, P, C):
    """Grid = (batch, time).  The whole time recurrence of one ConvLSTM layer runs
    inside this kernel: h is carried in a margin-padded VMEM scratch (flat
    spatially-padded layout), c is carried in the resident c_out block.  The 3x3
    hidden-to-hidden 'same' conv is 9 statically shifted slices of h_buf, each hit
    with one (C, 4C) dot (all four gates at once).  x-gate contributions (bias
    included, spatial border rows zero) come precomputed per timestep via xg."""
    t = pl.program_id(1)
    OFF = Wp + 1                        # max |flat halo offset| for a 3x3 window

    @pl.when(t == 0)
    def _init():
        h_buf[...] = jnp.zeros_like(h_buf)
        h_buf[pl.ds(OFF, P), :] = h0_ref[0]
        c_out_ref[...] = c0_ref[...]

    mask = mask_ref[...]                                    # (P, 1): 1 on interior
    pre = xg_ref[0, 0]                                      # (P, 4C) f32
    for dy in range(k):
        for dx in range(k):
            off = (dy - k // 2) * Wp + (dx - k // 2)
            hs = h_buf[pl.ds(OFF + off, P), :]              # (P, C)
            pre = pre + jnp.dot(hs, wh_ref[dy * k + dx],
                                preferred_element_type=jnp.float32)
    # One transcendental pass over the full (P, 4C) slab:
    #   i/f/o = sigmoid(pre) = 0.5*(tanh(pre/2)+1),  g = tanh(pre).
    col = jax.lax.broadcasted_iota(jnp.int32, pre.shape, 1)
    is_g = col >= 3 * C
    th = jnp.tanh(jnp.where(is_g, pre, 0.5 * pre))
    gates = jnp.where(is_g, th, 0.5 * (th + 1.0))
    i_g = gates[:, 0 * C:1 * C]
    f_g = gates[:, 1 * C:2 * C]
    o_g = gates[:, 2 * C:3 * C]
    g_g = gates[:, 3 * C:4 * C]
    c_new = (f_g * c_out_ref[0] + i_g * g_g) * mask         # keep border rows zero
    h_new = (o_g * jnp.tanh(c_new)) * mask
    c_out_ref[0] = c_new
    h_all_ref[0, 0] = h_new
    h_buf[pl.ds(OFF, P), :] = h_new


def pallas_convlstm_seq(h0, c0, xg, wh, mask, *, k, Wp):
    """h0/c0: (B, P, C) f32 flat-padded state; xg: (B, T, P, 4C) f32 precomputed
    input-gate contributions (bias included, border rows 0); wh: (k*k, C, 4C) f32;
    mask: (P, 1) f32 interior mask.  Returns h for every step and the final c."""
    B, T, P, C4 = xg.shape
    C = C4 // 4
    kern = functools.partial(_convlstm_seq_kernel, k=k, Wp=Wp, P=P, C=C)
    h_all, c_fin = pl.pallas_call(
        kern,
        out_shape=(jax.ShapeDtypeStruct((B, T, P, C), jnp.float32),
                   jax.ShapeDtypeStruct((B, P, C), jnp.float32)),
        grid=(B, T),
        in_specs=[
            pl.BlockSpec((1, P, C), lambda b, t: (b, 0, 0)),        # h0
            pl.BlockSpec((1, P, C), lambda b, t: (b, 0, 0)),        # c0
            pl.BlockSpec((1, 1, P, C4), lambda b, t: (b, t, 0, 0)),  # xg (per step)
            pl.BlockSpec((k * k, C, C4), lambda b, t: (0, 0, 0)),    # wh (resident)
            pl.BlockSpec((P, 1), lambda b, t: (0, 0)),               # interior mask
        ],
        out_specs=(
            pl.BlockSpec((1, 1, P, C), lambda b, t: (b, t, 0, 0)),   # h per step
            pl.BlockSpec((1, P, C), lambda b, t: (b, 0, 0)),         # c (resident)
        ),
        scratch_shapes=[pltpu.VMEM((P + 2 * (Wp + 1), C), jnp.float32)],
        compiler_params=pltpu.CompilerParams(
            dimension_semantics=("parallel", "arbitrary"),
            vmem_limit_bytes=_VMEM_LIMIT),
    )(h0, c0, xg, wh, mask)
    return h_all, c_fin


# --------------------------- conv / conv-transpose --------------------------

def _im2col_nhwc(x, kh, kw, stride):
    """x: (N, H, W, C) already spatially padded -> ((N*OH*OW, KH*KW*C), OH, OW).
    K ordered (ky, kx, c) to match the prepared weight matrices."""
    n, h, w, c = x.shape
    oh = (h - kh) // stride + 1
    ow = (w - kw) // stride + 1
    cols = []
    for i in range(kh):
        for j in range(kw):
            cols.append(x[:, i:i + (oh - 1) * stride + 1:stride,
                             j:j + (ow - 1) * stride + 1:stride, :])
    patches = jnp.concatenate(cols, axis=-1)              # (n, oh, ow, kh*kw*c)
    return patches.reshape(n * oh * ow, kh * kw * c), oh, ow


def conv2d_nhwc(x, layer, stride=1, padding=0):
    """x: (N, H, W, C); layer: prepared conv dict (bf16 GEMM weight, fused epilogue)."""
    x = x.astype(jnp.bfloat16)
    if padding > 0:
        x = jnp.pad(x, ((0, 0), (padding, padding), (padding, padding), (0, 0)))
    a, oh, ow = _im2col_nhwc(x, layer['kh'], layer['kw'], stride)
    out = pallas_gemm_fused(a, layer['w'], layer['bias'], layer['scale'],
                            layer['shift'], relu=layer['relu'])
    return out.reshape(x.shape[0], oh, ow, -1)


def conv_transpose2d_subpixel(x, layer):
    """ConvTranspose2d(k=3, stride=2, pad=0) via the sub-pixel decomposition:
    one GEMM over a 2x2-window im2col of the 1-padded input producing the 4 output
    parity phases at once, then an XLA-side interleave into the full-res output."""
    n, h, w, cin = x.shape
    xp = jnp.pad(x.astype(jnp.bfloat16), ((0, 0), (1, 1), (1, 1), (0, 0)))
    a, oh, ow = _im2col_nhwc(xp, 2, 2, 1)                 # (n*(h+1)*(w+1), 4*cin)
    y = pallas_gemm_fused(a, layer['w'], layer['bias'], layer['scale'],
                          layer['shift'], relu=layer['relu'])
    cout = layer['cout']
    y = y.reshape(n, oh, ow, 4, cout)                      # phases: ee, eo, oe, oo
    out = jnp.zeros((n, 2 * oh, 2 * ow, cout), y.dtype)
    out = out.at[:, 0::2, 0::2].set(y[..., 0, :])
    out = out.at[:, 0::2, 1::2].set(y[..., 1, :])
    out = out.at[:, 1::2, 0::2].set(y[..., 2, :])
    out = out.at[:, 1::2, 1::2].set(y[..., 3, :])
    return out[:, :2 * h + 1, :2 * w + 1, :]


# ------------------------------ model pieces --------------------------------

def _interior_mask(hp, wp):
    """(hp*wp, 1) f32 mask: 1 on the unpadded interior, 0 on the 1-pixel border."""
    idx = jnp.arange(hp * wp)
    y, x = idx // wp, idx % wp
    m = ((y >= 1) & (y <= hp - 2) & (x >= 1) & (x <= wp - 2))
    return m.astype(jnp.float32).reshape(hp * wp, 1)


def stacked_convlstm(lstm_layers, xs, hiddens, *, B, T, H, W, mask,
                     xs_is_zero=False):
    # TODO(synk): model.core_module.ConvLSTM source is not provided; a standard
    # ConvLSTM (gate conv over concat([x, h]), 'same' padding, i/f/o/g gates) is
    # used, the extra ctor arg of the first cell and training-only dropout are
    # ignored (eval-mode semantics).
    # xs: (B, T, P, C) flat spatially-padded (1-pixel zero border), or None when
    # xs_is_zero (decoder's x_empty).
    Hp, Wp = H + 2, W + 2
    P = Hp * Wp
    n_layers = len(lstm_layers)
    if hiddens is None:
        hiddens = [None] * n_layers
    hiddens = list(hiddens)
    for li, lp in enumerate(lstm_layers):
        k, C = lp['k'], lp['C']
        if xs_is_zero:
            # conv(0) + bias == bias on interior rows: skip the GEMM + im2col.
            xg = jnp.broadcast_to(
                mask.reshape(1, 1, P, 1) * lp['bias'].reshape(1, 1, 1, 4 * C),
                (B, T, P, 4 * C))
        else:
            # input-to-hidden gates for ALL timesteps in one GEMM (input is already
            # spatially padded, so no extra pad before im2col).
            x4 = xs.reshape(B * T, Hp, Wp, C).astype(jnp.bfloat16)
            a_x, _, _ = _im2col_nhwc(x4, k, k, 1)          # (B*T*H*W, k*k*C)
            xg = pallas_gemm_fused(a_x, lp['wx'], lp['bias'], lp['ones'],
                                   lp['zeros'], relu=False)
            xg = xg.reshape(B, T, H, W, 4 * C)
            xg = jnp.pad(xg, ((0, 0), (0, 0), (1, 1), (1, 1), (0, 0)))
            xg = xg.reshape(B, T, P, 4 * C)
        if hiddens[li] is None:
            h0 = jnp.zeros((B, P, C), jnp.float32)
            c0 = jnp.zeros((B, P, C), jnp.float32)
        else:
            h0, c0 = hiddens[li]
        h_all, c_fin = pallas_convlstm_seq(h0, c0, xg, lp['wh'], mask, k=k, Wp=Wp)
        hiddens[li] = (h_all[:, -1], c_fin)
        xs = h_all                                          # next layer's input
        xs_is_zero = False
    return hiddens


def s_enc_forward(prep, x):
    # S_EncDec(encoder=True): Conv2d(stride 2) -> ReLU -> BatchNorm2d over (B*T).
    B, T = x.shape[:2]
    y = conv2d_nhwc(x.reshape(B * T, *x.shape[2:]), prep['enc'], stride=2, padding=0)
    return y.reshape(B, T, *y.shape[1:])


def s_dec_forward(prep, x):
    # S_EncDec(encoder=False): ConvT -> ReLU -> BN, last ConvT plain.
    y = conv_transpose2d_subpixel(x, prep['dec0'])
    return conv_transpose2d_subpixel(y, prep['dec1'])


def st_encdec_forward(prep, inputs, empty_steps=3):
    """ST_EncDec.forward (is_attn=False, eval mode, teacher_ratio unused).
    inputs: (B, T, C, H, W) NCHW like PyTorch."""
    # TODO(synk): init_cell_weight()/reset_cell_weight() of the (unprovided)
    # ConvLSTM is a no-op here.
    B, T = inputs.shape[:2]
    x = inputs.transpose(0, 1, 3, 4, 2)                    # -> (B, T, H, W, C)
    enc = s_enc_forward(prep, x)                           # (B, T, He, We, Ce)
    _, _, He, We, Ce = enc.shape
    Hp, Wp = He + 2, We + 2
    P = Hp * Wp
    mask = _interior_mask(Hp, Wp)
    enc_pad = jnp.pad(enc, ((0, 0), (0, 0), (1, 1), (1, 1), (0, 0)))
    enc_pad = enc_pad.reshape(B, T, P, Ce)
    hiddens = stacked_convlstm(prep['lstm'], enc_pad, None,
                               B=B, T=T, H=He, W=We, mask=mask)   # ST_Encoder

    def interior(hp_flat):                                 # (B, P, C) -> (B, He, We, C)
        return hp_flat.reshape(B, Hp, Wp, -1)[:, 1:1 + He, 1:1 + We, :]

    # ---- ST_Decoder ----
    dec_in = [interior(hiddens[-1][0])]
    # TODO(synk): original hardcodes x_empty to (B, 10, 64, 17, 127); generalized
    # to (B, empty_steps, H_enc, W_enc, C_enc) for this synthetic configuration.
    for _ in range(T - 1, 0, -1):
        hiddens = stacked_convlstm(prep['lstm'], None, hiddens,
                                   B=B, T=empty_steps, H=He, W=We, mask=mask,
                                   xs_is_zero=True)
        dec_in.append(interior(hiddens[-1][0]))
    # decode all T output steps in ONE batched pass
    dec_stack = jnp.stack(dec_in[::-1], axis=0).reshape(T * B, He, We, Ce)
    y = s_dec_forward(prep, dec_stack)                     # (T*B, Ho, Wo, 2)
    ho, wo = y.shape[1:3]
    return y.reshape(T, B, ho, wo, 2).transpose(1, 0, 4, 2, 3)   # (B, T, 2, Ho, Wo)


# ------------------------------- parameters ---------------------------------

def init_params(key, channels=(1, 8, 8), kernels=(3, 3), n_layers=2):
    c0, c1, c2 = channels
    k0, k1 = kernels
    keys = jax.random.split(key, 8)

    def nrm(k, shape, scale=0.1):
        return scale * jax.random.normal(k, shape, jnp.float32)

    p = {
        # encoder S_EncDec uses channels[:-1], kernels[:-1]: Conv2d(c0->c1, k0, s2)
        'enc_w': nrm(keys[0], (c1, c0, k0, k0)),
        'enc_b': nrm(keys[1], (c1,)),
        'enc_bn_gamma': jnp.ones((c1,), jnp.float32),
        'enc_bn_beta': jnp.zeros((c1,), jnp.float32),
        'enc_bn_mean': jnp.zeros((c1,), jnp.float32),
        'enc_bn_var': jnp.ones((c1,), jnp.float32),
    }
    # StackedConvLSTM: n_layers cells, channel = channels[-1] = c2, kernel = k1
    lk = jax.random.split(keys[2], n_layers * 2)
    p['lstm'] = [(nrm(lk[2 * i], (4 * c2, 2 * c2, k1, k1)),
                  nrm(lk[2 * i + 1], (4 * c2,))) for i in range(n_layers)]
    # decoder S_EncDec: channels[0]=2 then reversed -> [c2, c1, 2], kernels [k1, k0]
    p['dec0_w'] = nrm(keys[3], (c2, c1, k1, k1))   # ConvTranspose2d(c2, c1, k1, s2)
    p['dec0_b'] = nrm(keys[4], (c1,))
    p['dec0_bn_gamma'] = jnp.ones((c1,), jnp.float32)
    p['dec0_bn_beta'] = jnp.zeros((c1,), jnp.float32)
    p['dec0_bn_mean'] = jnp.zeros((c1,), jnp.float32)
    p['dec0_bn_var'] = jnp.ones((c1,), jnp.float32)
    p['dec1_w'] = nrm(keys[5], (c1, 2, k0, k0))    # ConvTranspose2d(c1, 2, k0, s2)
    p['dec1_b'] = nrm(keys[6], (2,))
    return p


def _fold_bn(gamma, beta, mean, var, eps=1e-5):
    scale = gamma / jnp.sqrt(var + eps)
    return scale, beta - mean * scale


def _prep_conv(w_oihw, b, scale, shift, relu):
    oc, ic, kh, kw = w_oihw.shape
    # (OC, IC, KH, KW) -> (KH*KW*IC, OC), matching _im2col_nhwc K ordering.
    wmat = w_oihw.transpose(2, 3, 1, 0).reshape(kh * kw * ic, oc)
    return dict(w=wmat.astype(jnp.bfloat16),
                bias=b.reshape(1, oc).astype(jnp.float32),
                scale=scale.reshape(1, oc).astype(jnp.float32),
                shift=shift.reshape(1, oc).astype(jnp.float32),
                kh=kh, kw=kw, relu=relu)


def _prep_convT3x3s2(w_iokk, b, scale, shift, relu):
    """ConvTranspose2d(k=3, stride=2, pad=0) sub-pixel weight: rows ordered
    (u2, v2, cin) for a 2x2 window over the 1-padded input, columns ordered
    (phase{ee,eo,oe,oo}, cout)."""
    cin, cout, kh, kw = w_iokk.shape
    assert (kh, kw) == (3, 3)   # TODO(synk): general k/stride falls back unimplemented
    wt = jnp.transpose(w_iokk, (2, 3, 0, 1))               # (ky, kx, cin, cout)
    z = jnp.zeros((cin, cout), w_iokk.dtype)
    rows = []
    for u2 in (0, 1):
        for v2 in (0, 1):
            cols = [wt[2 - 2 * u2, 2 - 2 * v2],                              # ee
                    wt[2 - 2 * u2, 1] if v2 == 1 else z,                     # eo
                    wt[1, 2 - 2 * v2] if u2 == 1 else z,                     # oe
                    wt[1, 1] if (u2 == 1 and v2 == 1) else z]                # oo
            rows.append(jnp.concatenate(cols, axis=1))      # (cin, 4*cout)
    wmat = jnp.concatenate(rows, axis=0)                    # (4*cin, 4*cout)
    return dict(w=wmat.astype(jnp.bfloat16),
                bias=jnp.tile(b, 4).reshape(1, 4 * cout).astype(jnp.float32),
                scale=jnp.tile(scale, 4).reshape(1, 4 * cout).astype(jnp.float32),
                shift=jnp.tile(shift, 4).reshape(1, 4 * cout).astype(jnp.float32),
                cout=cout, relu=relu)


def prepare_params(p):
    """One-time weight prep (hoisted out of all loops): GEMM-layout bf16 weights,
    folded eval-mode BatchNorm, ConvLSTM W_x / W_h split (W_h kept per-tap)."""
    prep = {}
    prep['enc'] = _prep_conv(p['enc_w'], p['enc_b'],
                             *_fold_bn(p['enc_bn_gamma'], p['enc_bn_beta'],
                                       p['enc_bn_mean'], p['enc_bn_var']),
                             relu=True)
    prep['dec0'] = _prep_convT3x3s2(p['dec0_w'], p['dec0_b'],
                                    *_fold_bn(p['dec0_bn_gamma'], p['dec0_bn_beta'],
                                              p['dec0_bn_mean'], p['dec0_bn_var']),
                                    relu=True)
    oc1 = p['dec1_w'].shape[1]
    prep['dec1'] = _prep_convT3x3s2(p['dec1_w'], p['dec1_b'],
                                    jnp.ones((oc1,), jnp.float32),
                                    jnp.zeros((oc1,), jnp.float32), relu=False)
    lstm = []
    for (w, b) in p['lstm']:
        # w: (4C, 2C, k, k) over concat([x, h]); gate order assumed i/f/o/g.
        four_c = w.shape[0]
        k = w.shape[-1]
        C = four_c // 4
        wx = w[:, :C].transpose(2, 3, 1, 0).reshape(k * k * C, four_c)
        wh = w[:, C:].transpose(2, 3, 1, 0).reshape(k * k, C, four_c)
        lstm.append(dict(
            wx=wx.astype(jnp.bfloat16),
            wh=wh.astype(jnp.float32),
            bias=b.reshape(1, four_c).astype(jnp.float32),
            ones=jnp.ones((1, four_c), jnp.float32),
            zeros=jnp.zeros((1, four_c), jnp.float32),
            k=k, C=C))
    prep['lstm'] = lstm
    return prep


if __name__ == "__main__":
    key = jax.random.PRNGKey(0)
    pkey, xkey = jax.random.split(key)
    params = init_params(pkey)
    prep = prepare_params(params)

    B, T, C, H, W = 2, 4, 1, 16, 16
    x = jax.random.normal(xkey, (B, T, C, H, W), jnp.float32)

    fwd = jax.jit(lambda xx: st_encdec_forward(prep, xx, empty_steps=3))
    out = jax.block_until_ready(fwd(x))

    # encoder: 16 -> 7 (conv k3 s2); decoder: 7 -> 15 -> 31 (two ConvT k3 s2), 2 ch
    assert out.shape == (B, T, 2, 31, 31), out.shape
    assert bool(jnp.all(jnp.isfinite(out)))
    print("KERNEL_OK")
</pallas_src>

<mosaic_0001>
module attributes {stable_mosaic.version = 11 : i64} {
  func.func @_gemm_epilogue_kernel(%arg0: i32, %arg1: memref<200x9xbf16, #tpu.memory_space<vmem>>, %arg2: memref<9x8xbf16, #tpu.memory_space<vmem>>, %arg3: memref<1x8xf32, #tpu.memory_space<vmem>>, %arg4: memref<1x8xf32, #tpu.memory_space<vmem>>, %arg5: memref<1x8xf32, #tpu.memory_space<vmem>>, %arg6: memref<200x8xf32, #tpu.memory_space<vmem>>) attributes {dimension_semantics = [#tpu.dimension_semantics<parallel>], iteration_bounds = array<i64: 2>, scalar_prefetch = 0 : i64, scratch_operands = 0 : i64, tpu.core_type = #tpu.core_type<tc>, window_params = [{transform_indices = @transform_0, window_bounds = array<i64: 200, 9>}, {pipeline_mode = #tpu.pipeline_mode<synchronous>, transform_indices = @transform_1, window_bounds = array<i64: 9, 8>}, {pipeline_mode = #tpu.pipeline_mode<synchronous>, transform_indices = @transform_2, window_bounds = array<i64: 1, 8>}, {pipeline_mode = #tpu.pipeline_mode<synchronous>, transform_indices = @transform_3, window_bounds = array<i64: 1, 8>}, {pipeline_mode = #tpu.pipeline_mode<synchronous>, transform_indices = @transform_4, window_bounds = array<i64: 1, 8>}, {transform_indices = @transform_5, window_bounds = array<i64: 200, 8>}]} {
    %c0 = arith.constant 0 : index
    %c0_0 = arith.constant 0 : index
    %0 = vector.load %arg1[%c0, %c0_0] : memref<200x9xbf16, #tpu.memory_space<vmem>>, vector<200x9xbf16>
    %c0_1 = arith.constant 0 : index
    %c0_2 = arith.constant 0 : index
    %1 = vector.load %arg2[%c0_1, %c0_2] : memref<9x8xbf16, #tpu.memory_space<vmem>>, vector<9x8xbf16>
    %cst = arith.constant dense<0.000000e+00> : vector<200x8xf32>
    %2 = tpu.matmul %0, %1, %cst {dimension_numbers = #tpu.dot_dimension_numbers<[1], [0], [0], [1], [0, 0, 1, 1], [], []>} : vector<200x9xbf16>, vector<9x8xbf16>, vector<200x8xf32> -> vector<200x8xf32>
    %c0_3 = arith.constant 0 : index
    %c0_4 = arith.constant 0 : index
    %3 = vector.load %arg3[%c0_3, %c0_4] : memref<1x8xf32, #tpu.memory_space<vmem>>, vector<1x8xf32>
    %4 = vector.broadcast %3 : vector<1x8xf32> to vector<200x8xf32>
    %5 = arith.addf %2, %4 : vector<200x8xf32>
    %cst_5 = arith.constant 0.000000e+00 : f32
    %6 = vector.broadcast %cst_5 : f32 to vector<200x8xf32>
    %7 = arith.maximumf %5, %6 : vector<200x8xf32>
    %c0_6 = arith.constant 0 : index
    %c0_7 = arith.constant 0 : index
    %8 = vector.load %arg4[%c0_6, %c0_7] : memref<1x8xf32, #tpu.memory_space<vmem>>, vector<1x8xf32>
    %9 = vector.broadcast %8 : vector<1x8xf32> to vector<200x8xf32>
    %10 = arith.mulf %7, %9 : vector<200x8xf32>
    %c0_8 = arith.constant 0 : index
    %c0_9 = arith.constant 0 : index
    %11 = vector.load %arg5[%c0_8, %c0_9] : memref<1x8xf32, #tpu.memory_space<vmem>>, vector<1x8xf32>
    %12 = vector.broadcast %11 : vector<1x8xf32> to vector<200x8xf32>
    %13 = arith.addf %10, %12 : vector<200x8xf32>
    %c0_10 = arith.constant 0 : index
    %c0_11 = arith.constant 0 : index
    %14 = vector.load %arg6[%c0_10, %c0_11] : memref<200x8xf32, #tpu.memory_space<vmem>>, vector<200x8xf32>
    tpu.vector_store %arg6[%c0_10, %c0_11], %13 {strides = array<i32>} : memref<200x8xf32, #tpu.memory_space<vmem>>, vector<200x8xf32>,
    return
  }
  func.func @transform_0(%arg0: i32) -> (i32, i32) {
    %c0_i32 = arith.constant 0 : i32
    %c0_i32_0 = arith.constant 0 : i32
    return %arg0, %c0_i32 : i32, i32
  }
  func.func @transform_1(%arg0: i32) -> (i32, i32) {
    %c0_i32 = arith.constant 0 : i32
    %c0_i32_0 = arith.constant 0 : i32
    %c0_i32_1 = arith.constant 0 : i32
    return %c0_i32, %c0_i32_0 : i32, i32
  }
  func.func @transform_2(%arg0: i32) -> (i32, i32) {
    %c0_i32 = arith.constant 0 : i32
    %c0_i32_0 = arith.constant 0 : i32
    %c0_i32_1 = arith.constant 0 : i32
    return %c0_i32, %c0_i32_0 : i32, i32
  }
  func.func @transform_3(%arg0: i32) -> (i32, i32) {
    %c0_i32 = arith.constant 0 : i32
    %c0_i32_0 = arith.constant 0 : i32
    %c0_i32_1 = arith.constant 0 : i32
    return %c0_i32, %c0_i32_0 : i32, i32
  }
  func.func @transform_4(%arg0: i32) -> (i32, i32) {
    %c0_i32 = arith.constant 0 : i32
    %c0_i32_0 = arith.constant 0 : i32
    %c0_i32_1 = arith.constant 0 : i32
    return %c0_i32, %c0_i32_0 : i32, i32
  }
  func.func @transform_5(%arg0: i32) -> (i32, i32) {
    %c0_i32 = arith.constant 0 : i32
    %c0_i32_0 = arith.constant 0 : i32
    return %arg0, %c0_i32 : i32, i32
  }
}

module attributes {stable_mosaic.version = 11 : i64} {
  func.func @_gemm_epilogue_kernel(%arg0: i32, %arg1: memref<200x72xbf16, #tpu.memory_space<vmem>>, %arg2: memref<72x32xbf16, #tpu.memory_space<vmem>>, %arg3: memref<1x32xf32, #tpu.memory_space<vmem>>, %arg4: memref<1x32xf32, #tpu.memory_space<vmem>>, %arg5: memref<1x32xf32, #tpu.memory_space<vmem>>, %arg6: memref<200x32xf32, #tpu.memory_space<vmem>>) attributes {dimension_semantics = [#tpu.dimension_semantics<parallel>], iteration_bounds = array<i64: 2>, scalar_prefetch = 0 : i64, scratch_operands = 0 : i64, tpu.core_type = #tpu.core_type<tc>, window_params = [{transform_indices = @transform_0, window_bounds = array<i64: 200, 72>}, {pipeline_mode = #tpu.pipeline_mode<synchronous>, transform_indices = @transform_1, window_bounds = array<i64: 72, 32>}, {pipeline_mode = #tpu.pipeline_mode<synchronous>, transform_indices = @transform_2, window_bounds = array<i64: 1, 32>}, {pipeline_mode = #tpu.pipeline_mode<synchronous>, transform_indices = @transform_3, window_bounds = array<i64: 1, 32>}, {pipeline_mode = #tpu.pipeline_mode<synchronous>, transform_indices = @transform_4, window_bounds = array<i64: 1, 32>}, {transform_indices = @transform_5, window_bounds = array<i64: 200, 32>}]} {
    %c0 = arith.constant 0 : index
    %c0_0 = arith.constant 0 : index
    %0 = vector.load %arg1[%c0, %c0_0] : memref<200x72xbf16, #tpu.memory_space<vmem>>, vector<200x72xbf16>
    %c0_1 = arith.constant 0 : index
    %c0_2 = arith.constant 0 : index
    %1 = vector.load %arg2[%c0_1, %c0_2] : memref<72x32xbf16, #tpu.memory_space<vmem>>, vector<72x32xbf16>
    %cst = arith.constant dense<0.000000e+00> : vector<200x32xf32>
    %2 = tpu.matmul %0, %1, %cst {dimension_numbers = #tpu.dot_dimension_numbers<[1], [0], [0], [1], [0, 0, 1, 1], [], []>} : vector<200x72xbf16>, vector<72x32xbf16>, vector<200x32xf32> -> vector<200x32xf32>
    %c0_3 = arith.constant 0 : index
    %c0_4 = arith.constant 0 : index
    %3 = vector.load %arg3[%c0_3, %c0_4] : memref<1x32xf32, #tpu.memory_space<vmem>>, vector<1x32xf32>
    %4 = vector.broadcast %3 : vector<1x32xf32> to vector<200x32xf32>
    %5 = arith.addf %2, %4 : vector<200x32xf32>
    %c0_5 = arith.constant 0 : index
    %c0_6 = arith.constant 0 : index
    %6 = vector.load %arg4[%c0_5, %c0_6] : memref<1x32xf32, #tpu.memory_space<vmem>>, vector<1x32xf32>
    %7 = vector.broadcast %6 : vector<1x32xf32> to vector<200x32xf32>
    %8 = arith.mulf %5, %7 : vector<200x32xf32>
    %c0_7 = arith.constant 0 : index
    %c0_8 = arith.constant 0 : index
    %9 = vector.load %arg5[%c0_7, %c0_8] : memref<1x32xf32, #tpu.memory_space<vmem>>, vector<1x32xf32>
    %10 = vector.broadcast %9 : vector<1x32xf32> to vector<200x32xf32>
    %11 = arith.addf %8, %10 : vector<200x32xf32>
    %c0_9 = arith.constant 0 : index
    %c0_10 = arith.constant 0 : index
    %12 = vector.load %arg6[%c0_9, %c0_10] : memref<200x32xf32, #tpu.memory_space<vmem>>, vector<200x32xf32>
    tpu.vector_store %arg6[%c0_9, %c0_10], %11 {strides = array<i32>} : memref<200x32xf32, #tpu.memory_space<vmem>>, vector<200x32xf32>,
    return
  }
  func.func @transform_0(%arg0: i32) -> (i32, i32) {
    %c0_i32 = arith.constant 0 : i32
    %c0_i32_0 = arith.constant 0 : i32
    return %arg0, %c0_i32 : i32, i32
  }
  func.func @transform_1(%arg0: i32) -> (i32, i32) {
    %c0_i32 = arith.constant 0 : i32
    %c0_i32_0 = arith.constant 0 : i32
    %c0_i32_1 = arith.constant 0 : i32
    return %c0_i32, %c0_i32_0 : i32, i32
  }
  func.func @transform_2(%arg0: i32) -> (i32, i32) {
    %c0_i32 = arith.constant 0 : i32
    %c0_i32_0 = arith.constant 0 : i32
    %c0_i32_1 = arith.constant 0 : i32
    return %c0_i32, %c0_i32_0 : i32, i32
  }
  func.func @transform_3(%arg0: i32) -> (i32, i32) {
    %c0_i32 = arith.constant 0 : i32
    %c0_i32_0 = arith.constant 0 : i32
    %c0_i32_1 = arith.constant 0 : i32
    return %c0_i32, %c0_i32_0 : i32, i32
  }
  func.func @transform_4(%arg0: i32) -> (i32, i32) {
    %c0_i32 = arith.constant 0 : i32
    %c0_i32_0 = arith.constant 0 : i32
    %c0_i32_1 = arith.constant 0 : i32
    return %c0_i32, %c0_i32_0 : i32, i32
  }
  func.func @transform_5(%arg0: i32) -> (i32, i32) {
    %c0_i32 = arith.constant 0 : i32
    %c0_i32_0 = arith.constant 0 : i32
    return %arg0, %c0_i32 : i32, i32
  }
}

module attributes {stable_mosaic.version = 11 : i64} {
  func.func @_convlstm_seq_kernel(%arg0: i32, %arg1: i32, %arg2: memref<1x81x8xf32, #tpu.memory_space<vmem>>, %arg3: memref<1x81x8xf32, #tpu.memory_space<vmem>>, %arg4: memref<1x1x81x32xf32, #tpu.memory_space<vmem>>, %arg5: memref<9x8x32xf32, #tpu.memory_space<vmem>>, %arg6: memref<81x1xf32, #tpu.memory_space<vmem>>, %arg7: memref<1x1x81x8xf32, #tpu.memory_space<vmem>>, %arg8: memref<1x81x8xf32, #tpu.memory_space<vmem>>, %arg9: memref<101x8xf32, #tpu.memory_space<vmem>>) attributes {dimension_semantics = [#tpu.dimension_semantics<parallel>, #tpu.dimension_semantics<arbitrary>], iteration_bounds = array<i64: 2, 4>, scalar_prefetch = 0 : i64, scratch_operands = 1 : i64, tpu.core_type = #tpu.core_type<tc>, window_params = [{transform_indices = @transform_0, window_bounds = array<i64: 1, 81, 8>}, {transform_indices = @transform_1, window_bounds = array<i64: 1, 81, 8>}, {transform_indices = @transform_2, window_bounds = array<i64: 1, 1, 81, 32>}, {pipeline_mode = #tpu.pipeline_mode<synchronous>, transform_indices = @transform_3, window_bounds = array<i64: 9, 8, 32>}, {pipeline_mode = #tpu.pipeline_mode<synchronous>, transform_indices = @transform_4, window_bounds = array<i64: 81, 1>}, {transform_indices = @transform_5, window_bounds = array<i64: 1, 1, 81, 8>}, {transform_indices = @transform_6, window_bounds = array<i64: 1, 81, 8>}]} {
    %c0_i32 = arith.constant 0 : i32
    %0 = arith.cmpi eq, %arg1, %c0_i32 : i32
    %1 = arith.extui %0 : i1 to i32
    %c0_i32_0 = arith.constant 0 : i32
    %2 = arith.cmpi ne, %1, %c0_i32_0 : i32
    scf.if %2 {
      %cst_60 = arith.constant 0.000000e+00 : f32
      %85 = vector.broadcast %cst_60 : f32 to vector<101x8xf32>
      %c0_61 = arith.constant 0 : index
      %c0_62 = arith.constant 0 : index
      %86 = vector.load %arg9[%c0_61, %c0_62] : memref<101x8xf32, #tpu.memory_space<vmem>>, vector<101x8xf32>
      tpu.vector_store %arg9[%c0_61, %c0_62], %85 {strides = array<i32>} : memref<101x8xf32, #tpu.memory_space<vmem>>, vector<101x8xf32>,
      %c0_63 = arith.constant 0 : index
      %c0_64 = arith.constant 0 : index
      %c0_65 = arith.constant 0 : index
      %87 = vector.load %arg2[%c0_63, %c0_64, %c0_65] : memref<1x81x8xf32, #tpu.memory_space<vmem>>, vector<1x81x8xf32>
      %88 = vector.shape_cast %87 : vector<1x81x8xf32> to vector<81x8xf32>
      %c10_66 = arith.constant 10 : index
      %c0_67 = arith.constant 0 : index
      %89 = vector.load %arg9[%c10_66, %c0_67] : memref<101x8xf32, #tpu.memory_space<vmem>>, vector<81x8xf32>
      tpu.vector_store %arg9[%c10_66, %c0_67], %88 {strides = array<i32>} : memref<101x8xf32, #tpu.memory_space<vmem>>, vector<81x8xf32>,
      %c0_68 = arith.constant 0 : index
      %c0_69 = arith.constant 0 : index
      %c0_70 = arith.constant 0 : index
      %90 = vector.load %arg3[%c0_68, %c0_69, %c0_70] : memref<1x81x8xf32, #tpu.memory_space<vmem>>, vector<1x81x8xf32>
      %c0_71 = arith.constant 0 : index
      %c0_72 = arith.constant 0 : index
      %c0_73 = arith.constant 0 : index
      %91 = vector.load %arg8[%c0_71, %c0_72, %c0_73] : memref<1x81x8xf32, #tpu.memory_space<vmem>>, vector<1x81x8xf32>
      tpu.vector_store %arg8[%c0_71, %c0_72, %c0_73], %90 {strides = array<i32>} : memref<1x81x8xf32, #tpu.memory_space<vmem>>, vector<1x81x8xf32>,
    } else {
    }
    %c0 = arith.constant 0 : index
    %c0_1 = arith.constant 0 : index
    %3 = vector.load %arg6[%c0, %c0_1] : memref<81x1xf32, #tpu.memory_space<vmem>>, vector<81x1xf32>
    %c0_2 = arith.constant 0 : index
    %c0_3 = arith.constant 0 : index
    %c0_4 = arith.constant 0 : index
    %c0_5 = arith.constant 0 : index
    %4 = vector.load %arg4[%c0_2, %c0_3, %c0_4, %c0_5] : memref<1x1x81x32xf32, #tpu.memory_space<vmem>>, vector<1x1x81x32xf32>
    %5 = vector.shape_cast %4 : vector<1x1x81x32xf32> to vector<81x32xf32>
    %c0_6 = arith.constant 0 : index
    %c0_7 = arith.constant 0 : index
    %6 = vector.load %arg9[%c0_6, %c0_7] : memref<101x8xf32, #tpu.memory_space<vmem>>, vector<81x8xf32>
    %c0_8 = arith.constant 0 : index
    %c0_9 = arith.constant 0 : index
    %c0_10 = arith.constant 0 : index
    %7 = vector.load %arg5[%c0_8, %c0_9, %c0_10] : memref<9x8x32xf32, #tpu.memory_space<vmem>>, vector<1x8x32xf32>
    %8 = vector.shape_cast %7 : vector<1x8x32xf32> to vector<8x32xf32>
    %cst = arith.constant dense<0.000000e+00> : vector<81x32xf32>
    %9 = tpu.matmul %6, %8, %cst {dimension_numbers = #tpu.dot_dimension_numbers<[1], [0], [0], [1], [0, 0, 1, 1], [], []>} : vector<81x8xf32>, vector<8x32xf32>, vector<81x32xf32> -> vector<81x32xf32>
    %10 = arith.addf %5, %9 : vector<81x32xf32>
    %c1 = arith.constant 1 : index
    %c0_11 = arith.constant 0 : index
    %11 = vector.load %arg9[%c1, %c0_11] : memref<101x8xf32, #tpu.memory_space<vmem>>, vector<81x8xf32>
    %c1_12 = arith.constant 1 : index
    %c0_13 = arith.constant 0 : index
    %c0_14 = arith.constant 0 : index
    %12 = vector.load %arg5[%c1_12, %c0_13, %c0_14] : memref<9x8x32xf32, #tpu.memory_space<vmem>>, vector<1x8x32xf32>
    %13 = vector.shape_cast %12 : vector<1x8x32xf32> to vector<8x32xf32>
    %cst_15 = arith.constant dense<0.000000e+00> : vector<81x32xf32>
    %14 = tpu.matmul %11, %13, %cst_15 {dimension_numbers = #tpu.dot_dimension_numbers<[1], [0], [0], [1], [0, 0, 1, 1], [], []>} : vector<81x8xf32>, vector<8x32xf32>, vector<81x32xf32> -> vector<81x32xf32>
    %15 = arith.addf %10, %14 : vector<81x32xf32>
    %c2 = arith.constant 2 : index
    %c0_16 = arith.constant 0 : index
    %16 = vector.load %arg9[%c2, %c0_16] : memref<101x8xf32, #tpu.memory_space<vmem>>, vector<81x8xf32>
    %c2_17 = arith.constant 2 : index
    %c0_18 = arith.constant 0 : index
    %c0_19 = arith.constant 0 : index
    %17 = vector.load %arg5[%c2_17, %c0_18, %c0_19] : memref<9x8x32xf32, #tpu.memory_space<vmem>>, vector<1x8x32xf32>
    %18 = vector.shape_cast %17 : vector<1x8x32xf32> to vector<8x32xf32>
    %cst_20 = arith.constant dense<0.000000e+00> : vector<81x32xf32>
    %19 = tpu.matmul %16, %18, %cst_20 {dimension_numbers = #tpu.dot_dimension_numbers<[1], [0], [0], [1], [0, 0, 1, 1], [], []>} : vector<81x8xf32>, vector<8x32xf32>, vector<81x32xf32> -> vector<81x32xf32>
    %20 = arith.addf %15, %19 : vector<81x32xf32>
    %c9 = arith.constant 9 : index
    %c0_21 = arith.constant 0 : index
    %21 = vector.load %arg9[%c9, %c0_21] : memref<101x8xf32, #tpu.memory_space<vmem>>, vector<81x8xf32>
    %c3 = arith.constant 3 : index
    %c0_22 = arith.constant 0 : index
    %c0_23 = arith.constant 0 : index
    %22 = vector.load %arg5[%c3, %c0_22, %c0_23] : memref<9x8x32xf32, #tpu.memory_space<vmem>>, vector<1x8x32xf32>
    %23 = vector.shape_cast %22 : vector<1x8x32xf32> to vector<8x32xf32>
    %cst_24 = arith.constant dense<0.000000e+00> : vector<81x32xf32>
    %24 = tpu.matmul %21, %23, %cst_24 {dimension_numbers = #tpu.dot_dimension_numbers<[1], [0], [0], [1], [0, 0, 1, 1], [], []>} : vector<81x8xf32>, vector<8x32xf32>, vector<81x32xf32> -> vector<81x32xf32>
    %25 = arith.addf %20, %24 : vector<81x32xf32>
    %c10 = arith.constant 10 : index
    %c0_25 = arith.constant 0 : index
    %26 = vector.load %arg9[%c10, %c0_25] : memref<101x8xf32, #tpu.memory_space<vmem>>, vector<81x8xf32>
    %c4 = arith.constant 4 : index
    %c0_26 = arith.constant 0 : index
    %c0_27 = arith.constant 0 : index
    %27 = vector.load %arg5[%c4, %c0_26, %c0_27] : memref<9x8x32xf32, #tpu.memory_space<vmem>>, vector<1x8x32xf32>
    %28 = vector.shape_cast %27 : vector<1x8x32xf32> to vector<8x32xf32>
    %cst_28 = arith.constant dense<0.000000e+00> : vector<81x32xf32>
    %29 = tpu.matmul %26, %28, %cst_28 {dimension_numbers = #tpu.dot_dimension_numbers<[1], [0], [0], [1], [0, 0, 1, 1], [], []>} : vector<81x8xf32>, vector<8x32xf32>, vector<81x32xf32> -> vector<81x32xf32>
    %30 = arith.addf %25, %29 : vector<81x32xf32>
    %c11 = arith.constant 11 : index
    %c0_29 = arith.constant 0 : index
    %31 = vector.load %arg9[%c11, %c0_29] : memref<101x8xf32, #tpu.memory_space<vmem>>, vector<81x8xf32>
    %c5 = arith.constant 5 : index
    %c0_30 = arith.constant 0 : index
    %c0_31 = arith.constant 0 : index
    %32 = vector.load %arg5[%c5, %c0_30, %c0_31] : memref<9x8x32xf32, #tpu.memory_space<vmem>>, vector<1x8x32xf32>
    %33 = vector.shape_cast %32 : vector<1x8x32xf32> to vector<8x32xf32>
    %cst_32 = arith.constant dense<0.000000e+00> : vector<81x32xf32>
    %34 = tpu.matmul %31, %33, %cst_32 {dimension_numbers = #tpu.dot_dimension_numbers<[1], [0], [0], [1], [0, 0, 1, 1], [], []>} : vector<81x8xf32>, vector<8x32xf32>, vector<81x32xf32> -> vector<81x32xf32>
    %35 = arith.addf %30, %34 : vector<81x32xf32>
    %c18 = arith.constant 18 : index
    %c0_33 = arith.constant 0 : index
    %36 = vector.load %arg9[%c18, %c0_33] : memref<101x8xf32, #tpu.memory_space<vmem>>, vector<81x8xf32>
    %c6 = arith.constant 6 : index
    %c0_34 = arith.constant 0 : index
    %c0_35 = arith.constant 0 : index
    %37 = vector.load %arg5[%c6, %c0_34, %c0_35] : memref<9x8x32xf32, #tpu.memory_space<vmem>>, vector<1x8x32xf32>
    %38 = vector.shape_cast %37 : vector<1x8x32xf32> to vector<8x32xf32>
    %cst_36 = arith.constant dense<0.000000e+00> : vector<81x32xf32>
    %39 = tpu.matmul %36, %38, %cst_36 {dimension_numbers = #tpu.dot_dimension_numbers<[1], [0], [0], [1], [0, 0, 1, 1], [], []>} : vector<81x8xf32>, vector<8x32xf32>, vector<81x32xf32> -> vector<81x32xf32>
    %40 = arith.addf %35, %39 : vector<81x32xf32>
    %c19 = arith.constant 19 : index
    %c0_37 = arith.constant 0 : index
    %41 = vector.load %arg9[%c19, %c0_37] : memref<101x8xf32, #tpu.memory_space<vmem>>, vector<81x8xf32>
    %c7 = arith.constant 7 : index
    %c0_38 = arith.constant 0 : index
    %c0_39 = arith.constant 0 : index
    %42 = vector.load %arg5[%c7, %c0_38, %c0_39] : memref<9x8x32xf32, #tpu.memory_space<vmem>>, vector<1x8x32xf32>
    %43 = vector.shape_cast %42 : vector<1x8x32xf32> to vector<8x32xf32>
    %cst_40 = arith.constant dense<0.000000e+00> : vector<81x32xf32>
    %44 = tpu.matmul %41, %43, %cst_40 {dimension_numbers = #tpu.dot_dimension_numbers<[1], [0], [0], [1], [0, 0, 1, 1], [], []>} : vector<81x8xf32>, vector<8x32xf32>, vector<81x32xf32> -> vector<81x32xf32>
    %45 = arith.addf %40, %44 : vector<81x32xf32>
    %c20 = arith.constant 20 : index
    %c0_41 = arith.constant 0 : index
    %46 = vector.load %arg9[%c20, %c0_41] : memref<101x8xf32, #tpu.memory_space<vmem>>, vector<81x8xf32>
    %c8 = arith.constant 8 : index
    %c0_42 = arith.constant 0 : index
    %c0_43 = arith.constant 0 : index
    %47 = vector.load %arg5[%c8, %c0_42, %c0_43] : memref<9x8x32xf32, #tpu.memory_space<vmem>>, vector<1x8x32xf32>
    %48 = vector.shape_cast %47 : vector<1x8x32xf32> to vector<8x32xf32>
    %cst_44 = arith.constant dense<0.000000e+00> : vector<81x32xf32>
    %49 = tpu.matmul %46, %48, %cst_44 {dimension_numbers = #tpu.dot_dimension_numbers<[1], [0], [0], [1], [0, 0, 1, 1], [], []>} : vector<81x8xf32>, vector<8x32xf32>, vector<81x32xf32> -> vector<81x32xf32>
    %50 = arith.addf %45, %49 : vector<81x32xf32>
    %51 = tpu.iota {dimensions = array<i32: 1>} : vector<81x32xi32>
    %c24_i32 = arith.constant 24 : i32
    %52 = vector.broadcast %c24_i32 : i32 to vector<81x32xi32>
    %53 = arith.cmpi sge, %51, %52 : vector<81x32xi32>
    %cst_45 = arith.constant 5.000000e-01 : f32
    %54 = vector.broadcast %cst_45 : f32 to vector<81x32xf32>
    %55 = arith.mulf %54, %50 : vector<81x32xf32>
    %56 = arith.select %53, %50, %55 : vector<81x32xi1>, vector<81x32xf32>
    %57 = math.tanh %56 : vector<81x32xf32>
    %cst_46 = arith.constant 1.000000e+00 : f32
    %58 = vector.broadcast %cst_46 : f32 to vector<81x32xf32>
    %59 = arith.addf %57, %58 : vector<81x32xf32>
    %cst_47 = arith.constant 5.000000e-01 : f32
    %60 = vector.broadcast %cst_47 : f32 to vector<81x32xf32>
    %61 = arith.mulf %60, %59 : vector<81x32xf32>
    %62 = arith.select %53, %57, %61 : vector<81x32xi1>, vector<81x32xf32>
    %63 = vector.extract_strided_slice %62 {offsets = [0, 0], sizes = [81, 8], strides = [1, 1]} : vector<81x32xf32> to vector<81x8xf32>
    %64 = vector.extract_strided_slice %62 {offsets = [0, 8], sizes = [81, 8], strides = [1, 1]} : vector<81x32xf32> to vector<81x8xf32>
    %65 = vector.extract_strided_slice %62 {offsets = [0, 16], sizes = [81, 8], strides = [1, 1]} : vector<81x32xf32> to vector<81x8xf32>
    %66 = vector.extract_strided_slice %62 {offsets = [0, 24], sizes = [81, 8], strides = [1, 1]} : vector<81x32xf32> to vector<81x8xf32>
    %c0_48 = arith.constant 0 : index
    %c0_49 = arith.constant 0 : index
    %c0_50 = arith.constant 0 : index
    %67 = vector.load %arg8[%c0_48, %c0_49, %c0_50] : memref<1x81x8xf32, #tpu.memory_space<vmem>>, vector<1x81x8xf32>
    %68 = vector.shape_cast %67 : vector<1x81x8xf32> to vector<81x8xf32>
    %69 = arith.mulf %64, %68 : vector<81x8xf32>
    %70 = arith.mulf %63, %66 : vector<81x8xf32>
    %71 = arith.addf %69, %70 : vector<81x8xf32>
    %72 = vector.broadcast %3 : vector<81x1xf32> to vector<81x8xf32>
    %73 = arith.mulf %71, %72 : vector<81x8xf32>
    %74 = math.tanh %73 : vector<81x8xf32>
    %75 = arith.mulf %65, %74 : vector<81x8xf32>
    %76 = vector.broadcast %3 : vector<81x1xf32> to vector<81x8xf32>
    %77 = arith.mulf %75, %76 : vector<81x8xf32>
    %c0_51 = arith.constant 0 : index
    %c0_52 = arith.constant 0 : index
    %c0_53 = arith.constant 0 : index
    %78 = vector.load %arg8[%c0_51, %c0_52, %c0_53] : memref<1x81x8xf32, #tpu.memory_space<vmem>>, vector<1x81x8xf32>
    %79 = vector.shape_cast %78 : vector<1x81x8xf32> to vector<81x8xf32>
    %80 = vector.shape_cast %73 : vector<81x8xf32> to vector<1x81x8xf32>
    tpu.vector_store %arg8[%c0_51, %c0_52, %c0_53], %80 {strides = array<i32>} : memref<1x81x8xf32, #tpu.memory_space<vmem>>, vector<1x81x8xf32>,
    %c0_54 = arith.constant 0 : index
    %c0_55 = arith.constant 0 : index
    %c0_56 = arith.constant 0 : index
    %c0_57 = arith.constant 0 : index
    %81 = vector.load %arg7[%c0_54, %c0_55, %c0_56, %c0_57] : memref<1x1x81x8xf32, #tpu.memory_space<vmem>>, vector<1x1x81x8xf32>
    %82 = vector.shape_cast %81 : vector<1x1x81x8xf32> to vector<81x8xf32>
    %83 = vector.shape_cast %77 : vector<81x8xf32> to vector<1x1x81x8xf32>
    tpu.vector_store %arg7[%c0_54, %c0_55, %c0_56, %c0_57], %83 {strides = array<i32>} : memref<1x1x81x8xf32, #tpu.memory_space<vmem>>, vector<1x1x81x8xf32>,
    %c10_58 = arith.constant 10 : index
    %c0_59 = arith.constant 0 : index
    %84 = vector.load %arg9[%c10_58, %c0_59] : memref<101x8xf32, #tpu.memory_space<vmem>>, vector<81x8xf32>
    tpu.vector_store %arg9[%c10_58, %c0_59], %77 {strides = array<i32>} : memref<101x8xf32, #tpu.memory_space<vmem>>, vector<81x8xf32>,
    return
  }
  func.func @transform_0(%arg0: i32, %arg1: i32) -> (i32, i32, i32) {
    %c0_i32 = arith.constant 0 : i32
    %c0_i32_0 = arith.constant 0 : i32
    %c0_i32_1 = arith.constant 0 : i32
    return %arg0, %c0_i32, %c0_i32_0 : i32, i32, i32
  }
  func.func @transform_1(%arg0: i32, %arg1: i32) -> (i32, i32, i32) {
    %c0_i32 = arith.constant 0 : i32
    %c0_i32_0 = arith.constant 0 : i32
    %c0_i32_1 = arith.constant 0 : i32
    return %arg0, %c0_i32, %c0_i32_0 : i32, i32, i32
  }
  func.func @transform_2(%arg0: i32, %arg1: i32) -> (i32, i32, i32, i32) {
    %c0_i32 = arith.constant 0 : i32
    %c0_i32_0 = arith.constant 0 : i32
    %c0_i32_1 = arith.constant 0 : i32
    return %arg0, %arg1, %c0_i32, %c0_i32_0 : i32, i32, i32, i32
  }
  func.func @transform_3(%arg0: i32, %arg1: i32) -> (i32, i32, i32) {
    %c0_i32 = arith.constant 0 : i32
    %c0_i32_0 = arith.constant 0 : i32
    %c0_i32_1 = arith.constant 0 : i32
    %c0_i32_2 = arith.constant 0 : i32
    return %c0_i32, %c0_i32_0, %c0_i32_1 : i32, i32, i32
  }
  func.func @transform_4(%arg0: i32, %arg1: i32) -> (i32, i32) {
    %c0_i32 = arith.constant 0 : i32
    %c0_i32_0 = arith.constant 0 : i32
    %c0_i32_1 = arith.constant 0 : i32
    return %c0_i32, %c0_i32_0 : i32, i32
  }
  func.func @transform_5(%arg0: i32, %arg1: i32) -> (i32, i32, i32, i32) {
    %c0_i32 = arith.constant 0 : i32
    %c0_i32_0 = arith.constant 0 : i32
    %c0_i32_1 = arith.constant 0 : i32
    return %arg0, %arg1, %c0_i32, %c0_i32_0 : i32, i32, i32, i32
  }
  func.func @transform_6(%arg0: i32, %arg1: i32) -> (i32, i32, i32) {
    %c0_i32 = arith.constant 0 : i32
    %c0_i32_0 = arith.constant 0 : i32
    %c0_i32_1 = arith.constant 0 : i32
    return %arg0, %c0_i32, %c0_i32_0 : i32, i32, i32
  }
}

module attributes {stable_mosaic.version = 11 : i64} {
  func.func @_convlstm_seq_kernel(%arg0: i32, %arg1: i32, %arg2: memref<1x81x8xf32, #tpu.memory_space<vmem>>, %arg3: memref<1x81x8xf32, #tpu.memory_space<vmem>>, %arg4: memref<1x1x81x32xf32, #tpu.memory_space<vmem>>, %arg5: memref<9x8x32xf32, #tpu.memory_space<vmem>>, %arg6: memref<81x1xf32, #tpu.memory_space<vmem>>, %arg7: memref<1x1x81x8xf32, #tpu.memory_space<vmem>>, %arg8: memref<1x81x8xf32, #tpu.memory_space<vmem>>, %arg9: memref<101x8xf32, #tpu.memory_space<vmem>>) attributes {dimension_semantics = [#tpu.dimension_semantics<parallel>, #tpu.dimension_semantics<arbitrary>], iteration_bounds = array<i64: 2, 3>, scalar_prefetch = 0 : i64, scratch_operands = 1 : i64, tpu.core_type = #tpu.core_type<tc>, window_params = [{transform_indices = @transform_0, window_bounds = array<i64: 1, 81, 8>}, {transform_indices = @transform_1, window_bounds = array<i64: 1, 81, 8>}, {transform_indices = @transform_2, window_bounds = array<i64: 1, 1, 81, 32>}, {pipeline_mode = #tpu.pipeline_mode<synchronous>, transform_indices = @transform_3, window_bounds = array<i64: 9, 8, 32>}, {pipeline_mode = #tpu.pipeline_mode<synchronous>, transform_indices = @transform_4, window_bounds = array<i64: 81, 1>}, {transform_indices = @transform_5, window_bounds = array<i64: 1, 1, 81, 8>}, {transform_indices = @transform_6, window_bounds = array<i64: 1, 81, 8>}]} {
    %c0_i32 = arith.constant 0 : i32
    %0 = arith.cmpi eq, %arg1, %c0_i32 : i32
    %1 = arith.extui %0 : i1 to i32
    %c0_i32_0 = arith.constant 0 : i32
    %2 = arith.cmpi ne, %1, %c0_i32_0 : i32
    scf.if %2 {
      %cst_60 = arith.constant 0.000000e+00 : f32
      %85 = vector.broadcast %cst_60 : f32 to vector<101x8xf32>
      %c0_61 = arith.constant 0 : index
      %c0_62 = arith.constant 0 : index
      %86 = vector.load %arg9[%c0_61, %c0_62] : memref<101x8xf32, #tpu.memory_space<vmem>>, vector<101x8xf32>
      tpu.vector_store %arg9[%c0_61, %c0_62], %85 {strides = array<i32>} : memref<101x8xf32, #tpu.memory_space<vmem>>, vector<101x8xf32>,
      %c0_63 = arith.constant 0 : index
      %c0_64 = arith.constant 0 : index
      %c0_65 = arith.constant 0 : index
      %87 = vector.load %arg2[%c0_63, %c0_64, %c0_65] : memref<1x81x8xf32, #tpu.memory_space<vmem>>, vector<1x81x8xf32>
      %88 = vector.shape_cast %87 : vector<1x81x8xf32> to vector<81x8xf32>
      %c10_66 = arith.constant 10 : index
      %c0_67 = arith.constant 0 : index
      %89 = vector.load %arg9[%c10_66, %c0_67] : memref<101x8xf32, #tpu.memory_space<vmem>>, vector<81x8xf32>
      tpu.vector_store %arg9[%c10_66, %c0_67], %88 {strides = array<i32>} : memref<101x8xf32, #tpu.memory_space<vmem>>, vector<81x8xf32>,
      %c0_68 = arith.constant 0 : index
      %c0_69 = arith.constant 0 : index
      %c0_70 = arith.constant 0 : index
      %90 = vector.load %arg3[%c0_68, %c0_69, %c0_70] : memref<1x81x8xf32, #tpu.memory_space<vmem>>, vector<1x81x8xf32>
      %c0_71 = arith.constant 0 : index
      %c0_72 = arith.constant 0 : index
      %c0_73 = arith.constant 0 : index
      %91 = vector.load %arg8[%c0_71, %c0_72, %c0_73] : memref<1x81x8xf32, #tpu.memory_space<vmem>>, vector<1x81x8xf32>
      tpu.vector_store %arg8[%c0_71, %c0_72, %c0_73], %90 {strides = array<i32>} : memref<1x81x8xf32, #tpu.memory_space<vmem>>, vector<1x81x8xf32>,
    } else {
    }
    %c0 = arith.constant 0 : index
    %c0_1 = arith.constant 0 : index
    %3 = vector.load %arg6[%c0, %c0_1] : memref<81x1xf32, #tpu.memory_space<vmem>>, vector<81x1xf32>
    %c0_2 = arith.constant 0 : index
    %c0_3 = arith.constant 0 : index
    %c0_4 = arith.constant 0 : index
    %c0_5 = arith.constant 0 : index
    %4 = vector.load %arg4[%c0_2, %c0_3, %c0_4, %c0_5] : memref<1x1x81x32xf32, #tpu.memory_space<vmem>>, vector<1x1x81x32xf32>
    %5 = vector.shape_cast %4 : vector<1x1x81x32xf32> to vector<81x32xf32>
    %c0_6 = arith.constant 0 : index
    %c0_7 = arith.constant 0 : index
    %6 = vector.load %arg9[%c0_6, %c0_7] : memref<101x8xf32, #tpu.memory_space<vmem>>, vector<81x8xf32>
    %c0_8 = arith.constant 0 : index
    %c0_9 = arith.constant 0 : index
    %c0_10 = arith.constant 0 : index
    %7 = vector.load %arg5[%c0_8, %c0_9, %c0_10] : memref<9x8x32xf32, #tpu.memory_space<vmem>>, vector<1x8x32xf32>
    %8 = vector.shape_cast %7 : vector<1x8x32xf32> to vector<8x32xf32>
    %cst = arith.constant dense<0.000000e+00> : vector<81x32xf32>
    %9 = tpu.matmul %6, %8, %cst {dimension_numbers = #tpu.dot_dimension_numbers<[1], [0], [0], [1], [0, 0, 1, 1], [], []>} : vector<81x8xf32>, vector<8x32xf32>, vector<81x32xf32> -> vector<81x32xf32>
    %10 = arith.addf %5, %9 : vector<81x32xf32>
    %c1 = arith.constant 1 : index
    %c0_11 = arith.constant 0 : index
    %11 = vector.load %arg9[%c1, %c0_11] : memref<101x8xf32, #tpu.memory_space<vmem>>, vector<81x8xf32>
    %c1_12 = arith.constant 1 : index
    %c0_13 = arith.constant 0 : index
    %c0_14 = arith.constant 0 : index
    %12 = vector.load %arg5[%c1_12, %c0_13, %c0_14] : memref<9x8x32xf32, #tpu.memory_space<vmem>>, vector<1x8x32xf32>
    %13 = vector.shape_cast %12 : vector<1x8x32xf32> to vector<8x32xf32>
    %cst_15 = arith.constant dense<0.000000e+00> : vector<81x32xf32>
    %14 = tpu.matmul %11, %13, %cst_15 {dimension_numbers = #tpu.dot_dimension_numbers<[1], [0], [0], [1], [0, 0, 1, 1], [], []>} : vector<81x8xf32>, vector<8x32xf32>, vector<81x32xf32> -> vector<81x32xf32>
    %15 = arith.addf %10, %14 : vector<81x32xf32>
    %c2 = arith.constant 2 : index
    %c0_16 = arith.constant 0 : index
    %16 = vector.load %arg9[%c2, %c0_16] : memref<101x8xf32, #tpu.memory_space<vmem>>, vector<81x8xf32>
    %c2_17 = arith.constant 2 : index
    %c0_18 = arith.constant 0 : index
    %c0_19 = arith.constant 0 : index
    %17 = vector.load %arg5[%c2_17, %c0_18, %c0_19] : memref<9x8x32xf32, #tpu.memory_space<vmem>>, vector<1x8x32xf32>
    %18 = vector.shape_cast %17 : vector<1x8x32xf32> to vector<8x32xf32>
    %cst_20 = arith.constant dense<0.000000e+00> : vector<81x32xf32>
    %19 = tpu.matmul %16, %18, %cst_20 {dimension_numbers = #tpu.dot_dimension_numbers<[1], [0], [0], [1], [0, 0, 1, 1], [], []>} : vector<81x8xf32>, vector<8x32xf32>, vector<81x32xf32> -> vector<81x32xf32>
    %20 = arith.addf %15, %19 : vector<81x32xf32>
    %c9 = arith.constant 9 : index
    %c0_21 = arith.constant 0 : index
    %21 = vector.load %arg9[%c9, %c0_21] : memref<101x8xf32, #tpu.memory_space<vmem>>, vector<81x8xf32>
    %c3 = arith.constant 3 : index
    %c0_22 = arith.constant 0 : index
    %c0_23 = arith.constant 0 : index
    %22 = vector.load %arg5[%c3, %c0_22, %c0_23] : memref<9x8x32xf32, #tpu.memory_space<vmem>>, vector<1x8x32xf32>
    %23 = vector.shape_cast %22 : vector<1x8x32xf32> to vector<8x32xf32>
    %cst_24 = arith.constant dense<0.000000e+00> : vector<81x32xf32>
    %24 = tpu.matmul %21, %23, %cst_24 {dimension_numbers = #tpu.dot_dimension_numbers<[1], [0], [0], [1], [0, 0, 1, 1], [], []>} : vector<81x8xf32>, vector<8x32xf32>, vector<81x32xf32> -> vector<81x32xf32>
    %25 = arith.addf %20, %24 : vector<81x32xf32>
    %c10 = arith.constant 10 : index
    %c0_25 = arith.constant 0 : index
    %26 = vector.load %arg9[%c10, %c0_25] : memref<101x8xf32, #tpu.memory_space<vmem>>, vector<81x8xf32>
    %c4 = arith.constant 4 : index
    %c0_26 = arith.constant 0 : index
    %c0_27 = arith.constant 0 : index
    %27 = vector.load %arg5[%c4, %c0_26, %c0_27] : memref<9x8x32xf32, #tpu.memory_space<vmem>>, vector<1x8x32xf32>
    %28 = vector.shape_cast %27 : vector<1x8x32xf32> to vector<8x32xf32>
    %cst_28 = arith.constant dense<0.000000e+00> : vector<81x32xf32>
    %29 = tpu.matmul %26, %28, %cst_28 {dimension_numbers = #tpu.dot_dimension_numbers<[1], [0], [0], [1], [0, 0, 1, 1], [], []>} : vector<81x8xf32>, vector<8x32xf32>, vector<81x32xf32> -> vector<81x32xf32>
    %30 = arith.addf %25, %29 : vector<81x32xf32>
    %c11 = arith.constant 11 : index
    %c0_29 = arith.constant 0 : index
    %31 = vector.load %arg9[%c11, %c0_29] : memref<101x8xf32, #tpu.memory_space<vmem>>, vector<81x8xf32>
    %c5 = arith.constant 5 : index
    %c0_30 = arith.constant 0 : index
    %c0_31 = arith.constant 0 : index
    %32 = vector.load %arg5[%c5, %c0_30, %c0_31] : memref<9x8x32xf32, #tpu.memory_space<vmem>>, vector<1x8x32xf32>
    %33 = vector.shape_cast %32 : vector<1x8x32xf32> to vector<8x32xf32>
    %cst_32 = arith.constant dense<0.000000e+00> : vector<81x32xf32>
    %34 = tpu.matmul %31, %33, %cst_32 {dimension_numbers = #tpu.dot_dimension_numbers<[1], [0], [0], [1], [0, 0, 1, 1], [], []>} : vector<81x8xf32>, vector<8x32xf32>, vector<81x32xf32> -> vector<81x32xf32>
    %35 = arith.addf %30, %34 : vector<81x32xf32>
    %c18 = arith.constant 18 : index
    %c0_33 = arith.constant 0 : index
    %36 = vector.load %arg9[%c18, %c0_33] : memref<101x8xf32, #tpu.memory_space<vmem>>, vector<81x8xf32>
    %c6 = arith.constant 6 : index
    %c0_34 = arith.constant 0 : index
    %c0_35 = arith.constant 0 : index
    %37 = vector.load %arg5[%c6, %c0_34, %c0_35] : memref<9x8x32xf32, #tpu.memory_space<vmem>>, vector<1x8x32xf32>
    %38 = vector.shape_cast %37 : vector<1x8x32xf32> to vector<8x32xf32>
    %cst_36 = arith.constant dense<0.000000e+00> : vector<81x32xf32>
    %39 = tpu.matmul %36, %38, %cst_36 {dimension_numbers = #tpu.dot_dimension_numbers<[1], [0], [0], [1], [0, 0, 1, 1], [], []>} : vector<81x8xf32>, vector<8x32xf32>, vector<81x32xf32> -> vector<81x32xf32>
    %40 = arith.addf %35, %39 : vector<81x32xf32>
    %c19 = arith.constant 19 : index
    %c0_37 = arith.constant 0 : index
    %41 = vector.load %arg9[%c19, %c0_37] : memref<101x8xf32, #tpu.memory_space<vmem>>, vector<81x8xf32>
    %c7 = arith.constant 7 : index
    %c0_38 = arith.constant 0 : index
    %c0_39 = arith.constant 0 : index
    %42 = vector.load %arg5[%c7, %c0_38, %c0_39] : memref<9x8x32xf32, #tpu.memory_space<vmem>>, vector<1x8x32xf32>
    %43 = vector.shape_cast %42 : vector<1x8x32xf32> to vector<8x32xf32>
    %cst_40 = arith.constant dense<0.000000e+00> : vector<81x32xf32>
    %44 = tpu.matmul %41, %43, %cst_40 {dimension_numbers = #tpu.dot_dimension_numbers<[1], [0], [0], [1], [0, 0, 1, 1], [], []>} : vector<81x8xf32>, vector<8x32xf32>, vector<81x32xf32> -> vector<81x32xf32>
    %45 = arith.addf %40, %44 : vector<81x32xf32>
    %c20 = arith.constant 20 : index
    %c0_41 = arith.constant 0 : index
    %46 = vector.load %arg9[%c20, %c0_41] : memref<101x8xf32, #tpu.memory_space<vmem>>, vector<81x8xf32>
    %c8 = arith.constant 8 : index
    %c0_42 = arith.constant 0 : index
    %c0_43 = arith.constant 0 : index
    %47 = vector.load %arg5[%c8, %c0_42, %c0_43] : memref<9x8x32xf32, #tpu.memory_space<vmem>>, vector<1x8x32xf32>
    %48 = vector.shape_cast %47 : vector<1x8x32xf32> to vector<8x32xf32>
    %cst_44 = arith.constant dense<0.000000e+00> : vector<81x32xf32>
    %49 = tpu.matmul %46, %48, %cst_44 {dimension_numbers = #tpu.dot_dimension_numbers<[1], [0], [0], [1], [0, 0, 1, 1], [], []>} : vector<81x8xf32>, vector<8x32xf32>, vector<81x32xf32> -> vector<81x32xf32>
    %50 = arith.addf %45, %49 : vector<81x32xf32>
    %51 = tpu.iota {dimensions = array<i32: 1>} : vector<81x32xi32>
    %c24_i32 = arith.constant 24 : i32
    %52 = vector.broadcast %c24_i32 : i32 to vector<81x32xi32>
    %53 = arith.cmpi sge, %51, %52 : vector<81x32xi32>
    %cst_45 = arith.constant 5.000000e-01 : f32
    %54 = vector.broadcast %cst_45 : f32 to vector<81x32xf32>
    %55 = arith.mulf %54, %50 : vector<81x32xf32>
    %56 = arith.select %53, %50, %55 : vector<81x32xi1>, vector<81x32xf32>
    %57 = math.tanh %56 : vector<81x32xf32>
    %cst_46 = arith.constant 1.000000e+00 : f32
    %58 = vector.broadcast %cst_46 : f32 to vector<81x32xf32>
    %59 = arith.addf %57, %58 : vector<81x32xf32>
    %cst_47 = arith.constant 5.000000e-01 : f32
    %60 = vector.broadcast %cst_47 : f32 to vector<81x32xf32>
    %61 = arith.mulf %60, %59 : vector<81x32xf32>
    %62 = arith.select %53, %57, %61 : vector<81x32xi1>, vector<81x32xf32>
    %63 = vector.extract_strided_slice %62 {offsets = [0, 0], sizes = [81, 8], strides = [1, 1]} : vector<81x32xf32> to vector<81x8xf32>
    %64 = vector.extract_strided_slice %62 {offsets = [0, 8], sizes = [81, 8], strides = [1, 1]} : vector<81x32xf32> to vector<81x8xf32>
    %65 = vector.extract_strided_slice %62 {offsets = [0, 16], sizes = [81, 8], strides = [1, 1]} : vector<81x32xf32> to vector<81x8xf32>
    %66 = vector.extract_strided_slice %62 {offsets = [0, 24], sizes = [81, 8], strides = [1, 1]} : vector<81x32xf32> to vector<81x8xf32>
    %c0_48 = arith.constant 0 : index
    %c0_49 = arith.constant 0 : index
    %c0_50 = arith.constant 0 : index
    %67 = vector.load %arg8[%c0_48, %c0_49, %c0_50] : memref<1x81x8xf32, #tpu.memory_space<vmem>>, vector<1x81x8xf32>
    %68 = vector.shape_cast %67 : vector<1x81x8xf32> to vector<81x8xf32>
    %69 = arith.mulf %64, %68 : vector<81x8xf32>
    %70 = arith.mulf %63, %66 : vector<81x8xf32>
    %71 = arith.addf %69, %70 : vector<81x8xf32>
    %72 = vector.broadcast %3 : vector<81x1xf32> to vector<81x8xf32>
    %73 = arith.mulf %71, %72 : vector<81x8xf32>
    %74 = math.tanh %73 : vector<81x8xf32>
    %75 = arith.mulf %65, %74 : vector<81x8xf32>
    %76 = vector.broadcast %3 : vector<81x1xf32> to vector<81x8xf32>
    %77 = arith.mulf %75, %76 : vector<81x8xf32>
    %c0_51 = arith.constant 0 : index
    %c0_52 = arith.constant 0 : index
    %c0_53 = arith.constant 0 : index
    %78 = vector.load %arg8[%c0_51, %c0_52, %c0_53] : memref<1x81x8xf32, #tpu.memory_space<vmem>>, vector<1x81x8xf32>
    %79 = vector.shape_cast %78 : vector<1x81x8xf32> to vector<81x8xf32>
    %80 = vector.shape_cast %73 : vector<81x8xf32> to vector<1x81x8xf32>
    tpu.vector_store %arg8[%c0_51, %c0_52, %c0_53], %80 {strides = array<i32>} : memref<1x81x8xf32, #tpu.memory_space<vmem>>, vector<1x81x8xf32>,
    %c0_54 = arith.constant 0 : index
    %c0_55 = arith.constant 0 : index
    %c0_56 = arith.constant 0 : index
    %c0_57 = arith.constant 0 : index
    %81 = vector.load %arg7[%c0_54, %c0_55, %c0_56, %c0_57] : memref<1x1x81x8xf32, #tpu.memory_space<vmem>>, vector<1x1x81x8xf32>
    %82 = vector.shape_cast %81 : vector<1x1x81x8xf32> to vector<81x8xf32>
    %83 = vector.shape_cast %77 : vector<81x8xf32> to vector<1x1x81x8xf32>
    tpu.vector_store %arg7[%c0_54, %c0_55, %c0_56, %c0_57], %83 {strides = array<i32>} : memref<1x1x81x8xf32, #tpu.memory_space<vmem>>, vector<1x1x81x8xf32>,
    %c10_58 = arith.constant 10 : index
    %c0_59 = arith.constant 0 : index
    %84 = vector.load %arg9[%c10_58, %c0_59] : memref<101x8xf32, #tpu.memory_space<vmem>>, vector<81x8xf32>
    tpu.vector_store %arg9[%c10_58, %c0_59], %77 {strides = array<i32>} : memref<101x8xf32, #tpu.memory_space<vmem>>, vector<81x8xf32>,
    return
  }
  func.func @transform_0(%arg0: i32, %arg1: i32) -> (i32, i32, i32) {
    %c0_i32 = arith.constant 0 : i32
    %c0_i32_0 = arith.constant 0 : i32
    %c0_i32_1 = arith.constant 0 : i32
    return %arg0, %c0_i32, %c0_i32_0 : i32, i32, i32
  }
  func.func @transform_1(%arg0: i32, %arg1: i32) -> (i32, i32, i32) {
    %c0_i32 = arith.constant 0 : i32
    %c0_i32_0 = arith.constant 0 : i32
    %c0_i32_1 = arith.constant 0 : i32
    return %arg0, %c0_i32, %c0_i32_0 : i32, i32, i32
  }
  func.func @transform_2(%arg0: i32, %arg1: i32) -> (i32, i32, i32, i32) {
    %c0_i32 = arith.constant 0 : i32
    %c0_i32_0 = arith.constant 0 : i32
    %c0_i32_1 = arith.constant 0 : i32
    return %arg0, %arg1, %c0_i32, %c0_i32_0 : i32, i32, i32, i32
  }
  func.func @transform_3(%arg0: i32, %arg1: i32) -> (i32, i32, i32) {
    %c0_i32 = arith.constant 0 : i32
    %c0_i32_0 = arith.constant 0 : i32
    %c0_i32_1 = arith.constant 0 : i32
    %c0_i32_2 = arith.constant 0 : i32
    return %c0_i32, %c0_i32_0, %c0_i32_1 : i32, i32, i32
  }
  func.func @transform_4(%arg0: i32, %arg1: i32) -> (i32, i32) {
    %c0_i32 = arith.constant 0 : i32
    %c0_i32_0 = arith.constant 0 : i32
    %c0_i32_1 = arith.constant 0 : i32
    return %c0_i32, %c0_i32_0 : i32, i32
  }
  func.func @transform_5(%arg0: i32, %arg1: i32) -> (i32, i32, i32, i32) {
    %c0_i32 = arith.constant 0 : i32
    %c0_i32_0 = arith.constant 0 : i32
    %c0_i32_1 = arith.constant 0 : i32
    return %arg0, %arg1, %c0_i32, %c0_i32_0 : i32, i32, i32, i32
  }
  func.func @transform_6(%arg0: i32, %arg1: i32) -> (i32, i32, i32) {
    %c0_i32 = arith.constant 0 : i32
    %c0_i32_0 = arith.constant 0 : i32
    %c0_i32_1 = arith.constant 0 : i32
    return %arg0, %c0_i32, %c0_i32_0 : i32, i32, i32
  }
}

module attributes {stable_mosaic.version = 11 : i64} {
  func.func @_convlstm_seq_kernel(%arg0: i32, %arg1: i32, %arg2: memref<1x81x8xf32, #tpu.memory_space<vmem>>, %arg3: memref<1x81x8xf32, #tpu.memory_space<vmem>>, %arg4: memref<1x1x81x32xf32, #tpu.memory_space<vmem>>, %arg5: memref<9x8x32xf32, #tpu.memory_space<vmem>>, %arg6: memref<81x1xf32, #tpu.memory_space<vmem>>, %arg7: memref<1x1x81x8xf32, #tpu.memory_space<vmem>>, %arg8: memref<1x81x8xf32, #tpu.memory_space<vmem>>, %arg9: memref<101x8xf32, #tpu.memory_space<vmem>>) attributes {dimension_semantics = [#tpu.dimension_semantics<parallel>, #tpu.dimension_semantics<arbitrary>], iteration_bounds = array<i64: 2, 3>, scalar_prefetch = 0 : i64, scratch_operands = 1 : i64, tpu.core_type = #tpu.core_type<tc>, window_params = [{transform_indices = @transform_0, window_bounds = array<i64: 1, 81, 8>}, {transform_indices = @transform_1, window_bounds = array<i64: 1, 81, 8>}, {transform_indices = @transform_2, window_bounds = array<i64: 1, 1, 81, 32>}, {pipeline_mode = #tpu.pipeline_mode<synchronous>, transform_indices = @transform_3, window_bounds = array<i64: 9, 8, 32>}, {pipeline_mode = #tpu.pipeline_mode<synchronous>, transform_indices = @transform_4, window_bounds = array<i64: 81, 1>}, {transform_indices = @transform_5, window_bounds = array<i64: 1, 1, 81, 8>}, {transform_indices = @transform_6, window_bounds = array<i64: 1, 81, 8>}]} {
    %c0_i32 = arith.constant 0 : i32
    %0 = arith.cmpi eq, %arg1, %c0_i32 : i32
    %1 = arith.extui %0 : i1 to i32
    %c0_i32_0 = arith.constant 0 : i32
    %2 = arith.cmpi ne, %1, %c0_i32_0 : i32
    scf.if %2 {
      %cst_60 = arith.constant 0.000000e+00 : f32
      %85 = vector.broadcast %cst_60 : f32 to vector<101x8xf32>
      %c0_61 = arith.constant 0 : index
      %c0_62 = arith.constant 0 : index
      %86 = vector.load %arg9[%c0_61, %c0_62] : memref<101x8xf32, #tpu.memory_space<vmem>>, vector<101x8xf32>
      tpu.vector_store %arg9[%c0_61, %c0_62], %85 {strides = array<i32>} : memref<101x8xf32, #tpu.memory_space<vmem>>, vector<101x8xf32>,
      %c0_63 = arith.constant 0 : index
      %c0_64 = arith.constant 0 : index
      %c0_65 = arith.constant 0 : index
      %87 = vector.load %arg2[%c0_63, %c0_64, %c0_65] : memref<1x81x8xf32, #tpu.memory_space<vmem>>, vector<1x81x8xf32>
      %88 = vector.shape_cast %87 : vector<1x81x8xf32> to vector<81x8xf32>
      %c10_66 = arith.constant 10 : index
      %c0_67 = arith.constant 0 : index
      %89 = vector.load %arg9[%c10_66, %c0_67] : memref<101x8xf32, #tpu.memory_space<vmem>>, vector<81x8xf32>
      tpu.vector_store %arg9[%c10_66, %c0_67], %88 {strides = array<i32>} : memref<101x8xf32, #tpu.memory_space<vmem>>, vector<81x8xf32>,
      %c0_68 = arith.constant 0 : index
      %c0_69 = arith.constant 0 : index
      %c0_70 = arith.constant 0 : index
      %90 = vector.load %arg3[%c0_68, %c0_69, %c0_70] : memref<1x81x8xf32, #tpu.memory_space<vmem>>, vector<1x81x8xf32>
      %c0_71 = arith.constant 0 : index
      %c0_72 = arith.constant 0 : index
      %c0_73 = arith.constant 0 : index
      %91 = vector.load %arg8[%c0_71, %c0_72, %c0_73] : memref<1x81x8xf32, #tpu.memory_space<vmem>>, vector<1x81x8xf32>
      tpu.vector_store %arg8[%c0_71, %c0_72, %c0_73], %90 {strides = array<i32>} : memref<1x81x8xf32, #tpu.memory_space<vmem>>, vector<1x81x8xf32>,
    } else {
    }
    %c0 = arith.constant 0 : index
    %c0_1 = arith.constant 0 : index
    %3 = vector.load %arg6[%c0, %c0_1] : memref<81x1xf32, #tpu.memory_space<vmem>>, vector<81x1xf32>
    %c0_2 = arith.constant 0 : index
    %c0_3 = arith.constant 0 : index
    %c0_4 = arith.constant 0 : index
    %c0_5 = arith.constant 0 : index
    %4 = vector.load %arg4[%c0_2, %c0_3, %c0_4, %c0_5] : memref<1x1x81x32xf32, #tpu.memory_space<vmem>>, vector<1x1x81x32xf32>
    %5 = vector.shape_cast %4 : vector<1x1x81x32xf32> to vector<81x32xf32>
    %c0_6 = arith.constant 0 : index
    %c0_7 = arith.constant 0 : index
    %6 = vector.load %arg9[%c0_6, %c0_7] : memref<101x8xf32, #tpu.memory_space<vmem>>, vector<81x8xf32>
    %c0_8 = arith.constant 0 : index
    %c0_9 = arith.constant 0 : index
    %c0_10 = arith.constant 0 : index
    %7 = vector.load %arg5[%c0_8, %c0_9, %c0_10] : memref<9x8x32xf32, #tpu.memory_space<vmem>>, vector<1x8x32xf32>
    %8 = vector.shape_cast %7 : vector<1x8x32xf32> to vector<8x32xf32>
    %cst = arith.constant dense<0.000000e+00> : vector<81x32xf32>
    %9 = tpu.matmul %6, %8, %cst {dimension_numbers = #tpu.dot_dimension_numbers<[1], [0], [0], [1], [0, 0, 1, 1], [], []>} : vector<81x8xf32>, vector<8x32xf32>, vector<81x32xf32> -> vector<81x32xf32>
    %10 = arith.addf %5, %9 : vector<81x32xf32>
    %c1 = arith.constant 1 : index
    %c0_11 = arith.constant 0 : index
    %11 = vector.load %arg9[%c1, %c0_11] : memref<101x8xf32, #tpu.memory_space<vmem>>, vector<81x8xf32>
    %c1_12 = arith.constant 1 : index
    %c0_13 = arith.constant 0 : index
    %c0_14 = arith.constant 0 : index
    %12 = vector.load %arg5[%c1_12, %c0_13, %c0_14] : memref<9x8x32xf32, #tpu.memory_space<vmem>>, vector<1x8x32xf32>
    %13 = vector.shape_cast %12 : vector<1x8x32xf32> to vector<8x32xf32>
    %cst_15 = arith.constant dense<0.000000e+00> : vector<81x32xf32>
    %14 = tpu.matmul %11, %13, %cst_15 {dimension_numbers = #tpu.dot_dimension_numbers<[1], [0], [0], [1], [0, 0, 1, 1], [], []>} : vector<81x8xf32>, vector<8x32xf32>, vector<81x32xf32> -> vector<81x32xf32>
    %15 = arith.addf %10, %14 : vector<81x32xf32>
    %c2 = arith.constant 2 : index
    %c0_16 = arith.constant 0 : index
    %16 = vector.load %arg9[%c2, %c0_16] : memref<101x8xf32, #tpu.memory_space<vmem>>, vector<81x8xf32>
    %c2_17 = arith.constant 2 : index
    %c0_18 = arith.constant 0 : index
    %c0_19 = arith.constant 0 : index
    %17 = vector.load %arg5[%c2_17, %c0_18, %c0_19] : memref<9x8x32xf32, #tpu.memory_space<vmem>>, vector<1x8x32xf32>
    %18 = vector.shape_cast %17 : vector<1x8x32xf32> to vector<8x32xf32>
    %cst_20 = arith.constant dense<0.000000e+00> : vector<81x32xf32>
    %19 = tpu.matmul %16, %18, %cst_20 {dimension_numbers = #tpu.dot_dimension_numbers<[1], [0], [0], [1], [0, 0, 1, 1], [], []>} : vector<81x8xf32>, vector<8x32xf32>, vector<81x32xf32> -> vector<81x32xf32>
    %20 = arith.addf %15, %19 : vector<81x32xf32>
    %c9 = arith.constant 9 : index
    %c0_21 = arith.constant 0 : index
    %21 = vector.load %arg9[%c9, %c0_21] : memref<101x8xf32, #tpu.memory_space<vmem>>, vector<81x8xf32>
    %c3 = arith.constant 3 : index
    %c0_22 = arith.constant 0 : index
    %c0_23 = arith.constant 0 : index
    %22 = vector.load %arg5[%c3, %c0_22, %c0_23] : memref<9x8x32xf32, #tpu.memory_space<vmem>>, vector<1x8x32xf32>
    %23 = vector.shape_cast %22 : vector<1x8x32xf32> to vector<8x32xf32>
    %cst_24 = arith.constant dense<0.000000e+00> : vector<81x32xf32>
    %24 = tpu.matmul %21, %23, %cst_24 {dimension_numbers = #tpu.dot_dimension_numbers<[1], [0], [0], [1], [0, 0, 1, 1], [], []>} : vector<81x8xf32>, vector<8x32xf32>, vector<81x32xf32> -> vector<81x32xf32>
    %25 = arith.addf %20, %24 : vector<81x32xf32>
    %c10 = arith.constant 10 : index
    %c0_25 = arith.constant 0 : index
    %26 = vector.load %arg9[%c10, %c0_25] : memref<101x8xf32, #tpu.memory_space<vmem>>, vector<81x8xf32>
    %c4 = arith.constant 4 : index
    %c0_26 = arith.constant 0 : index
    %c0_27 = arith.constant 0 : index
    %27 = vector.load %arg5[%c4, %c0_26, %c0_27] : memref<9x8x32xf32, #tpu.memory_space<vmem>>, vector<1x8x32xf32>
    %28 = vector.shape_cast %27 : vector<1x8x32xf32> to vector<8x32xf32>
    %cst_28 = arith.constant dense<0.000000e+00> : vector<81x32xf32>
    %29 = tpu.matmul %26, %28, %cst_28 {dimension_numbers = #tpu.dot_dimension_numbers<[1], [0], [0], [1], [0, 0, 1, 1], [], []>} : vector<81x8xf32>, vector<8x32xf32>, vector<81x32xf32> -> vector<81x32xf32>
    %30 = arith.addf %25, %29 : vector<81x32xf32>
    %c11 = arith.constant 11 : index
    %c0_29 = arith.constant 0 : index
    %31 = vector.load %arg9[%c11, %c0_29] : memref<101x8xf32, #tpu.memory_space<vmem>>, vector<81x8xf32>
    %c5 = arith.constant 5 : index
    %c0_30 = arith.constant 0 : index
    %c0_31 = arith.constant 0 : index
    %32 = vector.load %arg5[%c5, %c0_30, %c0_31] : memref<9x8x32xf32, #tpu.memory_space<vmem>>, vector<1x8x32xf32>
    %33 = vector.shape_cast %32 : vector<1x8x32xf32> to vector<8x32xf32>
    %cst_32 = arith.constant dense<0.000000e+00> : vector<81x32xf32>
    %34 = tpu.matmul %31, %33, %cst_32 {dimension_numbers = #tpu.dot_dimension_numbers<[1], [0], [0], [1], [0, 0, 1, 1], [], []>} : vector<81x8xf32>, vector<8x32xf32>, vector<81x32xf32> -> vector<81x32xf32>
    %35 = arith.addf %30, %34 : vector<81x32xf32>
    %c18 = arith.constant 18 : index
    %c0_33 = arith.constant 0 : index
    %36 = vector.load %arg9[%c18, %c0_33] : memref<101x8xf32, #tpu.memory_space<vmem>>, vector<81x8xf32>
    %c6 = arith.constant 6 : index
    %c0_34 = arith.constant 0 : index
    %c0_35 = arith.constant 0 : index
    %37 = vector.load %arg5[%c6, %c0_34, %c0_35] : memref<9x8x32xf32, #tpu.memory_space<vmem>>, vector<1x8x32xf32>
    %38 = vector.shape_cast %37 : vector<1x8x32xf32> to vector<8x32xf32>
    %cst_36 = arith.constant dense<0.000000e+00> : vector<81x32xf32>
    %39 = tpu.matmul %36, %38, %cst_36 {dimension_numbers = #tpu.dot_dimension_numbers<[1], [0], [0], [1], [0, 0, 1, 1], [], []>} : vector<81x8xf32>, vector<8x32xf32>, vector<81x32xf32> -> vector<81x32xf32>
    %40 = arith.addf %35, %39 : vector<81x32xf32>
    %c19 = arith.constant 19 : index
    %c0_37 = arith.constant 0 : index
    %41 = vector.load %arg9[%c19, %c0_37] : memref<101x8xf32, #tpu.memory_space<vmem>>, vector<81x8xf32>
    %c7 = arith.constant 7 : index
    %c0_38 = arith.constant 0 : index
    %c0_39 = arith.constant 0 : index
    %42 = vector.load %arg5[%c7, %c0_38, %c0_39] : memref<9x8x32xf32, #tpu.memory_space<vmem>>, vector<1x8x32xf32>
    %43 = vector.shape_cast %42 : vector<1x8x32xf32> to vector<8x32xf32>
    %cst_40 = arith.constant dense<0.000000e+00> : vector<81x32xf32>
    %44 = tpu.matmul %41, %43, %cst_40 {dimension_numbers = #tpu.dot_dimension_numbers<[1], [0], [0], [1], [0, 0, 1, 1], [], []>} : vector<81x8xf32>, vector<8x32xf32>, vector<81x32xf32> -> vector<81x32xf32>
    %45 = arith.addf %40, %44 : vector<81x32xf32>
    %c20 = arith.constant 20 : index
    %c0_41 = arith.constant 0 : index
    %46 = vector.load %arg9[%c20, %c0_41] : memref<101x8xf32, #tpu.memory_space<vmem>>, vector<81x8xf32>
    %c8 = arith.constant 8 : index
    %c0_42 = arith.constant 0 : index
    %c0_43 = arith.constant 0 : index
    %47 = vector.load %arg5[%c8, %c0_42, %c0_43] : memref<9x8x32xf32, #tpu.memory_space<vmem>>, vector<1x8x32xf32>
    %48 = vector.shape_cast %47 : vector<1x8x32xf32> to vector<8x32xf32>
    %cst_44 = arith.constant dense<0.000000e+00> : vector<81x32xf32>
    %49 = tpu.matmul %46, %48, %cst_44 {dimension_numbers = #tpu.dot_dimension_numbers<[1], [0], [0], [1], [0, 0, 1, 1], [], []>} : vector<81x8xf32>, vector<8x32xf32>, vector<81x32xf32> -> vector<81x32xf32>
    %50 = arith.addf %45, %49 : vector<81x32xf32>
    %51 = tpu.iota {dimensions = array<i32: 1>} : vector<81x32xi32>
    %c24_i32 = arith.constant 24 : i32
    %52 = vector.broadcast %c24_i32 : i32 to vector<81x32xi32>
    %53 = arith.cmpi sge, %51, %52 : vector<81x32xi32>
    %cst_45 = arith.constant 5.000000e-01 : f32
    %54 = vector.broadcast %cst_45 : f32 to vector<81x32xf32>
    %55 = arith.mulf %54, %50 : vector<81x32xf32>
    %56 = arith.select %53, %50, %55 : vector<81x32xi1>, vector<81x32xf32>
    %57 = math.tanh %56 : vector<81x32xf32>
    %cst_46 = arith.constant 1.000000e+00 : f32
    %58 = vector.broadcast %cst_46 : f32 to vector<81x32xf32>
    %59 = arith.addf %57, %58 : vector<81x32xf32>
    %cst_47 = arith.constant 5.000000e-01 : f32
    %60 = vector.broadcast %cst_47 : f32 to vector<81x32xf32>
    %61 = arith.mulf %60, %59 : vector<81x32xf32>
    %62 = arith.select %53, %57, %61 : vector<81x32xi1>, vector<81x32xf32>
    %63 = vector.extract_strided_slice %62 {offsets = [0, 0], sizes = [81, 8], strides = [1, 1]} : vector<81x32xf32> to vector<81x8xf32>
    %64 = vector.extract_strided_slice %62 {offsets = [0, 8], sizes = [81, 8], strides = [1, 1]} : vector<81x32xf32> to vector<81x8xf32>
    %65 = vector.extract_strided_slice %62 {offsets = [0, 16], sizes = [81, 8], strides = [1, 1]} : vector<81x32xf32> to vector<81x8xf32>
    %66 = vector.extract_strided_slice %62 {offsets = [0, 24], sizes = [81, 8], strides = [1, 1]} : vector<81x32xf32> to vector<81x8xf32>
    %c0_48 = arith.constant 0 : index
    %c0_49 = arith.constant 0 : index
    %c0_50 = arith.constant 0 : index
    %67 = vector.load %arg8[%c0_48, %c0_49, %c0_50] : memref<1x81x8xf32, #tpu.memory_space<vmem>>, vector<1x81x8xf32>
    %68 = vector.shape_cast %67 : vector<1x81x8xf32> to vector<81x8xf32>
    %69 = arith.mulf %64, %68 : vector<81x8xf32>
    %70 = arith.mulf %63, %66 : vector<81x8xf32>
    %71 = arith.addf %69, %70 : vector<81x8xf32>
    %72 = vector.broadcast %3 : vector<81x1xf32> to vector<81x8xf32>
    %73 = arith.mulf %71, %72 : vector<81x8xf32>
    %74 = math.tanh %73 : vector<81x8xf32>
    %75 = arith.mulf %65, %74 : vector<81x8xf32>
    %76 = vector.broadcast %3 : vector<81x1xf32> to vector<81x8xf32>
    %77 = arith.mulf %75, %76 : vector<81x8xf32>
    %c0_51 = arith.constant 0 : index
    %c0_52 = arith.constant 0 : index
    %c0_53 = arith.constant 0 : index
    %78 = vector.load %arg8[%c0_51, %c0_52, %c0_53] : memref<1x81x8xf32, #tpu.memory_space<vmem>>, vector<1x81x8xf32>
    %79 = vector.shape_cast %78 : vector<1x81x8xf32> to vector<81x8xf32>
    %80 = vector.shape_cast %73 : vector<81x8xf32> to vector<1x81x8xf32>
    tpu.vector_store %arg8[%c0_51, %c0_52, %c0_53], %80 {strides = array<i32>} : memref<1x81x8xf32, #tpu.memory_space<vmem>>, vector<1x81x8xf32>,
    %c0_54 = arith.constant 0 : index
    %c0_55 = arith.constant 0 : index
    %c0_56 = arith.constant 0 : index
    %c0_57 = arith.constant 0 : index
    %81 = vector.load %arg7[%c0_54, %c0_55, %c0_56, %c0_57] : memref<1x1x81x8xf32, #tpu.memory_space<vmem>>, vector<1x1x81x8xf32>
    %82 = vector.shape_cast %81 : vector<1x1x81x8xf32> to vector<81x8xf32>
    %83 = vector.shape_cast %77 : vector<81x8xf32> to vector<1x1x81x8xf32>
    tpu.vector_store %arg7[%c0_54, %c0_55, %c0_56, %c0_57], %83 {strides = array<i32>} : memref<1x1x81x8xf32, #tpu.memory_space<vmem>>, vector<1x1x81x8xf32>,
    %c10_58 = arith.constant 10 : index
    %c0_59 = arith.constant 0 : index
    %84 = vector.load %arg9[%c10_58, %c0_59] : memref<101x8xf32, #tpu.memory_space<vmem>>, vector<81x8xf32>
    tpu.vector_store %arg9[%c10_58, %c0_59], %77 {strides = array<i32>} : memref<101x8xf32, #tpu.memory_space<vmem>>, vector<81x8xf32>,
    return
  }
  func.func @transform_0(%arg0: i32, %arg1: i32) -> (i32, i32, i32) {
    %c0_i32 = arith.constant 0 : i32
    %c0_i32_0 = arith.constant 0 : i32
    %c0_i32_1 = arith.constant 0 : i32
    return %arg0, %c0_i32, %c0_i32_0 : i32, i32, i32
  }
  func.func @transform_1(%arg0: i32, %arg1: i32) -> (i32, i32, i32) {
    %c0_i32 = arith.constant 0 : i32
    %c0_i32_0 = arith.constant 0 : i32
    %c0_i32_1 = arith.constant 0 : i32
    return %arg0, %c0_i32, %c0_i32_0 : i32, i32, i32
  }
  func.func @transform_2(%arg0: i32, %arg1: i32) -> (i32, i32, i32, i32) {
    %c0_i32 = arith.constant 0 : i32
    %c0_i32_0 = arith.constant 0 : i32
    %c0_i32_1 = arith.constant 0 : i32
    return %arg0, %arg1, %c0_i32, %c0_i32_0 : i32, i32, i32, i32
  }
  func.func @transform_3(%arg0: i32, %arg1: i32) -> (i32, i32, i32) {
    %c0_i32 = arith.constant 0 : i32
    %c0_i32_0 = arith.constant 0 : i32
    %c0_i32_1 = arith.constant 0 : i32
    %c0_i32_2 = arith.constant 0 : i32
    return %c0_i32, %c0_i32_0, %c0_i32_1 : i32, i32, i32
  }
  func.func @transform_4(%arg0: i32, %arg1: i32) -> (i32, i32) {
    %c0_i32 = arith.constant 0 : i32
    %c0_i32_0 = arith.constant 0 : i32
    %c0_i32_1 = arith.constant 0 : i32
    return %c0_i32, %c0_i32_0 : i32, i32
  }
  func.func @transform_5(%arg0: i32, %arg1: i32) -> (i32, i32, i32, i32) {
    %c0_i32 = arith.constant 0 : i32
    %c0_i32_0 = arith.constant 0 : i32
    %c0_i32_1 = arith.constant 0 : i32
    return %arg0, %arg1, %c0_i32, %c0_i32_0 : i32, i32, i32, i32
  }
  func.func @transform_6(%arg0: i32, %arg1: i32) -> (i32, i32, i32) {
    %c0_i32 = arith.constant 0 : i32
    %c0_i32_0 = arith.constant 0 : i32
    %c0_i32_1 = arith.constant 0 : i32
    return %arg0, %c0_i32, %c0_i32_0 : i32, i32, i32
  }
}

module attributes {stable_mosaic.version = 11 : i64} {
  func.func @_gemm_epilogue_kernel(%arg0: i32, %arg1: memref<152x72xbf16, #tpu.memory_space<vmem>>, %arg2: memref<72x32xbf16, #tpu.memory_space<vmem>>, %arg3: memref<1x32xf32, #tpu.memory_space<vmem>>, %arg4: memref<1x32xf32, #tpu.memory_space<vmem>>, %arg5: memref<1x32xf32, #tpu.memory_space<vmem>>, %arg6: memref<152x32xf32, #tpu.memory_space<vmem>>) attributes {dimension_semantics = [#tpu.dimension_semantics<parallel>], iteration_bounds = array<i64: 2>, scalar_prefetch = 0 : i64, scratch_operands = 0 : i64, tpu.core_type = #tpu.core_type<tc>, window_params = [{transform_indices = @transform_0, window_bounds = array<i64: 152, 72>}, {pipeline_mode = #tpu.pipeline_mode<synchronous>, transform_indices = @transform_1, window_bounds = array<i64: 72, 32>}, {pipeline_mode = #tpu.pipeline_mode<synchronous>, transform_indices = @transform_2, window_bounds = array<i64: 1, 32>}, {pipeline_mode = #tpu.pipeline_mode<synchronous>, transform_indices = @transform_3, window_bounds = array<i64: 1, 32>}, {pipeline_mode = #tpu.pipeline_mode<synchronous>, transform_indices = @transform_4, window_bounds = array<i64: 1, 32>}, {transform_indices = @transform_5, window_bounds = array<i64: 152, 32>}]} {
    %c0 = arith.constant 0 : index
    %c0_0 = arith.constant 0 : index
    %0 = vector.load %arg1[%c0, %c0_0] : memref<152x72xbf16, #tpu.memory_space<vmem>>, vector<152x72xbf16>
    %c0_1 = arith.constant 0 : index
    %c0_2 = arith.constant 0 : index
    %1 = vector.load %arg2[%c0_1, %c0_2] : memref<72x32xbf16, #tpu.memory_space<vmem>>, vector<72x32xbf16>
    %cst = arith.constant dense<0.000000e+00> : vector<152x32xf32>
    %2 = tpu.matmul %0, %1, %cst {dimension_numbers = #tpu.dot_dimension_numbers<[1], [0], [0], [1], [0, 0, 1, 1], [], []>} : vector<152x72xbf16>, vector<72x32xbf16>, vector<152x32xf32> -> vector<152x32xf32>
    %c0_3 = arith.constant 0 : index
    %c0_4 = arith.constant 0 : index
    %3 = vector.load %arg3[%c0_3, %c0_4] : memref<1x32xf32, #tpu.memory_space<vmem>>, vector<1x32xf32>
    %4 = vector.broadcast %3 : vector<1x32xf32> to vector<152x32xf32>
    %5 = arith.addf %2, %4 : vector<152x32xf32>
    %c0_5 = arith.constant 0 : index
    %c0_6 = arith.constant 0 : index
    %6 = vector.load %arg4[%c0_5, %c0_6] : memref<1x32xf32, #tpu.memory_space<vmem>>, vector<1x32xf32>
    %7 = vector.broadcast %6 : vector<1x32xf32> to vector<152x32xf32>
    %8 = arith.mulf %5, %7 : vector<152x32xf32>
    %c0_7 = arith.constant 0 : index
    %c0_8 = arith.constant 0 : index
    %9 = vector.load %arg5[%c0_7, %c0_8] : memref<1x32xf32, #tpu.memory_space<vmem>>, vector<1x32xf32>
    %10 = vector.broadcast %9 : vector<1x32xf32> to vector<152x32xf32>
    %11 = arith.addf %8, %10 : vector<152x32xf32>
    %c0_9 = arith.constant 0 : index
    %c0_10 = arith.constant 0 : index
    %12 = vector.load %arg6[%c0_9, %c0_10] : memref<152x32xf32, #tpu.memory_space<vmem>>, vector<152x32xf32>
    tpu.vector_store %arg6[%c0_9, %c0_10], %11 {strides = array<i32>} : memref<152x32xf32, #tpu.memory_space<vmem>>, vector<152x32xf32>,
    return
  }
  func.func @transform_0(%arg0: i32) -> (i32, i32) {
    %c0_i32 = arith.constant 0 : i32
    %c0_i32_0 = arith.constant 0 : i32
    return %arg0, %c0_i32 : i32, i32
  }
  func.func @transform_1(%arg0: i32) -> (i32, i32) {
    %c0_i32 = arith.constant 0 : i32
    %c0_i32_0 = arith.constant 0 : i32
    %c0_i32_1 = arith.constant 0 : i32
    return %c0_i32, %c0_i32_0 : i32, i32
  }
  func.func @transform_2(%arg0: i32) -> (i32, i32) {
    %c0_i32 = arith.constant 0 : i32
    %c0_i32_0 = arith.constant 0 : i32
    %c0_i32_1 = arith.constant 0 : i32
    return %c0_i32, %c0_i32_0 : i32, i32
  }
  func.func @transform_3(%arg0: i32) -> (i32, i32) {
    %c0_i32 = arith.constant 0 : i32
    %c0_i32_0 = arith.constant 0 : i32
    %c0_i32_1 = arith.constant 0 : i32
    return %c0_i32, %c0_i32_0 : i32, i32
  }
  func.func @transform_4(%arg0: i32) -> (i32, i32) {
    %c0_i32 = arith.constant 0 : i32
    %c0_i32_0 = arith.constant 0 : i32
    %c0_i32_1 = arith.constant 0 : i32
    return %c0_i32, %c0_i32_0 : i32, i32
  }
  func.func @transform_5(%arg0: i32) -> (i32, i32) {
    %c0_i32 = arith.constant 0 : i32
    %c0_i32_0 = arith.constant 0 : i32
    return %arg0, %c0_i32 : i32, i32
  }
}

module attributes {stable_mosaic.version = 11 : i64} {
  func.func @_gemm_epilogue_kernel(%arg0: i32, %arg1: memref<256x32xbf16, #tpu.memory_space<vmem>>, %arg2: memref<32x32xbf16, #tpu.memory_space<vmem>>, %arg3: memref<1x32xf32, #tpu.memory_space<vmem>>, %arg4: memref<1x32xf32, #tpu.memory_space<vmem>>, %arg5: memref<1x32xf32, #tpu.memory_space<vmem>>, %arg6: memref<256x32xf32, #tpu.memory_space<vmem>>) attributes {dimension_semantics = [#tpu.dimension_semantics<parallel>], iteration_bounds = array<i64: 2>, scalar_prefetch = 0 : i64, scratch_operands = 0 : i64, tpu.core_type = #tpu.core_type<tc>, window_params = [{transform_indices = @transform_0, window_bounds = array<i64: 256, 32>}, {pipeline_mode = #tpu.pipeline_mode<synchronous>, transform_indices = @transform_1, window_bounds = array<i64: 32, 32>}, {pipeline_mode = #tpu.pipeline_mode<synchronous>, transform_indices = @transform_2, window_bounds = array<i64: 1, 32>}, {pipeline_mode = #tpu.pipeline_mode<synchronous>, transform_indices = @transform_3, window_bounds = array<i64: 1, 32>}, {pipeline_mode = #tpu.pipeline_mode<synchronous>, transform_indices = @transform_4, window_bounds = array<i64: 1, 32>}, {transform_indices = @transform_5, window_bounds = array<i64: 256, 32>}]} {
    %c0 = arith.constant 0 : index
    %c0_0 = arith.constant 0 : index
    %0 = vector.load %arg1[%c0, %c0_0] : memref<256x32xbf16, #tpu.memory_space<vmem>>, vector<256x32xbf16>
    %c0_1 = arith.constant 0 : index
    %c0_2 = arith.constant 0 : index
    %1 = vector.load %arg2[%c0_1, %c0_2] : memref<32x32xbf16, #tpu.memory_space<vmem>>, vector<32x32xbf16>
    %cst = arith.constant dense<0.000000e+00> : vector<256x32xf32>
    %2 = tpu.matmul %0, %1, %cst {dimension_numbers = #tpu.dot_dimension_numbers<[1], [0], [0], [1], [0, 0, 1, 1], [], []>} : vector<256x32xbf16>, vector<32x32xbf16>, vector<256x32xf32> -> vector<256x32xf32>
    %c0_3 = arith.constant 0 : index
    %c0_4 = arith.constant 0 : index
    %3 = vector.load %arg3[%c0_3, %c0_4] : memref<1x32xf32, #tpu.memory_space<vmem>>, vector<1x32xf32>
    %4 = vector.broadcast %3 : vector<1x32xf32> to vector<256x32xf32>
    %5 = arith.addf %2, %4 : vector<256x32xf32>
    %cst_5 = arith.constant 0.000000e+00 : f32
    %6 = vector.broadcast %cst_5 : f32 to vector<256x32xf32>
    %7 = arith.maximumf %5, %6 : vector<256x32xf32>
    %c0_6 = arith.constant 0 : index
    %c0_7 = arith.constant 0 : index
    %8 = vector.load %arg4[%c0_6, %c0_7] : memref<1x32xf32, #tpu.memory_space<vmem>>, vector<1x32xf32>
    %9 = vector.broadcast %8 : vector<1x32xf32> to vector<256x32xf32>
    %10 = arith.mulf %7, %9 : vector<256x32xf32>
    %c0_8 = arith.constant 0 : index
    %c0_9 = arith.constant 0 : index
    %11 = vector.load %arg5[%c0_8, %c0_9] : memref<1x32xf32, #tpu.memory_space<vmem>>, vector<1x32xf32>
    %12 = vector.broadcast %11 : vector<1x32xf32> to vector<256x32xf32>
    %13 = arith.addf %10, %12 : vector<256x32xf32>
    %c0_10 = arith.constant 0 : index
    %c0_11 = arith.constant 0 : index
    %14 = vector.load %arg6[%c0_10, %c0_11] : memref<256x32xf32, #tpu.memory_space<vmem>>, vector<256x32xf32>
    tpu.vector_store %arg6[%c0_10, %c0_11], %13 {strides = array<i32>} : memref<256x32xf32, #tpu.memory_space<vmem>>, vector<256x32xf32>,
    return
  }
  func.func @transform_0(%arg0: i32) -> (i32, i32) {
    %c0_i32 = arith.constant 0 : i32
    %c0_i32_0 = arith.constant 0 : i32
    return %arg0, %c0_i32 : i32, i32
  }
  func.func @transform_1(%arg0: i32) -> (i32, i32) {
    %c0_i32 = arith.constant 0 : i32
    %c0_i32_0 = arith.constant 0 : i32
    %c0_i32_1 = arith.constant 0 : i32
    return %c0_i32, %c0_i32_0 : i32, i32
  }
  func.func @transform_2(%arg0: i32) -> (i32, i32) {
    %c0_i32 = arith.constant 0 : i32
    %c0_i32_0 = arith.constant 0 : i32
    %c0_i32_1 = arith.constant 0 : i32
    return %c0_i32, %c0_i32_0 : i32, i32
  }
  func.func @transform_3(%arg0: i32) -> (i32, i32) {
    %c0_i32 = arith.constant 0 : i32
    %c0_i32_0 = arith.constant 0 : i32
    %c0_i32_1 = arith.constant 0 : i32
    return %c0_i32, %c0_i32_0 : i32, i32
  }
  func.func @transform_4(%arg0: i32) -> (i32, i32) {
    %c0_i32 = arith.constant 0 : i32
    %c0_i32_0 = arith.constant 0 : i32
    %c0_i32_1 = arith.constant 0 : i32
    return %c0_i32, %c0_i32_0 : i32, i32
  }
  func.func @transform_5(%arg0: i32) -> (i32, i32) {
    %c0_i32 = arith.constant 0 : i32
    %c0_i32_0 = arith.constant 0 : i32
    return %arg0, %c0_i32 : i32, i32
  }
}

module attributes {stable_mosaic.version = 11 : i64} {
  func.func @_gemm_epilogue_kernel(%arg0: i32, %arg1: memref<1024x32xbf16, #tpu.memory_space<vmem>>, %arg2: memref<32x8xbf16, #tpu.memory_space<vmem>>, %arg3: memref<1x8xf32, #tpu.memory_space<vmem>>, %arg4: memref<1x8xf32, #tpu.memory_space<vmem>>, %arg5: memref<1x8xf32, #tpu.memory_space<vmem>>, %arg6: memref<1024x8xf32, #tpu.memory_space<vmem>>) attributes {dimension_semantics = [#tpu.dimension_semantics<parallel>], iteration_bounds = array<i64: 2>, scalar_prefetch = 0 : i64, scratch_operands = 0 : i64, tpu.core_type = #tpu.core_type<tc>, window_params = [{transform_indices = @transform_0, window_bounds = array<i64: 1024, 32>}, {pipeline_mode = #tpu.pipeline_mode<synchronous>, transform_indices = @transform_1, window_bounds = array<i64: 32, 8>}, {pipeline_mode = #tpu.pipeline_mode<synchronous>, transform_indices = @transform_2, window_bounds = array<i64: 1, 8>}, {pipeline_mode = #tpu.pipeline_mode<synchronous>, transform_indices = @transform_3, window_bounds = array<i64: 1, 8>}, {pipeline_mode = #tpu.pipeline_mode<synchronous>, transform_indices = @transform_4, window_bounds = array<i64: 1, 8>}, {transform_indices = @transform_5, window_bounds = array<i64: 1024, 8>}]} {
    %c0 = arith.constant 0 : index
    %c0_0 = arith.constant 0 : index
    %0 = vector.load %arg1[%c0, %c0_0] : memref<1024x32xbf16, #tpu.memory_space<vmem>>, vector<1024x32xbf16>
    %c0_1 = arith.constant 0 : index
    %c0_2 = arith.constant 0 : index
    %1 = vector.load %arg2[%c0_1, %c0_2] : memref<32x8xbf16, #tpu.memory_space<vmem>>, vector<32x8xbf16>
    %cst = arith.constant dense<0.000000e+00> : vector<1024x8xf32>
    %2 = tpu.matmul %0, %1, %cst {dimension_numbers = #tpu.dot_dimension_numbers<[1], [0], [0], [1], [0, 0, 1, 1], [], []>} : vector<1024x32xbf16>, vector<32x8xbf16>, vector<1024x8xf32> -> vector<1024x8xf32>
    %c0_3 = arith.constant 0 : index
    %c0_4 = arith.constant 0 : index
    %3 = vector.load %arg3[%c0_3, %c0_4] : memref<1x8xf32, #tpu.memory_space<vmem>>, vector<1x8xf32>
    %4 = vector.broadcast %3 : vector<1x8xf32> to vector<1024x8xf32>
    %5 = arith.addf %2, %4 : vector<1024x8xf32>
    %c0_5 = arith.constant 0 : index
    %c0_6 = arith.constant 0 : index
    %6 = vector.load %arg4[%c0_5, %c0_6] : memref<1x8xf32, #tpu.memory_space<vmem>>, vector<1x8xf32>
    %7 = vector.broadcast %6 : vector<1x8xf32> to vector<1024x8xf32>
    %8 = arith.mulf %5, %7 : vector<1024x8xf32>
    %c0_7 = arith.constant 0 : index
    %c0_8 = arith.constant 0 : index
    %9 = vector.load %arg5[%c0_7, %c0_8] : memref<1x8xf32, #tpu.memory_space<vmem>>, vector<1x8xf32>
    %10 = vector.broadcast %9 : vector<1x8xf32> to vector<1024x8xf32>
    %11 = arith.addf %8, %10 : vector<1024x8xf32>
    %c0_9 = arith.constant 0 : index
    %c0_10 = arith.constant 0 : index
    %12 = vector.load %arg6[%c0_9, %c0_10] : memref<1024x8xf32, #tpu.memory_space<vmem>>, vector<1024x8xf32>
    tpu.vector_store %arg6[%c0_9, %c0_10], %11 {strides = array<i32>} : memref<1024x8xf32, #tpu.memory_space<vmem>>, vector<1024x8xf32>,
    return
  }
  func.func @transform_0(%arg0: i32) -> (i32, i32) {
    %c0_i32 = arith.constant 0 : i32
    %c0_i32_0 = arith.constant 0 : i32
    return %arg0, %c0_i32 : i32, i32
  }
  func.func @transform_1(%arg0: i32) -> (i32, i32) {
    %c0_i32 = arith.constant 0 : i32
    %c0_i32_0 = arith.constant 0 : i32
    %c0_i32_1 = arith.constant 0 : i32
    return %c0_i32, %c0_i32_0 : i32, i32
  }
  func.func @transform_2(%arg0: i32) -> (i32, i32) {
    %c0_i32 = arith.constant 0 : i32
    %c0_i32_0 = arith.constant 0 : i32
    %c0_i32_1 = arith.constant 0 : i32
    return %c0_i32, %c0_i32_0 : i32, i32
  }
  func.func @transform_3(%arg0: i32) -> (i32, i32) {
    %c0_i32 = arith.constant 0 : i32
    %c0_i32_0 = arith.constant 0 : i32
    %c0_i32_1 = arith.constant 0 : i32
    return %c0_i32, %c0_i32_0 : i32, i32
  }
  func.func @transform_4(%arg0: i32) -> (i32, i32) {
    %c0_i32 = arith.constant 0 : i32
    %c0_i32_0 = arith.constant 0 : i32
    %c0_i32_1 = arith.constant 0 : i32
    return %c0_i32, %c0_i32_0 : i32, i32
  }
  func.func @transform_5(%arg0: i32) -> (i32, i32) {
    %c0_i32 = arith.constant 0 : i32
    %c0_i32_0 = arith.constant 0 : i32
    return %arg0, %c0_i32 : i32, i32
  }
}

</mosaic_0001>

<bundles_post_ra>
// kernel: _lambda_.16
= control target key start
LH: loop header
LB: loop body
LE: loop exit
PB: predicated region body
PF: predicated region fallthrough
CT: control target
= control target key end

     0   :  { %10 = vsyncpa [#allocation3], 0  ;;  %s1863_s0 = inlined_call_operand.vmem [shape: bf16[392,9], index: 0, kind: input, shape index: {}]   ;;  %s1864_s1 = inlined_call_operand.hbm [shape: bf16[9,8], index: 1, kind: input, shape index: {}]   ;;  %s1865_s2 = inlined_call_operand.hbm [shape: f32[1,8], index: 2, kind: input, shape index: {}]   ;;  %s1866_s3 = inlined_call_operand.vmem [shape: f32[1,8], index: 3, kind: input, shape index: {}]   ;;  %s1867_s4 = inlined_call_operand.vmem [shape: f32[1,8], index: 4, kind: input, shape index: {}]   ;;  %s1868_s5 = inlined_call_operand.vmem [shape: f32[392,8], index: 5, kind: output, shape index: {}]  }
   0x1   :  { %11 = vsyncpa [#allocation5], 0  ;;  %s1455_s18 = smov 0   ;;  %s1457_s19 = smov 0  }
   0x2   :  { %s1459_s20 = smov 0  }
   0x3 LB: > { %s1468_s21 = sadd.s32 4294967295, %s1384_s20   ;;  %s1470_s22 = sadd.s32 1, %s1384_s20   ;;  %s1384_s20 = sphi %s1459_s20, %s1887_s20   ;;  %s1380_s19 = sphi %s1457_s19, %s1886_s19   ;;  %s1376_s18 = sphi %s1455_s18, %s1885_s18  }
   0x4   : > { %s131_s23 = ssub.s32 %s1384_s20, %s1470_s22  ;;  %s134_s24 = sadd.s32 1, %s1380_s19 }
   0x5   : > { %p132_p0 = scmp.eq.s32.totalorder %s131_s23, 0  ;;  %p144_p1 = scmp.ne.s32.totalorder %s1380_s19, %s1376_s18 }
   0x6   : > { %p145_p2 = scmp.eq.s32.totalorder %s1468_s21, 1  ;;  %p1011_p3 = scmp.ge.s32.totalorder %s1384_s20, 1 }
   0x7   : > { %s1478_s25 = scalar_select %p132_p0, %s1380_s19, %s134_s24  }
   0x8   : > { %p1480_p4 = por %p145_p2, %p144_p1  ;;  %p158_p5 = scmp.lt.s32.totalorder %s1384_s20, 3 }
   0x9   : > { %p1869_p6 = scmp.eq.s32.totalorder %s1468_s21, 0  ;;  %s1418_s28 = smov [#allocation2]  }
   0xa   : > { %s1871_s26 = scalar_select %p1480_p4, 1, 0 }
   0xb   : > { %p1485_p7 = pnand %p1011_p3, %p158_p5  ;;  %s170_s29 = sshll.u32 %s1418_s28, 4  ;;  %s171_s29 = int_to_ptr.vmem [resolvable:$true] %s170_s29 }
   0xc   : > { %s1419_s6 = smov [#allocation4]   ;;  %s1266_s10 = scalar_lea.hbm %s1864_s1, 128 }
   0xd   : > { %s1872_s27 = scalar_select %p1485_p7, 1, 0 }
   0xe   : > { %p1141_p8 = pneg %p1485_p7  ;;  %s184_s7 = sshll.u32 %s1419_s6, 4  ;;  %s1497_s7 = int_to_ptr.vmem [resolvable:$true] %s184_s7 }
   0xf   : > { %p1267_p10 = scmp.ne.s32.totalorder %s1864_s1, %s1266_s10  ;;  %p1273_p0 = scmp.lt.u32.totalorder %s1266_s10, %s1864_s1 }
  0x10   : > { %p1493_p9 = pnand %p1869_p6, %p1141_p8 }
  0x12   : > { %p1268_p11 = pneg %p1493_p9 }
  0x14   : > { %p1269_p12 = pnand %p1268_p11, %p1267_p10 }
  0x16   : > { %p1270_p13 = pneg %p1269_p12 }
  0x18   : > { %p1275_p1 = pnand %p1273_p0, %p1270_p13 }
  0x1a   : > { %1278 = shalt.err (!%p1275_p1)
}
  0x1b   : > { %s1279_s15 = scalar_lea.vmem %s171_s29, 128  ;;  %p1287_p8 = scmp.lt.s32.totalorder %s171_s29, %s171_s29 }
  0x1c   : > { %p1280_p2 = scmp.ne.s32.totalorder %s171_s29, %s1279_s15  ;;  %p1288_p6 = scmp.lt.s32.totalorder %s1279_s15, %s1279_s15 }
  0x1e   : > { %p1282_p3 = pnand %p1280_p2, %p1268_p11  ;;  %p1289_p4 = por %p1288_p6, %p1287_p8 }
  0x20   : > { %p1283_p5 = pneg %p1282_p3 }
  0x22   : > { %p1290_p7 = pnand %p1289_p4, %p1283_p5 }
  0x24   : > { %1293 = shalt.err (!%p1290_p7)
}
  0x25   : > { %s1420_s16 = smov 64   ;;  %s1421_s17 = smov 4  }
  0x26   : > { %1144 = dma.hbm_to_vmem [thread:$0]  (!%p1493_p9), %s1864_s1, 128, %s171_s29, [#allocation3], %s1420_s16, %s1420_s16, %s1421_s17  }
  0x27   : > { %s1294_s6 = scalar_lea.hbm %s1865_s2, 16 }
  0x28   : > { %p1295_p10 = scmp.ne.s32.totalorder %s1865_s2, %s1294_s6  ;;  %p1301_p7 = scmp.lt.u32.totalorder %s1294_s6, %s1865_s2 }
  0x2a   : > { %p1297_p4 = pnand %p1295_p10, %p1268_p11 }
  0x2c   : > { %p1298_p6 = pneg %p1297_p4 }
  0x2e   : > { %p1303_p12 = pnand %p1301_p7, %p1298_p6 }
  0x30   : > { %1306 = shalt.err (!%p1303_p12)
}
  0x31   : > { %s1307_s29 = scalar_lea.vmem %s1497_s7, 16  ;;  %s1314_s12 = scalar_lea.vmem %s1497_s7, 32 }
  0x32   : > { %p1308_p13 = scmp.ne.s32.totalorder %s1497_s7, %s1307_s29  ;;  %p1315_p2 = scmp.lt.s32.totalorder %s1497_s7, %s1497_s7 }
  0x33   : > { %p1316_p3 = scmp.lt.s32.totalorder %s1314_s12, %s1307_s29 }
  0x34   : > { %p1310_p0 = pnand %p1308_p13, %p1268_p11 }
  0x35   : > { %p1317_p5 = por %p1316_p3, %p1315_p2 }
  0x36   : > { %p1311_p1 = pneg %p1310_p0 }
  0x38   : > { %p1318_p8 = pnand %p1317_p5, %p1311_p1 }
  0x3a   : > { %1321 = shalt.err (!%p1318_p8)
}
  0x3b   : > { %1147 = dma.hbm_to_vmem [thread:$0]  (!%p1493_p9), %s1865_s2, 16, %s1497_s7, [#allocation5]  }
  0x3c   : > { %p1874_p10 = scmp.ne.s32.totalorder %s1872_s27, 0 }
  0x3d   : > { %p1875_p11 = scmp.eq.s32.totalorder (!%p1874_p10), %s1468_s21, 0 }
  0x3e   : > { %220 = sbr.rel (%p1874_p10) target bundleno = 419 (0x1a3), region = 40 }
  0x45   : > { %1367 = dma.done.wait (%p1875_p11), [#allocation3], 128   ;;  %p1876_p4 = pmov %p1875_p11 }
  0x47   : > { %1369 = vsyncadd (%p1876_p4), [#allocation3], 4294967168  ;;  %p1877_p6 = pmov %p1876_p4 }
  0x48   : > { %p1878_p7 = pmov %p1876_p4 }
  0x49   : > { %1371 = dma.done.wait (%p1877_p6), [#allocation5], 16  }
  0x4a   : > { %1373 = vsyncadd (%p1878_p7), [#allocation5], 4294967280  ;;  %vm417_vm0 = vcmask 1043456   ;;  %v1422_v0 = vmov 0.0   ;;  %s1558_s30 = smul.u32 25, %s1468_s21  ;;  %vm1423_vm1 = vmmov 0  }
  0x4b   : > { %1076 = vmatprep.subr.bf16.mxu0 %v1422_v0  ;;  %1130 = vmatprep.subr.bf16.mxu1 %v1422_v0  ;;  %vm418_vm2 = vcmask 1044480   ;;  %v1424_v1 = vmov 65535   ;;  %v1248_v4 = vld [vmem:[#allocation2] sm:$0x1f]   ;;  %vm377_vm3 = vcmask 72704   ;;  %s252_s20 = sand.u32 1, %s1376_s18  }
  0x4c   : > { %1078 = vmatprep.mubr.msk.bf16.mxu0 %vm1423_vm1, %v1422_v0  ;;  %1106 = vmatprep.mubr.msk.bf16.mxu1 %vm1423_vm1, %v1422_v0  ;;  %v419_v2 = vsel %vm417_vm0, 4294967295, %v1424_v1  ;;  %p260_p9 = scmp.lt.s32.totalorder %s1558_s30, 48  ;;  %v1606_v19 = vld [vmem:[#allocation4] ss:$0 sm:$0xff]  ;;  %s1132_s23 = smul.u32 200, %s252_s20  ;;  %vm649_vm4 = vcmask 64512  }
  0x4d   : > { %v420_v3 = vsel %vm418_vm2, %v419_v2, 0  ;;  %v1614_v26 = vld [vmem:[%s1866_s3] ss:$0 sm:$0xff]  ;;  %p1879_p12 = scmp.ne.s32.totalorder %s1871_s26, 0 }
  0x4e   : > { %s261_s27 = scalar_select %p260_p9, %s1558_s30, 48  ;;  %v422_v5 = vand.u32 %v1248_v4, %v420_v3  ;;  %v1621_v35 = vld [vmem:[%s1867_s4] ss:$0 sm:$0xff] }
  0x4f   : > { %s1629_s8 = scalar_lea.vmem [#allocation6], %s1132_s23   ;;  %s683_s9 = ssub.s32 (%p1879_p12), 49, %s1558_s30 }
  0x50   : > { %s1018_s7 = sshll.u32 %s261_s27, 2  ;;  %1077 = vmatpush3.bf16.msra.mxu0 %v422_v5  ;;  %1131 = vmatpush3.bf16.msra.mxu1 %v422_v5  ;;  %s1061_s10 = smul.u32 (%p1879_p12), 200, %s1468_s21 }
  0x51   : > { %s1567_s17 = scalar_lea.vmem %s1863_s0, %s1018_s7  ;;  %p684_p13 = scmp.lt.s32.totalorder (%p1879_p12), %s683_s9, 25 }
  0x52   : > { %v1249_v6 = vld [vmem:[%s1567_s17] sm:$0xff]   ;;  %v1250_v7 = vld [vmem:[%s1567_s17 + $0x38] sm:$0xff]   ;;  %v1251_v8 = vld [vmem:[%s1567_s17 + $0x8] sm:$0xff]   ;;  %s1753_s12 = scalar_lea.vmem (%p1879_p12), %s1868_s5, %s1061_s10  }
  0x53   : > { %1079 = vmatmul.mubr.msk.bf16.vlgmr.msra.gmra.mrb[0].mxu0 %vm377_vm3, %v1249_v6  ;;  %1107 = vmatmul.mubr.msk.bf16.vlgmr.msra.gmra.mrb[0].mxu1 %vm377_vm3, %v1250_v7  ;;  %v1252_v9 = vld [vmem:[%s1567_s17 + $0x40] sm:$0xff]   ;;  %v1253_v10 = vld [vmem:[%s1567_s17 + $0x10] sm:$0xff]   ;;  %v1254_v11 = vld [vmem:[%s1567_s17 + $0x48] sm:$0xff]  }
  0x54   : > { %1082 = vmatprep.mubr.msk.bf16.mxu0 %vm1423_vm1, %v1422_v0  ;;  %1110 = vmatprep.mubr.msk.bf16.mxu1 %vm1423_vm1, %v1422_v0  ;;  %v1255_v12 = vld [vmem:[%s1567_s17 + $0x18] sm:$0xff]   ;;  %v1256_v13 = vld [vmem:[%s1567_s17 + $0x50] sm:$0xff]   ;;  %v1257_v14 = vld [vmem:[%s1567_s17 + $0x20] sm:$0xff]  }
  0x55   : > { %v1258_v15 = vld [vmem:[%s1567_s17 + $0x58] sm:$0xff]   ;;  %v1259_v16 = vld [vmem:[%s1567_s17 + $0x28] sm:$0xff]   ;;  %v1260_v17 = vld [vmem:[%s1567_s17 + $0x60] ss:$0 sps:$4 sm:$0xff]  }
  0x56   : > { %v1261_v18 = vld [vmem:[%s1567_s17 + $0x30] sm:$0xff]  }
  0x5b   : > { %1083 = vmatmul.mubr.msk.bf16.gmra.mrb[4].mxu0 %vm377_vm3, %v1251_v8  ;;  %1111 = vmatmul.mubr.msk.bf16.gmra.mrb[4].mxu1 %vm377_vm3, %v1252_v9 }
  0x5c   : > { %1086 = vmatprep.mubr.msk.bf16.mxu0 %vm1423_vm1, %v1422_v0  ;;  %1114 = vmatprep.mubr.msk.bf16.mxu1 %vm1423_vm1, %v1422_v0 }
  0x63   : > { %1087 = vmatmul.mubr.msk.bf16.gmra.mrb[8].mxu0 %vm377_vm3, %v1253_v10  ;;  %1115 = vmatmul.mubr.msk.bf16.gmra.mrb[8].mxu1 %vm377_vm3, %v1254_v11 }
  0x64   : > { %1090 = vmatprep.mubr.msk.bf16.mxu0 %vm1423_vm1, %v1422_v0  ;;  %1118 = vmatprep.mubr.msk.bf16.mxu1 %vm1423_vm1, %v1422_v0 }
  0x6b   : > { %1091 = vmatmul.mubr.msk.bf16.gmra.mrb[12].mxu0 %vm377_vm3, %v1255_v12  ;;  %1119 = vmatmul.mubr.msk.bf16.gmra.mrb[12].mxu1 %vm377_vm3, %v1256_v13 }
  0x6c   : > { %1094 = vmatprep.mubr.msk.bf16.mxu0 %vm1423_vm1, %v1422_v0  ;;  %1122 = vmatprep.mubr.msk.bf16.mxu1 %vm1423_vm1, %v1422_v0 }
  0x73   : > { %1095 = vmatmul.mubr.msk.bf16.gmra.mrb[16].mxu0 %vm377_vm3, %v1257_v14  ;;  %1123 = vmatmul.mubr.msk.bf16.gmra.mrb[16].mxu1 %vm377_vm3, %v1258_v15 }
  0x74   : > { %1098 = vmatprep.mubr.msk.bf16.mxu0 %vm1423_vm1, %v1422_v0  ;;  %1126 = vmatprep.mubr.msk.bf16.mxu1 %vm1423_vm1, %v1422_v0 }
  0x7b   : > { %1099 = vmatmul.mubr.msk.bf16.gmra.mrb[20].mxu0 %vm377_vm3, %v1259_v16  ;;  %1127 = vmatmul.mubr.msk.bf16.gmra.mrb[20].mxu1 %vm377_vm3, %v1260_v17 }
  0x7c   : > { %1102 = vmatprep.mubr.msk.bf16.mxu0 %vm1423_vm1, %v1422_v0 }
  0x83   : > { %1103 = vmatmul.mubr.msk.bf16.gmra.mrb[24].mxu0 %vm377_vm3, %v1261_v18 }
 0x126   : > { %v458_v20 = vpop.f32.mrb[0].mxu0  ;;  %v514_v21 = vpop.f32.mrb[0].mxu1 }
 0x127   : > { %v459_v22 = vadd.f32 %v1606_v19, %v458_v20  ;;  %v1080_v23 = vpop.f32.mrb[1].mxu0  ;;  %v515_v24 = vadd.f32 %v1606_v19, %v514_v21  ;;  %v1108_v25 = vpop.f32.mrb[1].mxu1 }
 0x128   : > { %v461_v27 = vpop.f32.mrb[2].mxu0  ;;  %v517_v28 = vpop.f32.mrb[2].mxu1 }
 0x129   : > { %v560_v29 = vmax.f32 %v459_v22, 0.0  ;;  %v462_v30 = vadd.f32 %v1606_v19, %v461_v27  ;;  %v1081_v31 = vpop.f32.mrb[3].mxu0  ;;  %v574_v32 = vmax.f32 %v515_v24, 0.0  ;;  %v518_v33 = vadd.f32 %v1606_v19, %v517_v28  ;;  %v1109_v34 = vpop.f32.mrb[3].mxu1 }
 0x12b   : > { %v592_v36 = vmul.f32 %v1614_v26, %v560_v29  ;;  %v561_v37 = vmax.f32 %v462_v30, 0.0  ;;  %v606_v38 = vmul.f32 %v1614_v26, %v574_v32  ;;  %v575_v39 = vmax.f32 %v518_v33, 0.0 }
 0x12d   : > { %v624_v40 = vadd.f32 %v1621_v35, %v592_v36  ;;  %v593_v41 = vmul.f32 %v1614_v26, %v561_v37  ;;  %v638_v42 = vadd.f32 %v1621_v35, %v606_v38  ;;  %v607_v43 = vmul.f32 %v1614_v26, %v575_v39 }
 0x12e   : > { %v466_v44 = vpop.f32.mrb[4].mxu0  ;;  %v522_v45 = vpop.f32.mrb[4].mxu1 }
 0x12f   : > { %650 = vst.msk [vmem:[%s1629_s8] sm:$0xff] %vm649_vm4, %v624_v40  ;;  %v625_v46 = vadd.f32 %v1621_v35, %v593_v41  ;;  %664 = vst.msk [vmem:[%s1629_s8 + $0x70] sm:$0xff] %vm649_vm4, %v638_v42  ;;  %v467_v47 = vadd.f32 %v1606_v19, %v466_v44  ;;  %v1084_v48 = vpop.f32.mrb[5].mxu0  ;;  %v639_v49 = vadd.f32 %v1621_v35, %v607_v43  ;;  %v1112_v51 = vpop.f32.mrb[5].mxu1 }
 0x130   : > { %v523_v50 = vadd.f32 %v1606_v19, %v522_v45  ;;  %v469_v52 = vpop.f32.mrb[6].mxu0  ;;  %v525_v53 = vpop.f32.mrb[6].mxu1 }
 0x131   : > { %651 = vst.msk [vmem:[%s1629_s8 + $0x8] sm:$0xff] %vm649_vm4, %v625_v46  ;;  %v562_v54 = vmax.f32 %v467_v47, 0.0  ;;  %665 = vst.msk [vmem:[%s1629_s8 + $0x78] sm:$0xff] %vm649_vm4, %v639_v49  ;;  %v470_v55 = vadd.f32 %v1606_v19, %v469_v52  ;;  %v1085_v56 = vpop.f32.mrb[7].mxu0  ;;  %v526_v58 = vadd.f32 %v1606_v19, %v525_v53  ;;  %v1113_v59 = vpop.f32.mrb[7].mxu1 }
 0x132   : > { %v576_v57 = vmax.f32 %v523_v50, 0.0 }
 0x133   : > { %v594_v60 = vmul.f32 %v1614_v26, %v562_v54  ;;  %v563_v61 = vmax.f32 %v470_v55, 0.0  ;;  %v577_v63 = vmax.f32 %v526_v58, 0.0 }
 0x134   : > { %v608_v62 = vmul.f32 %v1614_v26, %v576_v57 }
 0x135   : > { %v626_v0 = vadd.f32 %v1621_v35, %v594_v60  ;;  %v595_v1 = vmul.f32 %v1614_v26, %v563_v61  ;;  %v609_v3 = vmul.f32 %v1614_v26, %v577_v63 }
 0x136   : > { %v640_v2 = vadd.f32 %v1621_v35, %v608_v62  ;;  %v474_v4 = vpop.f32.mrb[8].mxu0  ;;  %v530_v5 = vpop.f32.mrb[8].mxu1 }
 0x137   : > { %652 = vst.msk [vmem:[%s1629_s8 + $0x10] sm:$0xff] %vm649_vm4, %v626_v0  ;;  %v627_v6 = vadd.f32 %v1621_v35, %v595_v1  ;;  %v475_v7 = vadd.f32 %v1606_v19, %v474_v4  ;;  %v1088_v8 = vpop.f32.mrb[9].mxu0  ;;  %v641_v9 = vadd.f32 %v1621_v35, %v609_v3  ;;  %v531_v10 = vadd.f32 %v1606_v19, %v530_v5  ;;  %v1116_v11 = vpop.f32.mrb[9].mxu1 }
 0x138   : > { %666 = vst.msk [vmem:[%s1629_s8 + $0x80] sm:$0xff] %vm649_vm4, %v640_v2  ;;  %v477_v12 = vpop.f32.mrb[10].mxu0  ;;  %v533_v13 = vpop.f32.mrb[10].mxu1 }
 0x139   : > { %653 = vst.msk [vmem:[%s1629_s8 + $0x18] sm:$0xff] %vm649_vm4, %v627_v6  ;;  %v564_v14 = vmax.f32 %v475_v7, 0.0  ;;  %667 = vst.msk [vmem:[%s1629_s8 + $0x88] sm:$0xff] %vm649_vm4, %v641_v9  ;;  %v478_v15 = vadd.f32 %v1606_v19, %v477_v12  ;;  %v1089_v16 = vpop.f32.mrb[11].mxu0  ;;  %v578_v17 = vmax.f32 %v531_v10, 0.0  ;;  %v534_v18 = vadd.f32 %v1606_v19, %v533_v13  ;;  %v1117_v20 = vpop.f32.mrb[11].mxu1 }
 0x13b   : > { %v596_v21 = vmul.f32 %v1614_v26, %v564_v14  ;;  %v565_v22 = vmax.f32 %v478_v15, 0.0  ;;  %v610_v23 = vmul.f32 %v1614_v26, %v578_v17  ;;  %v579_v24 = vmax.f32 %v534_v18, 0.0 }
 0x13d   : > { %v628_v25 = vadd.f32 %v1621_v35, %v596_v21  ;;  %v597_v27 = vmul.f32 %v1614_v26, %v565_v22  ;;  %v642_v28 = vadd.f32 %v1621_v35, %v610_v23  ;;  %v611_v29 = vmul.f32 %v1614_v26, %v579_v24 }
 0x13e   : > { %v482_v30 = vpop.f32.mrb[12].mxu0  ;;  %v538_v31 = vpop.f32.mrb[12].mxu1 }
 0x13f   : > { %654 = vst.msk [vmem:[%s1629_s8 + $0x20] sm:$0xff] %vm649_vm4, %v628_v25  ;;  %v629_v32 = vadd.f32 %v1621_v35, %v597_v27  ;;  %668 = vst.msk [vmem:[%s1629_s8 + $0x90] sm:$0xff] %vm649_vm4, %v642_v28  ;;  %v483_v33 = vadd.f32 %v1606_v19, %v482_v30  ;;  %v1092_v34 = vpop.f32.mrb[13].mxu0  ;;  %v643_v36 = vadd.f32 %v1621_v35, %v611_v29  ;;  %v1120_v38 = vpop.f32.mrb[13].mxu1 }
 0x140   : > { %v539_v37 = vadd.f32 %v1606_v19, %v538_v31  ;;  %v485_v39 = vpop.f32.mrb[14].mxu0  ;;  %v541_v40 = vpop.f32.mrb[14].mxu1 }
 0x141   : > { %655 = vst.msk [vmem:[%s1629_s8 + $0x28] sm:$0xff] %vm649_vm4, %v629_v32  ;;  %v566_v41 = vmax.f32 %v483_v33, 0.0  ;;  %669 = vst.msk [vmem:[%s1629_s8 + $0x98] sm:$0xff] %vm649_vm4, %v643_v36  ;;  %v486_v42 = vadd.f32 %v1606_v19, %v485_v39  ;;  %v1093_v43 = vpop.f32.mrb[15].mxu0  ;;  %v542_v45 = vadd.f32 %v1606_v19, %v541_v40  ;;  %v1121_v46 = vpop.f32.mrb[15].mxu1 }
 0x142   : > { %v580_v44 = vmax.f32 %v539_v37, 0.0 }
 0x143   : > { %v598_v47 = vmul.f32 %v1614_v26, %v566_v41  ;;  %v567_v48 = vmax.f32 %v486_v42, 0.0  ;;  %v581_v50 = vmax.f32 %v542_v45, 0.0 }
 0x144   : > { %v612_v49 = vmul.f32 %v1614_v26, %v580_v44 }
 0x145   : > { %v630_v51 = vadd.f32 %v1621_v35, %v598_v47  ;;  %v599_v52 = vmul.f32 %v1614_v26, %v567_v48  ;;  %v613_v54 = vmul.f32 %v1614_v26, %v581_v50 }
 0x146   : > { %v644_v53 = vadd.f32 %v1621_v35, %v612_v49  ;;  %v490_v55 = vpop.f32.mrb[16].mxu0  ;;  %v546_v56 = vpop.f32.mrb[16].mxu1 }
 0x147   : > { %656 = vst.msk [vmem:[%s1629_s8 + $0x30] sm:$0xff] %vm649_vm4, %v630_v51  ;;  %v631_v57 = vadd.f32 %v1621_v35, %v599_v52  ;;  %v491_v58 = vadd.f32 %v1606_v19, %v490_v55  ;;  %v1096_v59 = vpop.f32.mrb[17].mxu0  ;;  %v645_v60 = vadd.f32 %v1621_v35, %v613_v54  ;;  %v547_v61 = vadd.f32 %v1606_v19, %v546_v56  ;;  %v1124_v62 = vpop.f32.mrb[17].mxu1 }
 0x148   : > { %670 = vst.msk [vmem:[%s1629_s8 + $0xa0] sm:$0xff] %vm649_vm4, %v644_v53  ;;  %v493_v63 = vpop.f32.mrb[18].mxu0  ;;  %v549_v0 = vpop.f32.mrb[18].mxu1 }
 0x149   : > { %657 = vst.msk [vmem:[%s1629_s8 + $0x38] sm:$0xff] %vm649_vm4, %v631_v57  ;;  %v568_v1 = vmax.f32 %v491_v58, 0.0  ;;  %671 = vst.msk [vmem:[%s1629_s8 + $0xa8] sm:$0xff] %vm649_vm4, %v645_v60  ;;  %v494_v2 = vadd.f32 %v1606_v19, %v493_v63  ;;  %v1097_v3 = vpop.f32.mrb[19].mxu0  ;;  %v582_v4 = vmax.f32 %v547_v61, 0.0  ;;  %v550_v5 = vadd.f32 %v1606_v19, %v549_v0  ;;  %v1125_v6 = vpop.f32.mrb[19].mxu1 }
 0x14b   : > { %v600_v7 = vmul.f32 %v1614_v26, %v568_v1  ;;  %v569_v8 = vmax.f32 %v494_v2, 0.0  ;;  %v614_v9 = vmul.f32 %v1614_v26, %v582_v4  ;;  %v583_v10 = vmax.f32 %v550_v5, 0.0 }
 0x14d   : > { %v632_v11 = vadd.f32 %v1621_v35, %v600_v7  ;;  %v601_v12 = vmul.f32 %v1614_v26, %v569_v8  ;;  %v646_v13 = vadd.f32 %v1621_v35, %v614_v9  ;;  %v615_v14 = vmul.f32 %v1614_v26, %v583_v10 }
 0x14e   : > { %v498_v15 = vpop.f32.mrb[20].mxu0  ;;  %v554_v16 = vpop.f32.mrb[20].mxu1 }
 0x14f   : > { %658 = vst.msk [vmem:[%s1629_s8 + $0x40] sm:$0xff] %vm649_vm4, %v632_v11  ;;  %v633_v17 = vadd.f32 %v1621_v35, %v601_v12  ;;  %672 = vst.msk [vmem:[%s1629_s8 + $0xb0] sm:$0xff] %vm649_vm4, %v646_v13  ;;  %v499_v18 = vadd.f32 %v1606_v19, %v498_v15  ;;  %v1100_v20 = vpop.f32.mrb[21].mxu0  ;;  %v647_v21 = vadd.f32 %v1621_v35, %v615_v14  ;;  %v1128_v23 = vpop.f32.mrb[21].mxu1 }
 0x150   : > { %v555_v22 = vadd.f32 %v1606_v19, %v554_v16  ;;  %v501_v24 = vpop.f32.mrb[22].mxu0  ;;  %v557_v25 = vpop.f32.mrb[22].mxu1 }
 0x151   : > { %659 = vst.msk [vmem:[%s1629_s8 + $0x48] sm:$0xff] %vm649_vm4, %v633_v17  ;;  %v570_v27 = vmax.f32 %v499_v18, 0.0  ;;  %673 = vst.msk [vmem:[%s1629_s8 + $0xb8] sm:$0xff] %vm649_vm4, %v647_v21  ;;  %v502_v28 = vadd.f32 %v1606_v19, %v501_v24  ;;  %v1101_v29 = vpop.f32.mrb[23].mxu0  ;;  %v1129_v31 = vpop.f32.mrb[23].mxu1 }
 0x152   : > { %v584_v30 = vmax.f32 %v555_v22, 0.0 }
 0x153   : > { %v602_v32 = vmul.f32 %v1614_v26, %v570_v27  ;;  %v571_v33 = vmax.f32 %v502_v28, 0.0 }
 0x154   : > { %v616_v34 = vmul.f32 %v1614_v26, %v584_v30 }
 0x155   : > { %v634_v36 = vadd.f32 %v1621_v35, %v602_v32  ;;  %v603_v37 = vmul.f32 %v1614_v26, %v571_v33 }
 0x156   : > { %v648_v38 = vadd.f32 %v1621_v35, %v616_v34  ;;  %v506_v39 = vpop.f32.mrb[24].mxu0 }
 0x157   : > { %660 = vst.msk [vmem:[%s1629_s8 + $0x50] sm:$0xff] %vm649_vm4, %v634_v36  ;;  %v635_v40 = vadd.f32 %v1621_v35, %v603_v37  ;;  %v507_v41 = vadd.f32 %v1606_v19, %v506_v39  ;;  %v1104_v42 = vpop.f32.mrb[25].mxu0 }
 0x158   : > { %674 = vst.msk [vmem:[%s1629_s8 + $0xc0] sm:$0xff] %vm649_vm4, %v648_v38  ;;  %v509_v43 = vpop.f32.mrb[26].mxu0 }
 0x159   : > { %661 = vst.msk [vmem:[%s1629_s8 + $0x58] sm:$0xff] %vm649_vm4, %v635_v40  ;;  %v572_v44 = vmax.f32 %v507_v41, 0.0  ;;  %v510_v45 = vadd.f32 %v1606_v19, %v509_v43  ;;  %v1105_v46 = vpop.f32.mrb[27].mxu0 }
 0x15b   : > { %v604_v47 = vmul.f32 %v1614_v26, %v572_v44  ;;  %v573_v48 = vmax.f32 %v510_v45, 0.0  ;;  %681 = sbr.rel (!%p1879_p12) target bundleno = 419 (0x1a3), region = 52 }
 0x15d   : > { %v636_v49 = vadd.f32 %v1621_v35, %v604_v47  ;;  %v605_v50 = vmul.f32 %v1614_v26, %v573_v48 }
 0x15f   : > { %662 = vst.msk [vmem:[%s1629_s8 + $0x60] sm:$0xff] %vm649_vm4, %v636_v49  ;;  %v637_v51 = vadd.f32 %v1621_v35, %v605_v50 }
 0x161   : > { %663 = vst.msk [vmem:[%s1629_s8 + $0x68] sm:$0xff] %vm649_vm4, %v637_v51 }
 0x162   : > { %s1889_s9 = smov (!%p684_p13, %s683_s9), 25 }
 0x163   : > { %s1049_s13 = sshll.u32 %s1889_s9, 7 }
 0x164   : > { %p1052_p0 = scmp.eq.s32.totalorder %s1049_s13, 0 }
 0x165   : > { %1262 = sdivrem.u32 (!%p1052_p0), %s1889_s9, 25 }
 0x166   : > { %692 = sbr.rel (%p1052_p0) target bundleno = 419 (0x1a3), region = 56 }
 0x16e   : > { %s1759_s26 = spop.drf %1262 }
 0x16f   : > { %p1053_p1 = scmp.le.s32.totalorder %s1759_s26, 0 }
 0x170   : > { %s1880_s21 = smov (!%p1053_p1), %s1753_s12  ;;  %s1881_s14 = smov (!%p1053_p1), %s1629_s8 }
 0x171   : > { %948 = sbr.rel (%p1053_p1) target bundleno = 390 (0x186), region = 133  ;;  %s1768_s30 = smov (!%p1053_p1), 0  }
 0x172   : > { %s1770_s27 = smov (!%p1053_p1), 0  }
 0x178 LB: >> { %v804_v19 = vld [vmem:[%s1392_s14] sm:$0xff]  ;;  %v806_v26 = vld [vmem:[%s1392_s14 + $0x8] sm:$0xff]  ;;  %v808_v35 = vld [vmem:[%s1392_s14 + $0x10] sm:$0xff]  ;;  %s854_s7 = sadd.s32 1, %s1396_s30  ;;  %s798_s27 = sadd.s32 1, %s1400_s27   ;;  %s1400_s27 = sphi %s1770_s27, %s798_s27   ;;  %s1396_s30 = sphi %s1768_s30, %s1884_s30   ;;  %s1392_s14 = sphi %s1881_s14, %s1883_s14   ;;  %s1388_s21 = sphi %s1880_s21, %s1882_s21  }
 0x179   : >> { %805 = vst [vmem:[%s1388_s21] sm:$0xff] %v804_v19  ;;  %807 = vst [vmem:[%s1388_s21 + $0x8] sm:$0xff] %v806_v26  ;;  %v810_v52 = vld [vmem:[%s1392_s14 + $0x18] sm:$0xff]  ;;  %v812_v53 = vld [vmem:[%s1392_s14 + $0x20] sm:$0xff]  ;;  %p855_p2 = scmp.ge.s32.totalorder %s854_s7, %s1759_s26  ;;  %p797_p3 = scmp.ge.s32.totalorder %s798_s27, %s1759_s26 }
 0x17a   : >> { %809 = vst [vmem:[%s1388_s21 + $0x10] sm:$0xff] %v808_v35  ;;  %v814_v54 = vld [vmem:[%s1392_s14 + $0x28] sm:$0xff]  ;;  %811 = vst [vmem:[%s1388_s21 + $0x18] sm:$0xff] %v810_v52  ;;  %v816_v55 = vld [vmem:[%s1392_s14 + $0x30] sm:$0xff] }
 0x17b   : >> { %813 = vst [vmem:[%s1388_s21 + $0x20] sm:$0xff] %v812_v53  ;;  %815 = vst [vmem:[%s1388_s21 + $0x28] sm:$0xff] %v814_v54  ;;  %v818_v56 = vld [vmem:[%s1392_s14 + $0x38] sm:$0xff]  ;;  %v820_v57 = vld [vmem:[%s1392_s14 + $0x40] sm:$0xff]  ;;  %s1891_s7 = smov (%p855_p2, %s854_s7), 0 }
 0x17c   : >> { %817 = vst [vmem:[%s1388_s21 + $0x30] sm:$0xff] %v816_v55  ;;  %819 = vst [vmem:[%s1388_s21 + $0x38] sm:$0xff] %v818_v56  ;;  %v822_v58 = vld [vmem:[%s1392_s14 + $0x48] sm:$0xff]  ;;  %v824_v59 = vld [vmem:[%s1392_s14 + $0x50] sm:$0xff]  ;;  %s857_s15 = smul.u32 200, %s1891_s7  ;;  %s1884_s30 = smov %s1891_s7 }
 0x17d   : >> { %821 = vst [vmem:[%s1388_s21 + $0x40] sm:$0xff] %v820_v57  ;;  %v826_v60 = vld [vmem:[%s1392_s14 + $0x58] sm:$0xff]  ;;  %823 = vst [vmem:[%s1388_s21 + $0x48] sm:$0xff] %v822_v58  ;;  %v828_v61 = vld [vmem:[%s1392_s14 + $0x60] sm:$0xff] }
 0x17e   : >> { %825 = vst [vmem:[%s1388_s21 + $0x50] sm:$0xff] %v824_v59  ;;  %827 = vst [vmem:[%s1388_s21 + $0x58] sm:$0xff] %v826_v60  ;;  %v830_v62 = vld [vmem:[%s1392_s14 + $0x68] sm:$0xff]  ;;  %v832_v63 = vld [vmem:[%s1392_s14 + $0x70] sm:$0xff]  ;;  %s859_s16 = scalar_lea.vmem %s1629_s8, %s857_s15 [#allocation6]   ;;  %s860_s17 = scalar_lea.vmem %s1753_s12, %s857_s15  }
 0x17f   : >> { %829 = vst [vmem:[%s1388_s21 + $0x60] sm:$0xff] %v828_v61  ;;  %831 = vst [vmem:[%s1388_s21 + $0x68] sm:$0xff] %v830_v62  ;;  %v834_v0 = vld [vmem:[%s1392_s14 + $0x78] sm:$0xff]  ;;  %v836_v1 = vld [vmem:[%s1392_s14 + $0x80] sm:$0xff]  ;;  %800 = sbr.rel (!%p797_p3) target bundleno = 376 (0x178), region = 139 }
 0x180   : >> { %833 = vst [vmem:[%s1388_s21 + $0x70] sm:$0xff] %v832_v63  ;;  %v838_v2 = vld [vmem:[%s1392_s14 + $0x88] sm:$0xff]  ;;  %835 = vst [vmem:[%s1388_s21 + $0x78] sm:$0xff] %v834_v0  ;;  %v840_v3 = vld [vmem:[%s1392_s14 + $0x90] sm:$0xff] }
 0x181   : >> { %837 = vst [vmem:[%s1388_s21 + $0x80] sm:$0xff] %v836_v1  ;;  %839 = vst [vmem:[%s1388_s21 + $0x88] sm:$0xff] %v838_v2  ;;  %v842_v4 = vld [vmem:[%s1392_s14 + $0x98] sm:$0xff]  ;;  %v844_v5 = vld [vmem:[%s1392_s14 + $0xa0] sm:$0xff] }
 0x182   : >> { %841 = vst [vmem:[%s1388_s21 + $0x90] sm:$0xff] %v840_v3  ;;  %843 = vst [vmem:[%s1388_s21 + $0x98] sm:$0xff] %v842_v4  ;;  %v846_v6 = vld [vmem:[%s1392_s14 + $0xa8] sm:$0xff]  ;;  %v848_v7 = vld [vmem:[%s1392_s14 + $0xb0] sm:$0xff] }
 0x183   : >> { %845 = vst [vmem:[%s1388_s21 + $0xa0] sm:$0xff] %v844_v5  ;;  %v850_v8 = vld [vmem:[%s1392_s14 + $0xb8] sm:$0xff]  ;;  %847 = vst [vmem:[%s1388_s21 + $0xa8] sm:$0xff] %v846_v6  ;;  %v852_v9 = vld [vmem:[%s1392_s14 + $0xc0] sm:$0xff]  ;;  %s1883_s14 = smov %s859_s16 }
 0x184   : >> { %849 = vst [vmem:[%s1388_s21 + $0xb0] sm:$0xff] %v848_v7  ;;  %851 = vst [vmem:[%s1388_s21 + $0xb8] sm:$0xff] %v850_v8 }
 0x185   : >> { %853 = vst [vmem:[%s1388_s21 + $0xc0] sm:$0xff] %v852_v9  ;;  %s1882_s21 = smov %s860_s17 }
 0x186 PF: > { %1264 = sdivrem.u32 %s1889_s9, 25 }
 0x187   : > { %s1054_s20 = smul.u32 200, %s1759_s26 }
 0x189   : > { %s865_s23 = scalar_lea.vmem %s1629_s8, %s1054_s20 [#allocation6]   ;;  %s867_s24 = scalar_lea.vmem %s1753_s12, %s1054_s20  }
 0x18f   : > { %s1265_s28 = spop.drf %1264 }
 0x190   : > { %p1056_p5 = scmp.le.s32.totalorder %s1265_s28, 0 }
 0x191   : > { %s1402_s18 = smov (!%p1056_p5), %s867_s24   ;;  %s1406_s6 = smov (!%p1056_p5), %s865_s23  }
 0x192   : > { %962 = sbr.rel (%p1056_p5) target bundleno = 419 (0x1a3), region = 144  ;;  %s1410_s10 = smov (!%p1056_p5), 0  }
 0x193   : > { %s1414_s11 = smov (!%p1056_p5), 0  }
 0x199 LB: >> { %v877_v10 = vld [vmem:[%s1408_s6] sm:$0xff]  ;;  %s879_s29 = sadd.s32 1, %s1412_s10  ;;  %s871_s11 = sadd.s32 1, %s1416_s11   ;;  %s1416_s11 = sphi %s1414_s11, %s871_s11   ;;  %s1412_s10 = sphi %s1410_s10, %s1411_s10   ;;  %s1408_s6 = sphi %s1406_s6, %s884_s6   ;;  %s1404_s18 = sphi %s1402_s18, %s885_s18  }
 0x19a   : >> { %878 = vst [vmem:[%s1404_s18] sm:$0xff] %v877_v10  ;;  %p880_p8 = scmp.ge.s32.totalorder %s879_s29, %s1265_s28  ;;  %p870_p10 = scmp.ge.s32.totalorder %s871_s11, %s1265_s28 }
 0x19c   : >> { %s1893_s29 = smov (%p880_p8, %s879_s29), 0  ;;  %873 = sbr.rel (!%p870_p10) target bundleno = 409 (0x199), region = 150 }
 0x19d   : >> { %s1057_s8 = sshll.u32 %s1893_s29, 3  ;;  %s1411_s10 = smov %s1893_s29  }
 0x19e   : >> { %s884_s6 = scalar_lea.vmem %s865_s23, %s1057_s8 [#allocation6]   ;;  %s885_s18 = scalar_lea.vmem %s867_s24, %s1057_s8  }
 0x1a3 PF: > { %p14_p11 = scmp.ge.s32.totalorder %s1470_s22, 4   ;;  %s1885_s18 = smov %s1380_s19 }
 0x1a4   : > { %s1886_s19 = smov %s1478_s25  ;;  %s1887_s20 = smov %s1470_s22 }
 0x1a5   :  { %16 = sbr.rel (!%p14_p11) target bundleno = 3 (0x3), region = 161 }
 0x1ac   :  { %901 = vsyncpa [#allocation3], 1 }
 0x1ad   :  { %903 = vsyncpa [#allocation3 + $0x1], 1 }
 0x1ae   :  { %904 = vsyncpa [#allocation5], 1 }

// kernel: _lambda_.17
= control target key start
LH: loop header
LB: loop body
LE: loop exit
PB: predicated region body
PF: predicated region fallthrough
CT: control target
= control target key end

     0   :  { %s1337_s18 = smov 0   ;;  %s1339_s19 = smov 0   ;;  %s1713_s0 = inlined_call_operand.vmem [shape: bf16[392,72], index: 0, kind: input, shape index: {}]   ;;  %s1714_s1 = inlined_call_operand.vmem [shape: bf16[72,32], index: 1, kind: input, shape index: {}]   ;;  %s1715_s2 = inlined_call_operand.vmem [shape: f32[1,32], index: 2, kind: input, shape index: {}]   ;;  %s1716_s3 = inlined_call_operand.vmem [shape: f32[1,32], index: 3, kind: input, shape index: {}]   ;;  %s1717_s4 = inlined_call_operand.vmem [shape: f32[1,32], index: 4, kind: input, shape index: {}]   ;;  %s1718_s5 = inlined_call_operand.vmem [shape: f32[392,32], index: 5, kind: output, shape index: {}]  }
   0x1   :  { %s1341_s20 = smov 0  }
   0x2 LB: > { %s1350_s21 = sadd.s32 4294967295, %s1271_s20   ;;  %s1352_s22 = sadd.s32 1, %s1271_s20   ;;  %s1271_s20 = sphi %s1341_s20, %s1727_s20   ;;  %s1267_s19 = sphi %s1339_s19, %s1726_s19   ;;  %s1263_s18 = sphi %s1337_s18, %s1725_s18  }
   0x3   : > { %s129_s23 = ssub.s32 %s1271_s20, %s1352_s22  ;;  %s132_s24 = sadd.s32 1, %s1267_s19 }
   0x4   : > { %p130_p0 = scmp.eq.s32.totalorder %s129_s23, 0  ;;  %p142_p1 = scmp.ne.s32.totalorder %s1267_s19, %s1263_s18 }
   0x5   : > { %p143_p2 = scmp.eq.s32.totalorder %s1350_s21, 1  ;;  %p964_p3 = scmp.ge.s32.totalorder %s1271_s20, 1 }
   0x6   : > { %s1360_s25 = scalar_select %p130_p0, %s1267_s19, %s132_s24  }
   0x7   : > { %p1362_p4 = por %p143_p2, %p142_p1  ;;  %p196_p5 = scmp.lt.s32.totalorder %s1271_s20, 3 }
   0x9   : > { %p197_p6 = pnand %p964_p3, %p196_p5 }
   0xa   : > { %v1195_v0 = vld [vmem:[%s1714_s1] sm:$0xff] (!%p197_p6)   ;;  %v1305_v1 = vmov (!%p197_p6), 0.0   ;;  %v1196_v2 = vld [vmem:[%s1714_s1 + $0x8] sm:$0xff] (!%p197_p6)   ;;  %s1377_s6 = smul.u32 (!%p197_p6), 25, %s1350_s21  ;;  %vm1306_vm0 = vmmov (!%p197_p6), 0   ;;  %v1197_v3 = vld [vmem:[%s1714_s1 + $0x10] sm:$0xff] (!%p197_p6)  }
   0xb   : > { %200 = sbr.rel (%p197_p6) target bundleno = 365 (0x16d), region = 40  ;;  %1031 = vmatprep.subr.bf16.mxu0 (!%p197_p6), %v1305_v1  ;;  %1093 = vmatprep.subr.bf16.mxu1 (!%p197_p6), %v1305_v1  ;;  %v1198_v4 = vld [vmem:[%s1714_s1 + $0x18] sm:$0xff] (!%p197_p6)   ;;  %v1199_v5 = vld [vmem:[%s1714_s1 + $0x20] ss:$0 sps:$4 sm:$0xff] (!%p197_p6)   ;;  %vm418_vm1 = vcmask (!%p197_p6), 1043456   ;;  %vm378_vm2 = vcmask (!%p197_p6), 588800  }
   0xc   : > { %1032 = vmatpush3.bf16.msra.mxu0 (!%p197_p6), %v1195_v0  ;;  %1098 = vmatpush3.bf16.msra.mxu1 (!%p197_p6), %v1195_v0  ;;  %p232_p7 = scmp.lt.s32.totalorder (!%p197_p6), %s1377_s6, 48  ;;  %v420_v6 = vsel (!%p197_p6), %vm418_vm1, %v1199_v5, 0  ;;  %s224_s20 = sand.u32 (!%p197_p6), 1, %s1263_s18   ;;  %v1457_v20 = vld [vmem:[%s1715_s2] ss:$0 sm:$0xff] (!%p197_p6)  ;;  %vm622_vm3 = vcmask (!%p197_p6), 261120  }
   0xd   : > { %1033 = vmatprep.subr.bf16.mxu0 (!%p197_p6), %v1305_v1  ;;  %1094 = vmatprep.subr.bf16.mxu1 (!%p197_p6), %v1305_v1  ;;  %s1103_s27 = smul.u32 (!%p197_p6), 200, %s224_s20  ;;  %v1462_v22 = vld [vmem:[%s1716_s3] ss:$0 sm:$0xff] (!%p197_p6) }
   0xe   : > { %1041 = vmatprep.mubr.msk.bf16.mxu0 (!%p197_p6), %vm1306_vm0, %v1305_v1  ;;  %1069 = vmatprep.mubr.msk.bf16.mxu1 (!%p197_p6), %vm1306_vm0, %v1305_v1  ;;  %v1469_v28 = vld [vmem:[%s1717_s4] ss:$0 sm:$0xff] (!%p197_p6) }
   0xf   : > { %s1479_s7 = scalar_lea.vmem (!%p197_p6), [#allocation2], %s1103_s27  }
  0x10   : > { %1034 = vmatpush3.bf16.msra.mxu0 (!%p197_p6), %v1196_v2  ;;  %1099 = vmatpush3.bf16.msra.mxu1 (!%p197_p6), %v1196_v2 }
  0x11   : > { %1035 = vmatprep.subr.bf16.mxu0 (!%p197_p6), %v1305_v1  ;;  %1095 = vmatprep.subr.bf16.mxu1 (!%p197_p6), %v1305_v1 }
  0x12   : > { %s233_s9 = scalar_select %p232_p7, %s1377_s6, 48 }
  0x13   : > { %s656_s8 = ssub.s32 (%p1362_p4), 49, %s1377_s6 }
  0x14   : > { %s965_s10 = sshll.u32 %s233_s9, 2  ;;  %1036 = vmatpush3.bf16.msra.mxu0 %v1197_v3  ;;  %1100 = vmatpush3.bf16.msra.mxu1 %v1197_v3  ;;  %s1012_s9 = smul.u32 (%p1362_p4), 200, %s1350_s21 }
  0x15   : > { %s1396_s15 = scalar_lea.vmem %s1713_s0, %s965_s10  ;;  %1037 = vmatprep.subr.bf16.mxu0 %v1305_v1  ;;  %1096 = vmatprep.subr.bf16.mxu1 %v1305_v1  ;;  %p657_p8 = scmp.lt.s32.totalorder (%p1362_p4), %s656_s8, 25 }
  0x16   : > { %v1200_v7 = vld [vmem:[%s1396_s15] sm:$0xff]   ;;  %v1201_v8 = vld [vmem:[%s1396_s15 + $0x38] sm:$0xff]   ;;  %v1202_v9 = vld [vmem:[%s1396_s15 + $0x8] sm:$0xff]   ;;  %s1603_s12 = scalar_lea.vmem (%p1362_p4), %s1718_s5, %s1012_s9  }
  0x17   : > { %v1203_v10 = vld [vmem:[%s1396_s15 + $0x40] sm:$0xff]   ;;  %v1204_v11 = vld [vmem:[%s1396_s15 + $0x10] sm:$0xff]   ;;  %v1205_v12 = vld [vmem:[%s1396_s15 + $0x48] sm:$0xff]  }
  0x18   : > { %1038 = vmatpush3.bf16.msra.mxu0 %v1198_v4  ;;  %1101 = vmatpush3.bf16.msra.mxu1 %v1198_v4  ;;  %v1206_v13 = vld [vmem:[%s1396_s15 + $0x18] sm:$0xff]   ;;  %v1207_v14 = vld [vmem:[%s1396_s15 + $0x50] sm:$0xff]   ;;  %v1208_v15 = vld [vmem:[%s1396_s15 + $0x20] sm:$0xff]  }
  0x19   : > { %1039 = vmatprep.subr.bf16.mxu0 %v1305_v1  ;;  %1097 = vmatprep.subr.bf16.mxu1 %v1305_v1  ;;  %v1209_v16 = vld [vmem:[%s1396_s15 + $0x58] sm:$0xff]   ;;  %v1210_v17 = vld [vmem:[%s1396_s15 + $0x28] sm:$0xff]   ;;  %v1211_v18 = vld [vmem:[%s1396_s15 + $0x60] ss:$0 sps:$4 sm:$0xff]  }
  0x1a   : > { %v1212_v19 = vld [vmem:[%s1396_s15 + $0x30] sm:$0xff]  }
  0x1c   : > { %1040 = vmatpush3.bf16.msra.mxu0 %v420_v6  ;;  %1102 = vmatpush3.bf16.msra.mxu1 %v420_v6 }
  0x1f   : > { %1042 = vmatmul.mubr.msk.bf16.vlgmr.msra.gmra.mrb[0].mxu0 %vm378_vm2, %v1200_v7  ;;  %1070 = vmatmul.mubr.msk.bf16.vlgmr.msra.gmra.mrb[0].mxu1 %vm378_vm2, %v1201_v8 }
  0x20   : > { %1045 = vmatprep.mubr.msk.bf16.mxu0 %vm1306_vm0, %v1305_v1  ;;  %1073 = vmatprep.mubr.msk.bf16.mxu1 %vm1306_vm0, %v1305_v1 }
  0x27   : > { %1046 = vmatmul.mubr.msk.bf16.gmra.mrb[4].mxu0 %vm378_vm2, %v1202_v9  ;;  %1074 = vmatmul.mubr.msk.bf16.gmra.mrb[4].mxu1 %vm378_vm2, %v1203_v10 }
  0x28   : > { %1049 = vmatprep.mubr.msk.bf16.mxu0 %vm1306_vm0, %v1305_v1  ;;  %1077 = vmatprep.mubr.msk.bf16.mxu1 %vm1306_vm0, %v1305_v1 }
  0x2f   : > { %1050 = vmatmul.mubr.msk.bf16.gmra.mrb[8].mxu0 %vm378_vm2, %v1204_v11  ;;  %1078 = vmatmul.mubr.msk.bf16.gmra.mrb[8].mxu1 %vm378_vm2, %v1205_v12 }
  0x30   : > { %1053 = vmatprep.mubr.msk.bf16.mxu0 %vm1306_vm0, %v1305_v1  ;;  %1081 = vmatprep.mubr.msk.bf16.mxu1 %vm1306_vm0, %v1305_v1 }
  0x37   : > { %1054 = vmatmul.mubr.msk.bf16.gmra.mrb[12].mxu0 %vm378_vm2, %v1206_v13  ;;  %1082 = vmatmul.mubr.msk.bf16.gmra.mrb[12].mxu1 %vm378_vm2, %v1207_v14 }
  0x38   : > { %1057 = vmatprep.mubr.msk.bf16.mxu0 %vm1306_vm0, %v1305_v1  ;;  %1085 = vmatprep.mubr.msk.bf16.mxu1 %vm1306_vm0, %v1305_v1 }
  0x3f   : > { %1058 = vmatmul.mubr.msk.bf16.gmra.mrb[16].mxu0 %vm378_vm2, %v1208_v15  ;;  %1086 = vmatmul.mubr.msk.bf16.gmra.mrb[16].mxu1 %vm378_vm2, %v1209_v16 }
  0x40   : > { %1061 = vmatprep.mubr.msk.bf16.mxu0 %vm1306_vm0, %v1305_v1  ;;  %1089 = vmatprep.mubr.msk.bf16.mxu1 %vm1306_vm0, %v1305_v1 }
  0x47   : > { %1062 = vmatmul.mubr.msk.bf16.gmra.mrb[20].mxu0 %vm378_vm2, %v1210_v17  ;;  %1090 = vmatmul.mubr.msk.bf16.gmra.mrb[20].mxu1 %vm378_vm2, %v1211_v18 }
  0x48   : > { %1065 = vmatprep.mubr.msk.bf16.mxu0 %vm1306_vm0, %v1305_v1 }
  0x4f   : > { %1066 = vmatmul.mubr.msk.bf16.gmra.mrb[24].mxu0 %vm378_vm2, %v1212_v19 }
  0xf2   : > { %v456_v21 = vpop.f32.mrb[0].mxu0  ;;  %v512_v23 = vpop.f32.mrb[0].mxu1 }
  0xf3   : > { %v457_v24 = vadd.f32 %v1457_v20, %v456_v21  ;;  %v1043_v25 = vpop.f32.mrb[1].mxu0  ;;  %v513_v26 = vadd.f32 %v1457_v20, %v512_v23  ;;  %v1071_v27 = vpop.f32.mrb[1].mxu1 }
  0xf4   : > { %v459_v29 = vpop.f32.mrb[2].mxu0  ;;  %v515_v30 = vpop.f32.mrb[2].mxu1 }
  0xf5   : > { %v565_v31 = vmul.f32 %v1462_v22, %v457_v24  ;;  %v460_v32 = vadd.f32 %v1457_v20, %v459_v29  ;;  %v1044_v33 = vpop.f32.mrb[3].mxu0  ;;  %v579_v34 = vmul.f32 %v1462_v22, %v513_v26  ;;  %v516_v35 = vadd.f32 %v1457_v20, %v515_v30  ;;  %v1072_v36 = vpop.f32.mrb[3].mxu1 }
  0xf7   : > { %v597_v37 = vadd.f32 %v1469_v28, %v565_v31  ;;  %v566_v38 = vmul.f32 %v1462_v22, %v460_v32  ;;  %v611_v39 = vadd.f32 %v1469_v28, %v579_v34  ;;  %v580_v40 = vmul.f32 %v1462_v22, %v516_v35 }
  0xf9   : > { %623 = vst.msk [vmem:[%s1479_s7] sm:$0xff] %vm622_vm3, %v597_v37  ;;  %v598_v41 = vadd.f32 %v1469_v28, %v566_v38  ;;  %637 = vst.msk [vmem:[%s1479_s7 + $0x70] sm:$0xff] %vm622_vm3, %v611_v39  ;;  %v612_v42 = vadd.f32 %v1469_v28, %v580_v40 }
  0xfa   : > { %v464_v43 = vpop.f32.mrb[4].mxu0  ;;  %v520_v44 = vpop.f32.mrb[4].mxu1 }
  0xfb   : > { %624 = vst.msk [vmem:[%s1479_s7 + $0x8] sm:$0xff] %vm622_vm3, %v598_v41  ;;  %v465_v45 = vadd.f32 %v1457_v20, %v464_v43  ;;  %v1047_v46 = vpop.f32.mrb[5].mxu0  ;;  %638 = vst.msk [vmem:[%s1479_s7 + $0x78] sm:$0xff] %vm622_vm3, %v612_v42  ;;  %v521_v47 = vadd.f32 %v1457_v20, %v520_v44  ;;  %v1075_v48 = vpop.f32.mrb[5].mxu1 }
  0xfc   : > { %v467_v49 = vpop.f32.mrb[6].mxu0  ;;  %v523_v50 = vpop.f32.mrb[6].mxu1 }
  0xfd   : > { %v567_v51 = vmul.f32 %v1462_v22, %v465_v45  ;;  %v468_v52 = vadd.f32 %v1457_v20, %v467_v49  ;;  %v1048_v53 = vpop.f32.mrb[7].mxu0  ;;  %v581_v54 = vmul.f32 %v1462_v22, %v521_v47  ;;  %v524_v55 = vadd.f32 %v1457_v20, %v523_v50  ;;  %v1076_v56 = vpop.f32.mrb[7].mxu1 }
  0xff   : > { %v599_v57 = vadd.f32 %v1469_v28, %v567_v51  ;;  %v568_v58 = vmul.f32 %v1462_v22, %v468_v52  ;;  %v613_v59 = vadd.f32 %v1469_v28, %v581_v54  ;;  %v582_v60 = vmul.f32 %v1462_v22, %v524_v55 }
 0x101   : > { %625 = vst.msk [vmem:[%s1479_s7 + $0x10] sm:$0xff] %vm622_vm3, %v599_v57  ;;  %v600_v61 = vadd.f32 %v1469_v28, %v568_v58  ;;  %639 = vst.msk [vmem:[%s1479_s7 + $0x80] sm:$0xff] %vm622_vm3, %v613_v59  ;;  %v614_v62 = vadd.f32 %v1469_v28, %v582_v60 }
 0x102   : > { %v472_v63 = vpop.f32.mrb[8].mxu0  ;;  %v528_v0 = vpop.f32.mrb[8].mxu1 }
 0x103   : > { %626 = vst.msk [vmem:[%s1479_s7 + $0x18] sm:$0xff] %vm622_vm3, %v600_v61  ;;  %v473_v1 = vadd.f32 %v1457_v20, %v472_v63  ;;  %v1051_v2 = vpop.f32.mrb[9].mxu0  ;;  %640 = vst.msk [vmem:[%s1479_s7 + $0x88] sm:$0xff] %vm622_vm3, %v614_v62  ;;  %v529_v3 = vadd.f32 %v1457_v20, %v528_v0  ;;  %v1079_v4 = vpop.f32.mrb[9].mxu1 }
 0x104   : > { %v475_v5 = vpop.f32.mrb[10].mxu0  ;;  %v531_v6 = vpop.f32.mrb[10].mxu1 }
 0x105   : > { %v569_v7 = vmul.f32 %v1462_v22, %v473_v1  ;;  %v476_v8 = vadd.f32 %v1457_v20, %v475_v5  ;;  %v1052_v9 = vpop.f32.mrb[11].mxu0  ;;  %v583_v10 = vmul.f32 %v1462_v22, %v529_v3  ;;  %v532_v11 = vadd.f32 %v1457_v20, %v531_v6  ;;  %v1080_v12 = vpop.f32.mrb[11].mxu1 }
 0x107   : > { %v601_v13 = vadd.f32 %v1469_v28, %v569_v7  ;;  %v570_v14 = vmul.f32 %v1462_v22, %v476_v8  ;;  %v615_v15 = vadd.f32 %v1469_v28, %v583_v10  ;;  %v584_v16 = vmul.f32 %v1462_v22, %v532_v11 }
 0x109   : > { %627 = vst.msk [vmem:[%s1479_s7 + $0x20] sm:$0xff] %vm622_vm3, %v601_v13  ;;  %v602_v17 = vadd.f32 %v1469_v28, %v570_v14  ;;  %641 = vst.msk [vmem:[%s1479_s7 + $0x90] sm:$0xff] %vm622_vm3, %v615_v15  ;;  %v616_v18 = vadd.f32 %v1469_v28, %v584_v16 }
 0x10a   : > { %v480_v19 = vpop.f32.mrb[12].mxu0  ;;  %v536_v21 = vpop.f32.mrb[12].mxu1 }
 0x10b   : > { %628 = vst.msk [vmem:[%s1479_s7 + $0x28] sm:$0xff] %vm622_vm3, %v602_v17  ;;  %v481_v23 = vadd.f32 %v1457_v20, %v480_v19  ;;  %v1055_v24 = vpop.f32.mrb[13].mxu0  ;;  %642 = vst.msk [vmem:[%s1479_s7 + $0x98] sm:$0xff] %vm622_vm3, %v616_v18  ;;  %v537_v25 = vadd.f32 %v1457_v20, %v536_v21  ;;  %v1083_v26 = vpop.f32.mrb[13].mxu1 }
 0x10c   : > { %v483_v27 = vpop.f32.mrb[14].mxu0  ;;  %v539_v29 = vpop.f32.mrb[14].mxu1 }
 0x10d   : > { %v571_v30 = vmul.f32 %v1462_v22, %v481_v23  ;;  %v484_v31 = vadd.f32 %v1457_v20, %v483_v27  ;;  %v1056_v32 = vpop.f32.mrb[15].mxu0  ;;  %v585_v33 = vmul.f32 %v1462_v22, %v537_v25  ;;  %v540_v34 = vadd.f32 %v1457_v20, %v539_v29  ;;  %v1084_v35 = vpop.f32.mrb[15].mxu1 }
 0x10f   : > { %v603_v36 = vadd.f32 %v1469_v28, %v571_v30  ;;  %v572_v37 = vmul.f32 %v1462_v22, %v484_v31  ;;  %v617_v38 = vadd.f32 %v1469_v28, %v585_v33  ;;  %v586_v39 = vmul.f32 %v1462_v22, %v540_v34 }
 0x111   : > { %629 = vst.msk [vmem:[%s1479_s7 + $0x30] sm:$0xff] %vm622_vm3, %v603_v36  ;;  %v604_v40 = vadd.f32 %v1469_v28, %v572_v37  ;;  %643 = vst.msk [vmem:[%s1479_s7 + $0xa0] sm:$0xff] %vm622_vm3, %v617_v38  ;;  %v618_v41 = vadd.f32 %v1469_v28, %v586_v39 }
 0x112   : > { %v488_v42 = vpop.f32.mrb[16].mxu0  ;;  %v544_v43 = vpop.f32.mrb[16].mxu1 }
 0x113   : > { %630 = vst.msk [vmem:[%s1479_s7 + $0x38] sm:$0xff] %vm622_vm3, %v604_v40  ;;  %v489_v44 = vadd.f32 %v1457_v20, %v488_v42  ;;  %v1059_v45 = vpop.f32.mrb[17].mxu0  ;;  %644 = vst.msk [vmem:[%s1479_s7 + $0xa8] sm:$0xff] %vm622_vm3, %v618_v41  ;;  %v545_v46 = vadd.f32 %v1457_v20, %v544_v43  ;;  %v1087_v47 = vpop.f32.mrb[17].mxu1 }
 0x114   : > { %v491_v48 = vpop.f32.mrb[18].mxu0  ;;  %v547_v49 = vpop.f32.mrb[18].mxu1 }
 0x115   : > { %v573_v50 = vmul.f32 %v1462_v22, %v489_v44  ;;  %v492_v51 = vadd.f32 %v1457_v20, %v491_v48  ;;  %v1060_v52 = vpop.f32.mrb[19].mxu0  ;;  %v587_v53 = vmul.f32 %v1462_v22, %v545_v46  ;;  %v548_v54 = vadd.f32 %v1457_v20, %v547_v49  ;;  %v1088_v55 = vpop.f32.mrb[19].mxu1 }
 0x117   : > { %v605_v56 = vadd.f32 %v1469_v28, %v573_v50  ;;  %v574_v57 = vmul.f32 %v1462_v22, %v492_v51  ;;  %v619_v58 = vadd.f32 %v1469_v28, %v587_v53  ;;  %v588_v59 = vmul.f32 %v1462_v22, %v548_v54 }
 0x119   : > { %631 = vst.msk [vmem:[%s1479_s7 + $0x40] sm:$0xff] %vm622_vm3, %v605_v56  ;;  %v606_v60 = vadd.f32 %v1469_v28, %v574_v57  ;;  %645 = vst.msk [vmem:[%s1479_s7 + $0xb0] sm:$0xff] %vm622_vm3, %v619_v58  ;;  %v620_v61 = vadd.f32 %v1469_v28, %v588_v59 }
 0x11a   : > { %v496_v62 = vpop.f32.mrb[20].mxu0  ;;  %v552_v63 = vpop.f32.mrb[20].mxu1 }
 0x11b   : > { %632 = vst.msk [vmem:[%s1479_s7 + $0x48] sm:$0xff] %vm622_vm3, %v606_v60  ;;  %v497_v0 = vadd.f32 %v1457_v20, %v496_v62  ;;  %v1063_v1 = vpop.f32.mrb[21].mxu0  ;;  %646 = vst.msk [vmem:[%s1479_s7 + $0xb8] sm:$0xff] %vm622_vm3, %v620_v61  ;;  %v553_v2 = vadd.f32 %v1457_v20, %v552_v63  ;;  %v1091_v3 = vpop.f32.mrb[21].mxu1 }
 0x11c   : > { %v499_v4 = vpop.f32.mrb[22].mxu0  ;;  %v555_v5 = vpop.f32.mrb[22].mxu1 }
 0x11d   : > { %v575_v6 = vmul.f32 %v1462_v22, %v497_v0  ;;  %v500_v7 = vadd.f32 %v1457_v20, %v499_v4  ;;  %v1064_v8 = vpop.f32.mrb[23].mxu0  ;;  %v589_v9 = vmul.f32 %v1462_v22, %v553_v2  ;;  %v1092_v10 = vpop.f32.mrb[23].mxu1 }
 0x11f   : > { %v607_v11 = vadd.f32 %v1469_v28, %v575_v6  ;;  %v576_v12 = vmul.f32 %v1462_v22, %v500_v7  ;;  %v621_v13 = vadd.f32 %v1469_v28, %v589_v9 }
 0x121   : > { %633 = vst.msk [vmem:[%s1479_s7 + $0x50] sm:$0xff] %vm622_vm3, %v607_v11  ;;  %v608_v14 = vadd.f32 %v1469_v28, %v576_v12  ;;  %647 = vst.msk [vmem:[%s1479_s7 + $0xc0] sm:$0xff] %vm622_vm3, %v621_v13 }
 0x122   : > { %v504_v15 = vpop.f32.mrb[24].mxu0 }
 0x123   : > { %634 = vst.msk [vmem:[%s1479_s7 + $0x58] sm:$0xff] %vm622_vm3, %v608_v14  ;;  %v505_v16 = vadd.f32 %v1457_v20, %v504_v15  ;;  %v1067_v17 = vpop.f32.mrb[25].mxu0 }
 0x124   : > { %v507_v18 = vpop.f32.mrb[26].mxu0 }
 0x125   : > { %v577_v19 = vmul.f32 %v1462_v22, %v505_v16  ;;  %v508_v21 = vadd.f32 %v1457_v20, %v507_v18  ;;  %v1068_v23 = vpop.f32.mrb[27].mxu0  ;;  %654 = sbr.rel (!%p1362_p4) target bundleno = 365 (0x16d), region = 44 }
 0x127   : > { %v609_v24 = vadd.f32 %v1469_v28, %v577_v19  ;;  %v578_v25 = vmul.f32 %v1462_v22, %v508_v21 }
 0x129   : > { %635 = vst.msk [vmem:[%s1479_s7 + $0x60] sm:$0xff] %vm622_vm3, %v609_v24  ;;  %v610_v26 = vadd.f32 %v1469_v28, %v578_v25 }
 0x12b   : > { %636 = vst.msk [vmem:[%s1479_s7 + $0x68] sm:$0xff] %vm622_vm3, %v610_v26 }
 0x12c   : > { %s1729_s8 = smov (!%p657_p8, %s656_s8), 25 }
 0x12d   : > { %s1000_s13 = sshll.u32 %s1729_s8, 7 }
 0x12e   : > { %p1003_p9 = scmp.eq.s32.totalorder %s1000_s13, 0 }
 0x12f   : > { %1213 = sdivrem.u32 (!%p1003_p9), %s1729_s8, 25 }
 0x130   : > { %665 = sbr.rel (%p1003_p9) target bundleno = 365 (0x16d), region = 48 }
 0x138   : > { %s1609_s26 = spop.drf %1213 }
 0x139   : > { %p1004_p10 = scmp.le.s32.totalorder %s1609_s26, 0 }
 0x13a   : > { %s1720_s21 = smov (!%p1004_p10), %s1603_s12  ;;  %s1721_s6 = smov (!%p1004_p10), %s1479_s7 }
 0x13b   : > { %917 = sbr.rel (%p1004_p10) target bundleno = 336 (0x150), region = 124  ;;  %s1618_s14 = smov (!%p1004_p10), 0  }
 0x13c   : > { %s1620_s15 = smov (!%p1004_p10), 0  }
 0x142 LB: >> { %v777_v20 = vld [vmem:[%s1279_s6] sm:$0xff]  ;;  %v779_v22 = vld [vmem:[%s1279_s6 + $0x8] sm:$0xff]  ;;  %v781_v28 = vld [vmem:[%s1279_s6 + $0x10] sm:$0xff]  ;;  %s827_s16 = sadd.s32 1, %s1283_s14  ;;  %s771_s15 = sadd.s32 1, %s1287_s15   ;;  %s1287_s15 = sphi %s1620_s15, %s771_s15   ;;  %s1283_s14 = sphi %s1618_s14, %s1724_s14   ;;  %s1279_s6 = sphi %s1721_s6, %s1723_s6   ;;  %s1275_s21 = sphi %s1720_s21, %s1722_s21  }
 0x143   : >> { %778 = vst [vmem:[%s1275_s21] sm:$0xff] %v777_v20  ;;  %780 = vst [vmem:[%s1275_s21 + $0x8] sm:$0xff] %v779_v22  ;;  %v783_v27 = vld [vmem:[%s1279_s6 + $0x18] sm:$0xff]  ;;  %v785_v29 = vld [vmem:[%s1279_s6 + $0x20] sm:$0xff]  ;;  %p828_p11 = scmp.ge.s32.totalorder %s827_s16, %s1609_s26  ;;  %p770_p12 = scmp.ge.s32.totalorder %s771_s15, %s1609_s26 }
 0x144   : >> { %782 = vst [vmem:[%s1275_s21 + $0x10] sm:$0xff] %v781_v28  ;;  %v787_v30 = vld [vmem:[%s1279_s6 + $0x28] sm:$0xff]  ;;  %784 = vst [vmem:[%s1275_s21 + $0x18] sm:$0xff] %v783_v27  ;;  %v789_v31 = vld [vmem:[%s1279_s6 + $0x30] sm:$0xff] }
 0x145   : >> { %786 = vst [vmem:[%s1275_s21 + $0x20] sm:$0xff] %v785_v29  ;;  %788 = vst [vmem:[%s1275_s21 + $0x28] sm:$0xff] %v787_v30  ;;  %v791_v32 = vld [vmem:[%s1279_s6 + $0x38] sm:$0xff]  ;;  %v793_v33 = vld [vmem:[%s1279_s6 + $0x40] sm:$0xff]  ;;  %s1731_s16 = smov (%p828_p11, %s827_s16), 0 }
 0x146   : >> { %790 = vst [vmem:[%s1275_s21 + $0x30] sm:$0xff] %v789_v31  ;;  %792 = vst [vmem:[%s1275_s21 + $0x38] sm:$0xff] %v791_v32  ;;  %v795_v34 = vld [vmem:[%s1279_s6 + $0x48] sm:$0xff]  ;;  %v797_v35 = vld [vmem:[%s1279_s6 + $0x50] sm:$0xff]  ;;  %s830_s17 = smul.u32 200, %s1731_s16  ;;  %s1724_s14 = smov %s1731_s16 }
 0x147   : >> { %794 = vst [vmem:[%s1275_s21 + $0x40] sm:$0xff] %v793_v33  ;;  %v799_v36 = vld [vmem:[%s1279_s6 + $0x58] sm:$0xff]  ;;  %796 = vst [vmem:[%s1275_s21 + $0x48] sm:$0xff] %v795_v34  ;;  %v801_v37 = vld [vmem:[%s1279_s6 + $0x60] sm:$0xff] }
 0x148   : >> { %798 = vst [vmem:[%s1275_s21 + $0x50] sm:$0xff] %v797_v35  ;;  %800 = vst [vmem:[%s1275_s21 + $0x58] sm:$0xff] %v799_v36  ;;  %v803_v38 = vld [vmem:[%s1279_s6 + $0x68] sm:$0xff]  ;;  %v805_v39 = vld [vmem:[%s1279_s6 + $0x70] sm:$0xff]  ;;  %s832_s20 = scalar_lea.vmem %s1479_s7, %s830_s17 [#allocation2]   ;;  %s833_s23 = scalar_lea.vmem %s1603_s12, %s830_s17  }
 0x149   : >> { %802 = vst [vmem:[%s1275_s21 + $0x60] sm:$0xff] %v801_v37  ;;  %804 = vst [vmem:[%s1275_s21 + $0x68] sm:$0xff] %v803_v38  ;;  %v807_v40 = vld [vmem:[%s1279_s6 + $0x78] sm:$0xff]  ;;  %v809_v41 = vld [vmem:[%s1279_s6 + $0x80] sm:$0xff]  ;;  %773 = sbr.rel (!%p770_p12) target bundleno = 322 (0x142), region = 130 }
 0x14a   : >> { %806 = vst [vmem:[%s1275_s21 + $0x70] sm:$0xff] %v805_v39  ;;  %v811_v42 = vld [vmem:[%s1279_s6 + $0x88] sm:$0xff]  ;;  %808 = vst [vmem:[%s1275_s21 + $0x78] sm:$0xff] %v807_v40  ;;  %v813_v43 = vld [vmem:[%s1279_s6 + $0x90] sm:$0xff] }
 0x14b   : >> { %810 = vst [vmem:[%s1275_s21 + $0x80] sm:$0xff] %v809_v41  ;;  %812 = vst [vmem:[%s1275_s21 + $0x88] sm:$0xff] %v811_v42  ;;  %v815_v44 = vld [vmem:[%s1279_s6 + $0x98] sm:$0xff]  ;;  %v817_v45 = vld [vmem:[%s1279_s6 + $0xa0] sm:$0xff] }
 0x14c   : >> { %814 = vst [vmem:[%s1275_s21 + $0x90] sm:$0xff] %v813_v43  ;;  %816 = vst [vmem:[%s1275_s21 + $0x98] sm:$0xff] %v815_v44  ;;  %v819_v46 = vld [vmem:[%s1279_s6 + $0xa8] sm:$0xff]  ;;  %v821_v47 = vld [vmem:[%s1279_s6 + $0xb0] sm:$0xff] }
 0x14d   : >> { %818 = vst [vmem:[%s1275_s21 + $0xa0] sm:$0xff] %v817_v45  ;;  %v823_v48 = vld [vmem:[%s1279_s6 + $0xb8] sm:$0xff]  ;;  %820 = vst [vmem:[%s1275_s21 + $0xa8] sm:$0xff] %v819_v46  ;;  %v825_v49 = vld [vmem:[%s1279_s6 + $0xc0] sm:$0xff]  ;;  %s1723_s6 = smov %s832_s20 }
 0x14e   : >> { %822 = vst [vmem:[%s1275_s21 + $0xb0] sm:$0xff] %v821_v47  ;;  %824 = vst [vmem:[%s1275_s21 + $0xb8] sm:$0xff] %v823_v48 }
 0x14f   : >> { %826 = vst [vmem:[%s1275_s21 + $0xc0] sm:$0xff] %v825_v49  ;;  %s1722_s21 = smov %s833_s23 }
 0x150 PF: > { %1215 = sdivrem.u32 %s1729_s8, 25 }
 0x151   : > { %s1005_s24 = smul.u32 200, %s1609_s26 }
 0x153   : > { %s838_s27 = scalar_lea.vmem %s1479_s7, %s1005_s24 [#allocation2]   ;;  %s840_s28 = scalar_lea.vmem %s1603_s12, %s1005_s24  }
 0x159   : > { %s1216_s29 = spop.drf %1215 }
 0x15a   : > { %p1007_p13 = scmp.le.s32.totalorder %s1216_s29, 0 }
 0x15b   : > { %s1289_s18 = smov (!%p1007_p13), %s840_s28   ;;  %s1293_s30 = smov (!%p1007_p13), %s838_s27  }
 0x15c   : > { %931 = sbr.rel (%p1007_p13) target bundleno = 365 (0x16d), region = 135  ;;  %s1297_s9 = smov (!%p1007_p13), 0  }
 0x15d   : > { %s1301_s10 = smov (!%p1007_p13), 0  }
 0x163 LB: >> { %v850_v50 = vld [vmem:[%s1295_s30] sm:$0xff]  ;;  %s852_s11 = sadd.s32 1, %s1299_s9  ;;  %s844_s10 = sadd.s32 1, %s1303_s10   ;;  %s1303_s10 = sphi %s1301_s10, %s844_s10   ;;  %s1299_s9 = sphi %s1297_s9, %s1298_s9   ;;  %s1295_s30 = sphi %s1293_s30, %s857_s30   ;;  %s1291_s18 = sphi %s1289_s18, %s858_s18  }
 0x164   : >> { %851 = vst [vmem:[%s1291_s18] sm:$0xff] %v850_v50  ;;  %p853_p0 = scmp.ge.s32.totalorder %s852_s11, %s1216_s29  ;;  %p843_p1 = scmp.ge.s32.totalorder %s844_s10, %s1216_s29 }
 0x166   : >> { %s1733_s11 = smov (%p853_p0, %s852_s11), 0  ;;  %846 = sbr.rel (!%p843_p1) target bundleno = 355 (0x163), region = 141 }
 0x167   : >> { %s1008_s7 = sshll.u32 %s1733_s11, 3  ;;  %s1298_s9 = smov %s1733_s11  }
 0x168   : >> { %s857_s30 = scalar_lea.vmem %s838_s27, %s1008_s7 [#allocation2]   ;;  %s858_s18 = scalar_lea.vmem %s840_s28, %s1008_s7  }
 0x16d PF: > { %p12_p2 = scmp.ge.s32.totalorder %s1352_s22, 4   ;;  %s1725_s18 = smov %s1267_s19 }
 0x16e   : > { %s1726_s19 = smov %s1360_s25  ;;  %s1727_s20 = smov %s1352_s22 }
 0x16f   :  { %14 = sbr.rel (!%p12_p2) target bundleno = 2 (0x2), region = 152 }

// kernel: _lambda_.18
= control target key start
LH: loop header
LB: loop body
LE: loop exit
PB: predicated region body
PF: predicated region fallthrough
CT: control target
= control target key end

     0   :  { %s3583_s21 = smov 0   ;;  %s3585_s22 = smov 0   ;;  %s4525_s0 = inlined_call_operand.vmem [shape: f32[2,81,8], index: 0, kind: input, shape index: {}, may-alias: {0,1}]   ;;  %s4526_s1 = inlined_call_operand.vmem [shape: f32[2,81,8], index: 1, kind: input, shape index: {}, may-alias: {0,1}]   ;;  %s4527_s2 = inlined_call_operand.vmem [shape: f32[2,4,81,32], index: 2, kind: input, shape index: {}]   ;;  %s4528_s3 = inlined_call_operand.vmem [shape: f32[9,8,32], index: 3, kind: input, shape index: {}]   ;;  %s4529_s4 = inlined_call_operand.vmem [shape: f32[81,1], index: 4, kind: input, shape index: {}]   ;;  %s4530_s5 = inlined_call_operand.vmem [shape: f32[2,4,81,8], index: 5, kind: output, shape index: {0}]   ;;  %s4531_s6 = inlined_call_operand.vmem [shape: f32[2,81,8], index: 6, kind: output, shape index: {1}]  }
   0x1   :  { %4532 = sst [smem:[#allocation3_spill]] %s4525_s0  ;;  %s3587_s23 = smov 0  }
   0x2   :  { %s3589_s24 = smov 0   ;;  %s3591_s25 = smov 0  }
   0x3 LB: > { %s26_s26 = sadd.s32 1, %s3530_s23  ;;  %s29_s27 = sadd.s32 1, %s3534_s24  ;;  %s3538_s25 = sphi %s3591_s25, %s17_s25   ;;  %s3534_s24 = sphi %s3589_s24, %s4537_s24   ;;  %s3530_s23 = sphi %s3587_s23, %s4536_s23   ;;  %s3526_s22 = sphi %s3585_s22, %s4535_s22   ;;  %s3522_s21 = sphi %s3583_s21, %s4534_s21  }
   0x4   : > { %p27_p0 = scmp.ge.s32.totalorder %s26_s26, 4  ;;  %p2686_p1 = scmp.ge.s32.totalorder %s3538_s25, 1 }
   0x5   : > { %p255_p2 = scmp.lt.s32.totalorder %s3538_s25, 9 }
   0x6   : > { %s4539_s26 = smov (%p27_p0, %s26_s26), 0  ;;  %s4541_s27 = smov (!%p27_p0, %s29_s27), %s3534_s24 }
   0x7   : > { %p256_p3 = pnand %p2686_p1, %p255_p2  ;;  %p31_p4 = scmp.ge.s32.totalorder %s4541_s27, 2 }
   0x8   : > { %p308_p5 = scmp.lt.s32.totalorder (!%p256_p3), %s3526_s22, 1  ;;  %p320_p6 = scmp.lt.s32.totalorder (!%p256_p3), %s3522_s21, 3 }
   0x9   : > { %s4543_s27 = smov (%p31_p4, %s4541_s27), 0  ;;  %259 = sbr.rel (%p256_p3) target bundleno = 966 (0x3c6), region = 40 }
   0xa   : > { %s4533_s0 = sld [smem:[#allocation3_spill]] (!%p256_p3)  ;;  %p2692_p7 = scmp.ne.s32.totalorder (!%p256_p3), %s3522_s21, 0 }
  0x10   : > { %s4545_s22 = smov (!%p308_p5, %s3526_s22), 1  ;;  %vm345_vm0 = vcmask (!%p2692_p7), 64512   ;;  %vm358_vm1 = vcmask (!%p2692_p7), 61440   ;;  %v3540_v3 = vmov (!%p2692_p7), 0.0   ;;  %vm381_vm2 = vcmask (!%p2692_p7), 57344  }
  0x11   : > { %s321_s28 = scalar_select %p320_p6, %s3522_s21, 3 }
  0x12   : > { %s3403_s29 = smul.u32 88, %s4545_s22  ;;  %347 = vst.msk [vmem:[#allocation2 + $0x8] sm:$0xff] (!%p2692_p7), %vm345_vm0, %v3540_v3  ;;  %346 = vst.msk [vmem:[#allocation2] sm:$0xff] (!%p2692_p7), %vm345_vm0, %v3540_v3 }
  0x13   : > { %s3404_s30 = smul.u32 11, %s321_s28  ;;  %348 = vst.msk [vmem:[#allocation2 + $0x10] sm:$0xff] (!%p2692_p7), %vm345_vm0, %v3540_v3  ;;  %349 = vst.msk [vmem:[#allocation2 + $0x18] sm:$0xff] (!%p2692_p7), %vm345_vm0, %v3540_v3 }
  0x14   : > { %s3620_s9 = scalar_lea.vmem %s4533_s0, %s3403_s29  ;;  %s3625_s12 = scalar_lea.vmem %s4526_s1, %s3403_s29  ;;  %350 = vst.msk [vmem:[#allocation2 + $0x20] sm:$0xff] (!%p2692_p7), %vm345_vm0, %v3540_v3  ;;  %351 = vst.msk [vmem:[#allocation2 + $0x28] sm:$0xff] (!%p2692_p7), %vm345_vm0, %v3540_v3 }
  0x15   : > { %s3405_s13 = smul.u32 44, %s4545_s22  ;;  %s3630_s16 = scalar_lea.vmem %s4531_s6, %s3403_s29  ;;  %v360_v0 = vld [vmem:[%s3620_s9] sm:$0xff] (!%p2692_p7)  ;;  %v361_v1 = vld [vmem:[%s3620_s9 + $0x8] sm:$0xff] (!%p2692_p7)  ;;  %v362_v2 = vld [vmem:[%s3620_s9 + $0x10] sm:$0xff] (!%p2692_p7)  ;;  %352 = vst.msk [vmem:[#allocation2 + $0x30] sm:$0xff] (!%p2692_p7), %vm345_vm0, %v3540_v3 }
  0x16   : > { %344 = sbr.rel (%p2692_p7) target bundleno = 37 (0x25), region = 44  ;;  %353 = vst.msk [vmem:[#allocation2 + $0x38] sm:$0xff] (!%p2692_p7), %vm345_vm0, %v3540_v3  ;;  %354 = vst.msk [vmem:[#allocation2 + $0x40] sm:$0xff] (!%p2692_p7), %vm345_vm0, %v3540_v3  ;;  %v363_v4 = vld [vmem:[%s3620_s9 + $0x18] sm:$0xff] (!%p2692_p7)  ;;  %v364_v5 = vld [vmem:[%s3620_s9 + $0x20] sm:$0xff] (!%p2692_p7) }
  0x17   : > { %s324_s17 = sadd.s32 %s3405_s13, %s3404_s30  ;;  %355 = vst.msk [vmem:[#allocation2 + $0x48] sm:$0xff] (!%p2692_p7), %vm345_vm0, %v3540_v3  ;;  %356 = vst.msk [vmem:[#allocation2 + $0x50] sm:$0xff] (!%p2692_p7), %vm345_vm0, %v3540_v3  ;;  %v365_v6 = vld [vmem:[%s3620_s9 + $0x28] sm:$0xff] (!%p2692_p7)  ;;  %v366_v7 = vld [vmem:[%s3620_s9 + $0x30] sm:$0xff] (!%p2692_p7) }
  0x18   : > { %s2689_s18 = sshll.u32 %s324_s17, 3  ;;  %357 = vst.msk [vmem:[#allocation2 + $0x58] sm:$0xff] (!%p2692_p7), %vm345_vm0, %v3540_v3  ;;  %371 = vst.msk [vmem:[#allocation2 + $0xa] sm:$0xff] (!%p2692_p7), %vm345_vm0, %v360_v0  ;;  %v367_v8 = vld [vmem:[%s3620_s9 + $0x38] sm:$0xff] (!%p2692_p7)  ;;  %v368_v9 = vld [vmem:[%s3620_s9 + $0x40] sm:$0xff] (!%p2692_p7) }
  0x19   : > { %s3635_s28 = scalar_lea.vmem %s4527_s2, %s2689_s18  ;;  %s3640_s0 = scalar_lea.vmem %s4530_s5, %s2689_s18  ;;  %359 = vst.msk [vmem:[#allocation2 + $0x60] sm:$0x1f] (!%p2692_p7), %vm358_vm1, %v3540_v3  ;;  %v369_v10 = vld [vmem:[%s3620_s9 + $0x48] sm:$0xff] (!%p2692_p7)  ;;  %v370_v11 = vld [vmem:[%s3620_s9 + $0x50] sm:$0x1] (!%p2692_p7)  ;;  %v383_v12 = vld [vmem:[%s3625_s12] sm:$0xff] (!%p2692_p7) }
  0x1a   : > { %372 = vst.msk [vmem:[#allocation2 + $0x12] sm:$0xff] (!%p2692_p7), %vm345_vm0, %v361_v1  ;;  %373 = vst.msk [vmem:[#allocation2 + $0x1a] sm:$0xff] (!%p2692_p7), %vm345_vm0, %v362_v2  ;;  %v384_v13 = vld [vmem:[%s3625_s12 + $0x8] sm:$0xff] (!%p2692_p7)  ;;  %v385_v14 = vld [vmem:[%s3625_s12 + $0x10] sm:$0xff] (!%p2692_p7) }
  0x1b   : > { %374 = vst.msk [vmem:[#allocation2 + $0x22] sm:$0xff] (!%p2692_p7), %vm345_vm0, %v363_v4  ;;  %375 = vst.msk [vmem:[#allocation2 + $0x2a] sm:$0xff] (!%p2692_p7), %vm345_vm0, %v364_v5  ;;  %v386_v15 = vld [vmem:[%s3625_s12 + $0x18] sm:$0xff] (!%p2692_p7)  ;;  %v387_v16 = vld [vmem:[%s3625_s12 + $0x20] sm:$0xff] (!%p2692_p7) }
  0x1c   : > { %376 = vst.msk [vmem:[#allocation2 + $0x32] sm:$0xff] (!%p2692_p7), %vm345_vm0, %v365_v6  ;;  %377 = vst.msk [vmem:[#allocation2 + $0x3a] sm:$0xff] (!%p2692_p7), %vm345_vm0, %v366_v7  ;;  %v388_v17 = vld [vmem:[%s3625_s12 + $0x28] sm:$0xff] (!%p2692_p7)  ;;  %v389_v18 = vld [vmem:[%s3625_s12 + $0x30] sm:$0xff] (!%p2692_p7) }
  0x1d   : > { %378 = vst.msk [vmem:[#allocation2 + $0x42] sm:$0xff] %vm345_vm0, %v367_v8  ;;  %379 = vst.msk [vmem:[#allocation2 + $0x4a] sm:$0xff] %vm345_vm0, %v368_v9  ;;  %v390_v19 = vld [vmem:[%s3625_s12 + $0x38] sm:$0xff]  ;;  %v391_v20 = vld [vmem:[%s3625_s12 + $0x40] sm:$0xff] }
  0x1e   : > { %380 = vst.msk [vmem:[#allocation2 + $0x52] sm:$0xff] %vm345_vm0, %v369_v10  ;;  %394 = vst.msk [vmem:[%s3630_s16] sm:$0xff] %vm345_vm0, %v383_v12  ;;  %v392_v21 = vld [vmem:[%s3625_s12 + $0x48] sm:$0xff]  ;;  %v393_v22 = vld [vmem:[%s3625_s12 + $0x50] sm:$0x1] }
  0x1f   : > { %382 = vst.msk [vmem:[#allocation2 + $0x5a] sm:$0x1] %vm381_vm2, %v370_v11  ;;  %404 = vst.msk [vmem:[%s3630_s16 + $0x50] sm:$0x1] %vm381_vm2, %v393_v22 }
  0x20   : > { %395 = vst.msk [vmem:[%s3630_s16 + $0x8] sm:$0xff] %vm345_vm0, %v384_v13  ;;  %396 = vst.msk [vmem:[%s3630_s16 + $0x10] sm:$0xff] %vm345_vm0, %v385_v14 }
  0x21   : > { %397 = vst.msk [vmem:[%s3630_s16 + $0x18] sm:$0xff] %vm345_vm0, %v386_v15  ;;  %398 = vst.msk [vmem:[%s3630_s16 + $0x20] sm:$0xff] %vm345_vm0, %v387_v16 }
  0x22   : > { %399 = vst.msk [vmem:[%s3630_s16 + $0x28] sm:$0xff] %vm345_vm0, %v388_v17  ;;  %400 = vst.msk [vmem:[%s3630_s16 + $0x30] sm:$0xff] %vm345_vm0, %v389_v18 }
  0x23   : > { %401 = vst.msk [vmem:[%s3630_s16 + $0x38] sm:$0xff] %vm345_vm0, %v390_v19  ;;  %402 = vst.msk [vmem:[%s3630_s16 + $0x40] sm:$0xff] %vm345_vm0, %v391_v20 }
  0x24   : > { %403 = vst.msk [vmem:[%s3630_s16 + $0x48] sm:$0xff] %vm345_vm0, %v392_v21 }
  0x25 PF: > { %v438_v23 = vld [vmem:[%s4528_s3] sm:$0xff]  ;;  %v3541_v25 = vmov 0.0   ;;  %vm439_vm3 = vcmask 64512   ;;  %vm3542_vm4 = vmmov 0   ;;  %v2752_v28 = vld [vmem:[%s4528_s3 + $0x28] sm:$0xff]  ;;  %v2764_v42 = vld [vmem:[%s4528_s3 + $0x30] sm:$0xff] }
  0x26   : > { %v3717_v24 = vld [vmem:[%s4528_s3 + $0x20] sm:$0xff]  ;;  %2910 = vmatprep.subr.mxu1 %v3541_v25  ;;  %3050 = vmatprep.subr.mxu0 %v3541_v25  ;;  %v2704_v29 = vld [vmem:[%s4528_s3 + $0x8] sm:$0xff]  ;;  %v2716_v53 = vld [vmem:[%s4528_s3 + $0x10] sm:$0xff]  ;;  %s3544_s12 = smov 104   ;;  %s3545_s11 = smov 8   ;;  %vm2462_vm6 = vcmask 57344  }
  0x27   : > { %v427_v26 = vld [vmem:[#allocation2] sm:$0xff]  ;;  %v3721_v27 = vld [vmem:[#allocation2 + $0xa] sm:$0xff]  ;;  %2911 = vmatpush3.msra.mxu1 %v438_v23  ;;  %2912 = vmatprep.mubr.msk.f32.mxu1 %vm3542_vm4, %v3541_v25  ;;  %v3887_v61 = vld [vmem:[#allocation2 + $0x53] sm:$0xff] }
  0x28   : > { %3051 = vmatpush3.msra.mxu0 %v3717_v24  ;;  %3052 = vmatprep.mubr.msk.f32.mxu0 %vm3542_vm4, %v3541_v25  ;;  %v428_v30 = vld [vmem:[#allocation2 + $0x8] sm:$0xff]  ;;  %v1322_v63 = vld [vmem:[#allocation2 + $0x5b] sm:$0x1]  ;;  %v3990_v11 = vld [vmem:[#allocation2 + $0x52] sm:$0xff] }
  0x29   : > { %2913 = vmatmul.mubr.msk.f32.vlgmr.msra.gmra.mrb[0].mxu1 %vm439_vm3, %v427_v26  ;;  %3053 = vmatmul.mubr.msk.f32.vlgmr.msra.gmra.mrb[0].mxu0 %vm439_vm3, %v3721_v27  ;;  %v3739_v31 = vld [vmem:[#allocation2 + $0x12] sm:$0xff]  ;;  %v3752_v33 = vld [vmem:[#allocation2 + $0x1a] sm:$0xff]  ;;  %v3846_v54 = vld [vmem:[#allocation2 + $0x9] sm:$0xff] }
  0x2a   : > { %3085 = vmatprep.subr.mxu0 %v3541_v25  ;;  %2945 = vmatprep.subr.mxu1 %v3541_v25  ;;  %v429_v32 = vld [vmem:[#allocation2 + $0x10] sm:$0xff]  ;;  %v430_v34 = vld [vmem:[#allocation2 + $0x18] sm:$0xff]  ;;  %v3763_v35 = vld [vmem:[#allocation2 + $0x22] sm:$0xff] }
  0x2b   : > { %3086 = vmatpush3.msra.mxu0 %v2752_v28  ;;  %2915 = vmatprep.mubr.msk.f32.mxu1 %vm3542_vm4, %v3541_v25  ;;  %v431_v36 = vld [vmem:[#allocation2 + $0x20] sm:$0xff]  ;;  %v3772_v37 = vld [vmem:[#allocation2 + $0x2a] sm:$0xff]  ;;  %v3781_v39 = vld [vmem:[#allocation2 + $0x32] sm:$0xff] }
  0x2c   : > { %2946 = vmatpush3.msra.mxu1 %v2704_v29  ;;  %3055 = vmatprep.mubr.msk.f32.mxu0 %vm3542_vm4, %v3541_v25  ;;  %v432_v38 = vld [vmem:[#allocation2 + $0x28] sm:$0xff]  ;;  %v433_v40 = vld [vmem:[#allocation2 + $0x30] sm:$0xff]  ;;  %v434_v43 = vld [vmem:[#allocation2 + $0x38] sm:$0xff] }
  0x2d   : > { %2916 = vmatmul.mubr.msk.f32.gmra.mrb[2].mxu1 %vm439_vm3, %v428_v30  ;;  %3056 = vmatmul.mubr.msk.f32.gmra.mrb[2].mxu0 %vm439_vm3, %v3739_v31  ;;  %v1312_v41 = vld [vmem:[#allocation2 + $0xb] sm:$0xff]  ;;  %v3797_v44 = vld [vmem:[#allocation2 + $0x13] sm:$0xff]  ;;  %v435_v45 = vld [vmem:[#allocation2 + $0x40] sm:$0xff] }
  0x2e   : > { %2918 = vmatprep.mubr.msk.f32.mxu1 %vm3542_vm4, %v3541_v25  ;;  %3058 = vmatprep.mubr.msk.f32.mxu0 %vm3542_vm4, %v3541_v25  ;;  %v3809_v46 = vld [vmem:[#allocation2 + $0x1b] sm:$0xff]  ;;  %v436_v47 = vld [vmem:[#allocation2 + $0x48] sm:$0xff]  ;;  %v437_v49 = vld [vmem:[#allocation2 + $0x50] sm:$0x1] }
  0x2f   : > { %3120 = vmatprep.subr.mxu0 %v3541_v25  ;;  %2980 = vmatprep.subr.mxu1 %v3541_v25  ;;  %v3818_v48 = vld [vmem:[#allocation2 + $0x23] sm:$0xff]  ;;  %v3827_v50 = vld [vmem:[#allocation2 + $0x2b] sm:$0xff]  ;;  %v3836_v52 = vld [vmem:[#allocation2 + $0x33] sm:$0xff] }
  0x30   : > { %v604_v51 = vld [vmem:[#allocation2 + $0x1] sm:$0xff]  ;;  %v3861_v56 = vld [vmem:[#allocation2 + $0x11] sm:$0xff]  ;;  %v3873_v58 = vld [vmem:[#allocation2 + $0x19] sm:$0xff] }
  0x31   : > { %2919 = vmatmul.mubr.msk.f32.gmra.mrb[4].mxu1 %vm439_vm3, %v429_v32  ;;  %3059 = vmatmul.mubr.msk.f32.gmra.mrb[4].mxu0 %vm439_vm3, %v3752_v33  ;;  %v3848_v55 = vld [vmem:[#allocation2 + $0x3b] sm:$0xff]  ;;  %v3863_v57 = vld [vmem:[#allocation2 + $0x43] sm:$0xff]  ;;  %v3875_v59 = vld [vmem:[#allocation2 + $0x4b] sm:$0xff] }
  0x32   : > { %2921 = vmatprep.mubr.msk.f32.mxu1 %vm3542_vm4, %v3541_v25  ;;  %3061 = vmatprep.mubr.msk.f32.mxu0 %vm3542_vm4, %v3541_v25  ;;  %v3885_v60 = vld [vmem:[#allocation2 + $0x21] sm:$0xff]  ;;  %v3897_v62 = vld [vmem:[#allocation2 + $0x29] sm:$0xff]  ;;  %v3906_v0 = vld [vmem:[#allocation2 + $0x31] sm:$0xff] }
  0x33   : > { %v2776_v1 = vld [vmem:[%s4528_s3 + $0x38] sm:$0xff]  ;;  %v3930_v3 = vld [vmem:[#allocation2 + $0x41] sm:$0xff]  ;;  %v3940_v4 = vld [vmem:[#allocation2 + $0x49] sm:$0xff] }
  0x34   : > { %v3917_v2 = vld [vmem:[#allocation2 + $0x39] sm:$0xff]  ;;  %v614_v5 = vld [vmem:[#allocation2 + $0x51] sm:$0x1]  ;;  %v781_v6 = vld [vmem:[#allocation2 + $0x2] sm:$0xff] }
  0x35   : > { %2922 = vmatmul.mubr.msk.f32.gmra.mrb[6].mxu1 %vm439_vm3, %v430_v34  ;;  %3062 = vmatmul.mubr.msk.f32.gmra.mrb[6].mxu0 %vm439_vm3, %v3763_v35  ;;  %v3957_v7 = vld [vmem:[#allocation2 + $0x3a] sm:$0xff]  ;;  %v3967_v9 = vld [vmem:[#allocation2 + $0x42] sm:$0xff]  ;;  %v3980_v10 = vld [vmem:[#allocation2 + $0x4a] sm:$0xff] }
  0x36   : > { %2924 = vmatprep.mubr.msk.f32.mxu1 %vm3542_vm4, %v3541_v25  ;;  %3064 = vmatprep.mubr.msk.f32.mxu0 %vm3542_vm4, %v3541_v25  ;;  %v2728_v8 = vld [vmem:[%s4528_s3 + $0x18] sm:$0xff]  ;;  %v1499_v13 = vld [vmem:[#allocation2 + $0x62] sm:$0x1]  ;;  %v791_v15 = vld [vmem:[#allocation2 + $0x52] sm:$0x1] }
  0x37   : > { %v1498_v12 = vld [vmem:[#allocation2 + $0x5a] sm:$0xff]  ;;  %v1676_v17 = vld [vmem:[#allocation2 + $0x63] sm:$0x1]  ;;  %v1845_v20 = vld [vmem:[#allocation2 + $0x24] sm:$0xff] }
  0x38   : > { %v2788_v14 = vld [vmem:[%s4528_s3 + $0x40] sm:$0xff]  ;;  %v1843_v18 = vld [vmem:[#allocation2 + $0x14] sm:$0xff]  ;;  %v1846_v22 = vld [vmem:[#allocation2 + $0x2c] sm:$0xff] }
  0x39   : > { %2925 = vmatmul.mubr.msk.f32.gmra.mrb[8].mxu1 %vm439_vm3, %v431_v36  ;;  %3065 = vmatmul.mubr.msk.f32.gmra.mrb[8].mxu0 %vm439_vm3, %v3772_v37  ;;  %v1675_v16 = vld [vmem:[#allocation2 + $0x5b] sm:$0xff]  ;;  %v967_v21 = vld [vmem:[#allocation2 + $0x51] sm:$0xff]  ;;  %v968_v23 = vld [vmem:[#allocation2 + $0x59] sm:$0x1] }
  0x3a   : > { %2927 = vmatprep.mubr.msk.f32.mxu1 %vm3542_vm4, %v3541_v25  ;;  %3067 = vmatprep.mubr.msk.f32.mxu0 %vm3542_vm4, %v3541_v25  ;;  %v1844_v19 = vld [vmem:[#allocation2 + $0x1c] sm:$0xff]  ;;  %v1850_v28 = vld [vmem:[#allocation2 + $0x4c] sm:$0xff]  ;;  %v1851_v29 = vld [vmem:[#allocation2 + $0x54] sm:$0xff] }
  0x3b   : > { %v1848_v26 = vld [vmem:[#allocation2 + $0x3c] sm:$0xff]  ;;  %v1145_v30 = vld [vmem:[#allocation2 + $0x5a] sm:$0x1]  ;;  %v1853_v32 = vld [vmem:[#allocation2 + $0x64] sm:$0x1] }
  0x3c   : > { %v406_v34 = vld [vmem:[%s4529_s4 + $0x8] sm:$0xff] }
  0x3d   : > { %2928 = vmatmul.mubr.msk.f32.gmra.mrb[10].mxu1 %vm439_vm3, %v432_v38  ;;  %3068 = vmatmul.mubr.msk.f32.gmra.mrb[10].mxu0 %vm439_vm3, %v3781_v39 }
  0x3e   : > { %2930 = vmatprep.mubr.msk.f32.mxu1 %vm3542_vm4, %v3541_v25  ;;  %3087 = vmatprep.mubr.msk.f32.mxu0 %vm3542_vm4, %v3541_v25 }
  0x41   : > { %2931 = vmatmul.mubr.msk.f32.gmra.mrb[12].mxu1 %vm439_vm3, %v433_v40  ;;  %3088 = vmatmul.mubr.msk.f32.vlgmr.msra.gmra.mrb[0].mxu0 %vm439_vm3, %v1312_v41 }
  0x42   : > { %3121 = vmatpush3.msra.mxu0 %v2764_v42  ;;  %2933 = vmatprep.mubr.msk.f32.mxu1 %vm3542_vm4, %v3541_v25 }
  0x43   : > { %3090 = vmatprep.mubr.msk.f32.mxu0 %vm3542_vm4, %v3541_v25  ;;  %3155 = vmatprep.subr.mxu0 %v3541_v25 }
  0x45   : > { %2934 = vmatmul.mubr.msk.f32.gmra.mrb[14].mxu1 %vm439_vm3, %v434_v43  ;;  %3091 = vmatmul.mubr.msk.f32.gmra.mrb[2].mxu0 %vm439_vm3, %v3797_v44 }
  0x46   : > { %2936 = vmatprep.mubr.msk.f32.mxu1 %vm3542_vm4, %v3541_v25  ;;  %3093 = vmatprep.mubr.msk.f32.mxu0 %vm3542_vm4, %v3541_v25 }
  0x49   : > { %2937 = vmatmul.mubr.msk.f32.gmra.mrb[16].mxu1 %vm439_vm3, %v435_v45  ;;  %3094 = vmatmul.mubr.msk.f32.gmra.mrb[4].mxu0 %vm439_vm3, %v3809_v46 }
  0x4a   : > { %2939 = vmatprep.mubr.msk.f32.mxu1 %vm3542_vm4, %v3541_v25  ;;  %3096 = vmatprep.mubr.msk.f32.mxu0 %vm3542_vm4, %v3541_v25 }
  0x4d   : > { %2940 = vmatmul.mubr.msk.f32.gmra.mrb[18].mxu1 %vm439_vm3, %v436_v47  ;;  %3097 = vmatmul.mubr.msk.f32.gmra.mrb[6].mxu0 %vm439_vm3, %v3818_v48  ;;  %v416_v47 = vld [vmem:[%s3635_s28] sm:$0xff] }
  0x4e   : > { %2942 = vmatprep.mubr.msk.f32.mxu1 %vm3542_vm4, %v3541_v25  ;;  %3099 = vmatprep.mubr.msk.f32.mxu0 %vm3542_vm4, %v3541_v25 }
  0x51   : > { %2943 = vmatmul.mubr.msk.f32.gmra.mrb[20].mxu1 %vm439_vm3, %v437_v49  ;;  %3100 = vmatmul.mubr.msk.f32.gmra.mrb[8].mxu0 %vm439_vm3, %v3827_v50 }
  0x52   : > { %2947 = vmatprep.mubr.msk.f32.mxu1 %vm3542_vm4, %v3541_v25  ;;  %3102 = vmatprep.mubr.msk.f32.mxu0 %vm3542_vm4, %v3541_v25 }
  0x55   : > { %2948 = vmatmul.mubr.msk.f32.vlgmr.msra.gmra.mrb[0].mxu1 %vm439_vm3, %v604_v51  ;;  %3103 = vmatmul.mubr.msk.f32.gmra.mrb[10].mxu0 %vm439_vm3, %v3836_v52 }
  0x56   : > { %2950 = vmatprep.mubr.msk.f32.mxu1 %vm3542_vm4, %v3541_v25  ;;  %2981 = vmatpush3.msra.mxu1 %v2716_v53 }
  0x57   : > { %3105 = vmatprep.mubr.msk.f32.mxu0 %vm3542_vm4, %v3541_v25  ;;  %3015 = vmatprep.subr.mxu1 %v3541_v25 }
  0x59   : > { %2951 = vmatmul.mubr.msk.f32.gmra.mrb[2].mxu1 %vm439_vm3, %v3846_v54  ;;  %3106 = vmatmul.mubr.msk.f32.gmra.mrb[12].mxu0 %vm439_vm3, %v3848_v55 }
  0x5a   : > { %2953 = vmatprep.mubr.msk.f32.mxu1 %vm3542_vm4, %v3541_v25  ;;  %3108 = vmatprep.mubr.msk.f32.mxu0 %vm3542_vm4, %v3541_v25 }
  0x5d   : > { %2954 = vmatmul.mubr.msk.f32.gmra.mrb[4].mxu1 %vm439_vm3, %v3861_v56  ;;  %3109 = vmatmul.mubr.msk.f32.gmra.mrb[14].mxu0 %vm439_vm3, %v3863_v57 }
  0x5e   : > { %2956 = vmatprep.mubr.msk.f32.mxu1 %vm3542_vm4, %v3541_v25  ;;  %3111 = vmatprep.mubr.msk.f32.mxu0 %vm3542_vm4, %v3541_v25 }
  0x61   : > { %2957 = vmatmul.mubr.msk.f32.gmra.mrb[6].mxu1 %vm439_vm3, %v3873_v58  ;;  %3112 = vmatmul.mubr.msk.f32.gmra.mrb[16].mxu0 %vm439_vm3, %v3875_v59 }
  0x62   : > { %2959 = vmatprep.mubr.msk.f32.mxu1 %vm3542_vm4, %v3541_v25  ;;  %3114 = vmatprep.mubr.msk.f32.mxu0 %vm3542_vm4, %v3541_v25 }
  0x65   : > { %2960 = vmatmul.mubr.msk.f32.gmra.mrb[8].mxu1 %vm439_vm3, %v3885_v60  ;;  %3115 = vmatmul.mubr.msk.f32.gmra.mrb[18].mxu0 %vm439_vm3, %v3887_v61 }
  0x66   : > { %2962 = vmatprep.mubr.msk.f32.mxu1 %vm3542_vm4, %v3541_v25  ;;  %3117 = vmatprep.mubr.msk.f32.mxu0 %vm3542_vm4, %v3541_v25 }
  0x69   : > { %2963 = vmatmul.mubr.msk.f32.gmra.mrb[10].mxu1 %vm439_vm3, %v3897_v62  ;;  %3118 = vmatmul.mubr.msk.f32.gmra.mrb[20].mxu0 %vm439_vm3, %v1322_v63 }
  0x6a   : > { %2965 = vmatprep.mubr.msk.f32.mxu1 %vm3542_vm4, %v3541_v25  ;;  %3122 = vmatprep.mubr.msk.f32.mxu0 %vm3542_vm4, %v3541_v25 }
  0x6d   : > { %2966 = vmatmul.mubr.msk.f32.gmra.mrb[12].mxu1 %vm439_vm3, %v3906_v0  ;;  %3123 = vmatmul.mubr.msk.f32.vlgmr.msra.gmra.mrb[0].mxu0 %vm439_vm3, %v3739_v31 }
  0x6e   : > { %3156 = vmatpush3.msra.mxu0 %v2776_v1  ;;  %2968 = vmatprep.mubr.msk.f32.mxu1 %vm3542_vm4, %v3541_v25  ;;  %v419_v1 = vld [vmem:[%s3635_s28 + $0x18] sm:$0xff] }
  0x6f   : > { %3125 = vmatprep.mubr.msk.f32.mxu0 %vm3542_vm4, %v3541_v25  ;;  %3190 = vmatprep.subr.mxu0 %v3541_v25 }
  0x71   : > { %2969 = vmatmul.mubr.msk.f32.gmra.mrb[14].mxu1 %vm439_vm3, %v3917_v2  ;;  %3126 = vmatmul.mubr.msk.f32.gmra.mrb[2].mxu0 %vm439_vm3, %v3752_v33 }
  0x72   : > { %2971 = vmatprep.mubr.msk.f32.mxu1 %vm3542_vm4, %v3541_v25  ;;  %3128 = vmatprep.mubr.msk.f32.mxu0 %vm3542_vm4, %v3541_v25 }
  0x75   : > { %2972 = vmatmul.mubr.msk.f32.gmra.mrb[16].mxu1 %vm439_vm3, %v3930_v3  ;;  %3129 = vmatmul.mubr.msk.f32.gmra.mrb[4].mxu0 %vm439_vm3, %v3763_v35 }
  0x76   : > { %2974 = vmatprep.mubr.msk.f32.mxu1 %vm3542_vm4, %v3541_v25  ;;  %3131 = vmatprep.mubr.msk.f32.mxu0 %vm3542_vm4, %v3541_v25 }
  0x79   : > { %2975 = vmatmul.mubr.msk.f32.gmra.mrb[18].mxu1 %vm439_vm3, %v3940_v4  ;;  %3132 = vmatmul.mubr.msk.f32.gmra.mrb[6].mxu0 %vm439_vm3, %v3772_v37 }
  0x7a   : > { %2977 = vmatprep.mubr.msk.f32.mxu1 %vm3542_vm4, %v3541_v25  ;;  %3134 = vmatprep.mubr.msk.f32.mxu0 %vm3542_vm4, %v3541_v25 }
  0x7d   : > { %2978 = vmatmul.mubr.msk.f32.gmra.mrb[20].mxu1 %vm439_vm3, %v614_v5  ;;  %3135 = vmatmul.mubr.msk.f32.gmra.mrb[8].mxu0 %vm439_vm3, %v3781_v39 }
  0x7e   : > { %2982 = vmatprep.mubr.msk.f32.mxu1 %vm3542_vm4, %v3541_v25  ;;  %3137 = vmatprep.mubr.msk.f32.mxu0 %vm3542_vm4, %v3541_v25 }
  0x81   : > { %2983 = vmatmul.mubr.msk.f32.vlgmr.msra.gmra.mrb[0].mxu1 %vm439_vm3, %v781_v6  ;;  %3138 = vmatmul.mubr.msk.f32.gmra.mrb[10].mxu0 %vm439_vm3, %v3957_v7 }
  0x82   : > { %2985 = vmatprep.mubr.msk.f32.mxu1 %vm3542_vm4, %v3541_v25  ;;  %3016 = vmatpush3.msra.mxu1 %v2728_v8  ;;  %v420_v8 = vld [vmem:[%s3635_s28 + $0x20] sm:$0xff] }
  0x83   : > { %3140 = vmatprep.mubr.msk.f32.mxu0 %vm3542_vm4, %v3541_v25  ;;  %3225 = vmatprep.subr.mxu1 %v3541_v25 }
  0x85   : > { %2986 = vmatmul.mubr.msk.f32.gmra.mrb[2].mxu1 %vm439_vm3, %v3721_v27  ;;  %3141 = vmatmul.mubr.msk.f32.gmra.mrb[12].mxu0 %vm439_vm3, %v3967_v9  ;;  %v1849_v27 = vld [vmem:[#allocation2 + $0x44] sm:$0xff] }
  0x86   : > { %2988 = vmatprep.mubr.msk.f32.mxu1 %vm3542_vm4, %v3541_v25  ;;  %3143 = vmatprep.mubr.msk.f32.mxu0 %vm3542_vm4, %v3541_v25 }
  0x89   : > { %2989 = vmatmul.mubr.msk.f32.gmra.mrb[4].mxu1 %vm439_vm3, %v3739_v31  ;;  %3144 = vmatmul.mubr.msk.f32.gmra.mrb[14].mxu0 %vm439_vm3, %v3980_v10  ;;  %v1852_v31 = vld [vmem:[#allocation2 + $0x5c] sm:$0xff] }
  0x8a   : > { %2991 = vmatprep.mubr.msk.f32.mxu1 %vm3542_vm4, %v3541_v25  ;;  %3146 = vmatprep.mubr.msk.f32.mxu0 %vm3542_vm4, %v3541_v25 }
  0x8d   : > { %2992 = vmatmul.mubr.msk.f32.gmra.mrb[6].mxu1 %vm439_vm3, %v3752_v33  ;;  %3147 = vmatmul.mubr.msk.f32.gmra.mrb[16].mxu0 %vm439_vm3, %v3990_v11  ;;  %v3543_v33 = vmov 0  }
  0x8e   : > { %2994 = vmatprep.mubr.msk.f32.mxu1 %vm3542_vm4, %v3541_v25  ;;  %3149 = vmatprep.mubr.msk.f32.mxu0 %vm3542_vm4, %v3541_v25 }
  0x8f   : > { %3455 = vset.pattern.permute.xlu0 %v3543_v33  ;;  %3454 = vset.pattern.permute.xlu1 %v3543_v33 }
  0x90   : > { %2272 = vperm.xlu0 %3455, %v406_v34  }
  0x91   : > { %2995 = vmatmul.mubr.msk.f32.gmra.mrb[8].mxu1 %vm439_vm3, %v3763_v35  ;;  %3150 = vmatmul.mubr.msk.f32.gmra.mrb[18].mxu0 %vm439_vm3, %v1498_v12  ;;  %v405_v35 = vld [vmem:[%s4529_s4] sm:$0xff] }
  0x92   : > { %2997 = vmatprep.mubr.msk.f32.mxu1 %vm3542_vm4, %v3541_v25  ;;  %3152 = vmatprep.mubr.msk.f32.mxu0 %vm3542_vm4, %v3541_v25 }
  0x93   : > { %2267 = vperm.xlu1 %3454, %v405_v35  }
  0x95   : > { %2998 = vmatmul.mubr.msk.f32.gmra.mrb[10].mxu1 %vm439_vm3, %v3772_v37  ;;  %3153 = vmatmul.mubr.msk.f32.gmra.mrb[20].mxu0 %vm439_vm3, %v1499_v13 }
  0x96   : > { %3000 = vmatprep.mubr.msk.f32.mxu1 %vm3542_vm4, %v3541_v25  ;;  %3157 = vmatprep.mubr.msk.f32.mxu0 %vm3542_vm4, %v3541_v25 }
  0x99   : > { %3001 = vmatmul.mubr.msk.f32.gmra.mrb[12].mxu1 %vm439_vm3, %v3781_v39  ;;  %3158 = vmatmul.mubr.msk.f32.vlgmr.msra.gmra.mrb[0].mxu0 %vm439_vm3, %v3797_v44 }
  0x9a   : > { %3191 = vmatpush3.msra.mxu0 %v2788_v14  ;;  %3003 = vmatprep.mubr.msk.f32.mxu1 %vm3542_vm4, %v3541_v25 }
  0x9b   : > { %3160 = vmatprep.mubr.msk.f32.mxu0 %vm3542_vm4, %v3541_v25 }
  0x9d   : > { %3004 = vmatmul.mubr.msk.f32.gmra.mrb[14].mxu1 %vm439_vm3, %v3957_v7  ;;  %3161 = vmatmul.mubr.msk.f32.gmra.mrb[2].mxu0 %vm439_vm3, %v3809_v46  ;;  %v2020_v46 = vlaneseq }
  0x9e   : > { %3006 = vmatprep.mubr.msk.f32.mxu1 %vm3542_vm4, %v3541_v25  ;;  %3163 = vmatprep.mubr.msk.f32.mxu0 %vm3542_vm4, %v3541_v25 }
  0xa1   : > { %3007 = vmatmul.mubr.msk.f32.gmra.mrb[16].mxu1 %vm439_vm3, %v3967_v9  ;;  %3164 = vmatmul.mubr.msk.f32.gmra.mrb[4].mxu0 %vm439_vm3, %v3818_v48 }
  0xa2   : > { %3009 = vmatprep.mubr.msk.f32.mxu1 %vm3542_vm4, %v3541_v25  ;;  %3166 = vmatprep.mubr.msk.f32.mxu0 %vm3542_vm4, %v3541_v25 }
  0xa5   : > { %3010 = vmatmul.mubr.msk.f32.gmra.mrb[18].mxu1 %vm439_vm3, %v3980_v10  ;;  %3167 = vmatmul.mubr.msk.f32.gmra.mrb[6].mxu0 %vm439_vm3, %v3827_v50  ;;  %v4179_v50 = vand.u32 127, %v2020_v46 }
  0xa6   : > { %3012 = vmatprep.mubr.msk.f32.mxu1 %vm3542_vm4, %v3541_v25  ;;  %3169 = vmatprep.mubr.msk.f32.mxu0 %vm3542_vm4, %v3541_v25 }
  0xa7   : > { %vm2022_vm5 = vcmp.ge.s32.totalorder %v4179_v50, 24  ;;  %v413_v50 = vld [vmem:[%s4529_s4 + $0x40] sm:$0xff] }
  0xa9   : > { %3013 = vmatmul.mubr.msk.f32.gmra.mrb[20].mxu1 %vm439_vm3, %v791_v15  ;;  %3170 = vmatmul.mubr.msk.f32.gmra.mrb[8].mxu0 %vm439_vm3, %v3836_v52  ;;  %v417_v52 = vld [vmem:[%s3635_s28 + $0x8] sm:$0xff] }
  0xaa   : > { %3017 = vmatprep.mubr.msk.f32.mxu1 %vm3542_vm4, %v3541_v25  ;;  %3172 = vmatprep.mubr.msk.f32.mxu0 %vm3542_vm4, %v3541_v25 }
  0xad   : > { %3018 = vmatmul.mubr.msk.f32.vlgmr.msra.gmra.mrb[0].mxu1 %vm439_vm3, %v3846_v54  ;;  %3173 = vmatmul.mubr.msk.f32.gmra.mrb[10].mxu0 %vm439_vm3, %v3848_v55 }
  0xae   : > { %3020 = vmatprep.mubr.msk.f32.mxu1 %vm3542_vm4, %v3541_v25  ;;  %3226 = vmatpush3.msra.mxu1 %v3717_v24  ;;  %v1847_v24 = vld [vmem:[#allocation2 + $0x34] sm:$0xff] }
  0xaf   : > { %3175 = vmatprep.mubr.msk.f32.mxu0 %vm3542_vm4, %v3541_v25 }
  0xb1   : > { %3021 = vmatmul.mubr.msk.f32.gmra.mrb[2].mxu1 %vm439_vm3, %v3861_v56  ;;  %3176 = vmatmul.mubr.msk.f32.gmra.mrb[12].mxu0 %vm439_vm3, %v3863_v57 }
  0xb2   : > { %3023 = vmatprep.mubr.msk.f32.mxu1 %vm3542_vm4, %v3541_v25  ;;  %3178 = vmatprep.mubr.msk.f32.mxu0 %vm3542_vm4, %v3541_v25 }
  0xb5   : > { %3024 = vmatmul.mubr.msk.f32.gmra.mrb[4].mxu1 %vm439_vm3, %v3873_v58  ;;  %3179 = vmatmul.mubr.msk.f32.gmra.mrb[14].mxu0 %vm439_vm3, %v3875_v59  ;;  %v418_v58 = vld [vmem:[%s3635_s28 + $0x10] sm:$0xff] }
  0xb6   : > { %3026 = vmatprep.mubr.msk.f32.mxu1 %vm3542_vm4, %v3541_v25  ;;  %3181 = vmatprep.mubr.msk.f32.mxu0 %vm3542_vm4, %v3541_v25 }
  0xb9   : > { %3027 = vmatmul.mubr.msk.f32.gmra.mrb[6].mxu1 %vm439_vm3, %v3885_v60  ;;  %3182 = vmatmul.mubr.msk.f32.gmra.mrb[16].mxu0 %vm439_vm3, %v3887_v61 }
  0xba   : > { %3029 = vmatprep.mubr.msk.f32.mxu1 %vm3542_vm4, %v3541_v25  ;;  %3184 = vmatprep.mubr.msk.f32.mxu0 %vm3542_vm4, %v3541_v25 }
  0xbd   : > { %3030 = vmatmul.mubr.msk.f32.gmra.mrb[8].mxu1 %vm439_vm3, %v3897_v62  ;;  %3185 = vmatmul.mubr.msk.f32.gmra.mrb[18].mxu0 %vm439_vm3, %v1675_v16  ;;  %v421_v16 = vld [vmem:[%s3635_s28 + $0x28] sm:$0xff] }
  0xbe   : > { %3032 = vmatprep.mubr.msk.f32.mxu1 %vm3542_vm4, %v3541_v25  ;;  %3187 = vmatprep.mubr.msk.f32.mxu0 %vm3542_vm4, %v3541_v25 }
  0xc1   : > { %3033 = vmatmul.mubr.msk.f32.gmra.mrb[10].mxu1 %vm439_vm3, %v3906_v0  ;;  %3188 = vmatmul.mubr.msk.f32.gmra.mrb[20].mxu0 %vm439_vm3, %v1676_v17 }
  0xc2   : > { %3035 = vmatprep.mubr.msk.f32.mxu1 %vm3542_vm4, %v3541_v25  ;;  %3192 = vmatprep.mubr.msk.f32.mxu0 %vm3542_vm4, %v3541_v25 }
  0xc5   : > { %3036 = vmatmul.mubr.msk.f32.gmra.mrb[12].mxu1 %vm439_vm3, %v3917_v2  ;;  %3193 = vmatmul.mubr.msk.f32.vlgmr.msra.gmra.mrb[0].mxu0 %vm439_vm3, %v1843_v18 }
  0xc6   : > { %3038 = vmatprep.mubr.msk.f32.mxu1 %vm3542_vm4, %v3541_v25  ;;  %3195 = vmatprep.mubr.msk.f32.mxu0 %vm3542_vm4, %v3541_v25 }
  0xc9   : > { %3039 = vmatmul.mubr.msk.f32.gmra.mrb[14].mxu1 %vm439_vm3, %v3930_v3  ;;  %3196 = vmatmul.mubr.msk.f32.gmra.mrb[2].mxu0 %vm439_vm3, %v1844_v19 }
  0xca   : > { %3041 = vmatprep.mubr.msk.f32.mxu1 %vm3542_vm4, %v3541_v25  ;;  %3198 = vmatprep.mubr.msk.f32.mxu0 %vm3542_vm4, %v3541_v25 }
  0xcd   : > { %3042 = vmatmul.mubr.msk.f32.gmra.mrb[16].mxu1 %vm439_vm3, %v3940_v4  ;;  %3199 = vmatmul.mubr.msk.f32.gmra.mrb[4].mxu0 %vm439_vm3, %v1845_v20 }
  0xce   : > { %3044 = vmatprep.mubr.msk.f32.mxu1 %vm3542_vm4, %v3541_v25  ;;  %3201 = vmatprep.mubr.msk.f32.mxu0 %vm3542_vm4, %v3541_v25 }
  0xd1   : > { %3045 = vmatmul.mubr.msk.f32.gmra.mrb[18].mxu1 %vm439_vm3, %v967_v21  ;;  %3202 = vmatmul.mubr.msk.f32.gmra.mrb[6].mxu0 %vm439_vm3, %v1846_v22 }
  0xd2   : > { %3047 = vmatprep.mubr.msk.f32.mxu1 %vm3542_vm4, %v3541_v25  ;;  %3204 = vmatprep.mubr.msk.f32.mxu0 %vm3542_vm4, %v3541_v25 }
  0xd5   : > { %3048 = vmatmul.mubr.msk.f32.gmra.mrb[20].mxu1 %vm439_vm3, %v968_v23  ;;  %3205 = vmatmul.mubr.msk.f32.gmra.mrb[8].mxu0 %vm439_vm3, %v1847_v24 }
  0xd6   : > { %3070 = vmatprep.mubr.msk.f32.mxu1 %vm3542_vm4, %v3541_v25  ;;  %3207 = vmatprep.mubr.msk.f32.mxu0 %vm3542_vm4, %v3541_v25 }
  0xd9   : > { %3071 = vmatmul.mubr.msk.f32.vlgmr.msra.gmra.mrb[12].mxu1 %vm439_vm3, %v3957_v7  ;;  %3208 = vmatmul.mubr.msk.f32.gmra.mrb[10].mxu0 %vm439_vm3, %v1848_v26 }
  0xda   : > { %3073 = vmatprep.mubr.msk.f32.mxu1 %vm3542_vm4, %v3541_v25  ;;  %3210 = vmatprep.mubr.msk.f32.mxu0 %vm3542_vm4, %v3541_v25 }
  0xdd   : > { %3074 = vmatmul.mubr.msk.f32.gmra.mrb[14].mxu1 %vm439_vm3, %v3967_v9  ;;  %3211 = vmatmul.mubr.msk.f32.gmra.mrb[12].mxu0 %vm439_vm3, %v1849_v27  ;;  %v422_v27 = vld [vmem:[%s3635_s28 + $0x30] sm:$0xff] }
  0xde   : > { %3076 = vmatprep.mubr.msk.f32.mxu1 %vm3542_vm4, %v3541_v25  ;;  %3213 = vmatprep.mubr.msk.f32.mxu0 %vm3542_vm4, %v3541_v25 }
  0xe1   : > { %3077 = vmatmul.mubr.msk.f32.gmra.mrb[16].mxu1 %vm439_vm3, %v3980_v10  ;;  %3214 = vmatmul.mubr.msk.f32.gmra.mrb[14].mxu0 %vm439_vm3, %v1850_v28 }
  0xe2   : > { %3079 = vmatprep.mubr.msk.f32.mxu1 %vm3542_vm4, %v3541_v25  ;;  %3216 = vmatprep.mubr.msk.f32.mxu0 %vm3542_vm4, %v3541_v25 }
  0xe5   : > { %3080 = vmatmul.mubr.msk.f32.gmra.mrb[18].mxu1 %vm439_vm3, %v3990_v11  ;;  %3217 = vmatmul.mubr.msk.f32.gmra.mrb[16].mxu0 %vm439_vm3, %v1851_v29 }
  0xe6   : > { %3082 = vmatprep.mubr.msk.f32.mxu1 %vm3542_vm4, %v3541_v25  ;;  %3219 = vmatprep.mubr.msk.f32.mxu0 %vm3542_vm4, %v3541_v25 }
  0xe9   : > { %3083 = vmatmul.mubr.msk.f32.gmra.mrb[20].mxu1 %vm439_vm3, %v1145_v30  ;;  %3220 = vmatmul.mubr.msk.f32.gmra.mrb[18].mxu0 %vm439_vm3, %v1852_v31 }
  0xea   : > { %3222 = vmatprep.mubr.msk.f32.mxu0 %vm3542_vm4, %v3541_v25  ;;  %v407_v25 = vld [vmem:[%s4529_s4 + $0x10] sm:$0xff] }
  0xeb   : > { %2277 = vperm.xlu1 %3454, %v407_v25  }
  0xed   : > { %3223 = vmatmul.mubr.msk.f32.gmra.mrb[20].mxu0 %vm439_vm3, %v1853_v32 }
 0x180   : > { %v1070_v36 = vpop.f32.mrb[0].mxu1 }
 0x181   : > { %v3019_v37 = vpop.f32.mrb[1].mxu1  ;;  %v3227_v51 = vadd.f32 %v1070_v36, %v416_v47 }
 0x184   : > { %v1075_v38 = vpop.f32.mrb[2].mxu1 }
 0x185   : > { %v3022_v39 = vpop.f32.mrb[3].mxu1  ;;  %v3229_v56 = vadd.f32 %v1075_v38, %v417_v52  ;;  %v423_v38 = vld [vmem:[%s3635_s28 + $0x38] sm:$0xff] }
 0x188   : > { %v1080_v40 = vpop.f32.mrb[4].mxu1 }
 0x189   : > { %v3025_v41 = vpop.f32.mrb[5].mxu1  ;;  %v3231_v63 = vadd.f32 %v1080_v40, %v418_v58 }
 0x18c   : > { %v1085_v42 = vpop.f32.mrb[6].mxu1 }
 0x18d   : > { %v3028_v43 = vpop.f32.mrb[7].mxu1  ;;  %v3233_v6 = vadd.f32 %v1085_v42, %v419_v1  ;;  %v425_v1 = vld [vmem:[%s3635_s28 + $0x48] sm:$0xff] }
 0x190   : > { %v1090_v44 = vpop.f32.mrb[8].mxu1 }
 0x191   : > { %v3031_v45 = vpop.f32.mrb[9].mxu1  ;;  %v3235_v13 = vadd.f32 %v1090_v44, %v420_v8 }
 0x194   : > { %v1095_v48 = vpop.f32.mrb[10].mxu1 }
 0x195   : > { %v3034_v49 = vpop.f32.mrb[11].mxu1  ;;  %v3237_v22 = vadd.f32 %v1095_v48, %v421_v16 }
 0x198   : > { %v1955_v53 = vpop.f32.mrb[0].mxu0 }
 0x199   : > { %v3228_v54 = vadd.f32 %v3227_v51, %v1955_v53  ;;  %v3194_v55 = vpop.f32.mrb[1].mxu0  ;;  %v424_v53 = vld [vmem:[%s3635_s28 + $0x40] sm:$0xff] }
 0x19b   : > { %v2023_v57 = vmul.f32 0.5, %v3228_v54 }
 0x19c   : > { %v1960_v59 = vpop.f32.mrb[2].mxu0 }
 0x19d   : > { %v2034_v60 = vsel %vm2022_vm5, %v3228_v54, %v2023_v57  ;;  %v3230_v61 = vadd.f32 %v3229_v56, %v1960_v59  ;;  %v3197_v62 = vpop.f32.mrb[3].mxu0 }
 0x19e   : > { %3456 = vtanh.f32 %v2034_v60 }
 0x19f   : > { %v2024_v0 = vmul.f32 0.5, %v3230_v61 }
 0x1a0   : > { %v1965_v2 = vpop.f32.mrb[4].mxu0 }
 0x1a1   : > { %v2035_v3 = vsel %vm2022_vm5, %v3230_v61, %v2024_v0  ;;  %v3232_v4 = vadd.f32 %v3231_v63, %v1965_v2  ;;  %v3200_v5 = vpop.f32.mrb[5].mxu0 }
 0x1a2   : > { %3458 = vtanh.f32 %v2035_v3 }
 0x1a3   : > { %v2025_v7 = vmul.f32 0.5, %v3232_v4 }
 0x1a4   : > { %v1970_v9 = vpop.f32.mrb[6].mxu0 }
 0x1a5   : > { %v2036_v10 = vsel %vm2022_vm5, %v3232_v4, %v2025_v7  ;;  %v3234_v11 = vadd.f32 %v3233_v6, %v1970_v9  ;;  %v3203_v12 = vpop.f32.mrb[7].mxu0 }
 0x1a6   : > { %3460 = vtanh.f32 %v2036_v10 }
 0x1a7   : > { %v2026_v14 = vmul.f32 0.5, %v3234_v11 }
 0x1a8   : > { %v3457_v15 = vpop.eup %3456  ;;  %v1975_v17 = vpop.f32.mrb[8].mxu0 }
 0x1a9   : > { %v2037_v18 = vsel %vm2022_vm5, %v3234_v11, %v2026_v14  ;;  %v3236_v19 = vadd.f32 %v3235_v13, %v1975_v17  ;;  %v3206_v20 = vpop.f32.mrb[9].mxu0  ;;  %v2056_v21 = vadd.f32 1.0, %v3457_v15 }
 0x1aa   : > { %3462 = vtanh.f32 %v2037_v18 }
 0x1ab   : > { %v2027_v23 = vmul.f32 0.5, %v3236_v19  ;;  %v2067_v24 = vmul.f32 0.5, %v2056_v21 }
 0x1ac   : > { %v3459_v26 = vpop.eup %3458  ;;  %v1277_v28 = vpop.f32.mrb[12].mxu1 }
 0x1ad   : > { %v1980_v29 = vpop.f32.mrb[10].mxu0  ;;  %v2038_v30 = vsel %vm2022_vm5, %v3236_v19, %v2027_v23  ;;  %v3072_v32 = vpop.f32.mrb[13].mxu1  ;;  %v4200_v34 = vsel %vm2022_vm5, %v3457_v15, %v2067_v24  ;;  %v2057_v35 = vadd.f32 1.0, %v3459_v26  ;;  %v3239_v25 = vadd.f32 %v1277_v28, %v422_v27  ;;  %v426_v15 = vld [vmem:[%s3635_s28 + $0x50] sm:$0x1]  ;;  %s3547_s28 = smov 112  }
 0x1ae   : > { %v3238_v31 = vadd.f32 %v3237_v22, %v1980_v29  ;;  %v3209_v33 = vpop.f32.mrb[11].mxu0  ;;  %3464 = vtanh.f32 %v2038_v30  ;;  %2166 = vrot.lane.b32.xlu0 %v4200_v34, %s3544_s12 }
 0x1af   : > { %v2068_v41 = vmul.f32 0.5, %v2057_v35 }
 0x1b0   : > { %v2028_v36 = vmul.f32 0.5, %v3238_v31  ;;  %v3461_v37 = vpop.eup %3460  ;;  %v1282_v39 = vpop.f32.mrb[14].mxu1 }
 0x1b1   : > { %v1985_v40 = vpop.f32.mrb[12].mxu0  ;;  %v3075_v44 = vpop.f32.mrb[15].mxu1  ;;  %v2058_v46 = vadd.f32 1.0, %v3461_v37  ;;  %v4209_v47 = vsel %vm2022_vm5, %v3459_v26, %v2068_v41  ;;  %v3241_v48 = vadd.f32 %v1282_v39, %v423_v38 }
 0x1b2   : > { %v2039_v42 = vsel %vm2022_vm5, %v3238_v31, %v2028_v36  ;;  %v3240_v43 = vadd.f32 %v3239_v25, %v1985_v40  ;;  %v3212_v45 = vpop.f32.mrb[13].mxu0  ;;  %2168 = vrot.lane.b32.xlu0 %v4209_v47, %s3544_s12 }
 0x1b3   : > { %3466 = vtanh.f32 %v2039_v42  ;;  %v2069_v51 = vmul.f32 0.5, %v2058_v46 }
 0x1b4   : > { %v2029_v49 = vmul.f32 0.5, %v3240_v43  ;;  %v3463_v52 = vpop.eup %3462  ;;  %v1287_v54 = vpop.f32.mrb[16].mxu1 }
 0x1b5   : > { %v1990_v55 = vpop.f32.mrb[14].mxu0  ;;  %v3078_v58 = vpop.f32.mrb[17].mxu1  ;;  %v4218_v60 = vsel %vm2022_vm5, %v3461_v37, %v2069_v51  ;;  %v2059_v61 = vadd.f32 1.0, %v3463_v52  ;;  %v3243_v62 = vadd.f32 %v1287_v54, %v424_v53  ;;  %v409_v51 = vld [vmem:[%s4529_s4 + $0x20] sm:$0xff] }
 0x1b6   : > { %v2040_v56 = vsel %vm2022_vm5, %v3240_v43, %v2029_v49  ;;  %v3242_v57 = vadd.f32 %v3241_v48, %v1990_v55  ;;  %v3215_v59 = vpop.f32.mrb[15].mxu0  ;;  %2170 = vrot.lane.b32.xlu1 %v4218_v60, %s3544_s12 }
 0x1b7   : > { %3468 = vtanh.f32 %v2040_v56  ;;  %v2070_v4 = vmul.f32 0.5, %v2059_v61  ;;  %v411_v59 = vld [vmem:[%s4529_s4 + $0x30] sm:$0xff]  ;;  %v410_v61 = vld [vmem:[%s4529_s4 + $0x28] sm:$0xff] }
 0x1b8   : > { %v2030_v63 = vmul.f32 0.5, %v3242_v57  ;;  %v3465_v0 = vpop.eup %3464  ;;  %v1292_v2 = vpop.f32.mrb[18].mxu1 }
 0x1b9   : > { %v1995_v3 = vpop.f32.mrb[16].mxu0  ;;  %v3081_v7 = vpop.f32.mrb[19].mxu1  ;;  %v2060_v9 = vadd.f32 1.0, %v3465_v0  ;;  %v4227_v10 = vsel %vm2022_vm5, %v3463_v52, %v2070_v4  ;;  %v3245_v11 = vadd.f32 %v1292_v2, %v425_v1  ;;  %v2090_v1 = vld [vmem:[%s3630_s16 + $0x8] sm:$0xff]  ;;  %v2089_v2 = vld [vmem:[%s3630_s16] sm:$0xff]  ;;  %v2091_v4 = vld [vmem:[%s3630_s16 + $0x10] sm:$0xff] }
 0x1ba   : > { %v2041_v5 = vsel %vm2022_vm5, %v3242_v57, %v2030_v63  ;;  %v3244_v6 = vadd.f32 %v3243_v62, %v1995_v3  ;;  %v3218_v8 = vpop.f32.mrb[17].mxu0  ;;  %2172 = vrot.lane.b32.xlu1 %v4227_v10, %s3544_s12  ;;  %v408_v57 = vld [vmem:[%s4529_s4 + $0x18] sm:$0xff]  ;;  %v415_v63 = vld [vmem:[%s4529_s4 + $0x50] sm:$0x1] }
 0x1bb   : > { %3470 = vtanh.f32 %v2041_v5  ;;  %v2071_v13 = vmul.f32 0.5, %v2060_v9  ;;  %v412_v62 = vld [vmem:[%s4529_s4 + $0x38] sm:$0xff]  ;;  %v2094_v5 = vld [vmem:[%s3630_s16 + $0x28] sm:$0xff]  ;;  %v2095_v8 = vld [vmem:[%s3630_s16 + $0x30] sm:$0xff] }
 0x1bc   : > { %v2031_v12 = vmul.f32 0.5, %v3244_v6  ;;  %v1297_v16 = vpop.f32.mrb[20].mxu1  ;;  %v2000_v17 = vpop.f32.mrb[18].mxu0  ;;  %v2092_v3 = vld [vmem:[%s3630_s16 + $0x18] sm:$0xff]  ;;  %v2098_v9 = vld [vmem:[%s3630_s16 + $0x48] sm:$0xff] }
 0x1bd   : > { %v3467_v14 = vpop.eup %3466  ;;  %v3246_v19 = vadd.f32 %v3245_v11, %v2000_v17  ;;  %v3084_v20 = vpop.f32.mrb[21].mxu1  ;;  %v4236_v22 = vsel %vm2022_vm5, %v3465_v0, %v2071_v13  ;;  %v3247_v24 = vadd.f32 %v1297_v16, %v426_v15  ;;  %v414_v0 = vld [vmem:[%s4529_s4 + $0x48] sm:$0xff]  ;;  %v2096_v7 = vld [vmem:[%s3630_s16 + $0x38] sm:$0xff]  ;;  %v2097_v11 = vld [vmem:[%s3630_s16 + $0x40] sm:$0xff] }
 0x1be   : > { %v2042_v18 = vsel %vm2022_vm5, %v3244_v6, %v2031_v12  ;;  %v3221_v21 = vpop.f32.mrb[19].mxu0  ;;  %2174 = vrot.lane.b32.xlu0 %v4236_v22, %s3544_s12  ;;  %v2061_v23 = vadd.f32 1.0, %v3467_v14  ;;  %v2093_v6 = vld [vmem:[%s3630_s16 + $0x20] sm:$0xff]  ;;  %v2099_v12 = vld [vmem:[%s3630_s16 + $0x50] sm:$0x1]  ;;  %v4326_v13 = vpop.permute.xlu0 %2272 }
 0x1bf   : > { %3472 = vtanh.f32 %v2042_v18  ;;  %v2032_v26 = vmul.f32 0.5, %v3246_v19 }
 0x1c0   : > { %v2005_v28 = vpop.f32.mrb[20].mxu0  ;;  %v2072_v29 = vmul.f32 0.5, %v2061_v23 }
 0x1c1   : > { %v3469_v27 = vpop.eup %3468  ;;  %v2043_v30 = vsel %vm2022_vm5, %v3246_v19, %v2032_v26  ;;  %v3248_v31 = vadd.f32 %v3247_v24, %v2005_v28  ;;  %v3224_v32 = vpop.f32.mrb[21].mxu0 }
 0x1c2   : > { %v2062_v33 = vadd.f32 1.0, %v3469_v27  ;;  %3474 = vtanh.f32 %v2043_v30  ;;  %v4244_v35 = vsel %vm2022_vm5, %v3467_v14, %v2072_v29  ;;  %v4328_v14 = vpop.permute.xlu1 %2267 }
 0x1c3   : > { %v2033_v25 = vmul.f32 0.5, %v3248_v31  ;;  %2176 = vrot.lane.b32.xlu1 %v4244_v35, %s3544_s12 }
 0x1c4   : > { %v2073_v36 = vmul.f32 0.5, %v2062_v33 }
 0x1c5   : > { %v3471_v37 = vpop.eup %3470  ;;  %v2044_v38 = vsel %vm2022_vm5, %v3248_v31, %v2033_v25 }
 0x1c6   : > { %v4252_v39 = vsel %vm2022_vm5, %v3469_v27, %v2073_v36  ;;  %v2063_v40 = vadd.f32 1.0, %v3471_v37  ;;  %3476 = vtanh.f32 %v2044_v38  ;;  %v4331_v17 = vpop.permute.xlu1 %2277 }
 0x1c7   : > { %2178 = vrot.lane.b32.xlu0 %v4252_v39, %s3544_s12 }
 0x1c8   : > { %v2074_v41 = vmul.f32 0.5, %v2063_v40 }
 0x1c9   : > { %v3473_v42 = vpop.eup %3472 }
 0x1ca   : > { %v4258_v43 = vsel %vm2022_vm5, %v3471_v37, %v2074_v41  ;;  %v2064_v44 = vadd.f32 1.0, %v3473_v42 }
 0x1cb   : > { %2180 = vrot.lane.b32.xlu1 %v4258_v43, %s3544_s12 }
 0x1cc   : > { %v2075_v45 = vmul.f32 0.5, %v2064_v44  ;;  %v3475_v46 = vpop.eup %3474 }
 0x1cd   : > { %v2065_v49 = vadd.f32 1.0, %v3475_v46 }
 0x1ce   : > { %v4264_v48 = vsel %vm2022_vm5, %v3473_v42, %v2075_v45 }
 0x1cf   : > { %2182 = vrot.lane.b32.xlu0 %v4264_v48, %s3544_s12  ;;  %v2076_v52 = vmul.f32 0.5, %v2065_v49 }
 0x1d0   : > { %v3477_v53 = vpop.eup %3476 }
 0x1d1   : > { %v4273_v54 = vsel %vm2022_vm5, %v3475_v46, %v2076_v52  ;;  %v2066_v55 = vadd.f32 1.0, %v3477_v53 }
 0x1d2   : > { %2184 = vrot.lane.b32.xlu1 %v4273_v54, %s3544_s12 }
 0x1d3   : > { %2287 = vperm.xlu0 %3455, %v409_v51   ;;  %v2077_v56 = vmul.f32 0.5, %v2066_v55 }
 0x1d5   : > { %v4282_v58 = vsel %vm2022_vm5, %v3477_v53, %v2077_v56 }
 0x1d6   : > { %2282 = vperm.xlu1 %3454, %v408_v57  }
 0x1d7   : > { %2186 = vrot.lane.b32.xlu0 %v4282_v58, %s3544_s12  ;;  %s3546_s12 = smov 120  }
 0x1da   : > { %2292 = vperm.xlu1 %3454, %v410_v61  }
 0x1db   : > { %2297 = vperm.xlu0 %3455, %v411_v59  }
 0x1de   : > { %2302 = vperm.xlu1 %3454, %v412_v62  }
 0x1df   : > { %2307 = vperm.xlu0 %3455, %v413_v50  }
 0x1e2   : > { %2312 = vperm.xlu1 %3454, %v414_v0  }
 0x1e3   : > { %2317 = vperm.xlu0 %3455, %v415_v63  }
 0x1e6   : > { %2111 = vrot.lane.b32.xlu1 %v2089_v2, %s3545_s11 }
 0x1e7   : > { %2113 = vrot.lane.b32.xlu0 %v2090_v1, %s3545_s11 }
 0x1ea   : > { %2115 = vrot.lane.b32.xlu1 %v2091_v4, %s3545_s11 }
 0x1eb   : > { %2117 = vrot.lane.b32.xlu0 %v2092_v3, %s3545_s11 }
 0x1ee   : > { %2119 = vrot.lane.b32.xlu1 %v2093_v6, %s3545_s11 }
 0x1ef   : > { %2121 = vrot.lane.b32.xlu0 %v2094_v5, %s3545_s11 }
 0x1f2   : > { %2123 = vrot.lane.b32.xlu1 %v2095_v8, %s3545_s11 }
 0x1f3   : > { %2125 = vrot.lane.b32.xlu0 %v2096_v7, %s3545_s11 }
 0x1f6   : > { %2127 = vrot.lane.b32.xlu1 %v2097_v11, %s3545_s11 }
 0x1f7   : > { %2129 = vrot.lane.b32.xlu0 %v2098_v9, %s3545_s11 }
 0x1fa   : > { %2131 = vrot.lane.b32.xlu1 %v2099_v12, %s3545_s11 }
 0x220   : > { %v2167_v15 = vpop.permute.xlu0 %2166 }
 0x221   : > { %v2199_v16 = vmul.f32 %v2167_v15, %v4200_v34 }
 0x223   : > { %2221 = vrot.lane.b32.xlu0 %v2199_v16, %s3545_s11 }
 0x224   : > { %v2169_v18 = vpop.permute.xlu0 %2168 }
 0x225   : > { %v2200_v19 = vmul.f32 %v2169_v18, %v4209_v47 }
 0x227   : > { %2223 = vrot.lane.b32.xlu1 %v2200_v19, %s3545_s11 }
 0x228   : > { %v2171_v20 = vpop.permute.xlu1 %2170 }
 0x229   : > { %v2201_v21 = vmul.f32 %v2171_v20, %v4218_v60 }
 0x22b   : > { %2225 = vrot.lane.b32.xlu0 %v2201_v21, %s3545_s11 }
 0x22c   : > { %v2173_v23 = vpop.permute.xlu1 %2172 }
 0x22d   : > { %v2202_v24 = vmul.f32 %v2173_v23, %v4227_v10 }
 0x22f   : > { %2227 = vrot.lane.b32.xlu1 %v2202_v24, %s3545_s11 }
 0x230   : > { %v2175_v26 = vpop.permute.xlu0 %2174 }
 0x231   : > { %v2203_v27 = vmul.f32 %v2175_v26, %v4236_v22 }
 0x233   : > { %2229 = vrot.lane.b32.xlu0 %v2203_v27, %s3545_s11 }
 0x235   : > { %v2177_v28 = vpop.permute.xlu1 %2176 }
 0x236   : > { %v2204_v29 = vmul.f32 %v2177_v28, %v4244_v35 }
 0x238   : > { %2231 = vrot.lane.b32.xlu1 %v2204_v29, %s3545_s11 }
 0x239   : > { %v2179_v30 = vpop.permute.xlu0 %2178 }
 0x23a   : > { %v2205_v31 = vmul.f32 %v2179_v30, %v4252_v39 }
 0x23c   : > { %2233 = vrot.lane.b32.xlu0 %v2205_v31, %s3545_s11 }
 0x23d   : > { %v2181_v32 = vpop.permute.xlu1 %2180 }
 0x23e   : > { %v2206_v33 = vmul.f32 %v2181_v32, %v4258_v43 }
 0x240   : > { %2235 = vrot.lane.b32.xlu1 %v2206_v33, %s3545_s11 }
 0x241   : > { %v2183_v25 = vpop.permute.xlu0 %2182 }
 0x242   : > { %v2207_v36 = vmul.f32 %v2183_v25, %v4264_v48 }
 0x244   : > { %2237 = vrot.lane.b32.xlu0 %v2207_v36, %s3545_s11  ;;  %v2185_v37 = vpop.permute.xlu1 %2184 }
 0x245   : > { %v2208_v38 = vmul.f32 %v2185_v37, %v4273_v54 }
 0x247   : > { %2239 = vrot.lane.b32.xlu1 %v2208_v38, %s3545_s11 }
 0x252   : > { %v4352_v40 = vpop.permute.xlu0 %2287 }
 0x255   : > { %v4356_v44 = vpop.permute.xlu1 %2282 }
 0x256   : > { %v2187_v41 = vpop.permute.xlu0 %2186 }
 0x257   : > { %v2209_v42 = vmul.f32 %v2187_v41, %v4282_v58 }
 0x259   : > { %2241 = vrot.lane.b32.xlu0 %v2209_v42, %s3545_s11  ;;  %v4358_v45 = vpop.permute.xlu1 %2292 }
 0x25a   : > { %v4360_v46 = vpop.permute.xlu0 %2297 }
 0x25d   : > { %v4362_v49 = vpop.permute.xlu1 %2302 }
 0x25e   : > { %v4364_v51 = vpop.permute.xlu0 %2307 }
 0x261   : > { %v4366_v52 = vpop.permute.xlu1 %2312 }
 0x262   : > { %v4368_v53 = vpop.permute.xlu0 %2317 }
 0x265   : > { %v2112_v55 = vpop.permute.xlu1 %2111 }
 0x266   : > { %v2114_v56 = vpop.permute.xlu0 %2113  ;;  %v2144_v2 = vmul.f32 %v2112_v55, %v4200_v34 }
 0x267   : > { %v2145_v7 = vmul.f32 %v2114_v56, %v4209_v47 }
 0x269   : > { %v2116_v57 = vpop.permute.xlu1 %2115 }
 0x26a   : > { %v2118_v59 = vpop.permute.xlu0 %2117  ;;  %v2146_v11 = vmul.f32 %v2116_v57, %v4218_v60 }
 0x26b   : > { %v2147_v19 = vmul.f32 %v2118_v59, %v4227_v10 }
 0x26d   : > { %v2120_v61 = vpop.permute.xlu1 %2119 }
 0x26e   : > { %v2122_v50 = vpop.permute.xlu0 %2121  ;;  %v2148_v24 = vmul.f32 %v2120_v61, %v4236_v22 }
 0x26f   : > { %v2149_v31 = vmul.f32 %v2122_v50, %v4244_v35 }
 0x271   : > { %v2124_v62 = vpop.permute.xlu1 %2123 }
 0x272   : > { %v2126_v63 = vpop.permute.xlu0 %2125  ;;  %v2150_v36 = vmul.f32 %v2124_v62, %v4252_v39 }
 0x273   : > { %v2151_v42 = vmul.f32 %v2126_v63, %v4258_v43 }
 0x275   : > { %v2128_v0 = vpop.permute.xlu1 %2127 }
 0x276   : > { %v2130_v1 = vpop.permute.xlu0 %2129  ;;  %v2152_v50 = vmul.f32 %v2128_v0, %v4264_v48 }
 0x277   : > { %v2153_v63 = vmul.f32 %v2130_v1, %v4273_v54 }
 0x279   : > { %v4371_v4 = vpop.permute.xlu1 %2131 }
 0x295   : > { %v2222_v3 = vpop.permute.xlu0 %2221 }
 0x296   : > { %v2254_v5 = vadd.f32 %v2222_v3, %v2144_v2 }
 0x298   : > { %v4374_v6 = vmul.f32 %v4328_v14, %v2254_v5 }
 0x299   : > { %v2224_v8 = vpop.permute.xlu1 %2223 }
 0x29a   : > { %3478 = vtanh.f32 %v4374_v6  ;;  %v2255_v9 = vadd.f32 %v2224_v8, %v2145_v7 }
 0x29c   : > { %v4380_v12 = vmul.f32 %v4326_v13, %v2255_v9 }
 0x29d   : > { %v2226_v15 = vpop.permute.xlu0 %2225 }
 0x29e   : > { %v2256_v16 = vadd.f32 %v2226_v15, %v2146_v11  ;;  %3480 = vtanh.f32 %v4380_v12 }
 0x2a0   : > { %v4384_v18 = vmul.f32 %v4331_v17, %v2256_v16 }
 0x2a1   : > { %v2228_v20 = vpop.permute.xlu1 %2227 }
 0x2a2   : > { %3482 = vtanh.f32 %v4384_v18  ;;  %v2257_v21 = vadd.f32 %v2228_v20, %v2147_v19  ;;  %v2154_v19 = vmul.f32 %v4371_v4, %v4282_v58 }
 0x2a4   : > { %v3479_v23 = vpop.eup %3478  ;;  %v4390_v26 = vmul.f32 %v4356_v44, %v2257_v21 }
 0x2a5   : > { %v2230_v27 = vpop.permute.xlu0 %2229  ;;  %2353 = vrot.lane.b32.xlu1 %v3479_v23, %s3545_s11 }
 0x2a6   : > { %v2258_v28 = vadd.f32 %v2230_v27, %v2148_v24  ;;  %3484 = vtanh.f32 %v4390_v26 }
 0x2a8   : > { %v2324_v29 = vmul.f32 %v4352_v40, %v2258_v28  ;;  %v3481_v30 = vpop.eup %3480 }
 0x2a9   : > { %2355 = vrot.lane.b32.xlu0 %v3481_v30, %s3545_s11 }
 0x2aa   : > { %3486 = vtanh.f32 %v2324_v29  ;;  %v2232_v32 = vpop.permute.xlu1 %2231 }
 0x2ab   : > { %v2259_v33 = vadd.f32 %v2232_v32, %v2149_v31 }
 0x2ac   : > { %v3483_v25 = vpop.eup %3482 }
 0x2ad   : > { %v2325_v37 = vmul.f32 %v4358_v45, %v2259_v33  ;;  %2357 = vrot.lane.b32.xlu1 %v3483_v25, %s3545_s11 }
 0x2ae   : > { %v2234_v38 = vpop.permute.xlu0 %2233 }
 0x2af   : > { %v2260_v41 = vadd.f32 %v2234_v38, %v2150_v36  ;;  %3488 = vtanh.f32 %v2325_v37 }
 0x2b0   : > { %v3485_v56 = vpop.eup %3484 }
 0x2b1   : > { %v2326_v55 = vmul.f32 %v4360_v46, %v2260_v41  ;;  %2359 = vrot.lane.b32.xlu0 %v3485_v56, %s3545_s11 }
 0x2b2   : > { %v2236_v57 = vpop.permute.xlu1 %2235 }
 0x2b3   : > { %3490 = vtanh.f32 %v2326_v55  ;;  %v2261_v59 = vadd.f32 %v2236_v57, %v2151_v42 }
 0x2b4   : > { %v3487_v61 = vpop.eup %3486 }
 0x2b5   : > { %v2327_v62 = vmul.f32 %v4362_v49, %v2261_v59  ;;  %2361 = vrot.lane.b32.xlu1 %v3487_v61, %s3545_s11 }
 0x2b6   : > { %v2238_v2 = vpop.permute.xlu0 %2237 }
 0x2b7   : > { %3492 = vtanh.f32 %v2327_v62  ;;  %v2262_v3 = vadd.f32 %v2238_v2, %v2152_v50 }
 0x2b9   : > { %v2328_v5 = vmul.f32 %v4364_v51, %v2262_v3  ;;  %v3489_v7 = vpop.eup %3488  ;;  %v2240_v8 = vpop.permute.xlu1 %2239 }
 0x2ba   : > { %2363 = vrot.lane.b32.xlu0 %v3489_v7, %s3545_s11  ;;  %v2263_v9 = vadd.f32 %v2240_v8, %v2153_v63 }
 0x2bb   : > { %3494 = vtanh.f32 %v2328_v5 }
 0x2bc   : > { %v2329_v0 = vmul.f32 %v4366_v52, %v2263_v9 }
 0x2bd   : > { %v3491_v11 = vpop.eup %3490 }
 0x2be   : > { %2365 = vrot.lane.b32.xlu1 %v3491_v11, %s3545_s11  ;;  %3496 = vtanh.f32 %v2329_v0 }
 0x2c1   : > { %v3493_v15 = vpop.eup %3492 }
 0x2c2   : > { %2367 = vrot.lane.b32.xlu0 %v3493_v15, %s3545_s11 }
 0x2c5   : > { %v3495_v16 = vpop.eup %3494 }
 0x2c6   : > { %2369 = vrot.lane.b32.xlu1 %v3495_v16, %s3545_s11 }
 0x2c8   : > { %v3497_v1 = vpop.eup %3496 }
 0x2c9   : > { %2371 = vrot.lane.b32.xlu0 %v3497_v1, %s3545_s11 }
 0x2cb   : > { %v2242_v20 = vpop.permute.xlu0 %2241 }
 0x2cc   : > { %v2264_v21 = vadd.f32 %v2242_v20, %v2154_v19 }
 0x2cd   : > { %2419 = vrot.lane.b32.xlu0 %v4374_v6, %s3546_s12 }
 0x2ce   : > { %v2330_v23 = vmul.f32 %v4368_v53, %v2264_v21 }
 0x2d0   : > { %3498 = vtanh.f32 %v2330_v23 }
 0x2d1   : > { %2423 = vrot.lane.b32.xlu0 %v4384_v18, %s3546_s12 }
 0x2d5   : > { %2427 = vrot.lane.b32.xlu0 %v2324_v29, %s3546_s12 }
 0x2d9   : > { %2431 = vrot.lane.b32.xlu0 %v2326_v55, %s3546_s12 }
 0x2da   : > { %v3499_v24 = vpop.eup %3498 }
 0x2db   : > { %2373 = vrot.lane.b32.xlu1 %v3499_v24, %s3545_s11 }
 0x2dd   : > { %2435 = vrot.lane.b32.xlu0 %v2328_v5, %s3546_s12 }
 0x2df   : > { %2421 = vrot.lane.b32.xlu1 %v4380_v12, %s3546_s12 }
 0x2e1   : > { %2439 = vrot.lane.b32.xlu0 %v2330_v23, %s3546_s12 }
 0x2e3   : > { %2425 = vrot.lane.b32.xlu1 %v4390_v26, %s3546_s12 }
 0x2e7   : > { %2429 = vrot.lane.b32.xlu1 %v2325_v37, %s3546_s12 }
 0x2eb   : > { %2433 = vrot.lane.b32.xlu1 %v2327_v62, %s3546_s12 }
 0x2ef   : > { %2437 = vrot.lane.b32.xlu1 %v2329_v0, %s3546_s12 }
 0x317   : > { %v2354_v4 = vpop.permute.xlu1 %2353 }
 0x318   : > { %v2386_v6 = vmul.f32 %v2354_v4, %v4200_v34 }
 0x31a   : > { %v2397_v27 = vmul.f32 %v2386_v6, %v4328_v14 }
 0x31b   : > { %v2356_v18 = vpop.permute.xlu0 %2355 }
 0x31c   : > { %2475 = vrot.lane.b32.xlu1 %v2397_v27, %s3547_s28  ;;  %v2387_v28 = vmul.f32 %v2356_v18, %v4209_v47 }
 0x31e   : > { %v2398_v29 = vmul.f32 %v2387_v28, %v4326_v13 }
 0x31f   : > { %v2358_v12 = vpop.permute.xlu1 %2357 }
 0x320   : > { %v2388_v30 = vmul.f32 %v2358_v12, %v4218_v60  ;;  %2477 = vrot.lane.b32.xlu0 %v2398_v29, %s3547_s28 }
 0x322   : > { %v2399_v26 = vmul.f32 %v2388_v30, %v4331_v17 }
 0x323   : > { %v2360_v31 = vpop.permute.xlu0 %2359 }
 0x324   : > { %2479 = vrot.lane.b32.xlu1 %v2399_v26, %s3547_s28  ;;  %v2389_v34 = vmul.f32 %v2360_v31, %v4227_v10 }
 0x326   : > { %v2400_v14 = vmul.f32 %v2389_v34, %v4356_v44 }
 0x327   : > { %v2362_v32 = vpop.permute.xlu1 %2361 }
 0x328   : > { %v2390_v33 = vmul.f32 %v2362_v32, %v4236_v22  ;;  %2481 = vrot.lane.b32.xlu0 %v2400_v14, %s3547_s28 }
 0x32a   : > { %v2401_v47 = vmul.f32 %v2390_v33, %v4352_v40 }
 0x32c   : > { %v2364_v13 = vpop.permute.xlu0 %2363  ;;  %2483 = vrot.lane.b32.xlu1 %v2401_v47, %s3547_s28 }
 0x32d   : > { %v2391_v60 = vmul.f32 %v2364_v13, %v4244_v35 }
 0x32f   : > { %v2402_v17 = vmul.f32 %v2391_v60, %v4358_v45 }
 0x330   : > { %v2366_v25 = vpop.permute.xlu1 %2365 }
 0x331   : > { %v2392_v36 = vmul.f32 %v2366_v25, %v4252_v39  ;;  %2485 = vrot.lane.b32.xlu0 %v2402_v17, %s3547_s28 }
 0x333   : > { %v2403_v10 = vmul.f32 %v2392_v36, %v4360_v46 }
 0x334   : > { %v2368_v22 = vpop.permute.xlu0 %2367 }
 0x335   : > { %v2393_v44 = vmul.f32 %v2368_v22, %v4258_v43  ;;  %2487 = vrot.lane.b32.xlu1 %v2403_v10, %s3547_s28 }
 0x337   : > { %v2404_v40 = vmul.f32 %v2393_v44, %v4362_v49 }
 0x338   : > { %v2370_v35 = vpop.permute.xlu1 %2369 }
 0x339   : > { %v2394_v45 = vmul.f32 %v2370_v35, %v4264_v48  ;;  %2489 = vrot.lane.b32.xlu0 %v2404_v40, %s3547_s28 }
 0x33b   : > { %v2405_v39 = vmul.f32 %v2394_v45, %v4364_v51  ;;  %v2372_v37 = vpop.permute.xlu0 %2371 }
 0x33c   : > { %v2395_v46 = vmul.f32 %v2372_v37, %v4273_v54 }
 0x33d   : > { %2491 = vrot.lane.b32.xlu1 %v2405_v39, %s3547_s28 }
 0x33e   : > { %v2406_v43 = vmul.f32 %v2395_v46, %v4366_v52 }
 0x33f   : > { %v2420_v38 = vpop.permute.xlu0 %2419 }
 0x340   : > { %2452 = vst.msk [vmem:[%s3630_s16] sm:$0xff] %vm439_vm3, %v2420_v38  ;;  %2493 = vrot.lane.b32.xlu0 %v2406_v43, %s3547_s28 }
 0x343   : > { %v2424_v49 = vpop.permute.xlu0 %2423 }
 0x344   : > { %2454 = vst.msk [vmem:[%s3630_s16 + $0x10] sm:$0xff] %vm439_vm3, %v2424_v49 }
 0x347   : > { %v2428_v48 = vpop.permute.xlu0 %2427 }
 0x348   : > { %2456 = vst.msk [vmem:[%s3630_s16 + $0x20] sm:$0xff] %vm439_vm3, %v2428_v48 }
 0x34b   : > { %v2432_v54 = vpop.permute.xlu0 %2431 }
 0x34c   : > { %2458 = vst.msk [vmem:[%s3630_s16 + $0x30] sm:$0xff] %vm439_vm3, %v2432_v54 }
 0x34d   : > { %v2374_v51 = vpop.permute.xlu1 %2373 }
 0x34e   : > { %v2396_v52 = vmul.f32 %v2374_v51, %v4282_v58 }
 0x34f   : > { %v2436_v42 = vpop.permute.xlu0 %2435 }
 0x350   : > { %v2407_v41 = vmul.f32 %v2396_v52, %v4368_v53  ;;  %2460 = vst.msk [vmem:[%s3630_s16 + $0x40] sm:$0xff] %vm439_vm3, %v2436_v42 }
 0x351   : > { %v2422_v55 = vpop.permute.xlu1 %2421 }
 0x352   : > { %2453 = vst.msk [vmem:[%s3630_s16 + $0x8] sm:$0xff] %vm439_vm3, %v2422_v55  ;;  %2495 = vrot.lane.b32.xlu1 %v2407_v41, %s3547_s28 }
 0x353   : > { %v2440_v56 = vpop.permute.xlu0 %2439 }
 0x354   : > { %2463 = vst.msk [vmem:[%s3630_s16 + $0x50] sm:$0x1] %vm2462_vm6, %v2440_v56 }
 0x355   : > { %v2426_v57 = vpop.permute.xlu1 %2425 }
 0x356   : > { %2455 = vst.msk [vmem:[%s3630_s16 + $0x18] sm:$0xff] %vm439_vm3, %v2426_v57 }
 0x359   : > { %v2430_v58 = vpop.permute.xlu1 %2429 }
 0x35a   : > { %2457 = vst.msk [vmem:[%s3630_s16 + $0x28] sm:$0xff] %vm439_vm3, %v2430_v58 }
 0x35d   : > { %v2434_v53 = vpop.permute.xlu1 %2433 }
 0x35e   : > { %2459 = vst.msk [vmem:[%s3630_s16 + $0x38] sm:$0xff] %vm439_vm3, %v2434_v53 }
 0x361   : > { %v2438_v59 = vpop.permute.xlu1 %2437 }
 0x362   : > { %2461 = vst.msk [vmem:[%s3630_s16 + $0x48] sm:$0xff] %vm439_vm3, %v2438_v59 }
 0x38e   : > { %v2476_v61 = vpop.permute.xlu1 %2475 }
 0x38f   : > { %2508 = vst.msk [vmem:[%s3640_s0] sm:$0xff] %vm439_vm3, %v2476_v61  ;;  %2519 = vst.msk [vmem:[#allocation2 + $0xa] sm:$0xff] %vm439_vm3, %v2476_v61 }
 0x392   : > { %v2478_v50 = vpop.permute.xlu0 %2477 }
 0x393   : > { %2509 = vst.msk [vmem:[%s3640_s0 + $0x8] sm:$0xff] %vm439_vm3, %v2478_v50  ;;  %2520 = vst.msk [vmem:[#allocation2 + $0x12] sm:$0xff] %vm439_vm3, %v2478_v50 }
 0x396   : > { %v2480_v62 = vpop.permute.xlu1 %2479 }
 0x397   : > { %2510 = vst.msk [vmem:[%s3640_s0 + $0x10] sm:$0xff] %vm439_vm3, %v2480_v62  ;;  %2521 = vst.msk [vmem:[#allocation2 + $0x1a] sm:$0xff] %vm439_vm3, %v2480_v62 }
 0x39a   : > { %v2482_v2 = vpop.permute.xlu0 %2481 }
 0x39b   : > { %2511 = vst.msk [vmem:[%s3640_s0 + $0x18] sm:$0xff] %vm439_vm3, %v2482_v2  ;;  %2522 = vst.msk [vmem:[#allocation2 + $0x22] sm:$0xff] %vm439_vm3, %v2482_v2 }
 0x39e   : > { %v2484_v3 = vpop.permute.xlu1 %2483 }
 0x39f   : > { %2512 = vst.msk [vmem:[%s3640_s0 + $0x20] sm:$0xff] %vm439_vm3, %v2484_v3  ;;  %2523 = vst.msk [vmem:[#allocation2 + $0x2a] sm:$0xff] %vm439_vm3, %v2484_v3 }
 0x3a3   : > { %v2486_v63 = vpop.permute.xlu0 %2485 }
 0x3a4   : > { %2513 = vst.msk [vmem:[%s3640_s0 + $0x28] sm:$0xff] %vm439_vm3, %v2486_v63  ;;  %2524 = vst.msk [vmem:[#allocation2 + $0x32] sm:$0xff] %vm439_vm3, %v2486_v63 }
 0x3a7   : > { %v2488_v5 = vpop.permute.xlu1 %2487 }
 0x3a8   : > { %2514 = vst.msk [vmem:[%s3640_s0 + $0x30] sm:$0xff] %vm439_vm3, %v2488_v5  ;;  %2525 = vst.msk [vmem:[#allocation2 + $0x3a] sm:$0xff] %vm439_vm3, %v2488_v5 }
 0x3ab   : > { %v2490_v7 = vpop.permute.xlu0 %2489 }
 0x3ac   : > { %2515 = vst.msk [vmem:[%s3640_s0 + $0x38] sm:$0xff] %vm439_vm3, %v2490_v7  ;;  %2526 = vst.msk [vmem:[#allocation2 + $0x42] sm:$0xff] %vm439_vm3, %v2490_v7 }
 0x3af   : > { %v2492_v8 = vpop.permute.xlu1 %2491 }
 0x3b0   : > { %2516 = vst.msk [vmem:[%s3640_s0 + $0x40] sm:$0xff] %vm439_vm3, %v2492_v8  ;;  %2527 = vst.msk [vmem:[#allocation2 + $0x4a] sm:$0xff] %vm439_vm3, %v2492_v8 }
 0x3b2   : > { %v2494_v9 = vpop.permute.xlu0 %2493 }
 0x3b3   : > { %2517 = vst.msk [vmem:[%s3640_s0 + $0x48] sm:$0xff] %vm439_vm3, %v2494_v9  ;;  %2528 = vst.msk [vmem:[#allocation2 + $0x52] sm:$0xff] %vm439_vm3, %v2494_v9 }
 0x3c4   : > { %v2496_v11 = vpop.permute.xlu1 %2495 }
 0x3c5   : > { %2518 = vst.msk [vmem:[%s3640_s0 + $0x50] sm:$0x1] %vm2462_vm6, %v2496_v11  ;;  %2529 = vst.msk [vmem:[#allocation2 + $0x5a] sm:$0x1] %vm2462_vm6, %v2496_v11 }
 0x3c6 PF: > { %s17_s25 = sadd.s32 1, %s3538_s25   ;;  %s4534_s21 = smov %s3530_s23 }
 0x3c7   : > { %p14_p8 = scmp.ge.s32.totalorder %s17_s25, 10   ;;  %s4535_s22 = smov %s3534_s24 }
 0x3c8   : > { %s4536_s23 = smov %s4539_s26  ;;  %s4537_s24 = smov %s4543_s27 }
 0x3c9   :  { %16 = sbr.rel (!%p14_p8) target bundleno = 3 (0x3), region = 100 }

// kernel: _lambda_.21
= control target key start
LH: loop header
LB: loop body
LE: loop exit
PB: predicated region body
PF: predicated region fallthrough
CT: control target
= control target key end

     0   :  { %s3583_s21 = smov 0   ;;  %s3585_s22 = smov 0   ;;  %s4525_s0 = inlined_call_operand.vmem [shape: f32[2,81,8], index: 0, kind: input, shape index: {}]   ;;  %s4526_s1 = inlined_call_operand.vmem [shape: f32[2,81,8], index: 1, kind: input, shape index: {}]   ;;  %s4527_s2 = inlined_call_operand.vmem [shape: f32[2,3,81,32], index: 2, kind: input, shape index: {}]   ;;  %s4528_s3 = inlined_call_operand.vmem [shape: f32[9,8,32], index: 3, kind: input, shape index: {}]   ;;  %s4529_s4 = inlined_call_operand.vmem [shape: f32[81,1], index: 4, kind: input, shape index: {}]   ;;  %s4530_s5 = inlined_call_operand.vmem [shape: f32[2,3,81,8], index: 5, kind: output, shape index: {0}]   ;;  %s4531_s6 = inlined_call_operand.vmem [shape: f32[2,81,8], index: 6, kind: output, shape index: {1}]  }
   0x1   :  { %4532 = sst [smem:[#allocation3_spill]] %s4525_s0  ;;  %s3587_s23 = smov 0  }
   0x2   :  { %s3589_s24 = smov 0   ;;  %s3591_s25 = smov 0  }
   0x3 LB: > { %s26_s26 = sadd.s32 1, %s3530_s23  ;;  %s29_s27 = sadd.s32 1, %s3534_s24  ;;  %s3538_s25 = sphi %s3591_s25, %s17_s25   ;;  %s3534_s24 = sphi %s3589_s24, %s4537_s24   ;;  %s3530_s23 = sphi %s3587_s23, %s4536_s23   ;;  %s3526_s22 = sphi %s3585_s22, %s4535_s22   ;;  %s3522_s21 = sphi %s3583_s21, %s4534_s21  }
   0x4   : > { %p27_p0 = scmp.ge.s32.totalorder %s26_s26, 3  ;;  %p2686_p1 = scmp.ge.s32.totalorder %s3538_s25, 1 }
   0x5   : > { %p255_p2 = scmp.lt.s32.totalorder %s3538_s25, 7 }
   0x6   : > { %s4539_s26 = smov (%p27_p0, %s26_s26), 0  ;;  %s4541_s27 = smov (!%p27_p0, %s29_s27), %s3534_s24 }
   0x7   : > { %p256_p3 = pnand %p2686_p1, %p255_p2  ;;  %p31_p4 = scmp.ge.s32.totalorder %s4541_s27, 2 }
   0x8   : > { %p308_p5 = scmp.lt.s32.totalorder (!%p256_p3), %s3526_s22, 1  ;;  %p320_p6 = scmp.lt.s32.totalorder (!%p256_p3), %s3522_s21, 2 }
   0x9   : > { %s4543_s27 = smov (%p31_p4, %s4541_s27), 0  ;;  %259 = sbr.rel (%p256_p3) target bundleno = 966 (0x3c6), region = 40 }
   0xa   : > { %s4533_s0 = sld [smem:[#allocation3_spill]] (!%p256_p3)  ;;  %p2692_p7 = scmp.ne.s32.totalorder (!%p256_p3), %s3522_s21, 0 }
  0x10   : > { %s4545_s22 = smov (!%p308_p5, %s3526_s22), 1  ;;  %vm345_vm0 = vcmask (!%p2692_p7), 64512   ;;  %vm358_vm1 = vcmask (!%p2692_p7), 61440   ;;  %v3540_v3 = vmov (!%p2692_p7), 0.0   ;;  %vm381_vm2 = vcmask (!%p2692_p7), 57344  }
  0x11   : > { %s321_s28 = scalar_select %p320_p6, %s3522_s21, 2 }
  0x12   : > { %s3403_s29 = smul.u32 88, %s4545_s22  ;;  %347 = vst.msk [vmem:[#allocation2 + $0x8] sm:$0xff] (!%p2692_p7), %vm345_vm0, %v3540_v3  ;;  %346 = vst.msk [vmem:[#allocation2] sm:$0xff] (!%p2692_p7), %vm345_vm0, %v3540_v3 }
  0x13   : > { %s3404_s30 = smul.u32 11, %s321_s28  ;;  %348 = vst.msk [vmem:[#allocation2 + $0x10] sm:$0xff] (!%p2692_p7), %vm345_vm0, %v3540_v3  ;;  %349 = vst.msk [vmem:[#allocation2 + $0x18] sm:$0xff] (!%p2692_p7), %vm345_vm0, %v3540_v3 }
  0x14   : > { %s3620_s9 = scalar_lea.vmem %s4533_s0, %s3403_s29  ;;  %s3625_s12 = scalar_lea.vmem %s4526_s1, %s3403_s29  ;;  %350 = vst.msk [vmem:[#allocation2 + $0x20] sm:$0xff] (!%p2692_p7), %vm345_vm0, %v3540_v3  ;;  %351 = vst.msk [vmem:[#allocation2 + $0x28] sm:$0xff] (!%p2692_p7), %vm345_vm0, %v3540_v3 }
  0x15   : > { %s3405_s13 = smul.u32 33, %s4545_s22  ;;  %s3630_s16 = scalar_lea.vmem %s4531_s6, %s3403_s29  ;;  %v360_v0 = vld [vmem:[%s3620_s9] sm:$0xff] (!%p2692_p7)  ;;  %v361_v1 = vld [vmem:[%s3620_s9 + $0x8] sm:$0xff] (!%p2692_p7)  ;;  %v362_v2 = vld [vmem:[%s3620_s9 + $0x10] sm:$0xff] (!%p2692_p7)  ;;  %352 = vst.msk [vmem:[#allocation2 + $0x30] sm:$0xff] (!%p2692_p7), %vm345_vm0, %v3540_v3 }
  0x16   : > { %344 = sbr.rel (%p2692_p7) target bundleno = 37 (0x25), region = 44  ;;  %353 = vst.msk [vmem:[#allocation2 + $0x38] sm:$0xff] (!%p2692_p7), %vm345_vm0, %v3540_v3  ;;  %354 = vst.msk [vmem:[#allocation2 + $0x40] sm:$0xff] (!%p2692_p7), %vm345_vm0, %v3540_v3  ;;  %v363_v4 = vld [vmem:[%s3620_s9 + $0x18] sm:$0xff] (!%p2692_p7)  ;;  %v364_v5 = vld [vmem:[%s3620_s9 + $0x20] sm:$0xff] (!%p2692_p7) }
  0x17   : > { %s324_s17 = sadd.s32 %s3405_s13, %s3404_s30  ;;  %355 = vst.msk [vmem:[#allocation2 + $0x48] sm:$0xff] (!%p2692_p7), %vm345_vm0, %v3540_v3  ;;  %356 = vst.msk [vmem:[#allocation2 + $0x50] sm:$0xff] (!%p2692_p7), %vm345_vm0, %v3540_v3  ;;  %v365_v6 = vld [vmem:[%s3620_s9 + $0x28] sm:$0xff] (!%p2692_p7)  ;;  %v366_v7 = vld [vmem:[%s3620_s9 + $0x30] sm:$0xff] (!%p2692_p7) }
  0x18   : > { %s2689_s18 = sshll.u32 %s324_s17, 3  ;;  %357 = vst.msk [vmem:[#allocation2 + $0x58] sm:$0xff] (!%p2692_p7), %vm345_vm0, %v3540_v3  ;;  %371 = vst.msk [vmem:[#allocation2 + $0xa] sm:$0xff] (!%p2692_p7), %vm345_vm0, %v360_v0  ;;  %v367_v8 = vld [vmem:[%s3620_s9 + $0x38] sm:$0xff] (!%p2692_p7)  ;;  %v368_v9 = vld [vmem:[%s3620_s9 + $0x40] sm:$0xff] (!%p2692_p7) }
  0x19   : > { %s3635_s28 = scalar_lea.vmem %s4527_s2, %s2689_s18  ;;  %s3640_s0 = scalar_lea.vmem %s4530_s5, %s2689_s18  ;;  %359 = vst.msk [vmem:[#allocation2 + $0x60] sm:$0x1f] (!%p2692_p7), %vm358_vm1, %v3540_v3  ;;  %v369_v10 = vld [vmem:[%s3620_s9 + $0x48] sm:$0xff] (!%p2692_p7)  ;;  %v370_v11 = vld [vmem:[%s3620_s9 + $0x50] sm:$0x1] (!%p2692_p7)  ;;  %v383_v12 = vld [vmem:[%s3625_s12] sm:$0xff] (!%p2692_p7) }
  0x1a   : > { %372 = vst.msk [vmem:[#allocation2 + $0x12] sm:$0xff] (!%p2692_p7), %vm345_vm0, %v361_v1  ;;  %373 = vst.msk [vmem:[#allocation2 + $0x1a] sm:$0xff] (!%p2692_p7), %vm345_vm0, %v362_v2  ;;  %v384_v13 = vld [vmem:[%s3625_s12 + $0x8] sm:$0xff] (!%p2692_p7)  ;;  %v385_v14 = vld [vmem:[%s3625_s12 + $0x10] sm:$0xff] (!%p2692_p7) }
  0x1b   : > { %374 = vst.msk [vmem:[#allocation2 + $0x22] sm:$0xff] (!%p2692_p7), %vm345_vm0, %v363_v4  ;;  %375 = vst.msk [vmem:[#allocation2 + $0x2a] sm:$0xff] (!%p2692_p7), %vm345_vm0, %v364_v5  ;;  %v386_v15 = vld [vmem:[%s3625_s12 + $0x18] sm:$0xff] (!%p2692_p7)  ;;  %v387_v16 = vld [vmem:[%s3625_s12 + $0x20] sm:$0xff] (!%p2692_p7) }
  0x1c   : > { %376 = vst.msk [vmem:[#allocation2 + $0x32] sm:$0xff] (!%p2692_p7), %vm345_vm0, %v365_v6  ;;  %377 = vst.msk [vmem:[#allocation2 + $0x3a] sm:$0xff] (!%p2692_p7), %vm345_vm0, %v366_v7  ;;  %v388_v17 = vld [vmem:[%s3625_s12 + $0x28] sm:$0xff] (!%p2692_p7)  ;;  %v389_v18 = vld [vmem:[%s3625_s12 + $0x30] sm:$0xff] (!%p2692_p7) }
  0x1d   : > { %378 = vst.msk [vmem:[#allocation2 + $0x42] sm:$0xff] %vm345_vm0, %v367_v8  ;;  %379 = vst.msk [vmem:[#allocation2 + $0x4a] sm:$0xff] %vm345_vm0, %v368_v9  ;;  %v390_v19 = vld [vmem:[%s3625_s12 + $0x38] sm:$0xff]  ;;  %v391_v20 = vld [vmem:[%s3625_s12 + $0x40] sm:$0xff] }
  0x1e   : > { %380 = vst.msk [vmem:[#allocation2 + $0x52] sm:$0xff] %vm345_vm0, %v369_v10  ;;  %394 = vst.msk [vmem:[%s3630_s16] sm:$0xff] %vm345_vm0, %v383_v12  ;;  %v392_v21 = vld [vmem:[%s3625_s12 + $0x48] sm:$0xff]  ;;  %v393_v22 = vld [vmem:[%s3625_s12 + $0x50] sm:$0x1] }
  0x1f   : > { %382 = vst.msk [vmem:[#allocation2 + $0x5a] sm:$0x1] %vm381_vm2, %v370_v11  ;;  %404 = vst.msk [vmem:[%s3630_s16 + $0x50] sm:$0x1] %vm381_vm2, %v393_v22 }
  0x20   : > { %395 = vst.msk [vmem:[%s3630_s16 + $0x8] sm:$0xff] %vm345_vm0, %v384_v13  ;;  %396 = vst.msk [vmem:[%s3630_s16 + $0x10] sm:$0xff] %vm345_vm0, %v385_v14 }
  0x21   : > { %397 = vst.msk [vmem:[%s3630_s16 + $0x18] sm:$0xff] %vm345_vm0, %v386_v15  ;;  %398 = vst.msk [vmem:[%s3630_s16 + $0x20] sm:$0xff] %vm345_vm0, %v387_v16 }
  0x22   : > { %399 = vst.msk [vmem:[%s3630_s16 + $0x28] sm:$0xff] %vm345_vm0, %v388_v17  ;;  %400 = vst.msk [vmem:[%s3630_s16 + $0x30] sm:$0xff] %vm345_vm0, %v389_v18 }
  0x23   : > { %401 = vst.msk [vmem:[%s3630_s16 + $0x38] sm:$0xff] %vm345_vm0, %v390_v19  ;;  %402 = vst.msk [vmem:[%s3630_s16 + $0x40] sm:$0xff] %vm345_vm0, %v391_v20 }
  0x24   : > { %403 = vst.msk [vmem:[%s3630_s16 + $0x48] sm:$0xff] %vm345_vm0, %v392_v21 }
  0x25 PF: > { %v438_v23 = vld [vmem:[%s4528_s3] sm:$0xff]  ;;  %v3541_v25 = vmov 0.0   ;;  %vm439_vm3 = vcmask 64512   ;;  %vm3542_vm4 = vmmov 0   ;;  %v2752_v28 = vld [vmem:[%s4528_s3 + $0x28] sm:$0xff]  ;;  %v2764_v42 = vld [vmem:[%s4528_s3 + $0x30] sm:$0xff] }
  0x26   : > { %v3717_v24 = vld [vmem:[%s4528_s3 + $0x20] sm:$0xff]  ;;  %2910 = vmatprep.subr.mxu1 %v3541_v25  ;;  %3050 = vmatprep.subr.mxu0 %v3541_v25  ;;  %v2704_v29 = vld [vmem:[%s4528_s3 + $0x8] sm:$0xff]  ;;  %v2716_v53 = vld [vmem:[%s4528_s3 + $0x10] sm:$0xff]  ;;  %s3544_s12 = smov 104   ;;  %s3545_s11 = smov 8   ;;  %vm2462_vm6 = vcmask 57344  }
  0x27   : > { %v427_v26 = vld [vmem:[#allocation2] sm:$0xff]  ;;  %v3721_v27 = vld [vmem:[#allocation2 + $0xa] sm:$0xff]  ;;  %2911 = vmatpush3.msra.mxu1 %v438_v23  ;;  %2912 = vmatprep.mubr.msk.f32.mxu1 %vm3542_vm4, %v3541_v25  ;;  %v3887_v61 = vld [vmem:[#allocation2 + $0x53] sm:$0xff] }
  0x28   : > { %3051 = vmatpush3.msra.mxu0 %v3717_v24  ;;  %3052 = vmatprep.mubr.msk.f32.mxu0 %vm3542_vm4, %v3541_v25  ;;  %v428_v30 = vld [vmem:[#allocation2 + $0x8] sm:$0xff]  ;;  %v1322_v63 = vld [vmem:[#allocation2 + $0x5b] sm:$0x1]  ;;  %v3990_v11 = vld [vmem:[#allocation2 + $0x52] sm:$0xff] }
  0x29   : > { %2913 = vmatmul.mubr.msk.f32.vlgmr.msra.gmra.mrb[0].mxu1 %vm439_vm3, %v427_v26  ;;  %3053 = vmatmul.mubr.msk.f32.vlgmr.msra.gmra.mrb[0].mxu0 %vm439_vm3, %v3721_v27  ;;  %v3739_v31 = vld [vmem:[#allocation2 + $0x12] sm:$0xff]  ;;  %v3752_v33 = vld [vmem:[#allocation2 + $0x1a] sm:$0xff]  ;;  %v3846_v54 = vld [vmem:[#allocation2 + $0x9] sm:$0xff] }
  0x2a   : > { %3085 = vmatprep.subr.mxu0 %v3541_v25  ;;  %2945 = vmatprep.subr.mxu1 %v3541_v25  ;;  %v429_v32 = vld [vmem:[#allocation2 + $0x10] sm:$0xff]  ;;  %v430_v34 = vld [vmem:[#allocation2 + $0x18] sm:$0xff]  ;;  %v3763_v35 = vld [vmem:[#allocation2 + $0x22] sm:$0xff] }
  0x2b   : > { %3086 = vmatpush3.msra.mxu0 %v2752_v28  ;;  %2915 = vmatprep.mubr.msk.f32.mxu1 %vm3542_vm4, %v3541_v25  ;;  %v431_v36 = vld [vmem:[#allocation2 + $0x20] sm:$0xff]  ;;  %v3772_v37 = vld [vmem:[#allocation2 + $0x2a] sm:$0xff]  ;;  %v3781_v39 = vld [vmem:[#allocation2 + $0x32] sm:$0xff] }
  0x2c   : > { %2946 = vmatpush3.msra.mxu1 %v2704_v29  ;;  %3055 = vmatprep.mubr.msk.f32.mxu0 %vm3542_vm4, %v3541_v25  ;;  %v432_v38 = vld [vmem:[#allocation2 + $0x28] sm:$0xff]  ;;  %v433_v40 = vld [vmem:[#allocation2 + $0x30] sm:$0xff]  ;;  %v434_v43 = vld [vmem:[#allocation2 + $0x38] sm:$0xff] }
  0x2d   : > { %2916 = vmatmul.mubr.msk.f32.gmra.mrb[2].mxu1 %vm439_vm3, %v428_v30  ;;  %3056 = vmatmul.mubr.msk.f32.gmra.mrb[2].mxu0 %vm439_vm3, %v3739_v31  ;;  %v1312_v41 = vld [vmem:[#allocation2 + $0xb] sm:$0xff]  ;;  %v3797_v44 = vld [vmem:[#allocation2 + $0x13] sm:$0xff]  ;;  %v435_v45 = vld [vmem:[#allocation2 + $0x40] sm:$0xff] }
  0x2e   : > { %2918 = vmatprep.mubr.msk.f32.mxu1 %vm3542_vm4, %v3541_v25  ;;  %3058 = vmatprep.mubr.msk.f32.mxu0 %vm3542_vm4, %v3541_v25  ;;  %v3809_v46 = vld [vmem:[#allocation2 + $0x1b] sm:$0xff]  ;;  %v436_v47 = vld [vmem:[#allocation2 + $0x48] sm:$0xff]  ;;  %v437_v49 = vld [vmem:[#allocation2 + $0x50] sm:$0x1] }
  0x2f   : > { %3120 = vmatprep.subr.mxu0 %v3541_v25  ;;  %2980 = vmatprep.subr.mxu1 %v3541_v25  ;;  %v3818_v48 = vld [vmem:[#allocation2 + $0x23] sm:$0xff]  ;;  %v3827_v50 = vld [vmem:[#allocation2 + $0x2b] sm:$0xff]  ;;  %v3836_v52 = vld [vmem:[#allocation2 + $0x33] sm:$0xff] }
  0x30   : > { %v604_v51 = vld [vmem:[#allocation2 + $0x1] sm:$0xff]  ;;  %v3861_v56 = vld [vmem:[#allocation2 + $0x11] sm:$0xff]  ;;  %v3873_v58 = vld [vmem:[#allocation2 + $0x19] sm:$0xff] }
  0x31   : > { %2919 = vmatmul.mubr.msk.f32.gmra.mrb[4].mxu1 %vm439_vm3, %v429_v32  ;;  %3059 = vmatmul.mubr.msk.f32.gmra.mrb[4].mxu0 %vm439_vm3, %v3752_v33  ;;  %v3848_v55 = vld [vmem:[#allocation2 + $0x3b] sm:$0xff]  ;;  %v3863_v57 = vld [vmem:[#allocation2 + $0x43] sm:$0xff]  ;;  %v3875_v59 = vld [vmem:[#allocation2 + $0x4b] sm:$0xff] }
  0x32   : > { %2921 = vmatprep.mubr.msk.f32.mxu1 %vm3542_vm4, %v3541_v25  ;;  %3061 = vmatprep.mubr.msk.f32.mxu0 %vm3542_vm4, %v3541_v25  ;;  %v3885_v60 = vld [vmem:[#allocation2 + $0x21] sm:$0xff]  ;;  %v3897_v62 = vld [vmem:[#allocation2 + $0x29] sm:$0xff]  ;;  %v3906_v0 = vld [vmem:[#allocation2 + $0x31] sm:$0xff] }
  0x33   : > { %v2776_v1 = vld [vmem:[%s4528_s3 + $0x38] sm:$0xff]  ;;  %v3930_v3 = vld [vmem:[#allocation2 + $0x41] sm:$0xff]  ;;  %v3940_v4 = vld [vmem:[#allocation2 + $0x49] sm:$0xff] }
  0x34   : > { %v3917_v2 = vld [vmem:[#allocation2 + $0x39] sm:$0xff]  ;;  %v614_v5 = vld [vmem:[#allocation2 + $0x51] sm:$0x1]  ;;  %v781_v6 = vld [vmem:[#allocation2 + $0x2] sm:$0xff] }
  0x35   : > { %2922 = vmatmul.mubr.msk.f32.gmra.mrb[6].mxu1 %vm439_vm3, %v430_v34  ;;  %3062 = vmatmul.mubr.msk.f32.gmra.mrb[6].mxu0 %vm439_vm3, %v3763_v35  ;;  %v3957_v7 = vld [vmem:[#allocation2 + $0x3a] sm:$0xff]  ;;  %v3967_v9 = vld [vmem:[#allocation2 + $0x42] sm:$0xff]  ;;  %v3980_v10 = vld [vmem:[#allocation2 + $0x4a] sm:$0xff] }
  0x36   : > { %2924 = vmatprep.mubr.msk.f32.mxu1 %vm3542_vm4, %v3541_v25  ;;  %3064 = vmatprep.mubr.msk.f32.mxu0 %vm3542_vm4, %v3541_v25  ;;  %v2728_v8 = vld [vmem:[%s4528_s3 + $0x18] sm:$0xff]  ;;  %v1499_v13 = vld [vmem:[#allocation2 + $0x62] sm:$0x1]  ;;  %v791_v15 = vld [vmem:[#allocation2 + $0x52] sm:$0x1] }
  0x37   : > { %v1498_v12 = vld [vmem:[#allocation2 + $0x5a] sm:$0xff]  ;;  %v1676_v17 = vld [vmem:[#allocation2 + $0x63] sm:$0x1]  ;;  %v1845_v20 = vld [vmem:[#allocation2 + $0x24] sm:$0xff] }
  0x38   : > { %v2788_v14 = vld [vmem:[%s4528_s3 + $0x40] sm:$0xff]  ;;  %v1843_v18 = vld [vmem:[#allocation2 + $0x14] sm:$0xff]  ;;  %v1846_v22 = vld [vmem:[#allocation2 + $0x2c] sm:$0xff] }
  0x39   : > { %2925 = vmatmul.mubr.msk.f32.gmra.mrb[8].mxu1 %vm439_vm3, %v431_v36  ;;  %3065 = vmatmul.mubr.msk.f32.gmra.mrb[8].mxu0 %vm439_vm3, %v3772_v37  ;;  %v1675_v16 = vld [vmem:[#allocation2 + $0x5b] sm:$0xff]  ;;  %v967_v21 = vld [vmem:[#allocation2 + $0x51] sm:$0xff]  ;;  %v968_v23 = vld [vmem:[#allocation2 + $0x59] sm:$0x1] }
  0x3a   : > { %2927 = vmatprep.mubr.msk.f32.mxu1 %vm3542_vm4, %v3541_v25  ;;  %3067 = vmatprep.mubr.msk.f32.mxu0 %vm3542_vm4, %v3541_v25  ;;  %v1844_v19 = vld [vmem:[#allocation2 + $0x1c] sm:$0xff]  ;;  %v1850_v28 = vld [vmem:[#allocation2 + $0x4c] sm:$0xff]  ;;  %v1851_v29 = vld [vmem:[#allocation2 + $0x54] sm:$0xff] }
  0x3b   : > { %v1848_v26 = vld [vmem:[#allocation2 + $0x3c] sm:$0xff]  ;;  %v1145_v30 = vld [vmem:[#allocation2 + $0x5a] sm:$0x1]  ;;  %v1853_v32 = vld [vmem:[#allocation2 + $0x64] sm:$0x1] }
  0x3c   : > { %v406_v34 = vld [vmem:[%s4529_s4 + $0x8] sm:$0xff] }
  0x3d   : > { %2928 = vmatmul.mubr.msk.f32.gmra.mrb[10].mxu1 %vm439_vm3, %v432_v38  ;;  %3068 = vmatmul.mubr.msk.f32.gmra.mrb[10].mxu0 %vm439_vm3, %v3781_v39 }
  0x3e   : > { %2930 = vmatprep.mubr.msk.f32.mxu1 %vm3542_vm4, %v3541_v25  ;;  %3087 = vmatprep.mubr.msk.f32.mxu0 %vm3542_vm4, %v3541_v25 }
  0x41   : > { %2931 = vmatmul.mubr.msk.f32.gmra.mrb[12].mxu1 %vm439_vm3, %v433_v40  ;;  %3088 = vmatmul.mubr.msk.f32.vlgmr.msra.gmra.mrb[0].mxu0 %vm439_vm3, %v1312_v41 }
  0x42   : > { %3121 = vmatpush3.msra.mxu0 %v2764_v42  ;;  %2933 = vmatprep.mubr.msk.f32.mxu1 %vm3542_vm4, %v3541_v25 }
  0x43   : > { %3090 = vmatprep.mubr.msk.f32.mxu0 %vm3542_vm4, %v3541_v25  ;;  %3155 = vmatprep.subr.mxu0 %v3541_v25 }
  0x45   : > { %2934 = vmatmul.mubr.msk.f32.gmra.mrb[14].mxu1 %vm439_vm3, %v434_v43  ;;  %3091 = vmatmul.mubr.msk.f32.gmra.mrb[2].mxu0 %vm439_vm3, %v3797_v44 }
  0x46   : > { %2936 = vmatprep.mubr.msk.f32.mxu1 %vm3542_vm4, %v3541_v25  ;;  %3093 = vmatprep.mubr.msk.f32.mxu0 %vm3542_vm4, %v3541_v25 }
  0x49   : > { %2937 = vmatmul.mubr.msk.f32.gmra.mrb[16].mxu1 %vm439_vm3, %v435_v45  ;;  %3094 = vmatmul.mubr.msk.f32.gmra.mrb[4].mxu0 %vm439_vm3, %v3809_v46 }
  0x4a   : > { %2939 = vmatprep.mubr.msk.f32.mxu1 %vm3542_vm4, %v3541_v25  ;;  %3096 = vmatprep.mubr.msk.f32.mxu0 %vm3542_vm4, %v3541_v25 }
  0x4d   : > { %2940 = vmatmul.mubr.msk.f32.gmra.mrb[18].mxu1 %vm439_vm3, %v436_v47  ;;  %3097 = vmatmul.mubr.msk.f32.gmra.mrb[6].mxu0 %vm439_vm3, %v3818_v48  ;;  %v416_v47 = vld [vmem:[%s3635_s28] sm:$0xff] }
  0x4e   : > { %2942 = vmatprep.mubr.msk.f32.mxu1 %vm3542_vm4, %v3541_v25  ;;  %3099 = vmatprep.mubr.msk.f32.mxu0 %vm3542_vm4, %v3541_v25 }
  0x51   : > { %2943 = vmatmul.mubr.msk.f32.gmra.mrb[20].mxu1 %vm439_vm3, %v437_v49  ;;  %3100 = vmatmul.mubr.msk.f32.gmra.mrb[8].mxu0 %vm439_vm3, %v3827_v50 }
  0x52   : > { %2947 = vmatprep.mubr.msk.f32.mxu1 %vm3542_vm4, %v3541_v25  ;;  %3102 = vmatprep.mubr.msk.f32.mxu0 %vm3542_vm4, %v3541_v25 }
  0x55   : > { %2948 = vmatmul.mubr.msk.f32.vlgmr.msra.gmra.mrb[0].mxu1 %vm439_vm3, %v604_v51  ;;  %3103 = vmatmul.mubr.msk.f32.gmra.mrb[10].mxu0 %vm439_vm3, %v3836_v52 }
  0x56   : > { %2950 = vmatprep.mubr.msk.f32.mxu1 %vm3542_vm4, %v3541_v25  ;;  %2981 = vmatpush3.msra.mxu1 %v2716_v53 }
  0x57   : > { %3105 = vmatprep.mubr.msk.f32.mxu0 %vm3542_vm4, %v3541_v25  ;;  %3015 = vmatprep.subr.mxu1 %v3541_v25 }
  0x59   : > { %2951 = vmatmul.mubr.msk.f32.gmra.mrb[2].mxu1 %vm439_vm3, %v3846_v54  ;;  %3106 = vmatmul.mubr.msk.f32.gmra.mrb[12].mxu0 %vm439_vm3, %v3848_v55 }
  0x5a   : > { %2953 = vmatprep.mubr.msk.f32.mxu1 %vm3542_vm4, %v3541_v25  ;;  %3108 = vmatprep.mubr.msk.f32.mxu0 %vm3542_vm4, %v3541_v25 }
  0x5d   : > { %2954 = vmatmul.mubr.msk.f32.gmra.mrb[4].mxu1 %vm439_vm3, %v3861_v56  ;;  %3109 = vmatmul.mubr.msk.f32.gmra.mrb[14].mxu0 %vm439_vm3, %v3863_v57 }
  0x5e   : > { %2956 = vmatprep.mubr.msk.f32.mxu1 %vm3542_vm4, %v3541_v25  ;;  %3111 = vmatprep.mubr.msk.f32.mxu0 %vm3542_vm4, %v3541_v25 }
  0x61   : > { %2957 = vmatmul.mubr.msk.f32.gmra.mrb[6].mxu1 %vm439_vm3, %v3873_v58  ;;  %3112 = vmatmul.mubr.msk.f32.gmra.mrb[16].mxu0 %vm439_vm3, %v3875_v59 }
  0x62   : > { %2959 = vmatprep.mubr.msk.f32.mxu1 %vm3542_vm4, %v3541_v25  ;;  %3114 = vmatprep.mubr.msk.f32.mxu0 %vm3542_vm4, %v3541_v25 }
  0x65   : > { %2960 = vmatmul.mubr.msk.f32.gmra.mrb[8].mxu1 %vm439_vm3, %v3885_v60  ;;  %3115 = vmatmul.mubr.msk.f32.gmra.mrb[18].mxu0 %vm439_vm3, %v3887_v61 }
  0x66   : > { %2962 = vmatprep.mubr.msk.f32.mxu1 %vm3542_vm4, %v3541_v25  ;;  %3117 = vmatprep.mubr.msk.f32.mxu0 %vm3542_vm4, %v3541_v25 }
  0x69   : > { %2963 = vmatmul.mubr.msk.f32.gmra.mrb[10].mxu1 %vm439_vm3, %v3897_v62  ;;  %3118 = vmatmul.mubr.msk.f32.gmra.mrb[20].mxu0 %vm439_vm3, %v1322_v63 }
  0x6a   : > { %2965 = vmatprep.mubr.msk.f32.mxu1 %vm3542_vm4, %v3541_v25  ;;  %3122 = vmatprep.mubr.msk.f32.mxu0 %vm3542_vm4, %v3541_v25 }
  0x6d   : > { %2966 = vmatmul.mubr.msk.f32.gmra.mrb[12].mxu1 %vm439_vm3, %v3906_v0  ;;  %3123 = vmatmul.mubr.msk.f32.vlgmr.msra.gmra.mrb[0].mxu0 %vm439_vm3, %v3739_v31 }
  0x6e   : > { %3156 = vmatpush3.msra.mxu0 %v2776_v1  ;;  %2968 = vmatprep.mubr.msk.f32.mxu1 %vm3542_vm4, %v3541_v25  ;;  %v419_v1 = vld [vmem:[%s3635_s28 + $0x18] sm:$0xff] }
  0x6f   : > { %3125 = vmatprep.mubr.msk.f32.mxu0 %vm3542_vm4, %v3541_v25  ;;  %3190 = vmatprep.subr.mxu0 %v3541_v25 }
  0x71   : > { %2969 = vmatmul.mubr.msk.f32.gmra.mrb[14].mxu1 %vm439_vm3, %v3917_v2  ;;  %3126 = vmatmul.mubr.msk.f32.gmra.mrb[2].mxu0 %vm439_vm3, %v3752_v33 }
  0x72   : > { %2971 = vmatprep.mubr.msk.f32.mxu1 %vm3542_vm4, %v3541_v25  ;;  %3128 = vmatprep.mubr.msk.f32.mxu0 %vm3542_vm4, %v3541_v25 }
  0x75   : > { %2972 = vmatmul.mubr.msk.f32.gmra.mrb[16].mxu1 %vm439_vm3, %v3930_v3  ;;  %3129 = vmatmul.mubr.msk.f32.gmra.mrb[4].mxu0 %vm439_vm3, %v3763_v35 }
  0x76   : > { %2974 = vmatprep.mubr.msk.f32.mxu1 %vm3542_vm4, %v3541_v25  ;;  %3131 = vmatprep.mubr.msk.f32.mxu0 %vm3542_vm4, %v3541_v25 }
  0x79   : > { %2975 = vmatmul.mubr.msk.f32.gmra.mrb[18].mxu1 %vm439_vm3, %v3940_v4  ;;  %3132 = vmatmul.mubr.msk.f32.gmra.mrb[6].mxu0 %vm439_vm3, %v3772_v37 }
  0x7a   : > { %2977 = vmatprep.mubr.msk.f32.mxu1 %vm3542_vm4, %v3541_v25  ;;  %3134 = vmatprep.mubr.msk.f32.mxu0 %vm3542_vm4, %v3541_v25 }
  0x7d   : > { %2978 = vmatmul.mubr.msk.f32.gmra.mrb[20].mxu1 %vm439_vm3, %v614_v5  ;;  %3135 = vmatmul.mubr.msk.f32.gmra.mrb[8].mxu0 %vm439_vm3, %v3781_v39 }
  0x7e   : > { %2982 = vmatprep.mubr.msk.f32.mxu1 %vm3542_vm4, %v3541_v25  ;;  %3137 = vmatprep.mubr.msk.f32.mxu0 %vm3542_vm4, %v3541_v25 }
  0x81   : > { %2983 = vmatmul.mubr.msk.f32.vlgmr.msra.gmra.mrb[0].mxu1 %vm439_vm3, %v781_v6  ;;  %3138 = vmatmul.mubr.msk.f32.gmra.mrb[10].mxu0 %vm439_vm3, %v3957_v7 }
  0x82   : > { %2985 = vmatprep.mubr.msk.f32.mxu1 %vm3542_vm4, %v3541_v25  ;;  %3016 = vmatpush3.msra.mxu1 %v2728_v8  ;;  %v420_v8 = vld [vmem:[%s3635_s28 + $0x20] sm:$0xff] }
  0x83   : > { %3140 = vmatprep.mubr.msk.f32.mxu0 %vm3542_vm4, %v3541_v25  ;;  %3225 = vmatprep.subr.mxu1 %v3541_v25 }
  0x85   : > { %2986 = vmatmul.mubr.msk.f32.gmra.mrb[2].mxu1 %vm439_vm3, %v3721_v27  ;;  %3141 = vmatmul.mubr.msk.f32.gmra.mrb[12].mxu0 %vm439_vm3, %v3967_v9  ;;  %v1849_v27 = vld [vmem:[#allocation2 + $0x44] sm:$0xff] }
  0x86   : > { %2988 = vmatprep.mubr.msk.f32.mxu1 %vm3542_vm4, %v3541_v25  ;;  %3143 = vmatprep.mubr.msk.f32.mxu0 %vm3542_vm4, %v3541_v25 }
  0x89   : > { %2989 = vmatmul.mubr.msk.f32.gmra.mrb[4].mxu1 %vm439_vm3, %v3739_v31  ;;  %3144 = vmatmul.mubr.msk.f32.gmra.mrb[14].mxu0 %vm439_vm3, %v3980_v10  ;;  %v1852_v31 = vld [vmem:[#allocation2 + $0x5c] sm:$0xff] }
  0x8a   : > { %2991 = vmatprep.mubr.msk.f32.mxu1 %vm3542_vm4, %v3541_v25  ;;  %3146 = vmatprep.mubr.msk.f32.mxu0 %vm3542_vm4, %v3541_v25 }
  0x8d   : > { %2992 = vmatmul.mubr.msk.f32.gmra.mrb[6].mxu1 %vm439_vm3, %v3752_v33  ;;  %3147 = vmatmul.mubr.msk.f32.gmra.mrb[16].mxu0 %vm439_vm3, %v3990_v11  ;;  %v3543_v33 = vmov 0  }
  0x8e   : > { %2994 = vmatprep.mubr.msk.f32.mxu1 %vm3542_vm4, %v3541_v25  ;;  %3149 = vmatprep.mubr.msk.f32.mxu0 %vm3542_vm4, %v3541_v25 }
  0x8f   : > { %3455 = vset.pattern.permute.xlu0 %v3543_v33  ;;  %3454 = vset.pattern.permute.xlu1 %v3543_v33 }
  0x90   : > { %2272 = vperm.xlu0 %3455, %v406_v34  }
  0x91   : > { %2995 = vmatmul.mubr.msk.f32.gmra.mrb[8].mxu1 %vm439_vm3, %v3763_v35  ;;  %3150 = vmatmul.mubr.msk.f32.gmra.mrb[18].mxu0 %vm439_vm3, %v1498_v12  ;;  %v405_v35 = vld [vmem:[%s4529_s4] sm:$0xff] }
  0x92   : > { %2997 = vmatprep.mubr.msk.f32.mxu1 %vm3542_vm4, %v3541_v25  ;;  %3152 = vmatprep.mubr.msk.f32.mxu0 %vm3542_vm4, %v3541_v25 }
  0x93   : > { %2267 = vperm.xlu1 %3454, %v405_v35  }
  0x95   : > { %2998 = vmatmul.mubr.msk.f32.gmra.mrb[10].mxu1 %vm439_vm3, %v3772_v37  ;;  %3153 = vmatmul.mubr.msk.f32.gmra.mrb[20].mxu0 %vm439_vm3, %v1499_v13 }
  0x96   : > { %3000 = vmatprep.mubr.msk.f32.mxu1 %vm3542_vm4, %v3541_v25  ;;  %3157 = vmatprep.mubr.msk.f32.mxu0 %vm3542_vm4, %v3541_v25 }
  0x99   : > { %3001 = vmatmul.mubr.msk.f32.gmra.mrb[12].mxu1 %vm439_vm3, %v3781_v39  ;;  %3158 = vmatmul.mubr.msk.f32.vlgmr.msra.gmra.mrb[0].mxu0 %vm439_vm3, %v3797_v44 }
  0x9a   : > { %3191 = vmatpush3.msra.mxu0 %v2788_v14  ;;  %3003 = vmatprep.mubr.msk.f32.mxu1 %vm3542_vm4, %v3541_v25 }
  0x9b   : > { %3160 = vmatprep.mubr.msk.f32.mxu0 %vm3542_vm4, %v3541_v25 }
  0x9d   : > { %3004 = vmatmul.mubr.msk.f32.gmra.mrb[14].mxu1 %vm439_vm3, %v3957_v7  ;;  %3161 = vmatmul.mubr.msk.f32.gmra.mrb[2].mxu0 %vm439_vm3, %v3809_v46  ;;  %v2020_v46 = vlaneseq }
  0x9e   : > { %3006 = vmatprep.mubr.msk.f32.mxu1 %vm3542_vm4, %v3541_v25  ;;  %3163 = vmatprep.mubr.msk.f32.mxu0 %vm3542_vm4, %v3541_v25 }
  0xa1   : > { %3007 = vmatmul.mubr.msk.f32.gmra.mrb[16].mxu1 %vm439_vm3, %v3967_v9  ;;  %3164 = vmatmul.mubr.msk.f32.gmra.mrb[4].mxu0 %vm439_vm3, %v3818_v48 }
  0xa2   : > { %3009 = vmatprep.mubr.msk.f32.mxu1 %vm3542_vm4, %v3541_v25  ;;  %3166 = vmatprep.mubr.msk.f32.mxu0 %vm3542_vm4, %v3541_v25 }
  0xa5   : > { %3010 = vmatmul.mubr.msk.f32.gmra.mrb[18].mxu1 %vm439_vm3, %v3980_v10  ;;  %3167 = vmatmul.mubr.msk.f32.gmra.mrb[6].mxu0 %vm439_vm3, %v3827_v50  ;;  %v4179_v50 = vand.u32 127, %v2020_v46 }
  0xa6   : > { %3012 = vmatprep.mubr.msk.f32.mxu1 %vm3542_vm4, %v3541_v25  ;;  %3169 = vmatprep.mubr.msk.f32.mxu0 %vm3542_vm4, %v3541_v25 }
  0xa7   : > { %vm2022_vm5 = vcmp.ge.s32.totalorder %v4179_v50, 24  ;;  %v413_v50 = vld [vmem:[%s4529_s4 + $0x40] sm:$0xff] }
  0xa9   : > { %3013 = vmatmul.mubr.msk.f32.gmra.mrb[20].mxu1 %vm439_vm3, %v791_v15  ;;  %3170 = vmatmul.mubr.msk.f32.gmra.mrb[8].mxu0 %vm439_vm3, %v3836_v52  ;;  %v417_v52 = vld [vmem:[%s3635_s28 + $0x8] sm:$0xff] }
  0xaa   : > { %3017 = vmatprep.mubr.msk.f32.mxu1 %vm3542_vm4, %v3541_v25  ;;  %3172 = vmatprep.mubr.msk.f32.mxu0 %vm3542_vm4, %v3541_v25 }
  0xad   : > { %3018 = vmatmul.mubr.msk.f32.vlgmr.msra.gmra.mrb[0].mxu1 %vm439_vm3, %v3846_v54  ;;  %3173 = vmatmul.mubr.msk.f32.gmra.mrb[10].mxu0 %vm439_vm3, %v3848_v55 }
  0xae   : > { %3020 = vmatprep.mubr.msk.f32.mxu1 %vm3542_vm4, %v3541_v25  ;;  %3226 = vmatpush3.msra.mxu1 %v3717_v24  ;;  %v1847_v24 = vld [vmem:[#allocation2 + $0x34] sm:$0xff] }
  0xaf   : > { %3175 = vmatprep.mubr.msk.f32.mxu0 %vm3542_vm4, %v3541_v25 }
  0xb1   : > { %3021 = vmatmul.mubr.msk.f32.gmra.mrb[2].mxu1 %vm439_vm3, %v3861_v56  ;;  %3176 = vmatmul.mubr.msk.f32.gmra.mrb[12].mxu0 %vm439_vm3, %v3863_v57 }
  0xb2   : > { %3023 = vmatprep.mubr.msk.f32.mxu1 %vm3542_vm4, %v3541_v25  ;;  %3178 = vmatprep.mubr.msk.f32.mxu0 %vm3542_vm4, %v3541_v25 }
  0xb5   : > { %3024 = vmatmul.mubr.msk.f32.gmra.mrb[4].mxu1 %vm439_vm3, %v3873_v58  ;;  %3179 = vmatmul.mubr.msk.f32.gmra.mrb[14].mxu0 %vm439_vm3, %v3875_v59  ;;  %v418_v58 = vld [vmem:[%s3635_s28 + $0x10] sm:$0xff] }
  0xb6   : > { %3026 = vmatprep.mubr.msk.f32.mxu1 %vm3542_vm4, %v3541_v25  ;;  %3181 = vmatprep.mubr.msk.f32.mxu0 %vm3542_vm4, %v3541_v25 }
  0xb9   : > { %3027 = vmatmul.mubr.msk.f32.gmra.mrb[6].mxu1 %vm439_vm3, %v3885_v60  ;;  %3182 = vmatmul.mubr.msk.f32.gmra.mrb[16].mxu0 %vm439_vm3, %v3887_v61 }
  0xba   : > { %3029 = vmatprep.mubr.msk.f32.mxu1 %vm3542_vm4, %v3541_v25  ;;  %3184 = vmatprep.mubr.msk.f32.mxu0 %vm3542_vm4, %v3541_v25 }
  0xbd   : > { %3030 = vmatmul.mubr.msk.f32.gmra.mrb[8].mxu1 %vm439_vm3, %v3897_v62  ;;  %3185 = vmatmul.mubr.msk.f32.gmra.mrb[18].mxu0 %vm439_vm3, %v1675_v16  ;;  %v421_v16 = vld [vmem:[%s3635_s28 + $0x28] sm:$0xff] }
  0xbe   : > { %3032 = vmatprep.mubr.msk.f32.mxu1 %vm3542_vm4, %v3541_v25  ;;  %3187 = vmatprep.mubr.msk.f32.mxu0 %vm3542_vm4, %v3541_v25 }
  0xc1   : > { %3033 = vmatmul.mubr.msk.f32.gmra.mrb[10].mxu1 %vm439_vm3, %v3906_v0  ;;  %3188 = vmatmul.mubr.msk.f32.gmra.mrb[20].mxu0 %vm439_vm3, %v1676_v17 }
  0xc2   : > { %3035 = vmatprep.mubr.msk.f32.mxu1 %vm3542_vm4, %v3541_v25  ;;  %3192 = vmatprep.mubr.msk.f32.mxu0 %vm3542_vm4, %v3541_v25 }
  0xc5   : > { %3036 = vmatmul.mubr.msk.f32.gmra.mrb[12].mxu1 %vm439_vm3, %v3917_v2  ;;  %3193 = vmatmul.mubr.msk.f32.vlgmr.msra.gmra.mrb[0].mxu0 %vm439_vm3, %v1843_v18 }
  0xc6   : > { %3038 = vmatprep.mubr.msk.f32.mxu1 %vm3542_vm4, %v3541_v25  ;;  %3195 = vmatprep.mubr.msk.f32.mxu0 %vm3542_vm4, %v3541_v25 }
  0xc9   : > { %3039 = vmatmul.mubr.msk.f32.gmra.mrb[14].mxu1 %vm439_vm3, %v3930_v3  ;;  %3196 = vmatmul.mubr.msk.f32.gmra.mrb[2].mxu0 %vm439_vm3, %v1844_v19 }
  0xca   : > { %3041 = vmatprep.mubr.msk.f32.mxu1 %vm3542_vm4, %v3541_v25  ;;  %3198 = vmatprep.mubr.msk.f32.mxu0 %vm3542_vm4, %v3541_v25 }
  0xcd   : > { %3042 = vmatmul.mubr.msk.f32.gmra.mrb[16].mxu1 %vm439_vm3, %v3940_v4  ;;  %3199 = vmatmul.mubr.msk.f32.gmra.mrb[4].mxu0 %vm439_vm3, %v1845_v20 }
  0xce   : > { %3044 = vmatprep.mubr.msk.f32.mxu1 %vm3542_vm4, %v3541_v25  ;;  %3201 = vmatprep.mubr.msk.f32.mxu0 %vm3542_vm4, %v3541_v25 }
  0xd1   : > { %3045 = vmatmul.mubr.msk.f32.gmra.mrb[18].mxu1 %vm439_vm3, %v967_v21  ;;  %3202 = vmatmul.mubr.msk.f32.gmra.mrb[6].mxu0 %vm439_vm3, %v1846_v22 }
  0xd2   : > { %3047 = vmatprep.mubr.msk.f32.mxu1 %vm3542_vm4, %v3541_v25  ;;  %3204 = vmatprep.mubr.msk.f32.mxu0 %vm3542_vm4, %v3541_v25 }
  0xd5   : > { %3048 = vmatmul.mubr.msk.f32.gmra.mrb[20].mxu1 %vm439_vm3, %v968_v23  ;;  %3205 = vmatmul.mubr.msk.f32.gmra.mrb[8].mxu0 %vm439_vm3, %v1847_v24 }
  0xd6   : > { %3070 = vmatprep.mubr.msk.f32.mxu1 %vm3542_vm4, %v3541_v25  ;;  %3207 = vmatprep.mubr.msk.f32.mxu0 %vm3542_vm4, %v3541_v25 }
  0xd9   : > { %3071 = vmatmul.mubr.msk.f32.vlgmr.msra.gmra.mrb[12].mxu1 %vm439_vm3, %v3957_v7  ;;  %3208 = vmatmul.mubr.msk.f32.gmra.mrb[10].mxu0 %vm439_vm3, %v1848_v26 }
  0xda   : > { %3073 = vmatprep.mubr.msk.f32.mxu1 %vm3542_vm4, %v3541_v25  ;;  %3210 = vmatprep.mubr.msk.f32.mxu0 %vm3542_vm4, %v3541_v25 }
  0xdd   : > { %3074 = vmatmul.mubr.msk.f32.gmra.mrb[14].mxu1 %vm439_vm3, %v3967_v9  ;;  %3211 = vmatmul.mubr.msk.f32.gmra.mrb[12].mxu0 %vm439_vm3, %v1849_v27  ;;  %v422_v27 = vld [vmem:[%s3635_s28 + $0x30] sm:$0xff] }
  0xde   : > { %3076 = vmatprep.mubr.msk.f32.mxu1 %vm3542_vm4, %v3541_v25  ;;  %3213 = vmatprep.mubr.msk.f32.mxu0 %vm3542_vm4, %v3541_v25 }
  0xe1   : > { %3077 = vmatmul.mubr.msk.f32.gmra.mrb[16].mxu1 %vm439_vm3, %v3980_v10  ;;  %3214 = vmatmul.mubr.msk.f32.gmra.mrb[14].mxu0 %vm439_vm3, %v1850_v28 }
  0xe2   : > { %3079 = vmatprep.mubr.msk.f32.mxu1 %vm3542_vm4, %v3541_v25  ;;  %3216 = vmatprep.mubr.msk.f32.mxu0 %vm3542_vm4, %v3541_v25 }
  0xe5   : > { %3080 = vmatmul.mubr.msk.f32.gmra.mrb[18].mxu1 %vm439_vm3, %v3990_v11  ;;  %3217 = vmatmul.mubr.msk.f32.gmra.mrb[16].mxu0 %vm439_vm3, %v1851_v29 }
  0xe6   : > { %3082 = vmatprep.mubr.msk.f32.mxu1 %vm3542_vm4, %v3541_v25  ;;  %3219 = vmatprep.mubr.msk.f32.mxu0 %vm3542_vm4, %v3541_v25 }
  0xe9   : > { %3083 = vmatmul.mubr.msk.f32.gmra.mrb[20].mxu1 %vm439_vm3, %v1145_v30  ;;  %3220 = vmatmul.mubr.msk.f32.gmra.mrb[18].mxu0 %vm439_vm3, %v1852_v31 }
  0xea   : > { %3222 = vmatprep.mubr.msk.f32.mxu0 %vm3542_vm4, %v3541_v25  ;;  %v407_v25 = vld [vmem:[%s4529_s4 + $0x10] sm:$0xff] }
  0xeb   : > { %2277 = vperm.xlu1 %3454, %v407_v25  }
  0xed   : > { %3223 = vmatmul.mubr.msk.f32.gmra.mrb[20].mxu0 %vm439_vm3, %v1853_v32 }
 0x180   : > { %v1070_v36 = vpop.f32.mrb[0].mxu1 }
 0x181   : > { %v3019_v37 = vpop.f32.mrb[1].mxu1  ;;  %v3227_v51 = vadd.f32 %v1070_v36, %v416_v47 }
 0x184   : > { %v1075_v38 = vpop.f32.mrb[2].mxu1 }
 0x185   : > { %v3022_v39 = vpop.f32.mrb[3].mxu1  ;;  %v3229_v56 = vadd.f32 %v1075_v38, %v417_v52  ;;  %v423_v38 = vld [vmem:[%s3635_s28 + $0x38] sm:$0xff] }
 0x188   : > { %v1080_v40 = vpop.f32.mrb[4].mxu1 }
 0x189   : > { %v3025_v41 = vpop.f32.mrb[5].mxu1  ;;  %v3231_v63 = vadd.f32 %v1080_v40, %v418_v58 }
 0x18c   : > { %v1085_v42 = vpop.f32.mrb[6].mxu1 }
 0x18d   : > { %v3028_v43 = vpop.f32.mrb[7].mxu1  ;;  %v3233_v6 = vadd.f32 %v1085_v42, %v419_v1  ;;  %v425_v1 = vld [vmem:[%s3635_s28 + $0x48] sm:$0xff] }
 0x190   : > { %v1090_v44 = vpop.f32.mrb[8].mxu1 }
 0x191   : > { %v3031_v45 = vpop.f32.mrb[9].mxu1  ;;  %v3235_v13 = vadd.f32 %v1090_v44, %v420_v8 }
 0x194   : > { %v1095_v48 = vpop.f32.mrb[10].mxu1 }
 0x195   : > { %v3034_v49 = vpop.f32.mrb[11].mxu1  ;;  %v3237_v22 = vadd.f32 %v1095_v48, %v421_v16 }
 0x198   : > { %v1955_v53 = vpop.f32.mrb[0].mxu0 }
 0x199   : > { %v3228_v54 = vadd.f32 %v3227_v51, %v1955_v53  ;;  %v3194_v55 = vpop.f32.mrb[1].mxu0  ;;  %v424_v53 = vld [vmem:[%s3635_s28 + $0x40] sm:$0xff] }
 0x19b   : > { %v2023_v57 = vmul.f32 0.5, %v3228_v54 }
 0x19c   : > { %v1960_v59 = vpop.f32.mrb[2].mxu0 }
 0x19d   : > { %v2034_v60 = vsel %vm2022_vm5, %v3228_v54, %v2023_v57  ;;  %v3230_v61 = vadd.f32 %v3229_v56, %v1960_v59  ;;  %v3197_v62 = vpop.f32.mrb[3].mxu0 }
 0x19e   : > { %3456 = vtanh.f32 %v2034_v60 }
 0x19f   : > { %v2024_v0 = vmul.f32 0.5, %v3230_v61 }
 0x1a0   : > { %v1965_v2 = vpop.f32.mrb[4].mxu0 }
 0x1a1   : > { %v2035_v3 = vsel %vm2022_vm5, %v3230_v61, %v2024_v0  ;;  %v3232_v4 = vadd.f32 %v3231_v63, %v1965_v2  ;;  %v3200_v5 = vpop.f32.mrb[5].mxu0 }
 0x1a2   : > { %3458 = vtanh.f32 %v2035_v3 }
 0x1a3   : > { %v2025_v7 = vmul.f32 0.5, %v3232_v4 }
 0x1a4   : > { %v1970_v9 = vpop.f32.mrb[6].mxu0 }
 0x1a5   : > { %v2036_v10 = vsel %vm2022_vm5, %v3232_v4, %v2025_v7  ;;  %v3234_v11 = vadd.f32 %v3233_v6, %v1970_v9  ;;  %v3203_v12 = vpop.f32.mrb[7].mxu0 }
 0x1a6   : > { %3460 = vtanh.f32 %v2036_v10 }
 0x1a7   : > { %v2026_v14 = vmul.f32 0.5, %v3234_v11 }
 0x1a8   : > { %v3457_v15 = vpop.eup %3456  ;;  %v1975_v17 = vpop.f32.mrb[8].mxu0 }
 0x1a9   : > { %v2037_v18 = vsel %vm2022_vm5, %v3234_v11, %v2026_v14  ;;  %v3236_v19 = vadd.f32 %v3235_v13, %v1975_v17  ;;  %v3206_v20 = vpop.f32.mrb[9].mxu0  ;;  %v2056_v21 = vadd.f32 1.0, %v3457_v15 }
 0x1aa   : > { %3462 = vtanh.f32 %v2037_v18 }
 0x1ab   : > { %v2027_v23 = vmul.f32 0.5, %v3236_v19  ;;  %v2067_v24 = vmul.f32 0.5, %v2056_v21 }
 0x1ac   : > { %v3459_v26 = vpop.eup %3458  ;;  %v1277_v28 = vpop.f32.mrb[12].mxu1 }
 0x1ad   : > { %v1980_v29 = vpop.f32.mrb[10].mxu0  ;;  %v2038_v30 = vsel %vm2022_vm5, %v3236_v19, %v2027_v23  ;;  %v3072_v32 = vpop.f32.mrb[13].mxu1  ;;  %v4200_v34 = vsel %vm2022_vm5, %v3457_v15, %v2067_v24  ;;  %v2057_v35 = vadd.f32 1.0, %v3459_v26  ;;  %v3239_v25 = vadd.f32 %v1277_v28, %v422_v27  ;;  %v426_v15 = vld [vmem:[%s3635_s28 + $0x50] sm:$0x1]  ;;  %s3547_s28 = smov 112  }
 0x1ae   : > { %v3238_v31 = vadd.f32 %v3237_v22, %v1980_v29  ;;  %v3209_v33 = vpop.f32.mrb[11].mxu0  ;;  %3464 = vtanh.f32 %v2038_v30  ;;  %2166 = vrot.lane.b32.xlu0 %v4200_v34, %s3544_s12 }
 0x1af   : > { %v2068_v41 = vmul.f32 0.5, %v2057_v35 }
 0x1b0   : > { %v2028_v36 = vmul.f32 0.5, %v3238_v31  ;;  %v3461_v37 = vpop.eup %3460  ;;  %v1282_v39 = vpop.f32.mrb[14].mxu1 }
 0x1b1   : > { %v1985_v40 = vpop.f32.mrb[12].mxu0  ;;  %v3075_v44 = vpop.f32.mrb[15].mxu1  ;;  %v2058_v46 = vadd.f32 1.0, %v3461_v37  ;;  %v4209_v47 = vsel %vm2022_vm5, %v3459_v26, %v2068_v41  ;;  %v3241_v48 = vadd.f32 %v1282_v39, %v423_v38 }
 0x1b2   : > { %v2039_v42 = vsel %vm2022_vm5, %v3238_v31, %v2028_v36  ;;  %v3240_v43 = vadd.f32 %v3239_v25, %v1985_v40  ;;  %v3212_v45 = vpop.f32.mrb[13].mxu0  ;;  %2168 = vrot.lane.b32.xlu0 %v4209_v47, %s3544_s12 }
 0x1b3   : > { %3466 = vtanh.f32 %v2039_v42  ;;  %v2069_v51 = vmul.f32 0.5, %v2058_v46 }
 0x1b4   : > { %v2029_v49 = vmul.f32 0.5, %v3240_v43  ;;  %v3463_v52 = vpop.eup %3462  ;;  %v1287_v54 = vpop.f32.mrb[16].mxu1 }
 0x1b5   : > { %v1990_v55 = vpop.f32.mrb[14].mxu0  ;;  %v3078_v58 = vpop.f32.mrb[17].mxu1  ;;  %v4218_v60 = vsel %vm2022_vm5, %v3461_v37, %v2069_v51  ;;  %v2059_v61 = vadd.f32 1.0, %v3463_v52  ;;  %v3243_v62 = vadd.f32 %v1287_v54, %v424_v53  ;;  %v409_v51 = vld [vmem:[%s4529_s4 + $0x20] sm:$0xff] }
 0x1b6   : > { %v2040_v56 = vsel %vm2022_vm5, %v3240_v43, %v2029_v49  ;;  %v3242_v57 = vadd.f32 %v3241_v48, %v1990_v55  ;;  %v3215_v59 = vpop.f32.mrb[15].mxu0  ;;  %2170 = vrot.lane.b32.xlu1 %v4218_v60, %s3544_s12 }
 0x1b7   : > { %3468 = vtanh.f32 %v2040_v56  ;;  %v2070_v4 = vmul.f32 0.5, %v2059_v61  ;;  %v411_v59 = vld [vmem:[%s4529_s4 + $0x30] sm:$0xff]  ;;  %v410_v61 = vld [vmem:[%s4529_s4 + $0x28] sm:$0xff] }
 0x1b8   : > { %v2030_v63 = vmul.f32 0.5, %v3242_v57  ;;  %v3465_v0 = vpop.eup %3464  ;;  %v1292_v2 = vpop.f32.mrb[18].mxu1 }
 0x1b9   : > { %v1995_v3 = vpop.f32.mrb[16].mxu0  ;;  %v3081_v7 = vpop.f32.mrb[19].mxu1  ;;  %v2060_v9 = vadd.f32 1.0, %v3465_v0  ;;  %v4227_v10 = vsel %vm2022_vm5, %v3463_v52, %v2070_v4  ;;  %v3245_v11 = vadd.f32 %v1292_v2, %v425_v1  ;;  %v2090_v1 = vld [vmem:[%s3630_s16 + $0x8] sm:$0xff]  ;;  %v2089_v2 = vld [vmem:[%s3630_s16] sm:$0xff]  ;;  %v2091_v4 = vld [vmem:[%s3630_s16 + $0x10] sm:$0xff] }
 0x1ba   : > { %v2041_v5 = vsel %vm2022_vm5, %v3242_v57, %v2030_v63  ;;  %v3244_v6 = vadd.f32 %v3243_v62, %v1995_v3  ;;  %v3218_v8 = vpop.f32.mrb[17].mxu0  ;;  %2172 = vrot.lane.b32.xlu1 %v4227_v10, %s3544_s12  ;;  %v408_v57 = vld [vmem:[%s4529_s4 + $0x18] sm:$0xff]  ;;  %v415_v63 = vld [vmem:[%s4529_s4 + $0x50] sm:$0x1] }
 0x1bb   : > { %3470 = vtanh.f32 %v2041_v5  ;;  %v2071_v13 = vmul.f32 0.5, %v2060_v9  ;;  %v412_v62 = vld [vmem:[%s4529_s4 + $0x38] sm:$0xff]  ;;  %v2094_v5 = vld [vmem:[%s3630_s16 + $0x28] sm:$0xff]  ;;  %v2095_v8 = vld [vmem:[%s3630_s16 + $0x30] sm:$0xff] }
 0x1bc   : > { %v2031_v12 = vmul.f32 0.5, %v3244_v6  ;;  %v1297_v16 = vpop.f32.mrb[20].mxu1  ;;  %v2000_v17 = vpop.f32.mrb[18].mxu0  ;;  %v2092_v3 = vld [vmem:[%s3630_s16 + $0x18] sm:$0xff]  ;;  %v2098_v9 = vld [vmem:[%s3630_s16 + $0x48] sm:$0xff] }
 0x1bd   : > { %v3467_v14 = vpop.eup %3466  ;;  %v3246_v19 = vadd.f32 %v3245_v11, %v2000_v17  ;;  %v3084_v20 = vpop.f32.mrb[21].mxu1  ;;  %v4236_v22 = vsel %vm2022_vm5, %v3465_v0, %v2071_v13  ;;  %v3247_v24 = vadd.f32 %v1297_v16, %v426_v15  ;;  %v414_v0 = vld [vmem:[%s4529_s4 + $0x48] sm:$0xff]  ;;  %v2096_v7 = vld [vmem:[%s3630_s16 + $0x38] sm:$0xff]  ;;  %v2097_v11 = vld [vmem:[%s3630_s16 + $0x40] sm:$0xff] }
 0x1be   : > { %v2042_v18 = vsel %vm2022_vm5, %v3244_v6, %v2031_v12  ;;  %v3221_v21 = vpop.f32.mrb[19].mxu0  ;;  %2174 = vrot.lane.b32.xlu0 %v4236_v22, %s3544_s12  ;;  %v2061_v23 = vadd.f32 1.0, %v3467_v14  ;;  %v2093_v6 = vld [vmem:[%s3630_s16 + $0x20] sm:$0xff]  ;;  %v2099_v12 = vld [vmem:[%s3630_s16 + $0x50] sm:$0x1]  ;;  %v4326_v13 = vpop.permute.xlu0 %2272 }
 0x1bf   : > { %3472 = vtanh.f32 %v2042_v18  ;;  %v2032_v26 = vmul.f32 0.5, %v3246_v19 }
 0x1c0   : > { %v2005_v28 = vpop.f32.mrb[20].mxu0  ;;  %v2072_v29 = vmul.f32 0.5, %v2061_v23 }
 0x1c1   : > { %v3469_v27 = vpop.eup %3468  ;;  %v2043_v30 = vsel %vm2022_vm5, %v3246_v19, %v2032_v26  ;;  %v3248_v31 = vadd.f32 %v3247_v24, %v2005_v28  ;;  %v3224_v32 = vpop.f32.mrb[21].mxu0 }
 0x1c2   : > { %v2062_v33 = vadd.f32 1.0, %v3469_v27  ;;  %3474 = vtanh.f32 %v2043_v30  ;;  %v4244_v35 = vsel %vm2022_vm5, %v3467_v14, %v2072_v29  ;;  %v4328_v14 = vpop.permute.xlu1 %2267 }
 0x1c3   : > { %v2033_v25 = vmul.f32 0.5, %v3248_v31  ;;  %2176 = vrot.lane.b32.xlu1 %v4244_v35, %s3544_s12 }
 0x1c4   : > { %v2073_v36 = vmul.f32 0.5, %v2062_v33 }
 0x1c5   : > { %v3471_v37 = vpop.eup %3470  ;;  %v2044_v38 = vsel %vm2022_vm5, %v3248_v31, %v2033_v25 }
 0x1c6   : > { %v4252_v39 = vsel %vm2022_vm5, %v3469_v27, %v2073_v36  ;;  %v2063_v40 = vadd.f32 1.0, %v3471_v37  ;;  %3476 = vtanh.f32 %v2044_v38  ;;  %v4331_v17 = vpop.permute.xlu1 %2277 }
 0x1c7   : > { %2178 = vrot.lane.b32.xlu0 %v4252_v39, %s3544_s12 }
 0x1c8   : > { %v2074_v41 = vmul.f32 0.5, %v2063_v40 }
 0x1c9   : > { %v3473_v42 = vpop.eup %3472 }
 0x1ca   : > { %v4258_v43 = vsel %vm2022_vm5, %v3471_v37, %v2074_v41  ;;  %v2064_v44 = vadd.f32 1.0, %v3473_v42 }
 0x1cb   : > { %2180 = vrot.lane.b32.xlu1 %v4258_v43, %s3544_s12 }
 0x1cc   : > { %v2075_v45 = vmul.f32 0.5, %v2064_v44  ;;  %v3475_v46 = vpop.eup %3474 }
 0x1cd   : > { %v2065_v49 = vadd.f32 1.0, %v3475_v46 }
 0x1ce   : > { %v4264_v48 = vsel %vm2022_vm5, %v3473_v42, %v2075_v45 }
 0x1cf   : > { %2182 = vrot.lane.b32.xlu0 %v4264_v48, %s3544_s12  ;;  %v2076_v52 = vmul.f32 0.5, %v2065_v49 }
 0x1d0   : > { %v3477_v53 = vpop.eup %3476 }
 0x1d1   : > { %v4273_v54 = vsel %vm2022_vm5, %v3475_v46, %v2076_v52  ;;  %v2066_v55 = vadd.f32 1.0, %v3477_v53 }
 0x1d2   : > { %2184 = vrot.lane.b32.xlu1 %v4273_v54, %s3544_s12 }
 0x1d3   : > { %2287 = vperm.xlu0 %3455, %v409_v51   ;;  %v2077_v56 = vmul.f32 0.5, %v2066_v55 }
 0x1d5   : > { %v4282_v58 = vsel %vm2022_vm5, %v3477_v53, %v2077_v56 }
 0x1d6   : > { %2282 = vperm.xlu1 %3454, %v408_v57  }
 0x1d7   : > { %2186 = vrot.lane.b32.xlu0 %v4282_v58, %s3544_s12  ;;  %s3546_s12 = smov 120  }
 0x1da   : > { %2292 = vperm.xlu1 %3454, %v410_v61  }
 0x1db   : > { %2297 = vperm.xlu0 %3455, %v411_v59  }
 0x1de   : > { %2302 = vperm.xlu1 %3454, %v412_v62  }
 0x1df   : > { %2307 = vperm.xlu0 %3455, %v413_v50  }
 0x1e2   : > { %2312 = vperm.xlu1 %3454, %v414_v0  }
 0x1e3   : > { %2317 = vperm.xlu0 %3455, %v415_v63  }
 0x1e6   : > { %2111 = vrot.lane.b32.xlu1 %v2089_v2, %s3545_s11 }
 0x1e7   : > { %2113 = vrot.lane.b32.xlu0 %v2090_v1, %s3545_s11 }
 0x1ea   : > { %2115 = vrot.lane.b32.xlu1 %v2091_v4, %s3545_s11 }
 0x1eb   : > { %2117 = vrot.lane.b32.xlu0 %v2092_v3, %s3545_s11 }
 0x1ee   : > { %2119 = vrot.lane.b32.xlu1 %v2093_v6, %s3545_s11 }
 0x1ef   : > { %2121 = vrot.lane.b32.xlu0 %v2094_v5, %s3545_s11 }
 0x1f2   : > { %2123 = vrot.lane.b32.xlu1 %v2095_v8, %s3545_s11 }
 0x1f3   : > { %2125 = vrot.lane.b32.xlu0 %v2096_v7, %s3545_s11 }
 0x1f6   : > { %2127 = vrot.lane.b32.xlu1 %v2097_v11, %s3545_s11 }
 0x1f7   : > { %2129 = vrot.lane.b32.xlu0 %v2098_v9, %s3545_s11 }
 0x1fa   : > { %2131 = vrot.lane.b32.xlu1 %v2099_v12, %s3545_s11 }
 0x220   : > { %v2167_v15 = vpop.permute.xlu0 %2166 }
 0x221   : > { %v2199_v16 = vmul.f32 %v2167_v15, %v4200_v34 }
 0x223   : > { %2221 = vrot.lane.b32.xlu0 %v2199_v16, %s3545_s11 }
 0x224   : > { %v2169_v18 = vpop.permute.xlu0 %2168 }
 0x225   : > { %v2200_v19 = vmul.f32 %v2169_v18, %v4209_v47 }
 0x227   : > { %2223 = vrot.lane.b32.xlu1 %v2200_v19, %s3545_s11 }
 0x228   : > { %v2171_v20 = vpop.permute.xlu1 %2170 }
 0x229   : > { %v2201_v21 = vmul.f32 %v2171_v20, %v4218_v60 }
 0x22b   : > { %2225 = vrot.lane.b32.xlu0 %v2201_v21, %s3545_s11 }
 0x22c   : > { %v2173_v23 = vpop.permute.xlu1 %2172 }
 0x22d   : > { %v2202_v24 = vmul.f32 %v2173_v23, %v4227_v10 }
 0x22f   : > { %2227 = vrot.lane.b32.xlu1 %v2202_v24, %s3545_s11 }
 0x230   : > { %v2175_v26 = vpop.permute.xlu0 %2174 }
 0x231   : > { %v2203_v27 = vmul.f32 %v2175_v26, %v4236_v22 }
 0x233   : > { %2229 = vrot.lane.b32.xlu0 %v2203_v27, %s3545_s11 }
 0x235   : > { %v2177_v28 = vpop.permute.xlu1 %2176 }
 0x236   : > { %v2204_v29 = vmul.f32 %v2177_v28, %v4244_v35 }
 0x238   : > { %2231 = vrot.lane.b32.xlu1 %v2204_v29, %s3545_s11 }
 0x239   : > { %v2179_v30 = vpop.permute.xlu0 %2178 }
 0x23a   : > { %v2205_v31 = vmul.f32 %v2179_v30, %v4252_v39 }
 0x23c   : > { %2233 = vrot.lane.b32.xlu0 %v2205_v31, %s3545_s11 }
 0x23d   : > { %v2181_v32 = vpop.permute.xlu1 %2180 }
 0x23e   : > { %v2206_v33 = vmul.f32 %v2181_v32, %v4258_v43 }
 0x240   : > { %2235 = vrot.lane.b32.xlu1 %v2206_v33, %s3545_s11 }
 0x241   : > { %v2183_v25 = vpop.permute.xlu0 %2182 }
 0x242   : > { %v2207_v36 = vmul.f32 %v2183_v25, %v4264_v48 }
 0x244   : > { %2237 = vrot.lane.b32.xlu0 %v2207_v36, %s3545_s11  ;;  %v2185_v37 = vpop.permute.xlu1 %2184 }
 0x245   : > { %v2208_v38 = vmul.f32 %v2185_v37, %v4273_v54 }
 0x247   : > { %2239 = vrot.lane.b32.xlu1 %v2208_v38, %s3545_s11 }
 0x252   : > { %v4352_v40 = vpop.permute.xlu0 %2287 }
 0x255   : > { %v4356_v44 = vpop.permute.xlu1 %2282 }
 0x256   : > { %v2187_v41 = vpop.permute.xlu0 %2186 }
 0x257   : > { %v2209_v42 = vmul.f32 %v2187_v41, %v4282_v58 }
 0x259   : > { %2241 = vrot.lane.b32.xlu0 %v2209_v42, %s3545_s11  ;;  %v4358_v45 = vpop.permute.xlu1 %2292 }
 0x25a   : > { %v4360_v46 = vpop.permute.xlu0 %2297 }
 0x25d   : > { %v4362_v49 = vpop.permute.xlu1 %2302 }
 0x25e   : > { %v4364_v51 = vpop.permute.xlu0 %2307 }
 0x261   : > { %v4366_v52 = vpop.permute.xlu1 %2312 }
 0x262   : > { %v4368_v53 = vpop.permute.xlu0 %2317 }
 0x265   : > { %v2112_v55 = vpop.permute.xlu1 %2111 }
 0x266   : > { %v2114_v56 = vpop.permute.xlu0 %2113  ;;  %v2144_v2 = vmul.f32 %v2112_v55, %v4200_v34 }
 0x267   : > { %v2145_v7 = vmul.f32 %v2114_v56, %v4209_v47 }
 0x269   : > { %v2116_v57 = vpop.permute.xlu1 %2115 }
 0x26a   : > { %v2118_v59 = vpop.permute.xlu0 %2117  ;;  %v2146_v11 = vmul.f32 %v2116_v57, %v4218_v60 }
 0x26b   : > { %v2147_v19 = vmul.f32 %v2118_v59, %v4227_v10 }
 0x26d   : > { %v2120_v61 = vpop.permute.xlu1 %2119 }
 0x26e   : > { %v2122_v50 = vpop.permute.xlu0 %2121  ;;  %v2148_v24 = vmul.f32 %v2120_v61, %v4236_v22 }
 0x26f   : > { %v2149_v31 = vmul.f32 %v2122_v50, %v4244_v35 }
 0x271   : > { %v2124_v62 = vpop.permute.xlu1 %2123 }
 0x272   : > { %v2126_v63 = vpop.permute.xlu0 %2125  ;;  %v2150_v36 = vmul.f32 %v2124_v62, %v4252_v39 }
 0x273   : > { %v2151_v42 = vmul.f32 %v2126_v63, %v4258_v43 }
 0x275   : > { %v2128_v0 = vpop.permute.xlu1 %2127 }
 0x276   : > { %v2130_v1 = vpop.permute.xlu0 %2129  ;;  %v2152_v50 = vmul.f32 %v2128_v0, %v4264_v48 }
 0x277   : > { %v2153_v63 = vmul.f32 %v2130_v1, %v4273_v54 }
 0x279   : > { %v4371_v4 = vpop.permute.xlu1 %2131 }
 0x295   : > { %v2222_v3 = vpop.permute.xlu0 %2221 }
 0x296   : > { %v2254_v5 = vadd.f32 %v2222_v3, %v2144_v2 }
 0x298   : > { %v4374_v6 = vmul.f32 %v4328_v14, %v2254_v5 }
 0x299   : > { %v2224_v8 = vpop.permute.xlu1 %2223 }
 0x29a   : > { %3478 = vtanh.f32 %v4374_v6  ;;  %v2255_v9 = vadd.f32 %v2224_v8, %v2145_v7 }
 0x29c   : > { %v4380_v12 = vmul.f32 %v4326_v13, %v2255_v9 }
 0x29d   : > { %v2226_v15 = vpop.permute.xlu0 %2225 }
 0x29e   : > { %v2256_v16 = vadd.f32 %v2226_v15, %v2146_v11  ;;  %3480 = vtanh.f32 %v4380_v12 }
 0x2a0   : > { %v4384_v18 = vmul.f32 %v4331_v17, %v2256_v16 }
 0x2a1   : > { %v2228_v20 = vpop.permute.xlu1 %2227 }
 0x2a2   : > { %3482 = vtanh.f32 %v4384_v18  ;;  %v2257_v21 = vadd.f32 %v2228_v20, %v2147_v19  ;;  %v2154_v19 = vmul.f32 %v4371_v4, %v4282_v58 }
 0x2a4   : > { %v3479_v23 = vpop.eup %3478  ;;  %v4390_v26 = vmul.f32 %v4356_v44, %v2257_v21 }
 0x2a5   : > { %v2230_v27 = vpop.permute.xlu0 %2229  ;;  %2353 = vrot.lane.b32.xlu1 %v3479_v23, %s3545_s11 }
 0x2a6   : > { %v2258_v28 = vadd.f32 %v2230_v27, %v2148_v24  ;;  %3484 = vtanh.f32 %v4390_v26 }
 0x2a8   : > { %v2324_v29 = vmul.f32 %v4352_v40, %v2258_v28  ;;  %v3481_v30 = vpop.eup %3480 }
 0x2a9   : > { %2355 = vrot.lane.b32.xlu0 %v3481_v30, %s3545_s11 }
 0x2aa   : > { %3486 = vtanh.f32 %v2324_v29  ;;  %v2232_v32 = vpop.permute.xlu1 %2231 }
 0x2ab   : > { %v2259_v33 = vadd.f32 %v2232_v32, %v2149_v31 }
 0x2ac   : > { %v3483_v25 = vpop.eup %3482 }
 0x2ad   : > { %v2325_v37 = vmul.f32 %v4358_v45, %v2259_v33  ;;  %2357 = vrot.lane.b32.xlu1 %v3483_v25, %s3545_s11 }
 0x2ae   : > { %v2234_v38 = vpop.permute.xlu0 %2233 }
 0x2af   : > { %v2260_v41 = vadd.f32 %v2234_v38, %v2150_v36  ;;  %3488 = vtanh.f32 %v2325_v37 }
 0x2b0   : > { %v3485_v56 = vpop.eup %3484 }
 0x2b1   : > { %v2326_v55 = vmul.f32 %v4360_v46, %v2260_v41  ;;  %2359 = vrot.lane.b32.xlu0 %v3485_v56, %s3545_s11 }
 0x2b2   : > { %v2236_v57 = vpop.permute.xlu1 %2235 }
 0x2b3   : > { %3490 = vtanh.f32 %v2326_v55  ;;  %v2261_v59 = vadd.f32 %v2236_v57, %v2151_v42 }
 0x2b4   : > { %v3487_v61 = vpop.eup %3486 }
 0x2b5   : > { %v2327_v62 = vmul.f32 %v4362_v49, %v2261_v59  ;;  %2361 = vrot.lane.b32.xlu1 %v3487_v61, %s3545_s11 }
 0x2b6   : > { %v2238_v2 = vpop.permute.xlu0 %2237 }
 0x2b7   : > { %3492 = vtanh.f32 %v2327_v62  ;;  %v2262_v3 = vadd.f32 %v2238_v2, %v2152_v50 }
 0x2b9   : > { %v2328_v5 = vmul.f32 %v4364_v51, %v2262_v3  ;;  %v3489_v7 = vpop.eup %3488  ;;  %v2240_v8 = vpop.permute.xlu1 %2239 }
 0x2ba   : > { %2363 = vrot.lane.b32.xlu0 %v3489_v7, %s3545_s11  ;;  %v2263_v9 = vadd.f32 %v2240_v8, %v2153_v63 }
 0x2bb   : > { %3494 = vtanh.f32 %v2328_v5 }
 0x2bc   : > { %v2329_v0 = vmul.f32 %v4366_v52, %v2263_v9 }
 0x2bd   : > { %v3491_v11 = vpop.eup %3490 }
 0x2be   : > { %2365 = vrot.lane.b32.xlu1 %v3491_v11, %s3545_s11  ;;  %3496 = vtanh.f32 %v2329_v0 }
 0x2c1   : > { %v3493_v15 = vpop.eup %3492 }
 0x2c2   : > { %2367 = vrot.lane.b32.xlu0 %v3493_v15, %s3545_s11 }
 0x2c5   : > { %v3495_v16 = vpop.eup %3494 }
 0x2c6   : > { %2369 = vrot.lane.b32.xlu1 %v3495_v16, %s3545_s11 }
 0x2c8   : > { %v3497_v1 = vpop.eup %3496 }
 0x2c9   : > { %2371 = vrot.lane.b32.xlu0 %v3497_v1, %s3545_s11 }
 0x2cb   : > { %v2242_v20 = vpop.permute.xlu0 %2241 }
 0x2cc   : > { %v2264_v21 = vadd.f32 %v2242_v20, %v2154_v19 }
 0x2cd   : > { %2419 = vrot.lane.b32.xlu0 %v4374_v6, %s3546_s12 }
 0x2ce   : > { %v2330_v23 = vmul.f32 %v4368_v53, %v2264_v21 }
 0x2d0   : > { %3498 = vtanh.f32 %v2330_v23 }
 0x2d1   : > { %2423 = vrot.lane.b32.xlu0 %v4384_v18, %s3546_s12 }
 0x2d5   : > { %2427 = vrot.lane.b32.xlu0 %v2324_v29, %s3546_s12 }
 0x2d9   : > { %2431 = vrot.lane.b32.xlu0 %v2326_v55, %s3546_s12 }
 0x2da   : > { %v3499_v24 = vpop.eup %3498 }
 0x2db   : > { %2373 = vrot.lane.b32.xlu1 %v3499_v24, %s3545_s11 }
 0x2dd   : > { %2435 = vrot.lane.b32.xlu0 %v2328_v5, %s3546_s12 }
 0x2df   : > { %2421 = vrot.lane.b32.xlu1 %v4380_v12, %s3546_s12 }
 0x2e1   : > { %2439 = vrot.lane.b32.xlu0 %v2330_v23, %s3546_s12 }
 0x2e3   : > { %2425 = vrot.lane.b32.xlu1 %v4390_v26, %s3546_s12 }
 0x2e7   : > { %2429 = vrot.lane.b32.xlu1 %v2325_v37, %s3546_s12 }
 0x2eb   : > { %2433 = vrot.lane.b32.xlu1 %v2327_v62, %s3546_s12 }
 0x2ef   : > { %2437 = vrot.lane.b32.xlu1 %v2329_v0, %s3546_s12 }
 0x317   : > { %v2354_v4 = vpop.permute.xlu1 %2353 }
 0x318   : > { %v2386_v6 = vmul.f32 %v2354_v4, %v4200_v34 }
 0x31a   : > { %v2397_v27 = vmul.f32 %v2386_v6, %v4328_v14 }
 0x31b   : > { %v2356_v18 = vpop.permute.xlu0 %2355 }
 0x31c   : > { %2475 = vrot.lane.b32.xlu1 %v2397_v27, %s3547_s28  ;;  %v2387_v28 = vmul.f32 %v2356_v18, %v4209_v47 }
 0x31e   : > { %v2398_v29 = vmul.f32 %v2387_v28, %v4326_v13 }
 0x31f   : > { %v2358_v12 = vpop.permute.xlu1 %2357 }
 0x320   : > { %v2388_v30 = vmul.f32 %v2358_v12, %v4218_v60  ;;  %2477 = vrot.lane.b32.xlu0 %v2398_v29, %s3547_s28 }
 0x322   : > { %v2399_v26 = vmul.f32 %v2388_v30, %v4331_v17 }
 0x323   : > { %v2360_v31 = vpop.permute.xlu0 %2359 }
 0x324   : > { %2479 = vrot.lane.b32.xlu1 %v2399_v26, %s3547_s28  ;;  %v2389_v34 = vmul.f32 %v2360_v31, %v4227_v10 }
 0x326   : > { %v2400_v14 = vmul.f32 %v2389_v34, %v4356_v44 }
 0x327   : > { %v2362_v32 = vpop.permute.xlu1 %2361 }
 0x328   : > { %v2390_v33 = vmul.f32 %v2362_v32, %v4236_v22  ;;  %2481 = vrot.lane.b32.xlu0 %v2400_v14, %s3547_s28 }
 0x32a   : > { %v2401_v47 = vmul.f32 %v2390_v33, %v4352_v40 }
 0x32c   : > { %v2364_v13 = vpop.permute.xlu0 %2363  ;;  %2483 = vrot.lane.b32.xlu1 %v2401_v47, %s3547_s28 }
 0x32d   : > { %v2391_v60 = vmul.f32 %v2364_v13, %v4244_v35 }
 0x32f   : > { %v2402_v17 = vmul.f32 %v2391_v60, %v4358_v45 }
 0x330   : > { %v2366_v25 = vpop.permute.xlu1 %2365 }
 0x331   : > { %v2392_v36 = vmul.f32 %v2366_v25, %v4252_v39  ;;  %2485 = vrot.lane.b32.xlu0 %v2402_v17, %s3547_s28 }
 0x333   : > { %v2403_v10 = vmul.f32 %v2392_v36, %v4360_v46 }
 0x334   : > { %v2368_v22 = vpop.permute.xlu0 %2367 }
 0x335   : > { %v2393_v44 = vmul.f32 %v2368_v22, %v4258_v43  ;;  %2487 = vrot.lane.b32.xlu1 %v2403_v10, %s3547_s28 }
 0x337   : > { %v2404_v40 = vmul.f32 %v2393_v44, %v4362_v49 }
 0x338   : > { %v2370_v35 = vpop.permute.xlu1 %2369 }
 0x339   : > { %v2394_v45 = vmul.f32 %v2370_v35, %v4264_v48  ;;  %2489 = vrot.lane.b32.xlu0 %v2404_v40, %s3547_s28 }
 0x33b   : > { %v2405_v39 = vmul.f32 %v2394_v45, %v4364_v51  ;;  %v2372_v37 = vpop.permute.xlu0 %2371 }
 0x33c   : > { %v2395_v46 = vmul.f32 %v2372_v37, %v4273_v54 }
 0x33d   : > { %2491 = vrot.lane.b32.xlu1 %v2405_v39, %s3547_s28 }
 0x33e   : > { %v2406_v43 = vmul.f32 %v2395_v46, %v4366_v52 }
 0x33f   : > { %v2420_v38 = vpop.permute.xlu0 %2419 }
 0x340   : > { %2452 = vst.msk [vmem:[%s3630_s16] sm:$0xff] %vm439_vm3, %v2420_v38  ;;  %2493 = vrot.lane.b32.xlu0 %v2406_v43, %s3547_s28 }
 0x343   : > { %v2424_v49 = vpop.permute.xlu0 %2423 }
 0x344   : > { %2454 = vst.msk [vmem:[%s3630_s16 + $0x10] sm:$0xff] %vm439_vm3, %v2424_v49 }
 0x347   : > { %v2428_v48 = vpop.permute.xlu0 %2427 }
 0x348   : > { %2456 = vst.msk [vmem:[%s3630_s16 + $0x20] sm:$0xff] %vm439_vm3, %v2428_v48 }
 0x34b   : > { %v2432_v54 = vpop.permute.xlu0 %2431 }
 0x34c   : > { %2458 = vst.msk [vmem:[%s3630_s16 + $0x30] sm:$0xff] %vm439_vm3, %v2432_v54 }
 0x34d   : > { %v2374_v51 = vpop.permute.xlu1 %2373 }
 0x34e   : > { %v2396_v52 = vmul.f32 %v2374_v51, %v4282_v58 }
 0x34f   : > { %v2436_v42 = vpop.permute.xlu0 %2435 }
 0x350   : > { %v2407_v41 = vmul.f32 %v2396_v52, %v4368_v53  ;;  %2460 = vst.msk [vmem:[%s3630_s16 + $0x40] sm:$0xff] %vm439_vm3, %v2436_v42 }
 0x351   : > { %v2422_v55 = vpop.permute.xlu1 %2421 }
 0x352   : > { %2453 = vst.msk [vmem:[%s3630_s16 + $0x8] sm:$0xff] %vm439_vm3, %v2422_v55  ;;  %2495 = vrot.lane.b32.xlu1 %v2407_v41, %s3547_s28 }
 0x353   : > { %v2440_v56 = vpop.permute.xlu0 %2439 }
 0x354   : > { %2463 = vst.msk [vmem:[%s3630_s16 + $0x50] sm:$0x1] %vm2462_vm6, %v2440_v56 }
 0x355   : > { %v2426_v57 = vpop.permute.xlu1 %2425 }
 0x356   : > { %2455 = vst.msk [vmem:[%s3630_s16 + $0x18] sm:$0xff] %vm439_vm3, %v2426_v57 }
 0x359   : > { %v2430_v58 = vpop.permute.xlu1 %2429 }
 0x35a   : > { %2457 = vst.msk [vmem:[%s3630_s16 + $0x28] sm:$0xff] %vm439_vm3, %v2430_v58 }
 0x35d   : > { %v2434_v53 = vpop.permute.xlu1 %2433 }
 0x35e   : > { %2459 = vst.msk [vmem:[%s3630_s16 + $0x38] sm:$0xff] %vm439_vm3, %v2434_v53 }
 0x361   : > { %v2438_v59 = vpop.permute.xlu1 %2437 }
 0x362   : > { %2461 = vst.msk [vmem:[%s3630_s16 + $0x48] sm:$0xff] %vm439_vm3, %v2438_v59 }
 0x38e   : > { %v2476_v61 = vpop.permute.xlu1 %2475 }
 0x38f   : > { %2508 = vst.msk [vmem:[%s3640_s0] sm:$0xff] %vm439_vm3, %v2476_v61  ;;  %2519 = vst.msk [vmem:[#allocation2 + $0xa] sm:$0xff] %vm439_vm3, %v2476_v61 }
 0x392   : > { %v2478_v50 = vpop.permute.xlu0 %2477 }
 0x393   : > { %2509 = vst.msk [vmem:[%s3640_s0 + $0x8] sm:$0xff] %vm439_vm3, %v2478_v50  ;;  %2520 = vst.msk [vmem:[#allocation2 + $0x12] sm:$0xff] %vm439_vm3, %v2478_v50 }
 0x396   : > { %v2480_v62 = vpop.permute.xlu1 %2479 }
 0x397   : > { %2510 = vst.msk [vmem:[%s3640_s0 + $0x10] sm:$0xff] %vm439_vm3, %v2480_v62  ;;  %2521 = vst.msk [vmem:[#allocation2 + $0x1a] sm:$0xff] %vm439_vm3, %v2480_v62 }
 0x39a   : > { %v2482_v2 = vpop.permute.xlu0 %2481 }
 0x39b   : > { %2511 = vst.msk [vmem:[%s3640_s0 + $0x18] sm:$0xff] %vm439_vm3, %v2482_v2  ;;  %2522 = vst.msk [vmem:[#allocation2 + $0x22] sm:$0xff] %vm439_vm3, %v2482_v2 }
 0x39e   : > { %v2484_v3 = vpop.permute.xlu1 %2483 }
 0x39f   : > { %2512 = vst.msk [vmem:[%s3640_s0 + $0x20] sm:$0xff] %vm439_vm3, %v2484_v3  ;;  %2523 = vst.msk [vmem:[#allocation2 + $0x2a] sm:$0xff] %vm439_vm3, %v2484_v3 }
 0x3a3   : > { %v2486_v63 = vpop.permute.xlu0 %2485 }
 0x3a4   : > { %2513 = vst.msk [vmem:[%s3640_s0 + $0x28] sm:$0xff] %vm439_vm3, %v2486_v63  ;;  %2524 = vst.msk [vmem:[#allocation2 + $0x32] sm:$0xff] %vm439_vm3, %v2486_v63 }
 0x3a7   : > { %v2488_v5 = vpop.permute.xlu1 %2487 }
 0x3a8   : > { %2514 = vst.msk [vmem:[%s3640_s0 + $0x30] sm:$0xff] %vm439_vm3, %v2488_v5  ;;  %2525 = vst.msk [vmem:[#allocation2 + $0x3a] sm:$0xff] %vm439_vm3, %v2488_v5 }
 0x3ab   : > { %v2490_v7 = vpop.permute.xlu0 %2489 }
 0x3ac   : > { %2515 = vst.msk [vmem:[%s3640_s0 + $0x38] sm:$0xff] %vm439_vm3, %v2490_v7  ;;  %2526 = vst.msk [vmem:[#allocation2 + $0x42] sm:$0xff] %vm439_vm3, %v2490_v7 }
 0x3af   : > { %v2492_v8 = vpop.permute.xlu1 %2491 }
 0x3b0   : > { %2516 = vst.msk [vmem:[%s3640_s0 + $0x40] sm:$0xff] %vm439_vm3, %v2492_v8  ;;  %2527 = vst.msk [vmem:[#allocation2 + $0x4a] sm:$0xff] %vm439_vm3, %v2492_v8 }
 0x3b2   : > { %v2494_v9 = vpop.permute.xlu0 %2493 }
 0x3b3   : > { %2517 = vst.msk [vmem:[%s3640_s0 + $0x48] sm:$0xff] %vm439_vm3, %v2494_v9  ;;  %2528 = vst.msk [vmem:[#allocation2 + $0x52] sm:$0xff] %vm439_vm3, %v2494_v9 }
 0x3c4   : > { %v2496_v11 = vpop.permute.xlu1 %2495 }
 0x3c5   : > { %2518 = vst.msk [vmem:[%s3640_s0 + $0x50] sm:$0x1] %vm2462_vm6, %v2496_v11  ;;  %2529 = vst.msk [vmem:[#allocation2 + $0x5a] sm:$0x1] %vm2462_vm6, %v2496_v11 }
 0x3c6 PF: > { %s17_s25 = sadd.s32 1, %s3538_s25   ;;  %s4534_s21 = smov %s3530_s23 }
 0x3c7   : > { %p14_p8 = scmp.ge.s32.totalorder %s17_s25, 8   ;;  %s4535_s22 = smov %s3534_s24 }
 0x3c8   : > { %s4536_s23 = smov %s4539_s26  ;;  %s4537_s24 = smov %s4543_s27 }
 0x3c9   :  { %16 = sbr.rel (!%p14_p8) target bundleno = 3 (0x3), region = 100 }

// kernel: _lambda_.27
= control target key start
LH: loop header
LB: loop body
LE: loop exit
PB: predicated region body
PF: predicated region fallthrough
CT: control target
= control target key end

     0   :  { %12 = vsyncpa [#allocation4], 0  ;;  %s4724_s0 = inlined_call_operand.vmem [shape: f32[2,81,8], index: 0, kind: input, shape index: {}]   ;;  %s4725_s1 = inlined_call_operand.vmem [shape: f32[2,81,8], index: 1, kind: input, shape index: {}]   ;;  %s4726_s2 = inlined_call_operand.vmem [shape: f32[2,3,81,32], index: 2, kind: input, shape index: {}]   ;;  %s4727_s3 = inlined_call_operand.vmem [shape: f32[9,8,32], index: 3, kind: input, shape index: {}]   ;;  %s4728_s4 = inlined_call_operand.vmem [shape: f32[81,1], index: 4, kind: input, shape index: {}]   ;;  %s4729_s5 = inlined_call_operand.vmem [shape: f32[2,3,81,8], index: 5, kind: output, shape index: {0}]   ;;  %s4730_s6 = inlined_call_operand.hbm [shape: f32[2,81,8], index: 6, kind: output, shape index: {1}]  }
   0x1   :  { %14 = vsyncpa [#allocation4 + $0x1], 0  ;;  %s3694_s21 = smov 0   ;;  %s3696_s22 = smov 0  }
   0x2   :  { %s3698_s23 = smov 0   ;;  %s3700_s24 = smov 0  }
   0x3   :  { %s3702_s25 = smov 0   ;;  %s3704_s26 = smov 0  }
   0x4   :  { %s3706_s27 = smov 0   ;;  %s3708_s28 = smov 0  }
   0x5 LB: > { %4738 = sst [smem:[#allocation6_spill]] %s3619_s21  ;;  %s2701_s29 = sadd.s32 4294967295, %s3647_s28   ;;  %s3647_s28 = sphi %s3708_s28, %s20_s28   ;;  %s3643_s27 = sphi %s3706_s27, %s4756_s27   ;;  %s3639_s26 = sphi %s3704_s26, %s4755_s26   ;;  %s3635_s25 = sphi %s3702_s25, %s4754_s25   ;;  %s3631_s24 = sphi %s3700_s24, %s4753_s24   ;;  %s3627_s23 = sphi %s3698_s23, %s4752_s23   ;;  %s3623_s22 = sphi %s3696_s22, %s4758_s22   ;;  %s3619_s21 = sphi %s3694_s21, %s4757_s21  }
   0x6   : > { %4739 = sst [smem:[#allocation7_spill]] %s3627_s23  ;;  %s2702_s30 = sadd.s32 4294967294, %s3647_s28  }
   0x7   : > { %4740 = sst [smem:[#allocation8_spill]] %s3639_s26  ;;  %s29_s7 = sadd.s32 1, %s3639_s26 }
   0x8   : > { %4741 = sst [smem:[#allocation9_spill]] %s3643_s27  ;;  %p30_p0 = scmp.ge.s32.totalorder %s29_s7, 3 }
   0x9   : > { %s32_s8 = sadd.s32 1, %s3643_s27  ;;  %p199_p1 = scmp.ne.s32.totalorder %s3627_s23, %s3623_s22 }
   0xa   : > { %p200_p2 = scmp.eq.s32.totalorder %s2701_s29, 5  ;;  %s4760_s7 = smov (%p30_p0, %s29_s7), 0 }
   0xb   : > { %4742 = sst [smem:[#allocation10_spill]] %s4760_s7  ;;  %s4762_s8 = smov (!%p30_p0, %s32_s8), %s3643_s27 }
   0xc   : > { %p3743_p3 = por %p200_p2, %p199_p1  ;;  %p205_p4 = scmp.ne.s32.totalorder %s3623_s22, %s3619_s21 }
   0xd   : > { %p34_p5 = scmp.ge.s32.totalorder %s4762_s8, 2  ;;  %p206_p6 = scmp.eq.s32.totalorder %s2702_s30, 5 }
   0xe   : > { %p2705_p7 = scmp.ge.s32.totalorder %s3647_s28, 1  ;;  %p258_p8 = scmp.lt.s32.totalorder %s3647_s28, 7 }
   0xf   : > { %s4764_s8 = smov (%p34_p5, %s4762_s8), 0  ;;  %p3753_p9 = por %p206_p6, %p205_p4 }
  0x10   : > { %4744 = sst [smem:[#allocation11_spill]] %s4764_s8  ;;  %p259_p10 = pnand %p2705_p7, %p258_p8 }
  0x11   : > { %s4745_s10 = scalar_select %p3753_p9, 1, 0 }
  0x12   : > { %s186_s11 = ssub.s32 %s3643_s27, %s4764_s8  ;;  %s189_s12 = sadd.s32 1, %s3627_s23 }
  0x13   : > { %4746 = sst [smem:[#allocation12_spill]] %s4745_s10  ;;  %p187_p11 = scmp.eq.s32.totalorder %s186_s11, 0 }
  0x14   : > { %262 = sbr.rel (%p259_p10) target bundleno = 978 (0x3d2), region = 40  ;;  %s4734_s14 = sand.u32 (!%p259_p10), 1, %s3623_s22  }
  0x15   : > { %s3761_s13 = scalar_select %p187_p11, %s3627_s23, %s189_s12  }
  0x16   : > { %p311_p12 = scmp.lt.s32.totalorder (!%p259_p10), %s3635_s25, 1  ;;  %s3422_s15 = smul.u32 (!%p259_p10), 88, %s4734_s14 }
  0x17   : > { %4747 = sst [smem:[#allocation13_spill]] %s3761_s13  ;;  %p323_p13 = scmp.lt.s32.totalorder (!%p259_p10), %s3631_s24, 2 }
  0x18   : > { %s3790_s20 = scalar_lea.vmem (!%p259_p10), [#allocation3], %s3422_s15  ;;  %p2710_p0 = scmp.ne.s32.totalorder (!%p259_p10), %s3631_s24, 0 }
  0x1b   : > { %s312_s16 = scalar_select %p311_p12, %s3635_s25, 1 }
  0x1c   : > { %s324_s18 = scalar_select %p323_p13, %s3631_s24, 2 }
  0x1d   : > { %s3423_s17 = smul.u32 88, %s312_s16  ;;  %vm343_vm0 = vcmask (!%p2710_p0), 64512   ;;  %vm356_vm1 = vcmask (!%p2710_p0), 61440   ;;  %v3649_v3 = vmov (!%p2710_p0), 0.0   ;;  %vm379_vm2 = vcmask (!%p2710_p0), 57344  }
  0x1e   : > { %s3424_s8 = smul.u32 11, %s324_s18  ;;  %345 = vst.msk [vmem:[#allocation2 + $0x8] sm:$0xff] (!%p2710_p0), %vm343_vm0, %v3649_v3  ;;  %344 = vst.msk [vmem:[#allocation2] sm:$0xff] (!%p2710_p0), %vm343_vm0, %v3649_v3 }
  0x1f   : > { %s3773_s29 = scalar_lea.vmem %s4724_s0, %s3423_s17  ;;  %s3778_s12 = scalar_lea.vmem %s4725_s1, %s3423_s17  ;;  %346 = vst.msk [vmem:[#allocation2 + $0x10] sm:$0xff] (!%p2710_p0), %vm343_vm0, %v3649_v3  ;;  %347 = vst.msk [vmem:[#allocation2 + $0x18] sm:$0xff] (!%p2710_p0), %vm343_vm0, %v3649_v3 }
  0x20   : > { %s3425_s7 = smul.u32 33, %s312_s16  ;;  %v358_v0 = vld [vmem:[%s3773_s29] sm:$0xff] (!%p2710_p0)  ;;  %v359_v1 = vld [vmem:[%s3773_s29 + $0x8] sm:$0xff] (!%p2710_p0)  ;;  %v360_v2 = vld [vmem:[%s3773_s29 + $0x10] sm:$0xff] (!%p2710_p0)  ;;  %348 = vst.msk [vmem:[#allocation2 + $0x20] sm:$0xff] (!%p2710_p0), %vm343_vm0, %v3649_v3 }
  0x21   : > { %342 = sbr.rel (%p2710_p0) target bundleno = 49 (0x31), region = 44  ;;  %349 = vst.msk [vmem:[#allocation2 + $0x28] sm:$0xff] (!%p2710_p0), %vm343_vm0, %v3649_v3  ;;  %350 = vst.msk [vmem:[#allocation2 + $0x30] sm:$0xff] (!%p2710_p0), %vm343_vm0, %v3649_v3  ;;  %v361_v4 = vld [vmem:[%s3773_s29 + $0x18] sm:$0xff] (!%p2710_p0)  ;;  %v362_v5 = vld [vmem:[%s3773_s29 + $0x20] sm:$0xff] (!%p2710_p0) }
  0x22   : > { %s327_s27 = sadd.s32 %s3425_s7, %s3424_s8  ;;  %351 = vst.msk [vmem:[#allocation2 + $0x38] sm:$0xff] (!%p2710_p0), %vm343_vm0, %v3649_v3  ;;  %352 = vst.msk [vmem:[#allocation2 + $0x40] sm:$0xff] (!%p2710_p0), %vm343_vm0, %v3649_v3  ;;  %v363_v6 = vld [vmem:[%s3773_s29 + $0x28] sm:$0xff] (!%p2710_p0)  ;;  %v364_v7 = vld [vmem:[%s3773_s29 + $0x30] sm:$0xff] (!%p2710_p0) }
  0x23   : > { %s2708_s26 = sshll.u32 %s327_s27, 3  ;;  %353 = vst.msk [vmem:[#allocation2 + $0x48] sm:$0xff] (!%p2710_p0), %vm343_vm0, %v3649_v3  ;;  %354 = vst.msk [vmem:[#allocation2 + $0x50] sm:$0xff] (!%p2710_p0), %vm343_vm0, %v3649_v3  ;;  %v365_v8 = vld [vmem:[%s3773_s29 + $0x38] sm:$0xff] (!%p2710_p0)  ;;  %v366_v9 = vld [vmem:[%s3773_s29 + $0x40] sm:$0xff] (!%p2710_p0) }
  0x24   : > { %s3783_s23 = scalar_lea.vmem %s4726_s2, %s2708_s26  ;;  %s3788_s19 = scalar_lea.vmem %s4729_s5, %s2708_s26  ;;  %355 = vst.msk [vmem:[#allocation2 + $0x58] sm:$0xff] (!%p2710_p0), %vm343_vm0, %v3649_v3  ;;  %369 = vst.msk [vmem:[#allocation2 + $0xa] sm:$0xff] (!%p2710_p0), %vm343_vm0, %v358_v0  ;;  %v367_v10 = vld [vmem:[%s3773_s29 + $0x48] sm:$0xff] (!%p2710_p0)  ;;  %v368_v11 = vld [vmem:[%s3773_s29 + $0x50] sm:$0x1] (!%p2710_p0) }
  0x25   : > { %357 = vst.msk [vmem:[#allocation2 + $0x60] sm:$0x1f] (!%p2710_p0), %vm356_vm1, %v3649_v3  ;;  %v381_v12 = vld [vmem:[%s3778_s12] sm:$0xff] (!%p2710_p0)  ;;  %v382_v13 = vld [vmem:[%s3778_s12 + $0x8] sm:$0xff] (!%p2710_p0)  ;;  %v383_v14 = vld [vmem:[%s3778_s12 + $0x10] sm:$0xff] (!%p2710_p0) }
  0x26   : > { %370 = vst.msk [vmem:[#allocation2 + $0x12] sm:$0xff] (!%p2710_p0), %vm343_vm0, %v359_v1  ;;  %371 = vst.msk [vmem:[#allocation2 + $0x1a] sm:$0xff] (!%p2710_p0), %vm343_vm0, %v360_v2  ;;  %v384_v15 = vld [vmem:[%s3778_s12 + $0x18] sm:$0xff] (!%p2710_p0)  ;;  %v385_v16 = vld [vmem:[%s3778_s12 + $0x20] sm:$0xff] (!%p2710_p0) }
  0x27   : > { %372 = vst.msk [vmem:[#allocation2 + $0x22] sm:$0xff] (!%p2710_p0), %vm343_vm0, %v361_v4  ;;  %373 = vst.msk [vmem:[#allocation2 + $0x2a] sm:$0xff] (!%p2710_p0), %vm343_vm0, %v362_v5  ;;  %v386_v17 = vld [vmem:[%s3778_s12 + $0x28] sm:$0xff] (!%p2710_p0)  ;;  %v387_v18 = vld [vmem:[%s3778_s12 + $0x30] sm:$0xff] (!%p2710_p0) }
  0x28   : > { %374 = vst.msk [vmem:[#allocation2 + $0x32] sm:$0xff] %vm343_vm0, %v363_v6  ;;  %375 = vst.msk [vmem:[#allocation2 + $0x3a] sm:$0xff] %vm343_vm0, %v364_v7  ;;  %v388_v19 = vld [vmem:[%s3778_s12 + $0x38] sm:$0xff]  ;;  %v389_v20 = vld [vmem:[%s3778_s12 + $0x40] sm:$0xff] }
  0x29   : > { %376 = vst.msk [vmem:[#allocation2 + $0x42] sm:$0xff] %vm343_vm0, %v365_v8  ;;  %377 = vst.msk [vmem:[#allocation2 + $0x4a] sm:$0xff] %vm343_vm0, %v366_v9  ;;  %v390_v21 = vld [vmem:[%s3778_s12 + $0x48] sm:$0xff]  ;;  %v391_v22 = vld [vmem:[%s3778_s12 + $0x50] sm:$0x1] }
  0x2a   : > { %378 = vst.msk [vmem:[#allocation2 + $0x52] sm:$0xff] %vm343_vm0, %v367_v10  ;;  %392 = vst.msk [vmem:[%s3790_s20] sm:$0xff] %vm343_vm0, %v381_v12 }
  0x2b   : > { %380 = vst.msk [vmem:[#allocation2 + $0x5a] sm:$0x1] %vm379_vm2, %v368_v11  ;;  %402 = vst.msk [vmem:[%s3790_s20 + $0x50] sm:$0x1] %vm379_vm2, %v391_v22 }
  0x2c   : > { %393 = vst.msk [vmem:[%s3790_s20 + $0x8] sm:$0xff] %vm343_vm0, %v382_v13  ;;  %394 = vst.msk [vmem:[%s3790_s20 + $0x10] sm:$0xff] %vm343_vm0, %v383_v14 }
  0x2d   : > { %395 = vst.msk [vmem:[%s3790_s20 + $0x18] sm:$0xff] %vm343_vm0, %v384_v15  ;;  %396 = vst.msk [vmem:[%s3790_s20 + $0x20] sm:$0xff] %vm343_vm0, %v385_v16 }
  0x2e   : > { %397 = vst.msk [vmem:[%s3790_s20 + $0x28] sm:$0xff] %vm343_vm0, %v386_v17  ;;  %398 = vst.msk [vmem:[%s3790_s20 + $0x30] sm:$0xff] %vm343_vm0, %v387_v18 }
  0x2f   : > { %399 = vst.msk [vmem:[%s3790_s20 + $0x38] sm:$0xff] %vm343_vm0, %v388_v19  ;;  %400 = vst.msk [vmem:[%s3790_s20 + $0x40] sm:$0xff] %vm343_vm0, %v389_v20 }
  0x30   : > { %401 = vst.msk [vmem:[%s3790_s20 + $0x48] sm:$0xff] %vm343_vm0, %v390_v21 }
  0x31 PF: > { %v436_v23 = vld [vmem:[%s4727_s3] sm:$0xff]  ;;  %v3650_v25 = vmov 0.0   ;;  %vm437_vm3 = vcmask 64512   ;;  %vm3651_vm4 = vmmov 0   ;;  %v2770_v28 = vld [vmem:[%s4727_s3 + $0x28] sm:$0xff]  ;;  %v2782_v42 = vld [vmem:[%s4727_s3 + $0x30] sm:$0xff] }
  0x32   : > { %v3867_v24 = vld [vmem:[%s4727_s3 + $0x20] sm:$0xff]  ;;  %2929 = vmatprep.subr.mxu1 %v3650_v25  ;;  %3069 = vmatprep.subr.mxu0 %v3650_v25  ;;  %v2722_v29 = vld [vmem:[%s4727_s3 + $0x8] sm:$0xff]  ;;  %v2734_v53 = vld [vmem:[%s4727_s3 + $0x10] sm:$0xff]  ;;  %s3653_s13 = smov 104   ;;  %s3654_s10 = smov 8   ;;  %vm2460_vm6 = vcmask 57344  }
  0x33   : > { %v425_v26 = vld [vmem:[#allocation2] sm:$0xff]  ;;  %2930 = vmatpush3.msra.mxu1 %v436_v23  ;;  %2931 = vmatprep.mubr.msk.f32.mxu1 %vm3651_vm4, %v3650_v25  ;;  %v434_v47 = vld [vmem:[#allocation2 + $0x48] sm:$0xff]  ;;  %v435_v49 = vld [vmem:[#allocation2 + $0x50] sm:$0x1]  ;;  %s3426_s14 = smul.u32 1408, %s3635_s25  ;;  %s2554_s15 = sshll.u32 %s3790_s20, 4  ;;  %s4632_s15 = int_to_ptr.vmem [resolvable:$true] %s2554_s15 }
  0x34   : > { %v3871_v27 = vld [vmem:[#allocation2 + $0xa] sm:$0xff]  ;;  %3070 = vmatpush3.msra.mxu0 %v3867_v24  ;;  %3071 = vmatprep.mubr.msk.f32.mxu0 %vm3651_vm4, %v3650_v25  ;;  %v602_v51 = vld [vmem:[#allocation2 + $0x1] sm:$0xff]  ;;  %v4037_v61 = vld [vmem:[#allocation2 + $0x53] sm:$0xff]  ;;  %s4748_s29 = sand.u32 1, %s3623_s22   ;;  %s3553_s25 = scalar_lea.vmem %s4632_s15, 1408 }
  0x35   : > { %2932 = vmatmul.mubr.msk.f32.vlgmr.msra.gmra.mrb[0].mxu1 %vm437_vm3, %v425_v26  ;;  %3072 = vmatmul.mubr.msk.f32.vlgmr.msra.gmra.mrb[0].mxu0 %vm437_vm3, %v3871_v27  ;;  %v426_v30 = vld [vmem:[#allocation2 + $0x8] sm:$0xff]  ;;  %v1320_v63 = vld [vmem:[#allocation2 + $0x5b] sm:$0x1]  ;;  %v612_v5 = vld [vmem:[#allocation2 + $0x51] sm:$0x1]  ;;  %s4630_s18 = scalar_lea.hbm %s4730_s6, %s3426_s14  ;;  %s4638_s30 = scalar_lea.sflag [#allocation4], %s4748_s29 }
  0x36   : > { %3104 = vmatprep.subr.mxu0 %v3650_v25  ;;  %2964 = vmatprep.subr.mxu1 %v3650_v25  ;;  %v3889_v31 = vld [vmem:[#allocation2 + $0x12] sm:$0xff]  ;;  %v3902_v33 = vld [vmem:[#allocation2 + $0x1a] sm:$0xff]  ;;  %v3996_v54 = vld [vmem:[#allocation2 + $0x9] sm:$0xff]  ;;  %p3554_p1 = scmp.ne.s32.totalorder %s4632_s15, %s3553_s25  ;;  %s3657_s11 = smov [#allocation3]  }
  0x37   : > { %3105 = vmatpush3.msra.mxu0 %v2770_v28  ;;  %2934 = vmatprep.mubr.msk.f32.mxu1 %vm3651_vm4, %v3650_v25  ;;  %v427_v32 = vld [vmem:[#allocation2 + $0x10] sm:$0xff]  ;;  %v428_v34 = vld [vmem:[#allocation2 + $0x18] sm:$0xff]  ;;  %v3913_v35 = vld [vmem:[#allocation2 + $0x22] sm:$0xff]  ;;  %s3557_s12 = sshll.u32 %s3657_s11, 4  ;;  %s3558_s12 = int_to_ptr.vmem [resolvable:$false] %s3557_s12 }
  0x38   : > { %2965 = vmatpush3.msra.mxu1 %v2722_v29  ;;  %3074 = vmatprep.mubr.msk.f32.mxu0 %vm3651_vm4, %v3650_v25  ;;  %v429_v36 = vld [vmem:[#allocation2 + $0x20] sm:$0xff]  ;;  %v3922_v37 = vld [vmem:[#allocation2 + $0x2a] sm:$0xff]  ;;  %v3931_v39 = vld [vmem:[#allocation2 + $0x32] sm:$0xff]  ;;  %p3555_p2 = pnand %p3554_p1, %p3743_p3  ;;  %s3559_s21 = scalar_lea.vmem %s3558_s12, 2816 }
  0x39   : > { %2935 = vmatmul.mubr.msk.f32.gmra.mrb[2].mxu1 %vm437_vm3, %v426_v30  ;;  %3075 = vmatmul.mubr.msk.f32.gmra.mrb[2].mxu0 %vm437_vm3, %v3889_v31  ;;  %v430_v38 = vld [vmem:[#allocation2 + $0x28] sm:$0xff]  ;;  %v431_v40 = vld [vmem:[#allocation2 + $0x30] sm:$0xff]  ;;  %v432_v43 = vld [vmem:[#allocation2 + $0x38] sm:$0xff]  ;;  %p3560_p5 = scmp.lt.s32.totalorder %s4632_s15, %s3558_s12  ;;  %p3561_p6 = scmp.lt.s32.totalorder %s3559_s21, %s3553_s25 }
  0x3a   : > { %2937 = vmatprep.mubr.msk.f32.mxu1 %vm3651_vm4, %v3650_v25  ;;  %3077 = vmatprep.mubr.msk.f32.mxu0 %vm3651_vm4, %v3650_v25  ;;  %v1310_v41 = vld [vmem:[#allocation2 + $0xb] sm:$0xff]  ;;  %v3947_v44 = vld [vmem:[#allocation2 + $0x13] sm:$0xff]  ;;  %v433_v45 = vld [vmem:[#allocation2 + $0x40] sm:$0xff]  ;;  %p3556_p4 = pneg %p3555_p2 }
  0x3b   : > { %3139 = vmatprep.subr.mxu0 %v3650_v25  ;;  %2999 = vmatprep.subr.mxu1 %v3650_v25  ;;  %v3959_v46 = vld [vmem:[#allocation2 + $0x1b] sm:$0xff]  ;;  %v3968_v48 = vld [vmem:[#allocation2 + $0x23] sm:$0xff]  ;;  %v3977_v50 = vld [vmem:[#allocation2 + $0x2b] sm:$0xff]  ;;  %p3562_p7 = por %p3561_p6, %p3560_p5 }
  0x3c   : > { %v3986_v52 = vld [vmem:[#allocation2 + $0x33] sm:$0xff]  ;;  %v3998_v55 = vld [vmem:[#allocation2 + $0x3b] sm:$0xff]  ;;  %v4013_v57 = vld [vmem:[#allocation2 + $0x43] sm:$0xff] }
  0x3d   : > { %2938 = vmatmul.mubr.msk.f32.gmra.mrb[4].mxu1 %vm437_vm3, %v427_v32  ;;  %3078 = vmatmul.mubr.msk.f32.gmra.mrb[4].mxu0 %vm437_vm3, %v3902_v33  ;;  %v4011_v56 = vld [vmem:[#allocation2 + $0x11] sm:$0xff]  ;;  %v4023_v58 = vld [vmem:[#allocation2 + $0x19] sm:$0xff]  ;;  %v4035_v60 = vld [vmem:[#allocation2 + $0x21] sm:$0xff]  ;;  %p3563_p8 = pnand %p3562_p7, %p3556_p4 }
  0x3e   : > { %2940 = vmatprep.mubr.msk.f32.mxu1 %vm3651_vm4, %v3650_v25  ;;  %3080 = vmatprep.mubr.msk.f32.mxu0 %vm3651_vm4, %v3650_v25  ;;  %v4025_v59 = vld [vmem:[#allocation2 + $0x4b] sm:$0xff]  ;;  %v2794_v1 = vld [vmem:[%s4727_s3 + $0x38] sm:$0xff]  ;;  %v4080_v3 = vld [vmem:[#allocation2 + $0x41] sm:$0xff] }
  0x3f   : > { %v4047_v62 = vld [vmem:[#allocation2 + $0x29] sm:$0xff]  ;;  %v4056_v0 = vld [vmem:[#allocation2 + $0x31] sm:$0xff]  ;;  %v4067_v2 = vld [vmem:[#allocation2 + $0x39] sm:$0xff] }
  0x40   : > { %v4090_v4 = vld [vmem:[#allocation2 + $0x49] sm:$0xff]  ;;  %v4107_v7 = vld [vmem:[#allocation2 + $0x3a] sm:$0xff]  ;;  %v4140_v11 = vld [vmem:[#allocation2 + $0x52] sm:$0xff] }
  0x41   : > { %2941 = vmatmul.mubr.msk.f32.gmra.mrb[6].mxu1 %vm437_vm3, %v428_v34  ;;  %3081 = vmatmul.mubr.msk.f32.gmra.mrb[6].mxu0 %vm437_vm3, %v3913_v35  ;;  %v779_v6 = vld [vmem:[#allocation2 + $0x2] sm:$0xff]  ;;  %v2746_v8 = vld [vmem:[%s4727_s3 + $0x18] sm:$0xff]  ;;  %v4130_v10 = vld [vmem:[#allocation2 + $0x4a] sm:$0xff] }
  0x42   : > { %2943 = vmatprep.mubr.msk.f32.mxu1 %vm3651_vm4, %v3650_v25  ;;  %3083 = vmatprep.mubr.msk.f32.mxu0 %vm3651_vm4, %v3650_v25  ;;  %v4117_v9 = vld [vmem:[#allocation2 + $0x42] sm:$0xff]  ;;  %v1496_v12 = vld [vmem:[#allocation2 + $0x5a] sm:$0xff]  ;;  %v789_v15 = vld [vmem:[#allocation2 + $0x52] sm:$0x1] }
  0x43   : > { %v1497_v13 = vld [vmem:[#allocation2 + $0x62] sm:$0x1]  ;;  %v1674_v17 = vld [vmem:[#allocation2 + $0x63] sm:$0x1]  ;;  %v1841_v18 = vld [vmem:[#allocation2 + $0x14] sm:$0xff] }
  0x44   : > { %v2806_v14 = vld [vmem:[%s4727_s3 + $0x40] sm:$0xff]  ;;  %v965_v21 = vld [vmem:[#allocation2 + $0x51] sm:$0xff]  ;;  %v966_v23 = vld [vmem:[#allocation2 + $0x59] sm:$0x1] }
  0x45   : > { %2944 = vmatmul.mubr.msk.f32.gmra.mrb[8].mxu1 %vm437_vm3, %v429_v36  ;;  %3084 = vmatmul.mubr.msk.f32.gmra.mrb[8].mxu0 %vm437_vm3, %v3922_v37  ;;  %v1673_v16 = vld [vmem:[#allocation2 + $0x5b] sm:$0xff]  ;;  %v1843_v20 = vld [vmem:[#allocation2 + $0x24] sm:$0xff]  ;;  %v1844_v22 = vld [vmem:[#allocation2 + $0x2c] sm:$0xff] }
  0x46   : > { %2946 = vmatprep.mubr.msk.f32.mxu1 %vm3651_vm4, %v3650_v25  ;;  %3086 = vmatprep.mubr.msk.f32.mxu0 %vm3651_vm4, %v3650_v25  ;;  %v1842_v19 = vld [vmem:[#allocation2 + $0x1c] sm:$0xff]  ;;  %v1848_v28 = vld [vmem:[#allocation2 + $0x4c] sm:$0xff]  ;;  %v1849_v29 = vld [vmem:[#allocation2 + $0x54] sm:$0xff] }
  0x47   : > { %v1846_v26 = vld [vmem:[#allocation2 + $0x3c] sm:$0xff]  ;;  %v1143_v30 = vld [vmem:[#allocation2 + $0x5a] sm:$0x1]  ;;  %v1851_v32 = vld [vmem:[#allocation2 + $0x64] sm:$0x1] }
  0x48   : > { %v404_v34 = vld [vmem:[%s4728_s4 + $0x8] sm:$0xff] }
  0x49   : > { %2947 = vmatmul.mubr.msk.f32.gmra.mrb[10].mxu1 %vm437_vm3, %v430_v38  ;;  %3087 = vmatmul.mubr.msk.f32.gmra.mrb[10].mxu0 %vm437_vm3, %v3931_v39 }
  0x4a   : > { %2949 = vmatprep.mubr.msk.f32.mxu1 %vm3651_vm4, %v3650_v25  ;;  %3106 = vmatprep.mubr.msk.f32.mxu0 %vm3651_vm4, %v3650_v25 }
  0x4d   : > { %2950 = vmatmul.mubr.msk.f32.gmra.mrb[12].mxu1 %vm437_vm3, %v431_v40  ;;  %3107 = vmatmul.mubr.msk.f32.vlgmr.msra.gmra.mrb[0].mxu0 %vm437_vm3, %v1310_v41 }
  0x4e   : > { %3140 = vmatpush3.msra.mxu0 %v2782_v42  ;;  %2952 = vmatprep.mubr.msk.f32.mxu1 %vm3651_vm4, %v3650_v25 }
  0x4f   : > { %3109 = vmatprep.mubr.msk.f32.mxu0 %vm3651_vm4, %v3650_v25  ;;  %3174 = vmatprep.subr.mxu0 %v3650_v25 }
  0x51   : > { %2953 = vmatmul.mubr.msk.f32.gmra.mrb[14].mxu1 %vm437_vm3, %v432_v43  ;;  %3110 = vmatmul.mubr.msk.f32.gmra.mrb[2].mxu0 %vm437_vm3, %v3947_v44 }
  0x52   : > { %2955 = vmatprep.mubr.msk.f32.mxu1 %vm3651_vm4, %v3650_v25  ;;  %3112 = vmatprep.mubr.msk.f32.mxu0 %vm3651_vm4, %v3650_v25 }
  0x55   : > { %2956 = vmatmul.mubr.msk.f32.gmra.mrb[16].mxu1 %vm437_vm3, %v433_v45  ;;  %3113 = vmatmul.mubr.msk.f32.gmra.mrb[4].mxu0 %vm437_vm3, %v3959_v46 }
  0x56   : > { %2958 = vmatprep.mubr.msk.f32.mxu1 %vm3651_vm4, %v3650_v25  ;;  %3115 = vmatprep.mubr.msk.f32.mxu0 %vm3651_vm4, %v3650_v25 }
  0x59   : > { %2959 = vmatmul.mubr.msk.f32.gmra.mrb[18].mxu1 %vm437_vm3, %v434_v47  ;;  %3116 = vmatmul.mubr.msk.f32.gmra.mrb[6].mxu0 %vm437_vm3, %v3968_v48  ;;  %v414_v47 = vld [vmem:[%s3783_s23] sm:$0xff] }
  0x5a   : > { %2961 = vmatprep.mubr.msk.f32.mxu1 %vm3651_vm4, %v3650_v25  ;;  %3118 = vmatprep.mubr.msk.f32.mxu0 %vm3651_vm4, %v3650_v25 }
  0x5d   : > { %2962 = vmatmul.mubr.msk.f32.gmra.mrb[20].mxu1 %vm437_vm3, %v435_v49  ;;  %3119 = vmatmul.mubr.msk.f32.gmra.mrb[8].mxu0 %vm437_vm3, %v3977_v50 }
  0x5e   : > { %2966 = vmatprep.mubr.msk.f32.mxu1 %vm3651_vm4, %v3650_v25  ;;  %3121 = vmatprep.mubr.msk.f32.mxu0 %vm3651_vm4, %v3650_v25 }
  0x61   : > { %2967 = vmatmul.mubr.msk.f32.vlgmr.msra.gmra.mrb[0].mxu1 %vm437_vm3, %v602_v51  ;;  %3122 = vmatmul.mubr.msk.f32.gmra.mrb[10].mxu0 %vm437_vm3, %v3986_v52 }
  0x62   : > { %2969 = vmatprep.mubr.msk.f32.mxu1 %vm3651_vm4, %v3650_v25  ;;  %3000 = vmatpush3.msra.mxu1 %v2734_v53 }
  0x63   : > { %3124 = vmatprep.mubr.msk.f32.mxu0 %vm3651_vm4, %v3650_v25  ;;  %3034 = vmatprep.subr.mxu1 %v3650_v25 }
  0x65   : > { %2970 = vmatmul.mubr.msk.f32.gmra.mrb[2].mxu1 %vm437_vm3, %v3996_v54  ;;  %3125 = vmatmul.mubr.msk.f32.gmra.mrb[12].mxu0 %vm437_vm3, %v3998_v55 }
  0x66   : > { %2972 = vmatprep.mubr.msk.f32.mxu1 %vm3651_vm4, %v3650_v25  ;;  %3127 = vmatprep.mubr.msk.f32.mxu0 %vm3651_vm4, %v3650_v25 }
  0x69   : > { %2973 = vmatmul.mubr.msk.f32.gmra.mrb[4].mxu1 %vm437_vm3, %v4011_v56  ;;  %3128 = vmatmul.mubr.msk.f32.gmra.mrb[14].mxu0 %vm437_vm3, %v4013_v57 }
  0x6a   : > { %2975 = vmatprep.mubr.msk.f32.mxu1 %vm3651_vm4, %v3650_v25  ;;  %3130 = vmatprep.mubr.msk.f32.mxu0 %vm3651_vm4, %v3650_v25 }
  0x6d   : > { %2976 = vmatmul.mubr.msk.f32.gmra.mrb[6].mxu1 %vm437_vm3, %v4023_v58  ;;  %3131 = vmatmul.mubr.msk.f32.gmra.mrb[16].mxu0 %vm437_vm3, %v4025_v59 }
  0x6e   : > { %2978 = vmatprep.mubr.msk.f32.mxu1 %vm3651_vm4, %v3650_v25  ;;  %3133 = vmatprep.mubr.msk.f32.mxu0 %vm3651_vm4, %v3650_v25 }
  0x71   : > { %2979 = vmatmul.mubr.msk.f32.gmra.mrb[8].mxu1 %vm437_vm3, %v4035_v60  ;;  %3134 = vmatmul.mubr.msk.f32.gmra.mrb[18].mxu0 %vm437_vm3, %v4037_v61 }
  0x72   : > { %2981 = vmatprep.mubr.msk.f32.mxu1 %vm3651_vm4, %v3650_v25  ;;  %3136 = vmatprep.mubr.msk.f32.mxu0 %vm3651_vm4, %v3650_v25 }
  0x75   : > { %2982 = vmatmul.mubr.msk.f32.gmra.mrb[10].mxu1 %vm437_vm3, %v4047_v62  ;;  %3137 = vmatmul.mubr.msk.f32.gmra.mrb[20].mxu0 %vm437_vm3, %v1320_v63 }
  0x76   : > { %2984 = vmatprep.mubr.msk.f32.mxu1 %vm3651_vm4, %v3650_v25  ;;  %3141 = vmatprep.mubr.msk.f32.mxu0 %vm3651_vm4, %v3650_v25 }
  0x79   : > { %2985 = vmatmul.mubr.msk.f32.gmra.mrb[12].mxu1 %vm437_vm3, %v4056_v0  ;;  %3142 = vmatmul.mubr.msk.f32.vlgmr.msra.gmra.mrb[0].mxu0 %vm437_vm3, %v3889_v31 }
  0x7a   : > { %3175 = vmatpush3.msra.mxu0 %v2794_v1  ;;  %2987 = vmatprep.mubr.msk.f32.mxu1 %vm3651_vm4, %v3650_v25  ;;  %v417_v1 = vld [vmem:[%s3783_s23 + $0x18] sm:$0xff] }
  0x7b   : > { %3144 = vmatprep.mubr.msk.f32.mxu0 %vm3651_vm4, %v3650_v25  ;;  %3209 = vmatprep.subr.mxu0 %v3650_v25 }
  0x7d   : > { %2988 = vmatmul.mubr.msk.f32.gmra.mrb[14].mxu1 %vm437_vm3, %v4067_v2  ;;  %3145 = vmatmul.mubr.msk.f32.gmra.mrb[2].mxu0 %vm437_vm3, %v3902_v33 }
  0x7e   : > { %2990 = vmatprep.mubr.msk.f32.mxu1 %vm3651_vm4, %v3650_v25  ;;  %3147 = vmatprep.mubr.msk.f32.mxu0 %vm3651_vm4, %v3650_v25 }
  0x81   : > { %2991 = vmatmul.mubr.msk.f32.gmra.mrb[16].mxu1 %vm437_vm3, %v4080_v3  ;;  %3148 = vmatmul.mubr.msk.f32.gmra.mrb[4].mxu0 %vm437_vm3, %v3913_v35 }
  0x82   : > { %2993 = vmatprep.mubr.msk.f32.mxu1 %vm3651_vm4, %v3650_v25  ;;  %3150 = vmatprep.mubr.msk.f32.mxu0 %vm3651_vm4, %v3650_v25 }
  0x85   : > { %2994 = vmatmul.mubr.msk.f32.gmra.mrb[18].mxu1 %vm437_vm3, %v4090_v4  ;;  %3151 = vmatmul.mubr.msk.f32.gmra.mrb[6].mxu0 %vm437_vm3, %v3922_v37 }
  0x86   : > { %2996 = vmatprep.mubr.msk.f32.mxu1 %vm3651_vm4, %v3650_v25  ;;  %3153 = vmatprep.mubr.msk.f32.mxu0 %vm3651_vm4, %v3650_v25 }
  0x89   : > { %2997 = vmatmul.mubr.msk.f32.gmra.mrb[20].mxu1 %vm437_vm3, %v612_v5  ;;  %3154 = vmatmul.mubr.msk.f32.gmra.mrb[8].mxu0 %vm437_vm3, %v3931_v39 }
  0x8a   : > { %3001 = vmatprep.mubr.msk.f32.mxu1 %vm3651_vm4, %v3650_v25  ;;  %3156 = vmatprep.mubr.msk.f32.mxu0 %vm3651_vm4, %v3650_v25 }
  0x8d   : > { %3002 = vmatmul.mubr.msk.f32.vlgmr.msra.gmra.mrb[0].mxu1 %vm437_vm3, %v779_v6  ;;  %3157 = vmatmul.mubr.msk.f32.gmra.mrb[10].mxu0 %vm437_vm3, %v4107_v7 }
  0x8e   : > { %3004 = vmatprep.mubr.msk.f32.mxu1 %vm3651_vm4, %v3650_v25  ;;  %3035 = vmatpush3.msra.mxu1 %v2746_v8  ;;  %v418_v8 = vld [vmem:[%s3783_s23 + $0x20] sm:$0xff] }
  0x8f   : > { %3159 = vmatprep.mubr.msk.f32.mxu0 %vm3651_vm4, %v3650_v25  ;;  %3244 = vmatprep.subr.mxu1 %v3650_v25 }
  0x91   : > { %3005 = vmatmul.mubr.msk.f32.gmra.mrb[2].mxu1 %vm437_vm3, %v3871_v27  ;;  %3160 = vmatmul.mubr.msk.f32.gmra.mrb[12].mxu0 %vm437_vm3, %v4117_v9  ;;  %v1847_v27 = vld [vmem:[#allocation2 + $0x44] sm:$0xff] }
  0x92   : > { %3007 = vmatprep.mubr.msk.f32.mxu1 %vm3651_vm4, %v3650_v25  ;;  %3162 = vmatprep.mubr.msk.f32.mxu0 %vm3651_vm4, %v3650_v25 }
  0x95   : > { %3008 = vmatmul.mubr.msk.f32.gmra.mrb[4].mxu1 %vm437_vm3, %v3889_v31  ;;  %3163 = vmatmul.mubr.msk.f32.gmra.mrb[14].mxu0 %vm437_vm3, %v4130_v10  ;;  %v1850_v31 = vld [vmem:[#allocation2 + $0x5c] sm:$0xff] }
  0x96   : > { %3010 = vmatprep.mubr.msk.f32.mxu1 %vm3651_vm4, %v3650_v25  ;;  %3165 = vmatprep.mubr.msk.f32.mxu0 %vm3651_vm4, %v3650_v25 }
  0x99   : > { %3011 = vmatmul.mubr.msk.f32.gmra.mrb[6].mxu1 %vm437_vm3, %v3902_v33  ;;  %3166 = vmatmul.mubr.msk.f32.gmra.mrb[16].mxu0 %vm437_vm3, %v4140_v11  ;;  %v3652_v33 = vmov 0  }
  0x9a   : > { %3013 = vmatprep.mubr.msk.f32.mxu1 %vm3651_vm4, %v3650_v25  ;;  %3168 = vmatprep.mubr.msk.f32.mxu0 %vm3651_vm4, %v3650_v25 }
  0x9b   : > { %3508 = vset.pattern.permute.xlu0 %v3652_v33  ;;  %3507 = vset.pattern.permute.xlu1 %v3652_v33 }
  0x9c   : > { %2270 = vperm.xlu0 %3508, %v404_v34  }
  0x9d   : > { %3014 = vmatmul.mubr.msk.f32.gmra.mrb[8].mxu1 %vm437_vm3, %v3913_v35  ;;  %3169 = vmatmul.mubr.msk.f32.gmra.mrb[18].mxu0 %vm437_vm3, %v1496_v12  ;;  %v403_v35 = vld [vmem:[%s4728_s4] sm:$0xff] }
  0x9e   : > { %3016 = vmatprep.mubr.msk.f32.mxu1 %vm3651_vm4, %v3650_v25  ;;  %3171 = vmatprep.mubr.msk.f32.mxu0 %vm3651_vm4, %v3650_v25 }
  0x9f   : > { %2265 = vperm.xlu1 %3507, %v403_v35  }
  0xa1   : > { %3017 = vmatmul.mubr.msk.f32.gmra.mrb[10].mxu1 %vm437_vm3, %v3922_v37  ;;  %3172 = vmatmul.mubr.msk.f32.gmra.mrb[20].mxu0 %vm437_vm3, %v1497_v13 }
  0xa2   : > { %3019 = vmatprep.mubr.msk.f32.mxu1 %vm3651_vm4, %v3650_v25  ;;  %3176 = vmatprep.mubr.msk.f32.mxu0 %vm3651_vm4, %v3650_v25 }
  0xa5   : > { %3020 = vmatmul.mubr.msk.f32.gmra.mrb[12].mxu1 %vm437_vm3, %v3931_v39  ;;  %3177 = vmatmul.mubr.msk.f32.vlgmr.msra.gmra.mrb[0].mxu0 %vm437_vm3, %v3947_v44 }
  0xa6   : > { %3210 = vmatpush3.msra.mxu0 %v2806_v14  ;;  %3022 = vmatprep.mubr.msk.f32.mxu1 %vm3651_vm4, %v3650_v25 }
  0xa7   : > { %3179 = vmatprep.mubr.msk.f32.mxu0 %vm3651_vm4, %v3650_v25 }
  0xa9   : > { %3023 = vmatmul.mubr.msk.f32.gmra.mrb[14].mxu1 %vm437_vm3, %v4107_v7  ;;  %3180 = vmatmul.mubr.msk.f32.gmra.mrb[2].mxu0 %vm437_vm3, %v3959_v46  ;;  %v2018_v46 = vlaneseq }
  0xaa   : > { %3025 = vmatprep.mubr.msk.f32.mxu1 %vm3651_vm4, %v3650_v25  ;;  %3182 = vmatprep.mubr.msk.f32.mxu0 %vm3651_vm4, %v3650_v25 }
  0xad   : > { %3026 = vmatmul.mubr.msk.f32.gmra.mrb[16].mxu1 %vm437_vm3, %v4117_v9  ;;  %3183 = vmatmul.mubr.msk.f32.gmra.mrb[4].mxu0 %vm437_vm3, %v3968_v48 }
  0xae   : > { %3028 = vmatprep.mubr.msk.f32.mxu1 %vm3651_vm4, %v3650_v25  ;;  %3185 = vmatprep.mubr.msk.f32.mxu0 %vm3651_vm4, %v3650_v25 }
  0xb1   : > { %3029 = vmatmul.mubr.msk.f32.gmra.mrb[18].mxu1 %vm437_vm3, %v4130_v10  ;;  %3186 = vmatmul.mubr.msk.f32.gmra.mrb[6].mxu0 %vm437_vm3, %v3977_v50  ;;  %v4329_v50 = vand.u32 127, %v2018_v46 }
  0xb2   : > { %3031 = vmatprep.mubr.msk.f32.mxu1 %vm3651_vm4, %v3650_v25  ;;  %3188 = vmatprep.mubr.msk.f32.mxu0 %vm3651_vm4, %v3650_v25 }
  0xb3   : > { %vm2020_vm5 = vcmp.ge.s32.totalorder %v4329_v50, 24  ;;  %v411_v50 = vld [vmem:[%s4728_s4 + $0x40] sm:$0xff] }
  0xb5   : > { %3032 = vmatmul.mubr.msk.f32.gmra.mrb[20].mxu1 %vm437_vm3, %v789_v15  ;;  %3189 = vmatmul.mubr.msk.f32.gmra.mrb[8].mxu0 %vm437_vm3, %v3986_v52  ;;  %v415_v52 = vld [vmem:[%s3783_s23 + $0x8] sm:$0xff] }
  0xb6   : > { %3036 = vmatprep.mubr.msk.f32.mxu1 %vm3651_vm4, %v3650_v25  ;;  %3191 = vmatprep.mubr.msk.f32.mxu0 %vm3651_vm4, %v3650_v25 }
  0xb9   : > { %3037 = vmatmul.mubr.msk.f32.vlgmr.msra.gmra.mrb[0].mxu1 %vm437_vm3, %v3996_v54  ;;  %3192 = vmatmul.mubr.msk.f32.gmra.mrb[10].mxu0 %vm437_vm3, %v3998_v55 }
  0xba   : > { %3039 = vmatprep.mubr.msk.f32.mxu1 %vm3651_vm4, %v3650_v25  ;;  %3245 = vmatpush3.msra.mxu1 %v3867_v24  ;;  %v1845_v24 = vld [vmem:[#allocation2 + $0x34] sm:$0xff] }
  0xbb   : > { %3194 = vmatprep.mubr.msk.f32.mxu0 %vm3651_vm4, %v3650_v25 }
  0xbd   : > { %3040 = vmatmul.mubr.msk.f32.gmra.mrb[2].mxu1 %vm437_vm3, %v4011_v56  ;;  %3195 = vmatmul.mubr.msk.f32.gmra.mrb[12].mxu0 %vm437_vm3, %v4013_v57 }
  0xbe   : > { %3042 = vmatprep.mubr.msk.f32.mxu1 %vm3651_vm4, %v3650_v25  ;;  %3197 = vmatprep.mubr.msk.f32.mxu0 %vm3651_vm4, %v3650_v25 }
  0xc1   : > { %3043 = vmatmul.mubr.msk.f32.gmra.mrb[4].mxu1 %vm437_vm3, %v4023_v58  ;;  %3198 = vmatmul.mubr.msk.f32.gmra.mrb[14].mxu0 %vm437_vm3, %v4025_v59  ;;  %v416_v58 = vld [vmem:[%s3783_s23 + $0x10] sm:$0xff] }
  0xc2   : > { %3045 = vmatprep.mubr.msk.f32.mxu1 %vm3651_vm4, %v3650_v25  ;;  %3200 = vmatprep.mubr.msk.f32.mxu0 %vm3651_vm4, %v3650_v25 }
  0xc5   : > { %3046 = vmatmul.mubr.msk.f32.gmra.mrb[6].mxu1 %vm437_vm3, %v4035_v60  ;;  %3201 = vmatmul.mubr.msk.f32.gmra.mrb[16].mxu0 %vm437_vm3, %v4037_v61 }
  0xc6   : > { %3048 = vmatprep.mubr.msk.f32.mxu1 %vm3651_vm4, %v3650_v25  ;;  %3203 = vmatprep.mubr.msk.f32.mxu0 %vm3651_vm4, %v3650_v25 }
  0xc9   : > { %3049 = vmatmul.mubr.msk.f32.gmra.mrb[8].mxu1 %vm437_vm3, %v4047_v62  ;;  %3204 = vmatmul.mubr.msk.f32.gmra.mrb[18].mxu0 %vm437_vm3, %v1673_v16  ;;  %v419_v16 = vld [vmem:[%s3783_s23 + $0x28] sm:$0xff] }
  0xca   : > { %3051 = vmatprep.mubr.msk.f32.mxu1 %vm3651_vm4, %v3650_v25  ;;  %3206 = vmatprep.mubr.msk.f32.mxu0 %vm3651_vm4, %v3650_v25 }
  0xcd   : > { %3052 = vmatmul.mubr.msk.f32.gmra.mrb[10].mxu1 %vm437_vm3, %v4056_v0  ;;  %3207 = vmatmul.mubr.msk.f32.gmra.mrb[20].mxu0 %vm437_vm3, %v1674_v17 }
  0xce   : > { %3054 = vmatprep.mubr.msk.f32.mxu1 %vm3651_vm4, %v3650_v25  ;;  %3211 = vmatprep.mubr.msk.f32.mxu0 %vm3651_vm4, %v3650_v25 }
  0xd1   : > { %3055 = vmatmul.mubr.msk.f32.gmra.mrb[12].mxu1 %vm437_vm3, %v4067_v2  ;;  %3212 = vmatmul.mubr.msk.f32.vlgmr.msra.gmra.mrb[0].mxu0 %vm437_vm3, %v1841_v18 }
  0xd2   : > { %3057 = vmatprep.mubr.msk.f32.mxu1 %vm3651_vm4, %v3650_v25  ;;  %3214 = vmatprep.mubr.msk.f32.mxu0 %vm3651_vm4, %v3650_v25 }
  0xd5   : > { %3058 = vmatmul.mubr.msk.f32.gmra.mrb[14].mxu1 %vm437_vm3, %v4080_v3  ;;  %3215 = vmatmul.mubr.msk.f32.gmra.mrb[2].mxu0 %vm437_vm3, %v1842_v19 }
  0xd6   : > { %3060 = vmatprep.mubr.msk.f32.mxu1 %vm3651_vm4, %v3650_v25  ;;  %3217 = vmatprep.mubr.msk.f32.mxu0 %vm3651_vm4, %v3650_v25 }
  0xd9   : > { %3061 = vmatmul.mubr.msk.f32.gmra.mrb[16].mxu1 %vm437_vm3, %v4090_v4  ;;  %3218 = vmatmul.mubr.msk.f32.gmra.mrb[4].mxu0 %vm437_vm3, %v1843_v20 }
  0xda   : > { %3063 = vmatprep.mubr.msk.f32.mxu1 %vm3651_vm4, %v3650_v25  ;;  %3220 = vmatprep.mubr.msk.f32.mxu0 %vm3651_vm4, %v3650_v25 }
  0xdd   : > { %3064 = vmatmul.mubr.msk.f32.gmra.mrb[18].mxu1 %vm437_vm3, %v965_v21  ;;  %3221 = vmatmul.mubr.msk.f32.gmra.mrb[6].mxu0 %vm437_vm3, %v1844_v22 }
  0xde   : > { %3066 = vmatprep.mubr.msk.f32.mxu1 %vm3651_vm4, %v3650_v25  ;;  %3223 = vmatprep.mubr.msk.f32.mxu0 %vm3651_vm4, %v3650_v25 }
  0xe1   : > { %3067 = vmatmul.mubr.msk.f32.gmra.mrb[20].mxu1 %vm437_vm3, %v966_v23  ;;  %3224 = vmatmul.mubr.msk.f32.gmra.mrb[8].mxu0 %vm437_vm3, %v1845_v24 }
  0xe2   : > { %3089 = vmatprep.mubr.msk.f32.mxu1 %vm3651_vm4, %v3650_v25  ;;  %3226 = vmatprep.mubr.msk.f32.mxu0 %vm3651_vm4, %v3650_v25 }
  0xe5   : > { %3090 = vmatmul.mubr.msk.f32.vlgmr.msra.gmra.mrb[12].mxu1 %vm437_vm3, %v4107_v7  ;;  %3227 = vmatmul.mubr.msk.f32.gmra.mrb[10].mxu0 %vm437_vm3, %v1846_v26 }
  0xe6   : > { %3092 = vmatprep.mubr.msk.f32.mxu1 %vm3651_vm4, %v3650_v25  ;;  %3229 = vmatprep.mubr.msk.f32.mxu0 %vm3651_vm4, %v3650_v25 }
  0xe9   : > { %3093 = vmatmul.mubr.msk.f32.gmra.mrb[14].mxu1 %vm437_vm3, %v4117_v9  ;;  %3230 = vmatmul.mubr.msk.f32.gmra.mrb[12].mxu0 %vm437_vm3, %v1847_v27  ;;  %v420_v27 = vld [vmem:[%s3783_s23 + $0x30] sm:$0xff] }
  0xea   : > { %3095 = vmatprep.mubr.msk.f32.mxu1 %vm3651_vm4, %v3650_v25  ;;  %3232 = vmatprep.mubr.msk.f32.mxu0 %vm3651_vm4, %v3650_v25 }
  0xed   : > { %3096 = vmatmul.mubr.msk.f32.gmra.mrb[16].mxu1 %vm437_vm3, %v4130_v10  ;;  %3233 = vmatmul.mubr.msk.f32.gmra.mrb[14].mxu0 %vm437_vm3, %v1848_v28 }
  0xee   : > { %3098 = vmatprep.mubr.msk.f32.mxu1 %vm3651_vm4, %v3650_v25  ;;  %3235 = vmatprep.mubr.msk.f32.mxu0 %vm3651_vm4, %v3650_v25 }
  0xf1   : > { %3099 = vmatmul.mubr.msk.f32.gmra.mrb[18].mxu1 %vm437_vm3, %v4140_v11  ;;  %3236 = vmatmul.mubr.msk.f32.gmra.mrb[16].mxu0 %vm437_vm3, %v1849_v29 }
  0xf2   : > { %3101 = vmatprep.mubr.msk.f32.mxu1 %vm3651_vm4, %v3650_v25  ;;  %3238 = vmatprep.mubr.msk.f32.mxu0 %vm3651_vm4, %v3650_v25 }
  0xf5   : > { %3102 = vmatmul.mubr.msk.f32.gmra.mrb[20].mxu1 %vm437_vm3, %v1143_v30  ;;  %3239 = vmatmul.mubr.msk.f32.gmra.mrb[18].mxu0 %vm437_vm3, %v1850_v31 }
  0xf6   : > { %3241 = vmatprep.mubr.msk.f32.mxu0 %vm3651_vm4, %v3650_v25  ;;  %v405_v25 = vld [vmem:[%s4728_s4 + $0x10] sm:$0xff] }
  0xf7   : > { %2275 = vperm.xlu1 %3507, %v405_v25  }
  0xf9   : > { %3242 = vmatmul.mubr.msk.f32.gmra.mrb[20].mxu0 %vm437_vm3, %v1851_v32 }
 0x18c   : > { %v1068_v36 = vpop.f32.mrb[0].mxu1 }
 0x18d   : > { %v3038_v37 = vpop.f32.mrb[1].mxu1  ;;  %v3246_v51 = vadd.f32 %v1068_v36, %v414_v47 }
 0x190   : > { %v1073_v38 = vpop.f32.mrb[2].mxu1 }
 0x191   : > { %v3041_v39 = vpop.f32.mrb[3].mxu1  ;;  %v3248_v56 = vadd.f32 %v1073_v38, %v415_v52  ;;  %v421_v38 = vld [vmem:[%s3783_s23 + $0x38] sm:$0xff] }
 0x194   : > { %v1078_v40 = vpop.f32.mrb[4].mxu1 }
 0x195   : > { %v3044_v41 = vpop.f32.mrb[5].mxu1  ;;  %v3250_v63 = vadd.f32 %v1078_v40, %v416_v58 }
 0x198   : > { %v1083_v42 = vpop.f32.mrb[6].mxu1 }
 0x199   : > { %v3047_v43 = vpop.f32.mrb[7].mxu1  ;;  %v3252_v6 = vadd.f32 %v1083_v42, %v417_v1  ;;  %v423_v1 = vld [vmem:[%s3783_s23 + $0x48] sm:$0xff] }
 0x19c   : > { %v1088_v44 = vpop.f32.mrb[8].mxu1 }
 0x19d   : > { %v3050_v45 = vpop.f32.mrb[9].mxu1  ;;  %v3254_v13 = vadd.f32 %v1088_v44, %v418_v8 }
 0x1a0   : > { %v1093_v48 = vpop.f32.mrb[10].mxu1 }
 0x1a1   : > { %v3053_v49 = vpop.f32.mrb[11].mxu1  ;;  %v3256_v22 = vadd.f32 %v1093_v48, %v419_v16 }
 0x1a4   : > { %v1953_v53 = vpop.f32.mrb[0].mxu0 }
 0x1a5   : > { %v3247_v54 = vadd.f32 %v3246_v51, %v1953_v53  ;;  %v3213_v55 = vpop.f32.mrb[1].mxu0  ;;  %v422_v53 = vld [vmem:[%s3783_s23 + $0x40] sm:$0xff] }
 0x1a7   : > { %v2021_v57 = vmul.f32 0.5, %v3247_v54 }
 0x1a8   : > { %v1958_v59 = vpop.f32.mrb[2].mxu0 }
 0x1a9   : > { %v2032_v60 = vsel %vm2020_vm5, %v3247_v54, %v2021_v57  ;;  %v3249_v61 = vadd.f32 %v3248_v56, %v1958_v59  ;;  %v3216_v62 = vpop.f32.mrb[3].mxu0 }
 0x1aa   : > { %3509 = vtanh.f32 %v2032_v60 }
 0x1ab   : > { %v2022_v0 = vmul.f32 0.5, %v3249_v61 }
 0x1ac   : > { %v1963_v2 = vpop.f32.mrb[4].mxu0 }
 0x1ad   : > { %v2033_v3 = vsel %vm2020_vm5, %v3249_v61, %v2022_v0  ;;  %v3251_v4 = vadd.f32 %v3250_v63, %v1963_v2  ;;  %v3219_v5 = vpop.f32.mrb[5].mxu0 }
 0x1ae   : > { %3511 = vtanh.f32 %v2033_v3 }
 0x1af   : > { %v2023_v7 = vmul.f32 0.5, %v3251_v4 }
 0x1b0   : > { %v1968_v9 = vpop.f32.mrb[6].mxu0 }
 0x1b1   : > { %v2034_v10 = vsel %vm2020_vm5, %v3251_v4, %v2023_v7  ;;  %v3253_v11 = vadd.f32 %v3252_v6, %v1968_v9  ;;  %v3222_v12 = vpop.f32.mrb[7].mxu0 }
 0x1b2   : > { %3513 = vtanh.f32 %v2034_v10 }
 0x1b3   : > { %v2024_v14 = vmul.f32 0.5, %v3253_v11 }
 0x1b4   : > { %v3510_v15 = vpop.eup %3509  ;;  %v1973_v17 = vpop.f32.mrb[8].mxu0 }
 0x1b5   : > { %v2035_v18 = vsel %vm2020_vm5, %v3253_v11, %v2024_v14  ;;  %v3255_v19 = vadd.f32 %v3254_v13, %v1973_v17  ;;  %v3225_v20 = vpop.f32.mrb[9].mxu0  ;;  %v2054_v21 = vadd.f32 1.0, %v3510_v15 }
 0x1b6   : > { %3515 = vtanh.f32 %v2035_v18 }
 0x1b7   : > { %v2025_v23 = vmul.f32 0.5, %v3255_v19  ;;  %v2065_v24 = vmul.f32 0.5, %v2054_v21 }
 0x1b8   : > { %v3512_v26 = vpop.eup %3511  ;;  %v1275_v28 = vpop.f32.mrb[12].mxu1 }
 0x1b9   : > { %v1978_v29 = vpop.f32.mrb[10].mxu0  ;;  %v2036_v30 = vsel %vm2020_vm5, %v3255_v19, %v2025_v23  ;;  %v3091_v32 = vpop.f32.mrb[13].mxu1  ;;  %v4350_v34 = vsel %vm2020_vm5, %v3510_v15, %v2065_v24  ;;  %v2055_v35 = vadd.f32 1.0, %v3512_v26  ;;  %v3258_v25 = vadd.f32 %v1275_v28, %v420_v27  ;;  %v424_v15 = vld [vmem:[%s3783_s23 + $0x50] sm:$0x1]  ;;  %s3656_s23 = smov 112  }
 0x1ba   : > { %v3257_v31 = vadd.f32 %v3256_v22, %v1978_v29  ;;  %v3228_v33 = vpop.f32.mrb[11].mxu0  ;;  %3517 = vtanh.f32 %v2036_v30  ;;  %2164 = vrot.lane.b32.xlu0 %v4350_v34, %s3653_s13 }
 0x1bb   : > { %v2066_v41 = vmul.f32 0.5, %v2055_v35 }
 0x1bc   : > { %v2026_v36 = vmul.f32 0.5, %v3257_v31  ;;  %v3514_v37 = vpop.eup %3513  ;;  %v1280_v39 = vpop.f32.mrb[14].mxu1 }
 0x1bd   : > { %v1983_v40 = vpop.f32.mrb[12].mxu0  ;;  %v3094_v44 = vpop.f32.mrb[15].mxu1  ;;  %v2056_v46 = vadd.f32 1.0, %v3514_v37  ;;  %v4359_v47 = vsel %vm2020_vm5, %v3512_v26, %v2066_v41  ;;  %v3260_v48 = vadd.f32 %v1280_v39, %v421_v38 }
 0x1be   : > { %v2037_v42 = vsel %vm2020_vm5, %v3257_v31, %v2026_v36  ;;  %v3259_v43 = vadd.f32 %v3258_v25, %v1983_v40  ;;  %v3231_v45 = vpop.f32.mrb[13].mxu0  ;;  %2166 = vrot.lane.b32.xlu0 %v4359_v47, %s3653_s13 }
 0x1bf   : > { %3519 = vtanh.f32 %v2037_v42  ;;  %v2067_v51 = vmul.f32 0.5, %v2056_v46 }
 0x1c0   : > { %v2027_v49 = vmul.f32 0.5, %v3259_v43  ;;  %v3516_v52 = vpop.eup %3515  ;;  %v1285_v54 = vpop.f32.mrb[16].mxu1 }
 0x1c1   : > { %v1988_v55 = vpop.f32.mrb[14].mxu0  ;;  %v3097_v58 = vpop.f32.mrb[17].mxu1  ;;  %v4368_v60 = vsel %vm2020_vm5, %v3514_v37, %v2067_v51  ;;  %v2057_v61 = vadd.f32 1.0, %v3516_v52  ;;  %v3262_v62 = vadd.f32 %v1285_v54, %v422_v53  ;;  %v407_v51 = vld [vmem:[%s4728_s4 + $0x20] sm:$0xff] }
 0x1c2   : > { %v2038_v56 = vsel %vm2020_vm5, %v3259_v43, %v2027_v49  ;;  %v3261_v57 = vadd.f32 %v3260_v48, %v1988_v55  ;;  %v3234_v59 = vpop.f32.mrb[15].mxu0  ;;  %2168 = vrot.lane.b32.xlu1 %v4368_v60, %s3653_s13 }
 0x1c3   : > { %3521 = vtanh.f32 %v2038_v56  ;;  %v2068_v4 = vmul.f32 0.5, %v2057_v61  ;;  %v409_v59 = vld [vmem:[%s4728_s4 + $0x30] sm:$0xff]  ;;  %v408_v61 = vld [vmem:[%s4728_s4 + $0x28] sm:$0xff] }
 0x1c4   : > { %v2028_v63 = vmul.f32 0.5, %v3261_v57  ;;  %v3518_v0 = vpop.eup %3517  ;;  %v1290_v2 = vpop.f32.mrb[18].mxu1 }
 0x1c5   : > { %v1993_v3 = vpop.f32.mrb[16].mxu0  ;;  %v3100_v7 = vpop.f32.mrb[19].mxu1  ;;  %v2058_v9 = vadd.f32 1.0, %v3518_v0  ;;  %v4377_v10 = vsel %vm2020_vm5, %v3516_v52, %v2068_v4  ;;  %v3264_v11 = vadd.f32 %v1290_v2, %v423_v1  ;;  %v2088_v1 = vld [vmem:[%s3790_s20 + $0x8] sm:$0xff]  ;;  %v2087_v2 = vld [vmem:[%s3790_s20] sm:$0xff]  ;;  %v2089_v4 = vld [vmem:[%s3790_s20 + $0x10] sm:$0xff] }
 0x1c6   : > { %v2039_v5 = vsel %vm2020_vm5, %v3261_v57, %v2028_v63  ;;  %v3263_v6 = vadd.f32 %v3262_v62, %v1993_v3  ;;  %v3237_v8 = vpop.f32.mrb[17].mxu0  ;;  %2170 = vrot.lane.b32.xlu1 %v4377_v10, %s3653_s13  ;;  %v406_v57 = vld [vmem:[%s4728_s4 + $0x18] sm:$0xff]  ;;  %v413_v63 = vld [vmem:[%s4728_s4 + $0x50] sm:$0x1] }
 0x1c7   : > { %3523 = vtanh.f32 %v2039_v5  ;;  %v2069_v13 = vmul.f32 0.5, %v2058_v9  ;;  %v410_v62 = vld [vmem:[%s4728_s4 + $0x38] sm:$0xff]  ;;  %v2092_v5 = vld [vmem:[%s3790_s20 + $0x28] sm:$0xff] }
 0x1c8   : > { %v2029_v12 = vmul.f32 0.5, %v3263_v6  ;;  %v1295_v16 = vpop.f32.mrb[20].mxu1  ;;  %v1998_v17 = vpop.f32.mrb[18].mxu0  ;;  %v2090_v3 = vld [vmem:[%s3790_s20 + $0x18] sm:$0xff]  ;;  %v2093_v8 = vld [vmem:[%s3790_s20 + $0x30] sm:$0xff]  ;;  %v2096_v9 = vld [vmem:[%s3790_s20 + $0x48] sm:$0xff] }
 0x1c9   : > { %v3520_v14 = vpop.eup %3519  ;;  %v3265_v19 = vadd.f32 %v3264_v11, %v1998_v17  ;;  %v3103_v20 = vpop.f32.mrb[21].mxu1  ;;  %v4386_v22 = vsel %vm2020_vm5, %v3518_v0, %v2069_v13  ;;  %v3266_v24 = vadd.f32 %v1295_v16, %v424_v15  ;;  %v412_v0 = vld [vmem:[%s4728_s4 + $0x48] sm:$0xff]  ;;  %v2094_v7 = vld [vmem:[%s3790_s20 + $0x38] sm:$0xff] }
 0x1ca   : > { %v2040_v18 = vsel %vm2020_vm5, %v3263_v6, %v2029_v12  ;;  %v3240_v21 = vpop.f32.mrb[19].mxu0  ;;  %2172 = vrot.lane.b32.xlu0 %v4386_v22, %s3653_s13  ;;  %v2059_v23 = vadd.f32 1.0, %v3520_v14  ;;  %v2091_v6 = vld [vmem:[%s3790_s20 + $0x20] sm:$0xff]  ;;  %v2097_v12 = vld [vmem:[%s3790_s20 + $0x50] sm:$0x1]  ;;  %v4476_v13 = vpop.permute.xlu0 %2270 }
 0x1cb   : > { %3525 = vtanh.f32 %v2040_v18  ;;  %v2030_v26 = vmul.f32 0.5, %v3265_v19  ;;  %v2095_v11 = vld [vmem:[%s3790_s20 + $0x40] sm:$0xff] }
 0x1cc   : > { %v2003_v28 = vpop.f32.mrb[20].mxu0  ;;  %v2070_v29 = vmul.f32 0.5, %v2059_v23 }
 0x1cd   : > { %v3522_v27 = vpop.eup %3521  ;;  %v2041_v30 = vsel %vm2020_vm5, %v3265_v19, %v2030_v26  ;;  %v3267_v31 = vadd.f32 %v3266_v24, %v2003_v28  ;;  %v3243_v32 = vpop.f32.mrb[21].mxu0 }
 0x1ce   : > { %v2060_v33 = vadd.f32 1.0, %v3522_v27  ;;  %3527 = vtanh.f32 %v2041_v30  ;;  %v4394_v35 = vsel %vm2020_vm5, %v3520_v14, %v2070_v29  ;;  %v4478_v14 = vpop.permute.xlu1 %2265 }
 0x1cf   : > { %v2031_v25 = vmul.f32 0.5, %v3267_v31  ;;  %2174 = vrot.lane.b32.xlu1 %v4394_v35, %s3653_s13 }
 0x1d0   : > { %v2071_v36 = vmul.f32 0.5, %v2060_v33 }
 0x1d1   : > { %v3524_v37 = vpop.eup %3523  ;;  %v2042_v38 = vsel %vm2020_vm5, %v3267_v31, %v2031_v25 }
 0x1d2   : > { %v4402_v39 = vsel %vm2020_vm5, %v3522_v27, %v2071_v36  ;;  %v2061_v40 = vadd.f32 1.0, %v3524_v37  ;;  %3529 = vtanh.f32 %v2042_v38  ;;  %v4481_v17 = vpop.permute.xlu1 %2275 }
 0x1d3   : > { %2176 = vrot.lane.b32.xlu0 %v4402_v39, %s3653_s13 }
 0x1d4   : > { %v2072_v41 = vmul.f32 0.5, %v2061_v40 }
 0x1d5   : > { %v3526_v42 = vpop.eup %3525 }
 0x1d6   : > { %v4408_v43 = vsel %vm2020_vm5, %v3524_v37, %v2072_v41  ;;  %v2062_v44 = vadd.f32 1.0, %v3526_v42 }
 0x1d7   : > { %2178 = vrot.lane.b32.xlu1 %v4408_v43, %s3653_s13 }
 0x1d8   : > { %v2073_v45 = vmul.f32 0.5, %v2062_v44  ;;  %v3528_v46 = vpop.eup %3527 }
 0x1d9   : > { %v2063_v49 = vadd.f32 1.0, %v3528_v46 }
 0x1da   : > { %v4414_v48 = vsel %vm2020_vm5, %v3526_v42, %v2073_v45 }
 0x1db   : > { %2180 = vrot.lane.b32.xlu0 %v4414_v48, %s3653_s13  ;;  %v2074_v52 = vmul.f32 0.5, %v2063_v49 }
 0x1dc   : > { %v3530_v53 = vpop.eup %3529 }
 0x1dd   : > { %v4423_v54 = vsel %vm2020_vm5, %v3528_v46, %v2074_v52  ;;  %v2064_v55 = vadd.f32 1.0, %v3530_v53 }
 0x1de   : > { %2182 = vrot.lane.b32.xlu1 %v4423_v54, %s3653_s13 }
 0x1df   : > { %2285 = vperm.xlu0 %3508, %v407_v51   ;;  %v2075_v56 = vmul.f32 0.5, %v2064_v55 }
 0x1e1   : > { %v4432_v58 = vsel %vm2020_vm5, %v3530_v53, %v2075_v56 }
 0x1e2   : > { %2280 = vperm.xlu1 %3507, %v406_v57  }
 0x1e3   : > { %2184 = vrot.lane.b32.xlu0 %v4432_v58, %s3653_s13  ;;  %s3655_s13 = smov 120  }
 0x1e6   : > { %2290 = vperm.xlu1 %3507, %v408_v61  }
 0x1e7   : > { %2295 = vperm.xlu0 %3508, %v409_v59  }
 0x1ea   : > { %2300 = vperm.xlu1 %3507, %v410_v62  }
 0x1eb   : > { %2305 = vperm.xlu0 %3508, %v411_v50  }
 0x1ee   : > { %2310 = vperm.xlu1 %3507, %v412_v0  }
 0x1ef   : > { %2315 = vperm.xlu0 %3508, %v413_v63  }
 0x1f2   : > { %2109 = vrot.lane.b32.xlu1 %v2087_v2, %s3654_s10 }
 0x1f3   : > { %2111 = vrot.lane.b32.xlu0 %v2088_v1, %s3654_s10 }
 0x1f6   : > { %2113 = vrot.lane.b32.xlu1 %v2089_v4, %s3654_s10 }
 0x1f7   : > { %2115 = vrot.lane.b32.xlu0 %v2090_v3, %s3654_s10 }
 0x1fa   : > { %2117 = vrot.lane.b32.xlu1 %v2091_v6, %s3654_s10 }
 0x1fb   : > { %2119 = vrot.lane.b32.xlu0 %v2092_v5, %s3654_s10 }
 0x1fe   : > { %2121 = vrot.lane.b32.xlu1 %v2093_v8, %s3654_s10 }
 0x1ff   : > { %2123 = vrot.lane.b32.xlu0 %v2094_v7, %s3654_s10 }
 0x202   : > { %2125 = vrot.lane.b32.xlu1 %v2095_v11, %s3654_s10 }
 0x203   : > { %2127 = vrot.lane.b32.xlu0 %v2096_v9, %s3654_s10 }
 0x206   : > { %2129 = vrot.lane.b32.xlu1 %v2097_v12, %s3654_s10 }
 0x22c   : > { %v2165_v15 = vpop.permute.xlu0 %2164 }
 0x22d   : > { %v2197_v16 = vmul.f32 %v2165_v15, %v4350_v34 }
 0x22f   : > { %2219 = vrot.lane.b32.xlu0 %v2197_v16, %s3654_s10 }
 0x230   : > { %v2167_v18 = vpop.permute.xlu0 %2166 }
 0x231   : > { %v2198_v19 = vmul.f32 %v2167_v18, %v4359_v47 }
 0x233   : > { %2221 = vrot.lane.b32.xlu1 %v2198_v19, %s3654_s10 }
 0x234   : > { %v2169_v20 = vpop.permute.xlu1 %2168 }
 0x235   : > { %v2199_v21 = vmul.f32 %v2169_v20, %v4368_v60 }
 0x237   : > { %2223 = vrot.lane.b32.xlu0 %v2199_v21, %s3654_s10 }
 0x238   : > { %v2171_v23 = vpop.permute.xlu1 %2170 }
 0x239   : > { %v2200_v24 = vmul.f32 %v2171_v23, %v4377_v10 }
 0x23b   : > { %2225 = vrot.lane.b32.xlu1 %v2200_v24, %s3654_s10 }
 0x23c   : > { %v2173_v26 = vpop.permute.xlu0 %2172 }
 0x23d   : > { %v2201_v27 = vmul.f32 %v2173_v26, %v4386_v22 }
 0x23f   : > { %2227 = vrot.lane.b32.xlu0 %v2201_v27, %s3654_s10 }
 0x241   : > { %v2175_v28 = vpop.permute.xlu1 %2174 }
 0x242   : > { %v2202_v29 = vmul.f32 %v2175_v28, %v4394_v35 }
 0x244   : > { %2229 = vrot.lane.b32.xlu1 %v2202_v29, %s3654_s10 }
 0x245   : > { %v2177_v30 = vpop.permute.xlu0 %2176 }
 0x246   : > { %v2203_v31 = vmul.f32 %v2177_v30, %v4402_v39 }
 0x248   : > { %2231 = vrot.lane.b32.xlu0 %v2203_v31, %s3654_s10 }
 0x249   : > { %v2179_v32 = vpop.permute.xlu1 %2178 }
 0x24a   : > { %v2204_v33 = vmul.f32 %v2179_v32, %v4408_v43 }
 0x24c   : > { %2233 = vrot.lane.b32.xlu1 %v2204_v33, %s3654_s10 }
 0x24d   : > { %v2181_v25 = vpop.permute.xlu0 %2180 }
 0x24e   : > { %v2205_v36 = vmul.f32 %v2181_v25, %v4414_v48 }
 0x250   : > { %2235 = vrot.lane.b32.xlu0 %v2205_v36, %s3654_s10  ;;  %v2183_v37 = vpop.permute.xlu1 %2182 }
 0x251   : > { %v2206_v38 = vmul.f32 %v2183_v37, %v4423_v54 }
 0x253   : > { %2237 = vrot.lane.b32.xlu1 %v2206_v38, %s3654_s10 }
 0x25e   : > { %v4502_v40 = vpop.permute.xlu0 %2285 }
 0x261   : > { %v4506_v44 = vpop.permute.xlu1 %2280 }
 0x262   : > { %v2185_v41 = vpop.permute.xlu0 %2184 }
 0x263   : > { %v2207_v42 = vmul.f32 %v2185_v41, %v4432_v58 }
 0x265   : > { %2239 = vrot.lane.b32.xlu0 %v2207_v42, %s3654_s10  ;;  %v4508_v45 = vpop.permute.xlu1 %2290 }
 0x266   : > { %v4510_v46 = vpop.permute.xlu0 %2295 }
 0x269   : > { %v4512_v49 = vpop.permute.xlu1 %2300 }
 0x26a   : > { %v4514_v51 = vpop.permute.xlu0 %2305 }
 0x26d   : > { %v4516_v52 = vpop.permute.xlu1 %2310 }
 0x26e   : > { %v4518_v53 = vpop.permute.xlu0 %2315 }
 0x271   : > { %v2110_v55 = vpop.permute.xlu1 %2109 }
 0x272   : > { %v2112_v56 = vpop.permute.xlu0 %2111  ;;  %v2142_v2 = vmul.f32 %v2110_v55, %v4350_v34 }
 0x273   : > { %v2143_v7 = vmul.f32 %v2112_v56, %v4359_v47 }
 0x275   : > { %v2114_v57 = vpop.permute.xlu1 %2113 }
 0x276   : > { %v2116_v59 = vpop.permute.xlu0 %2115  ;;  %v2144_v11 = vmul.f32 %v2114_v57, %v4368_v60 }
 0x277   : > { %v2145_v19 = vmul.f32 %v2116_v59, %v4377_v10 }
 0x279   : > { %v2118_v61 = vpop.permute.xlu1 %2117 }
 0x27a   : > { %v2120_v50 = vpop.permute.xlu0 %2119  ;;  %v2146_v24 = vmul.f32 %v2118_v61, %v4386_v22 }
 0x27b   : > { %v2147_v31 = vmul.f32 %v2120_v50, %v4394_v35 }
 0x27d   : > { %v2122_v62 = vpop.permute.xlu1 %2121 }
 0x27e   : > { %v2124_v63 = vpop.permute.xlu0 %2123  ;;  %v2148_v36 = vmul.f32 %v2122_v62, %v4402_v39 }
 0x27f   : > { %v2149_v42 = vmul.f32 %v2124_v63, %v4408_v43 }
 0x281   : > { %v2126_v0 = vpop.permute.xlu1 %2125 }
 0x282   : > { %v2128_v1 = vpop.permute.xlu0 %2127  ;;  %v2150_v50 = vmul.f32 %v2126_v0, %v4414_v48 }
 0x283   : > { %v2151_v63 = vmul.f32 %v2128_v1, %v4423_v54 }
 0x285   : > { %v4521_v4 = vpop.permute.xlu1 %2129 }
 0x2a1   : > { %v2220_v3 = vpop.permute.xlu0 %2219 }
 0x2a2   : > { %v2252_v5 = vadd.f32 %v2220_v3, %v2142_v2 }
 0x2a4   : > { %v4524_v6 = vmul.f32 %v4478_v14, %v2252_v5 }
 0x2a5   : > { %v2222_v8 = vpop.permute.xlu1 %2221 }
 0x2a6   : > { %3531 = vtanh.f32 %v4524_v6  ;;  %v2253_v9 = vadd.f32 %v2222_v8, %v2143_v7 }
 0x2a8   : > { %v4530_v12 = vmul.f32 %v4476_v13, %v2253_v9 }
 0x2a9   : > { %v2224_v15 = vpop.permute.xlu0 %2223 }
 0x2aa   : > { %v2254_v16 = vadd.f32 %v2224_v15, %v2144_v11  ;;  %3533 = vtanh.f32 %v4530_v12 }
 0x2ac   : > { %v4534_v18 = vmul.f32 %v4481_v17, %v2254_v16 }
 0x2ad   : > { %v2226_v20 = vpop.permute.xlu1 %2225 }
 0x2ae   : > { %3535 = vtanh.f32 %v4534_v18  ;;  %v2255_v21 = vadd.f32 %v2226_v20, %v2145_v19  ;;  %v2152_v19 = vmul.f32 %v4521_v4, %v4432_v58 }
 0x2b0   : > { %v3532_v23 = vpop.eup %3531  ;;  %v4540_v26 = vmul.f32 %v4506_v44, %v2255_v21 }
 0x2b1   : > { %v2228_v27 = vpop.permute.xlu0 %2227  ;;  %2351 = vrot.lane.b32.xlu1 %v3532_v23, %s3654_s10 }
 0x2b2   : > { %v2256_v28 = vadd.f32 %v2228_v27, %v2146_v24  ;;  %3537 = vtanh.f32 %v4540_v26 }
 0x2b4   : > { %v2322_v29 = vmul.f32 %v4502_v40, %v2256_v28  ;;  %v3534_v30 = vpop.eup %3533 }
 0x2b5   : > { %2353 = vrot.lane.b32.xlu0 %v3534_v30, %s3654_s10 }
 0x2b6   : > { %3539 = vtanh.f32 %v2322_v29  ;;  %v2230_v32 = vpop.permute.xlu1 %2229 }
 0x2b7   : > { %v2257_v33 = vadd.f32 %v2230_v32, %v2147_v31 }
 0x2b8   : > { %v3536_v25 = vpop.eup %3535 }
 0x2b9   : > { %v2323_v37 = vmul.f32 %v4508_v45, %v2257_v33  ;;  %2355 = vrot.lane.b32.xlu1 %v3536_v25, %s3654_s10 }
 0x2ba   : > { %v2232_v38 = vpop.permute.xlu0 %2231 }
 0x2bb   : > { %v2258_v41 = vadd.f32 %v2232_v38, %v2148_v36  ;;  %3541 = vtanh.f32 %v2323_v37 }
 0x2bc   : > { %v3538_v56 = vpop.eup %3537 }
 0x2bd   : > { %v2324_v55 = vmul.f32 %v4510_v46, %v2258_v41  ;;  %2357 = vrot.lane.b32.xlu0 %v3538_v56, %s3654_s10 }
 0x2be   : > { %v2234_v57 = vpop.permute.xlu1 %2233 }
 0x2bf   : > { %3543 = vtanh.f32 %v2324_v55  ;;  %v2259_v59 = vadd.f32 %v2234_v57, %v2149_v42 }
 0x2c0   : > { %v3540_v61 = vpop.eup %3539 }
 0x2c1   : > { %v2325_v62 = vmul.f32 %v4512_v49, %v2259_v59  ;;  %2359 = vrot.lane.b32.xlu1 %v3540_v61, %s3654_s10 }
 0x2c2   : > { %v2236_v2 = vpop.permute.xlu0 %2235 }
 0x2c3   : > { %3545 = vtanh.f32 %v2325_v62  ;;  %v2260_v3 = vadd.f32 %v2236_v2, %v2150_v50 }
 0x2c5   : > { %v2326_v5 = vmul.f32 %v4514_v51, %v2260_v3  ;;  %v3542_v7 = vpop.eup %3541  ;;  %v2238_v8 = vpop.permute.xlu1 %2237 }
 0x2c6   : > { %2361 = vrot.lane.b32.xlu0 %v3542_v7, %s3654_s10  ;;  %v2261_v9 = vadd.f32 %v2238_v8, %v2151_v63 }
 0x2c7   : > { %3547 = vtanh.f32 %v2326_v5 }
 0x2c8   : > { %v2327_v0 = vmul.f32 %v4516_v52, %v2261_v9 }
 0x2c9   : > { %v3544_v11 = vpop.eup %3543 }
 0x2ca   : > { %2363 = vrot.lane.b32.xlu1 %v3544_v11, %s3654_s10  ;;  %3549 = vtanh.f32 %v2327_v0 }
 0x2cd   : > { %v3546_v15 = vpop.eup %3545 }
 0x2ce   : > { %2365 = vrot.lane.b32.xlu0 %v3546_v15, %s3654_s10 }
 0x2d1   : > { %v3548_v16 = vpop.eup %3547 }
 0x2d2   : > { %2367 = vrot.lane.b32.xlu1 %v3548_v16, %s3654_s10 }
 0x2d4   : > { %v3550_v1 = vpop.eup %3549 }
 0x2d5   : > { %2369 = vrot.lane.b32.xlu0 %v3550_v1, %s3654_s10 }
 0x2d7   : > { %v2240_v20 = vpop.permute.xlu0 %2239 }
 0x2d8   : > { %v2262_v21 = vadd.f32 %v2240_v20, %v2152_v19 }
 0x2d9   : > { %2417 = vrot.lane.b32.xlu0 %v4524_v6, %s3655_s13 }
 0x2da   : > { %v2328_v23 = vmul.f32 %v4518_v53, %v2262_v21 }
 0x2dc   : > { %3551 = vtanh.f32 %v2328_v23 }
 0x2dd   : > { %2421 = vrot.lane.b32.xlu0 %v4534_v18, %s3655_s13 }
 0x2e1   : > { %2425 = vrot.lane.b32.xlu0 %v2322_v29, %s3655_s13 }
 0x2e5   : > { %2429 = vrot.lane.b32.xlu0 %v2324_v55, %s3655_s13 }
 0x2e6   : > { %v3552_v24 = vpop.eup %3551 }
 0x2e7   : > { %2371 = vrot.lane.b32.xlu1 %v3552_v24, %s3654_s10 }
 0x2e9   : > { %2433 = vrot.lane.b32.xlu0 %v2326_v5, %s3655_s13 }
 0x2eb   : > { %2419 = vrot.lane.b32.xlu1 %v4530_v12, %s3655_s13 }
 0x2ed   : > { %2437 = vrot.lane.b32.xlu0 %v2328_v23, %s3655_s13 }
 0x2ef   : > { %2423 = vrot.lane.b32.xlu1 %v4540_v26, %s3655_s13 }
 0x2f3   : > { %2427 = vrot.lane.b32.xlu1 %v2323_v37, %s3655_s13 }
 0x2f7   : > { %2431 = vrot.lane.b32.xlu1 %v2325_v62, %s3655_s13 }
 0x2fb   : > { %2435 = vrot.lane.b32.xlu1 %v2327_v0, %s3655_s13 }
 0x323   : > { %v2352_v4 = vpop.permute.xlu1 %2351 }
 0x324   : > { %v2384_v6 = vmul.f32 %v2352_v4, %v4350_v34 }
 0x326   : > { %v2395_v27 = vmul.f32 %v2384_v6, %v4478_v14 }
 0x327   : > { %v2354_v18 = vpop.permute.xlu0 %2353 }
 0x328   : > { %2473 = vrot.lane.b32.xlu1 %v2395_v27, %s3656_s23  ;;  %v2385_v28 = vmul.f32 %v2354_v18, %v4359_v47 }
 0x32a   : > { %v2396_v29 = vmul.f32 %v2385_v28, %v4476_v13 }
 0x32b   : > { %v2356_v12 = vpop.permute.xlu1 %2355 }
 0x32c   : > { %v2386_v30 = vmul.f32 %v2356_v12, %v4368_v60  ;;  %2475 = vrot.lane.b32.xlu0 %v2396_v29, %s3656_s23 }
 0x32e   : > { %v2397_v26 = vmul.f32 %v2386_v30, %v4481_v17 }
 0x32f   : > { %v2358_v31 = vpop.permute.xlu0 %2357 }
 0x330   : > { %2477 = vrot.lane.b32.xlu1 %v2397_v26, %s3656_s23  ;;  %v2387_v34 = vmul.f32 %v2358_v31, %v4377_v10 }
 0x332   : > { %v2398_v14 = vmul.f32 %v2387_v34, %v4506_v44 }
 0x333   : > { %v2360_v32 = vpop.permute.xlu1 %2359 }
 0x334   : > { %v2388_v33 = vmul.f32 %v2360_v32, %v4386_v22  ;;  %2479 = vrot.lane.b32.xlu0 %v2398_v14, %s3656_s23 }
 0x336   : > { %v2399_v47 = vmul.f32 %v2388_v33, %v4502_v40 }
 0x338   : > { %v2362_v13 = vpop.permute.xlu0 %2361  ;;  %2481 = vrot.lane.b32.xlu1 %v2399_v47, %s3656_s23 }
 0x339   : > { %v2389_v60 = vmul.f32 %v2362_v13, %v4394_v35 }
 0x33b   : > { %v2400_v17 = vmul.f32 %v2389_v60, %v4508_v45 }
 0x33c   : > { %v2364_v25 = vpop.permute.xlu1 %2363 }
 0x33d   : > { %v2390_v36 = vmul.f32 %v2364_v25, %v4402_v39  ;;  %2483 = vrot.lane.b32.xlu0 %v2400_v17, %s3656_s23 }
 0x33f   : > { %v2401_v10 = vmul.f32 %v2390_v36, %v4510_v46 }
 0x340   : > { %v2366_v22 = vpop.permute.xlu0 %2365 }
 0x341   : > { %v2391_v44 = vmul.f32 %v2366_v22, %v4408_v43  ;;  %2485 = vrot.lane.b32.xlu1 %v2401_v10, %s3656_s23 }
 0x343   : > { %v2402_v40 = vmul.f32 %v2391_v44, %v4512_v49 }
 0x344   : > { %v2368_v35 = vpop.permute.xlu1 %2367 }
 0x345   : > { %v2392_v45 = vmul.f32 %v2368_v35, %v4414_v48  ;;  %2487 = vrot.lane.b32.xlu0 %v2402_v40, %s3656_s23 }
 0x347   : > { %v2403_v39 = vmul.f32 %v2392_v45, %v4514_v51  ;;  %v2370_v37 = vpop.permute.xlu0 %2369 }
 0x348   : > { %v2393_v46 = vmul.f32 %v2370_v37, %v4423_v54 }
 0x349   : > { %2489 = vrot.lane.b32.xlu1 %v2403_v39, %s3656_s23 }
 0x34a   : > { %v2404_v43 = vmul.f32 %v2393_v46, %v4516_v52 }
 0x34b   : > { %v2418_v38 = vpop.permute.xlu0 %2417 }
 0x34c   : > { %2450 = vst.msk [vmem:[%s3790_s20] sm:$0xff] %vm437_vm3, %v2418_v38  ;;  %2491 = vrot.lane.b32.xlu0 %v2404_v43, %s3656_s23 }
 0x34f   : > { %v2422_v49 = vpop.permute.xlu0 %2421 }
 0x350   : > { %2452 = vst.msk [vmem:[%s3790_s20 + $0x10] sm:$0xff] %vm437_vm3, %v2422_v49 }
 0x353   : > { %v2426_v48 = vpop.permute.xlu0 %2425 }
 0x354   : > { %2454 = vst.msk [vmem:[%s3790_s20 + $0x20] sm:$0xff] %vm437_vm3, %v2426_v48 }
 0x357   : > { %v2430_v54 = vpop.permute.xlu0 %2429 }
 0x358   : > { %2456 = vst.msk [vmem:[%s3790_s20 + $0x30] sm:$0xff] %vm437_vm3, %v2430_v54 }
 0x359   : > { %v2372_v51 = vpop.permute.xlu1 %2371 }
 0x35a   : > { %v2394_v52 = vmul.f32 %v2372_v51, %v4432_v58 }
 0x35b   : > { %v2434_v42 = vpop.permute.xlu0 %2433 }
 0x35c   : > { %v2405_v41 = vmul.f32 %v2394_v52, %v4518_v53  ;;  %2458 = vst.msk [vmem:[%s3790_s20 + $0x40] sm:$0xff] %vm437_vm3, %v2434_v42 }
 0x35d   : > { %v2420_v55 = vpop.permute.xlu1 %2419 }
 0x35e   : > { %2451 = vst.msk [vmem:[%s3790_s20 + $0x8] sm:$0xff] %vm437_vm3, %v2420_v55  ;;  %2493 = vrot.lane.b32.xlu1 %v2405_v41, %s3656_s23 }
 0x35f   : > { %v2438_v56 = vpop.permute.xlu0 %2437 }
 0x360   : > { %2461 = vst.msk [vmem:[%s3790_s20 + $0x50] sm:$0x1] %vm2460_vm6, %v2438_v56 }
 0x361   : > { %v2424_v58 = vpop.permute.xlu1 %2423 }
 0x362   : > { %2453 = vst.msk [vmem:[%s3790_s20 + $0x18] sm:$0xff] %vm437_vm3, %v2424_v58 }
 0x365   : > { %v2428_v53 = vpop.permute.xlu1 %2427 }
 0x366   : > { %2455 = vst.msk [vmem:[%s3790_s20 + $0x28] sm:$0xff] %vm437_vm3, %v2428_v53 }
 0x369   : > { %v2432_v57 = vpop.permute.xlu1 %2431 }
 0x36a   : > { %2457 = vst.msk [vmem:[%s3790_s20 + $0x38] sm:$0xff] %vm437_vm3, %v2432_v57 }
 0x36d   : > { %v2436_v59 = vpop.permute.xlu1 %2435 }
 0x36e   : > { %2459 = vst.msk [vmem:[%s3790_s20 + $0x48] sm:$0xff] %vm437_vm3, %v2436_v59 }
 0x36f   : > { %3566 = shalt.err (!%p3563_p8)
}
 0x370   : > { %s3567_s20 = scalar_lea.hbm %s4630_s18, 1408  ;;  %s3571_s27 = scalar_lea.hbm %s4730_s6, 2816 }
 0x371   : > { %p3568_p10 = scmp.ne.s32.totalorder %s4630_s18, %s3567_s20  ;;  %p3572_p13 = scmp.lt.u32.totalorder %s4630_s18, %s4730_s6 }
 0x372   : > { %p3573_p0 = scmp.lt.u32.totalorder %s3571_s27, %s3567_s20  ;;  %p3575_p2 = scmp.lt.u32.totalorder %s3567_s20, %s4630_s18 }
 0x373   : > { %p3569_p11 = pnand %p3568_p10, %p3743_p3 }
 0x374   : > { %p3574_p1 = por %p3573_p0, %p3572_p13 }
 0x375   : > { %p3570_p12 = pneg %p3569_p11 }
 0x376   : > { %p3576_p4 = por %p3575_p2, %p3574_p1 }
 0x378   : > { %p3577_p5 = pnand %p3576_p4, %p3570_p12 }
 0x37a   : > { %3580 = shalt.err (!%p3577_p5)
}
 0x37b   : > { %s3658_s13 = smov 128  }
 0x37c   : > { %3427 = dma.vmem_to_hbm [thread:$0]  (%p3743_p3), %s4632_s15, 1408, %s4630_s18, %s4638_s30, %s3658_s13, %s3658_s13, %s3654_s10  }
 0x39a   : > { %v2474_v61 = vpop.permute.xlu1 %2473 }
 0x39b   : > { %2506 = vst.msk [vmem:[%s3788_s19] sm:$0xff] %vm437_vm3, %v2474_v61  ;;  %2517 = vst.msk [vmem:[#allocation2 + $0xa] sm:$0xff] %vm437_vm3, %v2474_v61 }
 0x39e   : > { %v2476_v50 = vpop.permute.xlu0 %2475 }
 0x39f   : > { %2507 = vst.msk [vmem:[%s3788_s19 + $0x8] sm:$0xff] %vm437_vm3, %v2476_v50  ;;  %2518 = vst.msk [vmem:[#allocation2 + $0x12] sm:$0xff] %vm437_vm3, %v2476_v50 }
 0x3a2   : > { %v2478_v62 = vpop.permute.xlu1 %2477 }
 0x3a3   : > { %2508 = vst.msk [vmem:[%s3788_s19 + $0x10] sm:$0xff] %vm437_vm3, %v2478_v62  ;;  %2519 = vst.msk [vmem:[#allocation2 + $0x1a] sm:$0xff] %vm437_vm3, %v2478_v62 }
 0x3a6   : > { %v2480_v2 = vpop.permute.xlu0 %2479 }
 0x3a7   : > { %2509 = vst.msk [vmem:[%s3788_s19 + $0x18] sm:$0xff] %vm437_vm3, %v2480_v2  ;;  %2520 = vst.msk [vmem:[#allocation2 + $0x22] sm:$0xff] %vm437_vm3, %v2480_v2 }
 0x3aa   : > { %v2482_v3 = vpop.permute.xlu1 %2481 }
 0x3ab   : > { %2510 = vst.msk [vmem:[%s3788_s19 + $0x20] sm:$0xff] %vm437_vm3, %v2482_v3  ;;  %2521 = vst.msk [vmem:[#allocation2 + $0x2a] sm:$0xff] %vm437_vm3, %v2482_v3 }
 0x3af   : > { %v2484_v63 = vpop.permute.xlu0 %2483 }
 0x3b0   : > { %2511 = vst.msk [vmem:[%s3788_s19 + $0x28] sm:$0xff] %vm437_vm3, %v2484_v63  ;;  %2522 = vst.msk [vmem:[#allocation2 + $0x32] sm:$0xff] %vm437_vm3, %v2484_v63 }
 0x3b3   : > { %v2486_v5 = vpop.permute.xlu1 %2485 }
 0x3b4   : > { %2512 = vst.msk [vmem:[%s3788_s19 + $0x30] sm:$0xff] %vm437_vm3, %v2486_v5  ;;  %2523 = vst.msk [vmem:[#allocation2 + $0x3a] sm:$0xff] %vm437_vm3, %v2486_v5 }
 0x3b7   : > { %v2488_v7 = vpop.permute.xlu0 %2487 }
 0x3b8   : > { %2513 = vst.msk [vmem:[%s3788_s19 + $0x38] sm:$0xff] %vm437_vm3, %v2488_v7  ;;  %2524 = vst.msk [vmem:[#allocation2 + $0x42] sm:$0xff] %vm437_vm3, %v2488_v7 }
 0x3bb   : > { %v2490_v8 = vpop.permute.xlu1 %2489 }
 0x3bc   : > { %2514 = vst.msk [vmem:[%s3788_s19 + $0x40] sm:$0xff] %vm437_vm3, %v2490_v8  ;;  %2525 = vst.msk [vmem:[#allocation2 + $0x4a] sm:$0xff] %vm437_vm3, %v2490_v8 }
 0x3be   : > { %v2492_v9 = vpop.permute.xlu0 %2491 }
 0x3bf   : > { %2515 = vst.msk [vmem:[%s3788_s19 + $0x48] sm:$0xff] %vm437_vm3, %v2492_v9  ;;  %2526 = vst.msk [vmem:[#allocation2 + $0x52] sm:$0xff] %vm437_vm3, %v2492_v9 }
 0x3d0   : > { %v2494_v11 = vpop.permute.xlu1 %2493 }
 0x3d1   : > { %2516 = vst.msk [vmem:[%s3788_s19 + $0x50] sm:$0x1] %vm2460_vm6, %v2494_v11  ;;  %2527 = vst.msk [vmem:[#allocation2 + $0x5a] sm:$0x1] %vm2460_vm6, %v2494_v11 }
 0x3d2 PF: > { %s4749_s9 = sld [smem:[#allocation6_spill]]  ;;  %p3433_p3 = scmp.ge.s32.totalorder %s3647_s28, 2 }
 0x3d4   : > { %p3430_p6 = pnand %p3433_p3, %p3753_p9 }
 0x3d8   : > { %s2581_s23 = sand.u32 1, %s4749_s9  }
 0x3d9   : > { %s2582_s14 = scalar_lea.sflag [#allocation4], %s2581_s23 }
 0x3da   : > { %3614 = dma.done.wait (!%p3430_p6), %s2582_s14, 1408  }
 0x3db   : > { %3616 = vsyncadd (!%p3430_p6), %s2582_s14, 4294965888  ;;  %s20_s28 = sadd.s32 1, %s3647_s28   ;;  %s4751_s15 = sld [smem:[#allocation7_spill]] }
 0x3dc   : > { %p17_p7 = scmp.ge.s32.totalorder %s20_s28, 8   ;;  %s4752_s23 = sld [smem:[#allocation13_spill]] }
 0x3dd   : > { %s4753_s24 = sld [smem:[#allocation8_spill]]  ;;  %s4754_s25 = sld [smem:[#allocation9_spill]] }
 0x3de   : > { %s4755_s26 = sld [smem:[#allocation10_spill]]  ;;  %s4756_s27 = sld [smem:[#allocation11_spill]] }
 0x3df   : > { %s4757_s21 = smov %s3623_s22  ;;  %19 = sbr.rel (!%p17_p7) target bundleno = 5 (0x5), region = 105 }
 0x3e1   : > { %s4758_s22 = smov %s4751_s15 }
 0x3e6   :  { %2587 = vsyncpa [#allocation4], 1 }
 0x3e7   :  { %2589 = vsyncpa [#allocation4 + $0x1], 1 }

// kernel: _lambda_.28
= control target key start
LH: loop header
LB: loop body
LE: loop exit
PB: predicated region body
PF: predicated region fallthrough
CT: control target
= control target key end

     0   :  { %s1195_s18 = smov 0   ;;  %s1197_s19 = smov 0   ;;  %s1486_s0 = inlined_call_operand.vmem [shape: bf16[294,72], index: 0, kind: input, shape index: {}]   ;;  %s1487_s1 = inlined_call_operand.vmem [shape: bf16[72,32], index: 1, kind: input, shape index: {}]   ;;  %s1488_s2 = inlined_call_operand.vmem [shape: f32[1,32], index: 2, kind: input, shape index: {}]   ;;  %s1489_s3 = inlined_call_operand.vmem [shape: f32[1,32], index: 3, kind: input, shape index: {}]   ;;  %s1490_s4 = inlined_call_operand.vmem [shape: f32[1,32], index: 4, kind: input, shape index: {}]   ;;  %s1491_s5 = inlined_call_operand.vmem [shape: f32[294,32], index: 5, kind: output, shape index: {}]  }
   0x1   :  { %s1199_s20 = smov 0  }
   0x2 LB: > { %s1208_s21 = sadd.s32 4294967295, %s1131_s20   ;;  %s1210_s22 = sadd.s32 1, %s1131_s20   ;;  %s1131_s20 = sphi %s1199_s20, %s1498_s20   ;;  %s1127_s19 = sphi %s1197_s19, %s1497_s19   ;;  %s1123_s18 = sphi %s1195_s18, %s1496_s18  }
   0x3   : > { %s129_s23 = ssub.s32 %s1131_s20, %s1210_s22  ;;  %s132_s24 = sadd.s32 1, %s1127_s19 }
   0x4   : > { %p130_p0 = scmp.eq.s32.totalorder %s129_s23, 0  ;;  %p142_p1 = scmp.ne.s32.totalorder %s1127_s19, %s1123_s18 }
   0x5   : > { %p143_p2 = scmp.eq.s32.totalorder %s1208_s21, 1  ;;  %p868_p3 = scmp.ge.s32.totalorder %s1131_s20, 1 }
   0x6   : > { %s1218_s25 = scalar_select %p130_p0, %s1127_s19, %s132_s24  }
   0x7   : > { %p1220_p4 = por %p143_p2, %p142_p1  ;;  %p196_p5 = scmp.lt.s32.totalorder %s1131_s20, 3 }
   0x9   : > { %p197_p6 = pnand %p868_p3, %p196_p5 }
   0xa   : > { %v1058_v0 = vld [vmem:[%s1487_s1] sm:$0xff] (!%p197_p6)   ;;  %v1059_v1 = vld [vmem:[%s1487_s1 + $0x8] sm:$0xff] (!%p197_p6)   ;;  %s1231_s6 = smul.u32 (!%p197_p6), 19, %s1208_s21  ;;  %v1060_v2 = vld [vmem:[%s1487_s1 + $0x10] sm:$0xff] (!%p197_p6)   ;;  %vm357_vm0 = vcmask (!%p197_p6), 588800   ;;  %vm388_vm1 = vcmask (!%p197_p6), 1043456  }
   0xb   : > { %200 = sbr.rel (%p197_p6) target bundleno = 332 (0x14c), region = 40  ;;  %926 = vmatprep.subr.bf16.mxu0 (!%p197_p6), %v1058_v0  ;;  %956 = vmatprep.subr.bf16.mxu1 (!%p197_p6), %v1058_v0  ;;  %v1061_v3 = vld [vmem:[%s1487_s1 + $0x18] sm:$0xff] (!%p197_p6)   ;;  %v1062_v6 = vld [vmem:[%s1487_s1 + $0x20] ss:$0 sps:$4 sm:$0xff] (!%p197_p6)   ;;  %s224_s20 = sand.u32 (!%p197_p6), 1, %s1123_s18   ;;  %vm556_vm2 = vcmask (!%p197_p6), 261120  }
   0xc   : > { %927 = vmatpush3.bf16.msra.mxu0 (!%p197_p6), %v1058_v0  ;;  %961 = vmatpush3.bf16.msra.mxu1 (!%p197_p6), %v1058_v0  ;;  %p232_p7 = scmp.lt.s32.totalorder (!%p197_p6), %s1231_s6, 36  ;;  %v390_v7 = vsel (!%p197_p6), %vm388_vm1, %v1062_v6, 0  ;;  %v1273_v16 = vld [vmem:[%s1488_s2] ss:$0 sm:$0xff] (!%p197_p6)  ;;  %s1275_s27 = smul.u32 (!%p197_p6), 152, %s224_s20 }
   0xd   : > { %928 = vmatprep.subr.bf16.mxu0 (!%p197_p6), %v1059_v1  ;;  %957 = vmatprep.subr.bf16.mxu1 (!%p197_p6), %v1059_v1  ;;  %v1280_v18 = vld [vmem:[%s1489_s3] ss:$0 sm:$0xff] (!%p197_p6) }
   0xe   : > { %v1287_v24 = vld [vmem:[%s1490_s4] ss:$0 sm:$0xff] (!%p197_p6)  ;;  %s1308_s7 = scalar_lea.vmem (!%p197_p6), [#allocation2], %s1275_s27  }
  0x10   : > { %929 = vmatpush3.bf16.msra.mxu0 (!%p197_p6), %v1059_v1  ;;  %962 = vmatpush3.bf16.msra.mxu1 (!%p197_p6), %v1059_v1 }
  0x11   : > { %930 = vmatprep.subr.bf16.mxu0 (!%p197_p6), %v1060_v2  ;;  %958 = vmatprep.subr.bf16.mxu1 (!%p197_p6), %v1060_v2 }
  0x12   : > { %s233_s9 = scalar_select %p232_p7, %s1231_s6, 36 }
  0x13   : > { %s584_s8 = ssub.s32 (%p1220_p4), 37, %s1231_s6 }
  0x14   : > { %s869_s10 = sshll.u32 %s233_s9, 2  ;;  %931 = vmatpush3.bf16.msra.mxu0 %v1060_v2  ;;  %963 = vmatpush3.bf16.msra.mxu1 %v1060_v2  ;;  %s910_s9 = smul.u32 (%p1220_p4), 152, %s1208_s21 }
  0x15   : > { %s1244_s15 = scalar_lea.vmem %s1486_s0, %s869_s10  ;;  %932 = vmatprep.subr.bf16.mxu0 %v1061_v3  ;;  %959 = vmatprep.subr.bf16.mxu1 %v1061_v3  ;;  %p585_p8 = scmp.lt.s32.totalorder (%p1220_p4), %s584_s8, 19 }
  0x16   : > { %v1063_v4 = vld [vmem:[%s1244_s15] sm:$0xff]   ;;  %v1065_v5 = vld [vmem:[%s1244_s15 + $0x30] sm:$0xff]   ;;  %v1064_v8 = vld [vmem:[%s1244_s15 + $0x8] sm:$0xff]   ;;  %s1392_s12 = scalar_lea.vmem (%p1220_p4), %s1491_s5, %s910_s9  }
  0x17   : > { %936 = vmatprep.mubr.msk.bf16.mxu0 %vm357_vm0, %v1063_v4  ;;  %948 = vmatprep.mubr.msk.bf16.mxu1 %vm357_vm0, %v1065_v5  ;;  %v1066_v9 = vld [vmem:[%s1244_s15 + $0x38] sm:$0xff]   ;;  %v1067_v10 = vld [vmem:[%s1244_s15 + $0x10] sm:$0xff]   ;;  %v1069_v11 = vld [vmem:[%s1244_s15 + $0x40] sm:$0xff]  }
  0x18   : > { %933 = vmatpush3.bf16.msra.mxu0 %v1061_v3  ;;  %964 = vmatpush3.bf16.msra.mxu1 %v1061_v3  ;;  %v1068_v12 = vld [vmem:[%s1244_s15 + $0x18] sm:$0xff]   ;;  %v1070_v13 = vld [vmem:[%s1244_s15 + $0x48] ss:$0 sps:$4 sm:$0xff]   ;;  %v1071_v14 = vld [vmem:[%s1244_s15 + $0x20] sm:$0xff]  }
  0x19   : > { %966 = vmatprep.subr.msk.bf16.mxu0 %vm388_vm1, %v1062_v6  ;;  %967 = vmatprep.subr.msk.bf16.mxu1 %vm388_vm1, %v1062_v6  ;;  %v1072_v15 = vld [vmem:[%s1244_s15 + $0x28] sm:$0xff]  }
  0x1c   : > { %935 = vmatpush3.bf16.msra.mxu0 %v390_v7  ;;  %965 = vmatpush3.bf16.msra.mxu1 %v390_v7 }
  0x1f   : > { %937 = vmatmul.mubr.msk.bf16.vlgmr.msra.gmra.mrb[0].mxu0 %vm357_vm0, %v1064_v8  ;;  %949 = vmatmul.mubr.msk.bf16.vlgmr.msra.gmra.mrb[0].mxu1 %vm357_vm0, %v1066_v9 }
  0x20   : > { %940 = vmatprep.mubr.msk.bf16.mxu0 %vm357_vm0, %v1067_v10  ;;  %952 = vmatprep.mubr.msk.bf16.mxu1 %vm357_vm0, %v1069_v11 }
  0x27   : > { %941 = vmatmul.mubr.msk.bf16.gmra.mrb[4].mxu0 %vm357_vm0, %v1068_v12  ;;  %953 = vmatmul.mubr.msk.bf16.gmra.mrb[4].mxu1 %vm357_vm0, %v1070_v13 }
  0x28   : > { %944 = vmatprep.mubr.msk.bf16.mxu0 %vm357_vm0, %v1071_v14 }
  0x2f   : > { %945 = vmatmul.mubr.msk.bf16.gmra.mrb[8].mxu0 %vm357_vm0, %v1072_v15 }
  0xf2   : > { %v938_v17 = vpop.f32.mrb[0].mxu0  ;;  %v950_v19 = vpop.f32.mrb[0].mxu1 }
  0xf3   : > { %v435_v20 = vadd.f32 %v938_v17, %v1273_v16  ;;  %v426_v21 = vpop.f32.mrb[1].mxu0  ;;  %v483_v22 = vadd.f32 %v950_v19, %v1273_v16  ;;  %v474_v23 = vpop.f32.mrb[1].mxu1 }
  0xf4   : > { %v427_v25 = vadd.f32 %v1273_v16, %v426_v21  ;;  %v939_v26 = vpop.f32.mrb[2].mxu0  ;;  %v475_v27 = vadd.f32 %v1273_v16, %v474_v23  ;;  %v951_v28 = vpop.f32.mrb[2].mxu1 }
  0xf5   : > { %v513_v29 = vmul.f32 %v1280_v18, %v435_v20  ;;  %v438_v30 = vadd.f32 %v939_v26, %v1273_v16  ;;  %v429_v31 = vpop.f32.mrb[3].mxu0  ;;  %v525_v32 = vmul.f32 %v1280_v18, %v483_v22  ;;  %v486_v33 = vadd.f32 %v951_v28, %v1273_v16  ;;  %v477_v34 = vpop.f32.mrb[3].mxu1 }
  0xf6   : > { %v511_v35 = vmul.f32 %v1280_v18, %v427_v25  ;;  %v430_v36 = vadd.f32 %v1273_v16, %v429_v31  ;;  %v523_v37 = vmul.f32 %v1280_v18, %v475_v27  ;;  %v478_v38 = vadd.f32 %v1273_v16, %v477_v34 }
  0xf7   : > { %v539_v39 = vadd.f32 %v1287_v24, %v513_v29  ;;  %v514_v40 = vmul.f32 %v1280_v18, %v438_v30  ;;  %v551_v41 = vadd.f32 %v1287_v24, %v525_v32  ;;  %v526_v42 = vmul.f32 %v1280_v18, %v486_v33 }
  0xf8   : > { %v537_v43 = vadd.f32 %v1287_v24, %v511_v35  ;;  %v512_v44 = vmul.f32 %v1280_v18, %v430_v36  ;;  %v549_v45 = vadd.f32 %v1287_v24, %v523_v37  ;;  %v524_v46 = vmul.f32 %v1280_v18, %v478_v38 }
  0xf9   : > { %559 = vst.msk [vmem:[%s1308_s7 + $0x10] sm:$0xff] %vm556_vm2, %v539_v39  ;;  %v540_v47 = vadd.f32 %v1287_v24, %v514_v40  ;;  %571 = vst.msk [vmem:[%s1308_s7 + $0x70] sm:$0xff] %vm556_vm2, %v551_v41  ;;  %v552_v48 = vadd.f32 %v1287_v24, %v526_v42 }
  0xfa   : > { %557 = vst.msk [vmem:[%s1308_s7] sm:$0xff] %vm556_vm2, %v537_v43  ;;  %v538_v49 = vadd.f32 %v1287_v24, %v512_v44  ;;  %569 = vst.msk [vmem:[%s1308_s7 + $0x60] sm:$0xff] %vm556_vm2, %v549_v45  ;;  %v942_v50 = vpop.f32.mrb[4].mxu0  ;;  %v550_v51 = vadd.f32 %v1287_v24, %v524_v46  ;;  %v954_v52 = vpop.f32.mrb[4].mxu1 }
  0xfb   : > { %560 = vst.msk [vmem:[%s1308_s7 + $0x18] sm:$0xff] %vm556_vm2, %v540_v47  ;;  %572 = vst.msk [vmem:[%s1308_s7 + $0x78] sm:$0xff] %vm556_vm2, %v552_v48  ;;  %v451_v53 = vadd.f32 %v942_v50, %v1273_v16  ;;  %v442_v54 = vpop.f32.mrb[5].mxu0  ;;  %v499_v55 = vadd.f32 %v954_v52, %v1273_v16  ;;  %v490_v56 = vpop.f32.mrb[5].mxu1 }
  0xfc   : > { %558 = vst.msk [vmem:[%s1308_s7 + $0x8] sm:$0xff] %vm556_vm2, %v538_v49  ;;  %570 = vst.msk [vmem:[%s1308_s7 + $0x68] sm:$0xff] %vm556_vm2, %v550_v51  ;;  %v443_v57 = vadd.f32 %v1273_v16, %v442_v54  ;;  %v943_v58 = vpop.f32.mrb[6].mxu0  ;;  %v491_v59 = vadd.f32 %v1273_v16, %v490_v56  ;;  %v955_v60 = vpop.f32.mrb[6].mxu1 }
  0xfd   : > { %v517_v61 = vmul.f32 %v1280_v18, %v451_v53  ;;  %v454_v62 = vadd.f32 %v943_v58, %v1273_v16  ;;  %v445_v63 = vpop.f32.mrb[7].mxu0  ;;  %v529_v0 = vmul.f32 %v1280_v18, %v499_v55  ;;  %v493_v1 = vpop.f32.mrb[7].mxu1 }
  0xfe   : > { %v515_v2 = vmul.f32 %v1280_v18, %v443_v57  ;;  %v446_v3 = vadd.f32 %v1273_v16, %v445_v63  ;;  %v527_v4 = vmul.f32 %v1280_v18, %v491_v59  ;;  %v494_v5 = vadd.f32 %v1273_v16, %v493_v1 }
  0xff   : > { %v543_v6 = vadd.f32 %v1287_v24, %v517_v61  ;;  %v518_v7 = vmul.f32 %v1280_v18, %v454_v62  ;;  %v555_v8 = vadd.f32 %v1287_v24, %v529_v0 }
 0x100   : > { %v541_v9 = vadd.f32 %v1287_v24, %v515_v2  ;;  %v516_v10 = vmul.f32 %v1280_v18, %v446_v3  ;;  %v553_v11 = vadd.f32 %v1287_v24, %v527_v4  ;;  %v528_v12 = vmul.f32 %v1280_v18, %v494_v5 }
 0x101   : > { %563 = vst.msk [vmem:[%s1308_s7 + $0x30] sm:$0xff] %vm556_vm2, %v543_v6  ;;  %v544_v13 = vadd.f32 %v1287_v24, %v518_v7  ;;  %575 = vst.msk [vmem:[%s1308_s7 + $0x90] sm:$0xff] %vm556_vm2, %v555_v8 }
 0x102   : > { %561 = vst.msk [vmem:[%s1308_s7 + $0x20] sm:$0xff] %vm556_vm2, %v541_v9  ;;  %v542_v14 = vadd.f32 %v1287_v24, %v516_v10  ;;  %573 = vst.msk [vmem:[%s1308_s7 + $0x80] sm:$0xff] %vm556_vm2, %v553_v11  ;;  %v946_v15 = vpop.f32.mrb[8].mxu0  ;;  %v554_v17 = vadd.f32 %v1287_v24, %v528_v12 }
 0x103   : > { %564 = vst.msk [vmem:[%s1308_s7 + $0x38] sm:$0xff] %vm556_vm2, %v544_v13  ;;  %v467_v19 = vadd.f32 %v946_v15, %v1273_v16  ;;  %v458_v20 = vpop.f32.mrb[9].mxu0 }
 0x104   : > { %562 = vst.msk [vmem:[%s1308_s7 + $0x28] sm:$0xff] %vm556_vm2, %v542_v14  ;;  %574 = vst.msk [vmem:[%s1308_s7 + $0x88] sm:$0xff] %vm556_vm2, %v554_v17  ;;  %v459_v21 = vadd.f32 %v1273_v16, %v458_v20  ;;  %v947_v22 = vpop.f32.mrb[10].mxu0 }
 0x105   : > { %v521_v23 = vmul.f32 %v1280_v18, %v467_v19  ;;  %v470_v25 = vadd.f32 %v947_v22, %v1273_v16  ;;  %v461_v26 = vpop.f32.mrb[11].mxu0 }
 0x106   : > { %v519_v27 = vmul.f32 %v1280_v18, %v459_v21  ;;  %v462_v28 = vadd.f32 %v1273_v16, %v461_v26  ;;  %582 = sbr.rel (!%p1220_p4) target bundleno = 332 (0x14c), region = 44 }
 0x107   : > { %v547_v29 = vadd.f32 %v1287_v24, %v521_v23  ;;  %v522_v30 = vmul.f32 %v1280_v18, %v470_v25 }
 0x108   : > { %v545_v31 = vadd.f32 %v1287_v24, %v519_v27  ;;  %v520_v32 = vmul.f32 %v1280_v18, %v462_v28 }
 0x109   : > { %567 = vst.msk [vmem:[%s1308_s7 + $0x50] sm:$0xff] %vm556_vm2, %v547_v29  ;;  %v548_v33 = vadd.f32 %v1287_v24, %v522_v30 }
 0x10a   : > { %565 = vst.msk [vmem:[%s1308_s7 + $0x40] sm:$0xff] %vm556_vm2, %v545_v31  ;;  %v546_v34 = vadd.f32 %v1287_v24, %v520_v32 }
 0x10b   : > { %568 = vst.msk [vmem:[%s1308_s7 + $0x58] sm:$0xff] %vm556_vm2, %v548_v33 }
 0x10c   : > { %566 = vst.msk [vmem:[%s1308_s7 + $0x48] sm:$0xff] %vm556_vm2, %v546_v34 }
 0x10d   : > { %s1500_s8 = smov (!%p585_p8, %s584_s8), 19 }
 0x10e   : > { %s898_s13 = sshll.u32 %s1500_s8, 7 }
 0x10f   : > { %p901_p9 = scmp.eq.s32.totalorder %s898_s13, 0 }
 0x110   : > { %1073 = sdivrem.u32 (!%p901_p9), %s1500_s8, 19 }
 0x111   : > { %593 = sbr.rel (%p901_p9) target bundleno = 332 (0x14c), region = 48 }
 0x119   : > { %s1398_s26 = spop.drf %1073 }
 0x11a   : > { %p902_p10 = scmp.le.s32.totalorder %s1398_s26, 0 }
 0x11b   : > { %s1493_s21 = smov (!%p902_p10), %s1392_s12  ;;  %s1494_s6 = smov (!%p902_p10), %s1308_s7 }
 0x11c   : > { %821 = sbr.rel (%p902_p10) target bundleno = 303 (0x12f), region = 124  ;;  %s1407_s14 = smov (!%p902_p10), 0  }
 0x11d   : > { %s1409_s15 = smov (!%p902_p10), 0  }
 0x123 LB: >> { %v693_v16 = vld [vmem:[%s1139_s6] sm:$0xff]  ;;  %v695_v18 = vld [vmem:[%s1139_s6 + $0x8] sm:$0xff]  ;;  %v697_v24 = vld [vmem:[%s1139_s6 + $0x10] sm:$0xff]  ;;  %s731_s16 = sadd.s32 1, %s1143_s14  ;;  %s687_s15 = sadd.s32 1, %s1147_s15   ;;  %s1147_s15 = sphi %s1409_s15, %s687_s15   ;;  %s1143_s14 = sphi %s1407_s14, %s1495_s14   ;;  %s1139_s6 = sphi %s1494_s6, %s736_s6   ;;  %s1135_s21 = sphi %s1493_s21, %s737_s21  }
 0x124   : >> { %694 = vst [vmem:[%s1135_s21] sm:$0xff] %v693_v16  ;;  %696 = vst [vmem:[%s1135_s21 + $0x8] sm:$0xff] %v695_v18  ;;  %v699_v35 = vld [vmem:[%s1139_s6 + $0x18] sm:$0xff]  ;;  %v701_v36 = vld [vmem:[%s1139_s6 + $0x20] sm:$0xff]  ;;  %p732_p11 = scmp.ge.s32.totalorder %s731_s16, %s1398_s26  ;;  %p686_p12 = scmp.ge.s32.totalorder %s687_s15, %s1398_s26 }
 0x125   : >> { %698 = vst [vmem:[%s1135_s21 + $0x10] sm:$0xff] %v697_v24  ;;  %v703_v37 = vld [vmem:[%s1139_s6 + $0x28] sm:$0xff]  ;;  %700 = vst [vmem:[%s1135_s21 + $0x18] sm:$0xff] %v699_v35  ;;  %v705_v38 = vld [vmem:[%s1139_s6 + $0x30] sm:$0xff] }
 0x126   : >> { %702 = vst [vmem:[%s1135_s21 + $0x20] sm:$0xff] %v701_v36  ;;  %704 = vst [vmem:[%s1135_s21 + $0x28] sm:$0xff] %v703_v37  ;;  %v707_v39 = vld [vmem:[%s1139_s6 + $0x38] sm:$0xff]  ;;  %v709_v40 = vld [vmem:[%s1139_s6 + $0x40] sm:$0xff]  ;;  %s1502_s16 = smov (%p732_p11, %s731_s16), 0 }
 0x127   : >> { %706 = vst [vmem:[%s1135_s21 + $0x30] sm:$0xff] %v705_v38  ;;  %708 = vst [vmem:[%s1135_s21 + $0x38] sm:$0xff] %v707_v39  ;;  %v711_v41 = vld [vmem:[%s1139_s6 + $0x48] sm:$0xff]  ;;  %v713_v42 = vld [vmem:[%s1139_s6 + $0x50] sm:$0xff]  ;;  %s734_s17 = smul.u32 152, %s1502_s16  ;;  %s1495_s14 = smov %s1502_s16 }
 0x128   : >> { %710 = vst [vmem:[%s1135_s21 + $0x40] sm:$0xff] %v709_v40  ;;  %v715_v43 = vld [vmem:[%s1139_s6 + $0x58] sm:$0xff]  ;;  %712 = vst [vmem:[%s1135_s21 + $0x48] sm:$0xff] %v711_v41  ;;  %v717_v44 = vld [vmem:[%s1139_s6 + $0x60] sm:$0xff]  ;;  %689 = sbr.rel (!%p686_p12) target bundleno = 291 (0x123), region = 130 }
 0x129   : >> { %714 = vst [vmem:[%s1135_s21 + $0x50] sm:$0xff] %v713_v42  ;;  %716 = vst [vmem:[%s1135_s21 + $0x58] sm:$0xff] %v715_v43  ;;  %v719_v45 = vld [vmem:[%s1139_s6 + $0x68] sm:$0xff]  ;;  %v721_v46 = vld [vmem:[%s1139_s6 + $0x70] sm:$0xff] }
 0x12a   : >> { %718 = vst [vmem:[%s1135_s21 + $0x60] sm:$0xff] %v717_v44  ;;  %720 = vst [vmem:[%s1135_s21 + $0x68] sm:$0xff] %v719_v45  ;;  %v723_v47 = vld [vmem:[%s1139_s6 + $0x78] sm:$0xff]  ;;  %v725_v48 = vld [vmem:[%s1139_s6 + $0x80] sm:$0xff] }
 0x12b   : >> { %722 = vst [vmem:[%s1135_s21 + $0x70] sm:$0xff] %v721_v46  ;;  %v727_v49 = vld [vmem:[%s1139_s6 + $0x88] sm:$0xff]  ;;  %724 = vst [vmem:[%s1135_s21 + $0x78] sm:$0xff] %v723_v47  ;;  %v729_v50 = vld [vmem:[%s1139_s6 + $0x90] sm:$0xff]  ;;  %s736_s6 = scalar_lea.vmem %s1308_s7, %s734_s17 [#allocation2]  }
 0x12c   : >> { %726 = vst [vmem:[%s1135_s21 + $0x80] sm:$0xff] %v725_v48  ;;  %728 = vst [vmem:[%s1135_s21 + $0x88] sm:$0xff] %v727_v49 }
 0x12d   : >> { %730 = vst [vmem:[%s1135_s21 + $0x90] sm:$0xff] %v729_v50  ;;  %s737_s21 = scalar_lea.vmem %s1392_s12, %s734_s17  }
 0x12f PF: > { %1075 = sdivrem.u32 %s1500_s8, 19 }
 0x130   : > { %s903_s20 = smul.u32 152, %s1398_s26 }
 0x132   : > { %s742_s23 = scalar_lea.vmem %s1308_s7, %s903_s20 [#allocation2]   ;;  %s744_s24 = scalar_lea.vmem %s1392_s12, %s903_s20  }
 0x138   : > { %s1076_s27 = spop.drf %1075 }
 0x139   : > { %p905_p13 = scmp.le.s32.totalorder %s1076_s27, 0 }
 0x13a   : > { %s1149_s28 = smov (!%p905_p13), %s744_s24   ;;  %s1153_s29 = smov (!%p905_p13), %s742_s23  }
 0x13b   : > { %835 = sbr.rel (%p905_p13) target bundleno = 332 (0x14c), region = 135  ;;  %s1157_s18 = smov (!%p905_p13), 0  }
 0x13c   : > { %s1161_s30 = smov (!%p905_p13), 0  }
 0x142 LB: >> { %v754_v51 = vld [vmem:[%s1155_s29] sm:$0xff]  ;;  %s756_s9 = sadd.s32 1, %s1159_s18  ;;  %s748_s30 = sadd.s32 1, %s1163_s30   ;;  %s1163_s30 = sphi %s1161_s30, %s748_s30   ;;  %s1159_s18 = sphi %s1157_s18, %s1158_s18   ;;  %s1155_s29 = sphi %s1153_s29, %s761_s29   ;;  %s1151_s28 = sphi %s1149_s28, %s762_s28  }
 0x143   : >> { %755 = vst [vmem:[%s1151_s28] sm:$0xff] %v754_v51  ;;  %p757_p0 = scmp.ge.s32.totalorder %s756_s9, %s1076_s27  ;;  %p747_p1 = scmp.ge.s32.totalorder %s748_s30, %s1076_s27 }
 0x145   : >> { %s1504_s9 = smov (%p757_p0, %s756_s9), 0  ;;  %750 = sbr.rel (!%p747_p1) target bundleno = 322 (0x142), region = 141 }
 0x146   : >> { %s906_s7 = sshll.u32 %s1504_s9, 3  ;;  %s1158_s18 = smov %s1504_s9  }
 0x147   : >> { %s761_s29 = scalar_lea.vmem %s742_s23, %s906_s7 [#allocation2]   ;;  %s762_s28 = scalar_lea.vmem %s744_s24, %s906_s7  }
 0x14c PF: > { %p12_p2 = scmp.ge.s32.totalorder %s1210_s22, 4   ;;  %s1496_s18 = smov %s1127_s19 }
 0x14d   : > { %s1497_s19 = smov %s1218_s25  ;;  %s1498_s20 = smov %s1210_s22 }
 0x14e   :  { %14 = sbr.rel (!%p12_p2) target bundleno = 2 (0x2), region = 152 }

// kernel: squeeze.3
= control target key start
LH: loop header
LB: loop body
LE: loop exit
PB: predicated region body
PF: predicated region fallthrough
CT: control target
= control target key end

     0   :  { %vm34_vm0 = vcmask 72704   ;;  %s684_s8 = smov 119   ;;  %s685_s9 = smov 92   ;;  %s824_s0 = inlined_call_operand.vmem [shape: bf16[2,1,81,8], index: 0, kind: input, shape index: {}]   ;;  %s825_s1 = inlined_call_operand.vmem [shape: bf16[2,9,9,8], index: 1, kind: output, shape index: {}]  }
   0x1   :  { %v537_v0 = vld [vmem:[%s824_s0] sm:$0xff]   ;;  %s683_s0 = smov 101   ;;  %s686_s10 = smov 110  }
   0x2   :  { %v538_v1 = vunpack.c.l.bf16 %v537_v0  ;;  %v539_v2 = vunpack.c.h.bf16 %v537_v0  ;;  %s687_s11 = smov 74   ;;  %s688_s12 = smov 83  }
   0x3   :  { %s689_s13 = smov 56   ;;  %s690_s14 = smov 65  }
   0x4   :  { %v653_v3 = vpack.i.bf16 %v539_v2, %v538_v1  ;;  %35 = vst.msk [vmem:[#allocation0] ss:$16 sm:$0x3] %vm34_vm0, %v538_v1   ;;  %36 = vst.msk [vmem:[#allocation0] ss:$16 sm:$0xc] %vm34_vm0, %v538_v1  }
   0x5   :  { %37 = vst.msk [vmem:[#allocation0] ss:$16 sm:$0x30] %vm34_vm0, %v538_v1   ;;  %38 = vst.msk [vmem:[#allocation0] ss:$16 sm:$0xc0] %vm34_vm0, %v538_v1  }
   0x6   :  { %43 = vst.msk [vmem:[#allocation0 + $0x80] ss:$16 sm:$0x3] %vm34_vm0, %v539_v2   ;;  %45 = vst.msk [vmem:[#allocation0 + $0x80] ss:$16 sm:$0xc] %vm34_vm0, %v539_v2   ;;  %654 = vrot.lane.b32.xlu1 %v653_v3, %s683_s0  ;;  %644 = vrot.lane.b32.xlu0 %v653_v3, %s684_s8 }
   0x7   :  { %47 = vst.msk [vmem:[#allocation0 + $0x80] ss:$16 sm:$0x30] %vm34_vm0, %v539_v2   ;;  %49 = vst.msk [vmem:[#allocation0 + $0x80] ss:$16 sm:$0xc0] %vm34_vm0, %v539_v2  }
   0xa   :  { %659 = vrot.lane.b32.xlu1 %v653_v3, %s685_s9  ;;  %649 = vrot.lane.b32.xlu0 %v653_v3, %s686_s10 }
   0xe   :  { %669 = vrot.lane.b32.xlu1 %v653_v3, %s687_s11  ;;  %664 = vrot.lane.b32.xlu0 %v653_v3, %s688_s12 }
  0x12   :  { %679 = vrot.lane.b32.xlu1 %v653_v3, %s689_s13  ;;  %674 = vrot.lane.b32.xlu0 %v653_v3, %s690_s14 }
  0x78   :  { %v655_v4 = vpop.permute.xlu1 %654  ;;  %v645_v5 = vpop.permute.xlu0 %644 }
  0x79   :  { %v657_v6 = vunpack.i.h.bf16 %v655_v4  ;;  %v656_v7 = vunpack.i.l.bf16 %v655_v4  ;;  %v647_v8 = vunpack.i.h.bf16 %v645_v5  ;;  %v646_v9 = vunpack.i.l.bf16 %v645_v5 }
  0x7b   :  { %118 = vst.msk [vmem:[#allocation0 + $0x83] ss:$16 sm:$0x3] %vm34_vm0, %v657_v6   ;;  %120 = vst.msk [vmem:[#allocation0 + $0x83] ss:$16 sm:$0xc] %vm34_vm0, %v657_v6  }
  0x7c   :  { %122 = vst.msk [vmem:[#allocation0 + $0x83] ss:$16 sm:$0x30] %vm34_vm0, %v657_v6   ;;  %124 = vst.msk [vmem:[#allocation0 + $0x83] ss:$16 sm:$0xc0] %vm34_vm0, %v657_v6   ;;  %v660_v10 = vpop.permute.xlu1 %659  ;;  %v650_v11 = vpop.permute.xlu0 %649 }
  0x7d   :  { %105 = vst.msk [vmem:[#allocation0 + $0x3] ss:$16 sm:$0x3] %vm34_vm0, %v656_v7   ;;  %107 = vst.msk [vmem:[#allocation0 + $0x3] ss:$16 sm:$0xc] %vm34_vm0, %v656_v7   ;;  %v662_v12 = vunpack.i.h.bf16 %v660_v10  ;;  %v661_v13 = vunpack.i.l.bf16 %v660_v10  ;;  %v652_v14 = vunpack.i.h.bf16 %v650_v11  ;;  %v651_v15 = vunpack.i.l.bf16 %v650_v11 }
  0x7e   :  { %109 = vst.msk [vmem:[#allocation0 + $0x3] ss:$16 sm:$0x30] %vm34_vm0, %v656_v7   ;;  %111 = vst.msk [vmem:[#allocation0 + $0x3] ss:$16 sm:$0xc0] %vm34_vm0, %v656_v7  }
  0x7f   :  { %68 = vst.msk [vmem:[#allocation0 + $0x81] ss:$16 sm:$0x3] %vm34_vm0, %v647_v8   ;;  %70 = vst.msk [vmem:[#allocation0 + $0x81] ss:$16 sm:$0xc] %vm34_vm0, %v647_v8  }
  0x80   :  { %72 = vst.msk [vmem:[#allocation0 + $0x81] ss:$16 sm:$0x30] %vm34_vm0, %v647_v8   ;;  %74 = vst.msk [vmem:[#allocation0 + $0x81] ss:$16 sm:$0xc0] %vm34_vm0, %v647_v8   ;;  %v670_v16 = vpop.permute.xlu1 %669  ;;  %v665_v17 = vpop.permute.xlu0 %664 }
  0x81   :  { %55 = vst.msk [vmem:[#allocation0 + $0x1] ss:$16 sm:$0x3] %vm34_vm0, %v646_v9   ;;  %57 = vst.msk [vmem:[#allocation0 + $0x1] ss:$16 sm:$0xc] %vm34_vm0, %v646_v9   ;;  %v672_v18 = vunpack.i.h.bf16 %v670_v16  ;;  %v671_v19 = vunpack.i.l.bf16 %v670_v16  ;;  %v667_v20 = vunpack.i.h.bf16 %v665_v17  ;;  %v666_v21 = vunpack.i.l.bf16 %v665_v17 }
  0x82   :  { %59 = vst.msk [vmem:[#allocation0 + $0x1] ss:$16 sm:$0x30] %vm34_vm0, %v646_v9   ;;  %61 = vst.msk [vmem:[#allocation0 + $0x1] ss:$16 sm:$0xc0] %vm34_vm0, %v646_v9  }
  0x83   :  { %143 = vst.msk [vmem:[#allocation0 + $0x84] ss:$16 sm:$0x3] %vm34_vm0, %v662_v12   ;;  %145 = vst.msk [vmem:[#allocation0 + $0x84] ss:$16 sm:$0xc] %vm34_vm0, %v662_v12  }
  0x84   :  { %147 = vst.msk [vmem:[#allocation0 + $0x84] ss:$16 sm:$0x30] %vm34_vm0, %v662_v12   ;;  %149 = vst.msk [vmem:[#allocation0 + $0x84] ss:$16 sm:$0xc0] %vm34_vm0, %v662_v12   ;;  %v680_v22 = vpop.permute.xlu1 %679  ;;  %v675_v23 = vpop.permute.xlu0 %674 }
  0x85   :  { %130 = vst.msk [vmem:[#allocation0 + $0x4] ss:$16 sm:$0x3] %vm34_vm0, %v661_v13   ;;  %132 = vst.msk [vmem:[#allocation0 + $0x4] ss:$16 sm:$0xc] %vm34_vm0, %v661_v13   ;;  %v682_v24 = vunpack.i.h.bf16 %v680_v22  ;;  %v681_v25 = vunpack.i.l.bf16 %v680_v22  ;;  %v677_v26 = vunpack.i.h.bf16 %v675_v23  ;;  %v676_v27 = vunpack.i.l.bf16 %v675_v23 }
  0x86   :  { %134 = vst.msk [vmem:[#allocation0 + $0x4] ss:$16 sm:$0x30] %vm34_vm0, %v661_v13   ;;  %136 = vst.msk [vmem:[#allocation0 + $0x4] ss:$16 sm:$0xc0] %vm34_vm0, %v661_v13  }
  0x87   :  { %93 = vst.msk [vmem:[#allocation0 + $0x82] ss:$16 sm:$0x3] %vm34_vm0, %v652_v14   ;;  %95 = vst.msk [vmem:[#allocation0 + $0x82] ss:$16 sm:$0xc] %vm34_vm0, %v652_v14  }
  0x88   :  { %97 = vst.msk [vmem:[#allocation0 + $0x82] ss:$16 sm:$0x30] %vm34_vm0, %v652_v14   ;;  %99 = vst.msk [vmem:[#allocation0 + $0x82] ss:$16 sm:$0xc0] %vm34_vm0, %v652_v14  }
  0x89   :  { %80 = vst.msk [vmem:[#allocation0 + $0x2] ss:$16 sm:$0x3] %vm34_vm0, %v651_v15   ;;  %82 = vst.msk [vmem:[#allocation0 + $0x2] ss:$16 sm:$0xc] %vm34_vm0, %v651_v15  }
  0x8a   :  { %84 = vst.msk [vmem:[#allocation0 + $0x2] ss:$16 sm:$0x30] %vm34_vm0, %v651_v15   ;;  %86 = vst.msk [vmem:[#allocation0 + $0x2] ss:$16 sm:$0xc0] %vm34_vm0, %v651_v15  }
  0x8b   :  { %193 = vst.msk [vmem:[#allocation0 + $0x86] ss:$16 sm:$0x3] %vm34_vm0, %v672_v18   ;;  %195 = vst.msk [vmem:[#allocation0 + $0x86] ss:$16 sm:$0xc] %vm34_vm0, %v672_v18  }
  0x8c   :  { %197 = vst.msk [vmem:[#allocation0 + $0x86] ss:$16 sm:$0x30] %vm34_vm0, %v672_v18   ;;  %199 = vst.msk [vmem:[#allocation0 + $0x86] ss:$16 sm:$0xc0] %vm34_vm0, %v672_v18  }
  0x8d   :  { %180 = vst.msk [vmem:[#allocation0 + $0x6] ss:$16 sm:$0x3] %vm34_vm0, %v671_v19   ;;  %182 = vst.msk [vmem:[#allocation0 + $0x6] ss:$16 sm:$0xc] %vm34_vm0, %v671_v19  }
  0x8e   :  { %184 = vst.msk [vmem:[#allocation0 + $0x6] ss:$16 sm:$0x30] %vm34_vm0, %v671_v19   ;;  %186 = vst.msk [vmem:[#allocation0 + $0x6] ss:$16 sm:$0xc0] %vm34_vm0, %v671_v19  }
  0x8f   :  { %168 = vst.msk [vmem:[#allocation0 + $0x85] ss:$16 sm:$0x3] %vm34_vm0, %v667_v20   ;;  %170 = vst.msk [vmem:[#allocation0 + $0x85] ss:$16 sm:$0xc] %vm34_vm0, %v667_v20  }
  0x90   :  { %172 = vst.msk [vmem:[#allocation0 + $0x85] ss:$16 sm:$0x30] %vm34_vm0, %v667_v20   ;;  %174 = vst.msk [vmem:[#allocation0 + $0x85] ss:$16 sm:$0xc0] %vm34_vm0, %v667_v20  }
  0x91   :  { %155 = vst.msk [vmem:[#allocation0 + $0x5] ss:$16 sm:$0x3] %vm34_vm0, %v666_v21   ;;  %157 = vst.msk [vmem:[#allocation0 + $0x5] ss:$16 sm:$0xc] %vm34_vm0, %v666_v21  }
  0x92   :  { %159 = vst.msk [vmem:[#allocation0 + $0x5] ss:$16 sm:$0x30] %vm34_vm0, %v666_v21   ;;  %161 = vst.msk [vmem:[#allocation0 + $0x5] ss:$16 sm:$0xc0] %vm34_vm0, %v666_v21  }
  0x93   :  { %243 = vst.msk [vmem:[#allocation0 + $0x88] ss:$16 sm:$0x3] %vm34_vm0, %v682_v24   ;;  %245 = vst.msk [vmem:[#allocation0 + $0x88] ss:$16 sm:$0xc] %vm34_vm0, %v682_v24  }
  0x94   :  { %247 = vst.msk [vmem:[#allocation0 + $0x88] ss:$16 sm:$0x30] %vm34_vm0, %v682_v24   ;;  %249 = vst.msk [vmem:[#allocation0 + $0x88] ss:$16 sm:$0xc0] %vm34_vm0, %v682_v24  }
  0x95   :  { %230 = vst.msk [vmem:[#allocation0 + $0x8] ss:$16 sm:$0x3] %vm34_vm0, %v681_v25   ;;  %232 = vst.msk [vmem:[#allocation0 + $0x8] ss:$16 sm:$0xc] %vm34_vm0, %v681_v25  }
  0x96   :  { %234 = vst.msk [vmem:[#allocation0 + $0x8] ss:$16 sm:$0x30] %vm34_vm0, %v681_v25   ;;  %236 = vst.msk [vmem:[#allocation0 + $0x8] ss:$16 sm:$0xc0] %vm34_vm0, %v681_v25  }
  0x97   :  { %218 = vst.msk [vmem:[#allocation0 + $0x87] ss:$16 sm:$0x3] %vm34_vm0, %v677_v26   ;;  %220 = vst.msk [vmem:[#allocation0 + $0x87] ss:$16 sm:$0xc] %vm34_vm0, %v677_v26  }
  0x98   :  { %222 = vst.msk [vmem:[#allocation0 + $0x87] ss:$16 sm:$0x30] %vm34_vm0, %v677_v26   ;;  %224 = vst.msk [vmem:[#allocation0 + $0x87] ss:$16 sm:$0xc0] %vm34_vm0, %v677_v26  }
  0x99   :  { %205 = vst.msk [vmem:[#allocation0 + $0x7] ss:$16 sm:$0x3] %vm34_vm0, %v676_v27   ;;  %207 = vst.msk [vmem:[#allocation0 + $0x7] ss:$16 sm:$0xc] %vm34_vm0, %v676_v27  }
  0x9a   :  { %209 = vst.msk [vmem:[#allocation0 + $0x7] ss:$16 sm:$0x30] %vm34_vm0, %v676_v27   ;;  %211 = vst.msk [vmem:[#allocation0 + $0x7] ss:$16 sm:$0xc0] %vm34_vm0, %v676_v27  }
  0x9b   :  { %v370_v32 = vld [vmem:[#allocation0 + $0x88] sm:$0xff]  ;;  %v384_v33 = vld [vmem:[#allocation0 + $0x98] sm:$0xff] }
  0x9c   :  { %v259_v28 = vld [vmem:[#allocation0 + $0x8] sm:$0xff]  ;;  %v272_v29 = vld [vmem:[#allocation0 + $0x18] sm:$0xff] }
  0x9d   :  { %v286_v30 = vld [vmem:[#allocation0 + $0x28] sm:$0xff]  ;;  %v300_v31 = vld [vmem:[#allocation0 + $0x38] sm:$0xff] }
  0x9e   :  { %v398_v34 = vld [vmem:[#allocation0 + $0xa8] sm:$0xff]  ;;  %v328_v36 = vld [vmem:[#allocation0 + $0x58] sm:$0xff]  ;;  %v363_v60 = vld [vmem:[#allocation0 + $0x80] sm:$0xff] }
  0x9f   :  { %v314_v35 = vld [vmem:[#allocation0 + $0x48] sm:$0xff]  ;;  %v412_v38 = vld [vmem:[#allocation0 + $0xb8] sm:$0xff]  ;;  %v377_v61 = vld [vmem:[#allocation0 + $0x90] sm:$0xff]  ;;  %v583_v63 = vpack.c.bf16 %v370_v32, %v363_v60 }
  0xa0   :  { %v342_v37 = vld [vmem:[#allocation0 + $0x68] sm:$0xff]  ;;  %v440_v40 = vld [vmem:[#allocation0 + $0xd8] sm:$0xff]  ;;  %v254_v42 = vld [vmem:[#allocation0] sm:$0xff]  ;;  %v588_v0 = vpack.c.bf16 %v384_v33, %v377_v61 }
  0xa1   :  { %v426_v39 = vld [vmem:[#allocation0 + $0xc8] sm:$0xff]  ;;  %v356_v41 = vld [vmem:[#allocation0 + $0x78] sm:$0xff]  ;;  %v265_v43 = vld [vmem:[#allocation0 + $0x10] sm:$0xff]  ;;  %v543_v46 = vpack.c.bf16 %v259_v28, %v254_v42  ;;  %627 = vst [vmem:[%s825_s1 + $0x40] sm:$0xff] %v583_v63  }
  0xa2   :  { %v454_v44 = vld [vmem:[#allocation0 + $0xe8] sm:$0xff]  ;;  %v468_v45 = vld [vmem:[#allocation0 + $0xf8] sm:$0xff]  ;;  %v548_v47 = vpack.c.bf16 %v272_v29, %v265_v43  ;;  %v279_v48 = vld [vmem:[#allocation0 + $0x20] sm:$0xff]  ;;  %628 = vst [vmem:[%s825_s1 + $0x48] sm:$0xff] %v588_v0  }
  0xa3   :  { %v293_v49 = vld [vmem:[#allocation0 + $0x30] sm:$0xff]  ;;  %v307_v50 = vld [vmem:[#allocation0 + $0x40] sm:$0xff]  ;;  %v553_v51 = vpack.c.bf16 %v286_v30, %v279_v48  ;;  %544 = vst [vmem:[%s825_s1] sm:$0xff] %v543_v46  }
  0xa4   :  { %v558_v52 = vpack.c.bf16 %v300_v31, %v293_v49  ;;  %v563_v53 = vpack.c.bf16 %v314_v35, %v307_v50  ;;  %v321_v54 = vld [vmem:[#allocation0 + $0x50] sm:$0xff]  ;;  %v335_v55 = vld [vmem:[#allocation0 + $0x60] sm:$0xff]  ;;  %620 = vst [vmem:[%s825_s1 + $0x8] sm:$0xff] %v548_v47  }
  0xa5   :  { %v349_v56 = vld [vmem:[#allocation0 + $0x70] sm:$0xff]  ;;  %v568_v57 = vpack.c.bf16 %v328_v36, %v321_v54  ;;  %v573_v58 = vpack.c.bf16 %v342_v37, %v335_v55  ;;  %v391_v62 = vld [vmem:[#allocation0 + $0xa0] sm:$0xff]  ;;  %621 = vst [vmem:[%s825_s1 + $0x10] sm:$0xff] %v553_v51  }
  0xa6   :  { %v578_v59 = vpack.c.bf16 %v356_v41, %v349_v56  ;;  %622 = vst [vmem:[%s825_s1 + $0x18] sm:$0xff] %v558_v52   ;;  %623 = vst [vmem:[%s825_s1 + $0x20] sm:$0xff] %v563_v53   ;;  %v593_v1 = vpack.c.bf16 %v398_v34, %v391_v62  ;;  %v405_v2 = vld [vmem:[#allocation0 + $0xb0] sm:$0xff]  ;;  %v419_v3 = vld [vmem:[#allocation0 + $0xc0] sm:$0xff] }
  0xa7   :  { %v433_v4 = vld [vmem:[#allocation0 + $0xd0] sm:$0xff]  ;;  %624 = vst [vmem:[%s825_s1 + $0x28] sm:$0xff] %v568_v57   ;;  %625 = vst [vmem:[%s825_s1 + $0x30] sm:$0xff] %v573_v58   ;;  %v598_v5 = vpack.c.bf16 %v412_v38, %v405_v2  ;;  %v603_v6 = vpack.c.bf16 %v426_v39, %v419_v3  ;;  %v447_v8 = vld [vmem:[#allocation0 + $0xe0] sm:$0xff] }
  0xa8   :  { %626 = vst [vmem:[%s825_s1 + $0x38] sm:$0xff] %v578_v59   ;;  %v608_v7 = vpack.c.bf16 %v440_v40, %v433_v4  ;;  %v461_v9 = vld [vmem:[#allocation0 + $0xf0] sm:$0xff]  ;;  %629 = vst [vmem:[%s825_s1 + $0x50] sm:$0xff] %v593_v1   ;;  %v613_v10 = vpack.c.bf16 %v454_v44, %v447_v8 }
  0xa9   :  { %v618_v11 = vpack.c.bf16 %v468_v45, %v461_v9  ;;  %630 = vst [vmem:[%s825_s1 + $0x58] sm:$0xff] %v598_v5   ;;  %631 = vst [vmem:[%s825_s1 + $0x60] sm:$0xff] %v603_v6  }
  0xaa   :  { %632 = vst [vmem:[%s825_s1 + $0x68] sm:$0xff] %v608_v7   ;;  %633 = vst [vmem:[%s825_s1 + $0x70] sm:$0xff] %v613_v10  }
  0xab   :  { %634 = vst [vmem:[%s825_s1 + $0x78] sm:$0xff] %v618_v11  }

// kernel: _lambda_.30
= control target key start
LH: loop header
LB: loop body
LE: loop exit
PB: predicated region body
PF: predicated region fallthrough
CT: control target
= control target key end

     0   :  { %s942_s18 = smov 0   ;;  %s1180_s0 = inlined_call_operand.vmem [shape: bf16[512,32], index: 0, kind: input, shape index: {}]   ;;  %s1181_s1 = inlined_call_operand.vmem [shape: bf16[32,32], index: 1, kind: input, shape index: {}]   ;;  %s1182_s2 = inlined_call_operand.vmem [shape: f32[1,32], index: 2, kind: input, shape index: {}]   ;;  %s1183_s3 = inlined_call_operand.vmem [shape: f32[1,32], index: 3, kind: input, shape index: {}]   ;;  %s1184_s4 = inlined_call_operand.vmem [shape: f32[1,32], index: 4, kind: input, shape index: {}]   ;;  %s1185_s5 = inlined_call_operand.vmem [shape: f32[512,32], index: 5, kind: output, shape index: {}]  }
   0x1 LB: > { %s772_s19 = sadd.s32 4294967295, %s910_s18   ;;  %p776_p0 = scmp.ge.s32.totalorder %s910_s18, 1  ;;  %s910_s18 = sphi %s942_s18, %s15_s18  }
   0x2   : > { %p188_p1 = scmp.lt.s32.totalorder %s910_s18, 3 }
   0x4   : > { %p189_p2 = pnand %p776_p0, %p188_p1 }
   0x5   : > { %v886_v0 = vld [vmem:[%s1181_s1] sm:$0xff] (!%p189_p2)   ;;  %s777_s22 = sshll.u32 (!%p189_p2), %s772_s19, 5  ;;  %v887_v1 = vld [vmem:[%s1181_s1 + $0x8] sm:$0xff] (!%p189_p2)   ;;  %vm364_vm0 = vcmask (!%p189_p2), 261120  }
   0x6   : > { %192 = sbr.rel (%p189_p2) target bundleno = 267 (0x10b), region = 40  ;;  %p217_p3 = scmp.lt.s32.totalorder (!%p189_p2), %s777_s22, 63  ;;  %838 = vmatprep.subr.bf16.mxu0 (!%p189_p2), %v886_v0  ;;  %874 = vmatprep.subr.bf16.mxu1 (!%p189_p2), %v886_v0  ;;  %v999_v18 = vld [vmem:[%s1182_s2] ss:$0 sm:$0xff] (!%p189_p2) }
   0x7   : > { %839 = vmatpush3.bf16.msra.mxu0 (!%p189_p2), %v886_v0  ;;  %876 = vmatpush3.bf16.msra.mxu1 (!%p189_p2), %v886_v0  ;;  %v1005_v23 = vld [vmem:[%s1183_s3] ss:$0 sm:$0xff] (!%p189_p2) }
   0x8   : > { %840 = vmatprep.subr.bf16.mxu0 (!%p189_p2), %v887_v1  ;;  %875 = vmatprep.subr.bf16.mxu1 (!%p189_p2), %v887_v1  ;;  %v1015_v33 = vld [vmem:[%s1184_s4] ss:$0 sm:$0xff] (!%p189_p2) }
   0xb   : > { %841 = vmatpush3.bf16.msra.mxu0 (!%p189_p2), %v887_v1  ;;  %877 = vmatpush3.bf16.msra.mxu1 (!%p189_p2), %v887_v1 }
   0xd   : > { %s1187_s22 = smov (!%p217_p3, %s777_s22), 63 }
   0xe   : > { %s778_s25 = sshll.u32 %s1187_s22, 2  ;;  %s780_s8 = sshll.u32 %s1187_s22, 3 }
   0xf   : > { %s962_s28 = scalar_lea.vmem %s1180_s0, %s778_s25  ;;  %s1024_s13 = scalar_lea.vmem %s1185_s5, %s780_s8 }
  0x10   : > { %v888_v2 = vld [vmem:[%s962_s28] sm:$0xff]   ;;  %v890_v4 = vld [vmem:[%s962_s28 + $0x8] sm:$0xff]   ;;  %v892_v6 = vld [vmem:[%s962_s28 + $0x10] sm:$0xff]  }
  0x11   : > { %v889_v3 = vld [vmem:[%s962_s28 + $0x40] sm:$0xff]   ;;  %842 = vmatprep.mubr.msk.bf16.mxu0 %vm364_vm0, %v888_v2  ;;  %v891_v5 = vld [vmem:[%s962_s28 + $0x48] sm:$0xff]   ;;  %v893_v7 = vld [vmem:[%s962_s28 + $0x50] sm:$0xff]  }
  0x12   : > { %858 = vmatprep.mubr.msk.bf16.mxu1 %vm364_vm0, %v889_v3  ;;  %843 = vmatmul.mubr.msk.bf16.vlgmr.msra.gmra.mrb[0].mxu0 %vm364_vm0, %v890_v4  ;;  %v894_v8 = vld [vmem:[%s962_s28 + $0x18] sm:$0xff]   ;;  %v896_v10 = vld [vmem:[%s962_s28 + $0x20] sm:$0xff]   ;;  %v898_v12 = vld [vmem:[%s962_s28 + $0x28] sm:$0xff]  }
  0x13   : > { %859 = vmatmul.mubr.msk.bf16.vlgmr.msra.gmra.mrb[0].mxu1 %vm364_vm0, %v891_v5  ;;  %846 = vmatprep.mubr.msk.bf16.mxu0 %vm364_vm0, %v892_v6  ;;  %v895_v9 = vld [vmem:[%s962_s28 + $0x58] sm:$0xff]   ;;  %v897_v11 = vld [vmem:[%s962_s28 + $0x60] sm:$0xff]   ;;  %v899_v13 = vld [vmem:[%s962_s28 + $0x68] sm:$0xff]  }
  0x14   : > { %862 = vmatprep.mubr.msk.bf16.mxu1 %vm364_vm0, %v893_v7  ;;  %v900_v14 = vld [vmem:[%s962_s28 + $0x30] sm:$0xff]   ;;  %v902_v16 = vld [vmem:[%s962_s28 + $0x38] sm:$0xff]  }
  0x15   : > { %v901_v15 = vld [vmem:[%s962_s28 + $0x70] sm:$0xff]   ;;  %v903_v17 = vld [vmem:[%s962_s28 + $0x78] sm:$0xff]  }
  0x1a   : > { %847 = vmatmul.mubr.msk.bf16.gmra.mrb[4].mxu0 %vm364_vm0, %v894_v8 }
  0x1b   : > { %863 = vmatmul.mubr.msk.bf16.gmra.mrb[4].mxu1 %vm364_vm0, %v895_v9  ;;  %850 = vmatprep.mubr.msk.bf16.mxu0 %vm364_vm0, %v896_v10 }
  0x1c   : > { %866 = vmatprep.mubr.msk.bf16.mxu1 %vm364_vm0, %v897_v11 }
  0x22   : > { %851 = vmatmul.mubr.msk.bf16.gmra.mrb[8].mxu0 %vm364_vm0, %v898_v12 }
  0x23   : > { %867 = vmatmul.mubr.msk.bf16.gmra.mrb[8].mxu1 %vm364_vm0, %v899_v13  ;;  %854 = vmatprep.mubr.msk.bf16.mxu0 %vm364_vm0, %v900_v14 }
  0x24   : > { %870 = vmatprep.mubr.msk.bf16.mxu1 %vm364_vm0, %v901_v15 }
  0x2a   : > { %855 = vmatmul.mubr.msk.bf16.gmra.mrb[12].mxu0 %vm364_vm0, %v902_v16 }
  0x2b   : > { %871 = vmatmul.mubr.msk.bf16.gmra.mrb[12].mxu1 %vm364_vm0, %v903_v17 }
  0xe5   : > { %v844_v19 = vpop.f32.mrb[0].mxu0 }
  0xe6   : > { %v456_v20 = vadd.f32 %v844_v19, %v999_v18  ;;  %v860_v21 = vpop.f32.mrb[0].mxu1  ;;  %v447_v22 = vpop.f32.mrb[1].mxu0 }
  0xe7   : > { %v520_v24 = vadd.f32 %v860_v21, %v999_v18  ;;  %v448_v25 = vadd.f32 %v999_v18, %v447_v22  ;;  %v511_v26 = vpop.f32.mrb[1].mxu1  ;;  %v845_v27 = vpop.f32.mrb[2].mxu0 }
  0xe8   : > { %v576_v28 = vmax.f32 %v456_v20, 0.0  ;;  %v512_v29 = vadd.f32 %v999_v18, %v511_v26  ;;  %v459_v30 = vadd.f32 %v845_v27, %v999_v18  ;;  %v861_v31 = vpop.f32.mrb[2].mxu1  ;;  %v450_v32 = vpop.f32.mrb[3].mxu0 }
  0xe9   : > { %v592_v34 = vmax.f32 %v520_v24, 0.0  ;;  %v574_v35 = vmax.f32 %v448_v25, 0.0  ;;  %v523_v36 = vadd.f32 %v861_v31, %v999_v18  ;;  %v451_v37 = vadd.f32 %v999_v18, %v450_v32  ;;  %v514_v38 = vpop.f32.mrb[3].mxu1 }
  0xea   : > { %v615_v39 = vmul.f32 %v1005_v23, %v576_v28  ;;  %v590_v40 = vmax.f32 %v512_v29, 0.0  ;;  %v577_v41 = vmax.f32 %v459_v30, 0.0  ;;  %v515_v42 = vadd.f32 %v999_v18, %v514_v38 }
  0xeb   : > { %v631_v43 = vmul.f32 %v1005_v23, %v592_v34  ;;  %v613_v44 = vmul.f32 %v1005_v23, %v574_v35  ;;  %v593_v45 = vmax.f32 %v523_v36, 0.0  ;;  %v575_v46 = vmax.f32 %v451_v37, 0.0 }
  0xec   : > { %v654_v47 = vadd.f32 %v1015_v33, %v615_v39  ;;  %v629_v48 = vmul.f32 %v1005_v23, %v590_v40  ;;  %v616_v49 = vmul.f32 %v1005_v23, %v577_v41  ;;  %v591_v50 = vmax.f32 %v515_v42, 0.0 }
  0xed   : > { %v670_v51 = vadd.f32 %v1015_v33, %v631_v43  ;;  %v652_v52 = vadd.f32 %v1015_v33, %v613_v44  ;;  %v632_v53 = vmul.f32 %v1005_v23, %v593_v45  ;;  %v614_v54 = vmul.f32 %v1005_v23, %v575_v46  ;;  %v848_v55 = vpop.f32.mrb[4].mxu0 }
  0xee   : > { %686 = vst.msk [vmem:[%s1024_s13 + $0x10] sm:$0xff] %vm364_vm0, %v654_v47  ;;  %v668_v56 = vadd.f32 %v1015_v33, %v629_v48  ;;  %v655_v57 = vadd.f32 %v1015_v33, %v616_v49  ;;  %v630_v58 = vmul.f32 %v1005_v23, %v591_v50  ;;  %v472_v59 = vadd.f32 %v848_v55, %v999_v18  ;;  %v864_v60 = vpop.f32.mrb[4].mxu1  ;;  %v463_v61 = vpop.f32.mrb[5].mxu0 }
  0xef   : > { %702 = vst.msk [vmem:[%s1024_s13 + $0x90] sm:$0xff] %vm364_vm0, %v670_v51  ;;  %684 = vst.msk [vmem:[%s1024_s13] sm:$0xff] %vm364_vm0, %v652_v52  ;;  %v671_v62 = vadd.f32 %v1015_v33, %v632_v53  ;;  %v653_v63 = vadd.f32 %v1015_v33, %v614_v54  ;;  %v536_v0 = vadd.f32 %v864_v60, %v999_v18  ;;  %v527_v2 = vpop.f32.mrb[5].mxu1  ;;  %v849_v3 = vpop.f32.mrb[6].mxu0 }
  0xf0   : > { %v464_v1 = vadd.f32 %v999_v18, %v463_v61  ;;  %700 = vst.msk [vmem:[%s1024_s13 + $0x80] sm:$0xff] %vm364_vm0, %v668_v56  ;;  %687 = vst.msk [vmem:[%s1024_s13 + $0x18] sm:$0xff] %vm364_vm0, %v655_v57  ;;  %v669_v4 = vadd.f32 %v1015_v33, %v630_v58  ;;  %v580_v5 = vmax.f32 %v472_v59, 0.0  ;;  %v528_v6 = vadd.f32 %v999_v18, %v527_v2  ;;  %v865_v8 = vpop.f32.mrb[6].mxu1  ;;  %v466_v9 = vpop.f32.mrb[7].mxu0 }
  0xf1   : > { %v475_v7 = vadd.f32 %v849_v3, %v999_v18  ;;  %703 = vst.msk [vmem:[%s1024_s13 + $0x98] sm:$0xff] %vm364_vm0, %v671_v62  ;;  %685 = vst.msk [vmem:[%s1024_s13 + $0x8] sm:$0xff] %vm364_vm0, %v653_v63  ;;  %v596_v10 = vmax.f32 %v536_v0, 0.0  ;;  %v539_v12 = vadd.f32 %v865_v8, %v999_v18  ;;  %v467_v13 = vadd.f32 %v999_v18, %v466_v9  ;;  %v530_v14 = vpop.f32.mrb[7].mxu1 }
  0xf2   : > { %v578_v11 = vmax.f32 %v464_v1, 0.0  ;;  %701 = vst.msk [vmem:[%s1024_s13 + $0x88] sm:$0xff] %vm364_vm0, %v669_v4  ;;  %v619_v15 = vmul.f32 %v1005_v23, %v580_v5  ;;  %v594_v16 = vmax.f32 %v528_v6, 0.0  ;;  %v531_v19 = vadd.f32 %v999_v18, %v530_v14 }
  0xf3   : > { %v581_v17 = vmax.f32 %v475_v7, 0.0  ;;  %v635_v20 = vmul.f32 %v1005_v23, %v596_v10  ;;  %v597_v22 = vmax.f32 %v539_v12, 0.0  ;;  %v579_v24 = vmax.f32 %v467_v13, 0.0 }
  0xf4   : > { %v617_v21 = vmul.f32 %v1005_v23, %v578_v11  ;;  %v658_v25 = vadd.f32 %v1015_v33, %v619_v15  ;;  %v633_v26 = vmul.f32 %v1005_v23, %v594_v16  ;;  %v595_v28 = vmax.f32 %v531_v19, 0.0 }
  0xf5   : > { %v620_v27 = vmul.f32 %v1005_v23, %v581_v17  ;;  %v674_v29 = vadd.f32 %v1015_v33, %v635_v20  ;;  %v636_v31 = vmul.f32 %v1005_v23, %v597_v22  ;;  %v618_v32 = vmul.f32 %v1005_v23, %v579_v24  ;;  %v852_v34 = vpop.f32.mrb[8].mxu0 }
  0xf6   : > { %v656_v30 = vadd.f32 %v1015_v33, %v617_v21  ;;  %690 = vst.msk [vmem:[%s1024_s13 + $0x30] sm:$0xff] %vm364_vm0, %v658_v25  ;;  %v672_v35 = vadd.f32 %v1015_v33, %v633_v26  ;;  %v634_v37 = vmul.f32 %v1005_v23, %v595_v28  ;;  %v488_v38 = vadd.f32 %v852_v34, %v999_v18  ;;  %v868_v39 = vpop.f32.mrb[8].mxu1  ;;  %v479_v40 = vpop.f32.mrb[9].mxu0 }
  0xf7   : > { %v659_v36 = vadd.f32 %v1015_v33, %v620_v27  ;;  %706 = vst.msk [vmem:[%s1024_s13 + $0xb0] sm:$0xff] %vm364_vm0, %v674_v29  ;;  %v675_v41 = vadd.f32 %v1015_v33, %v636_v31  ;;  %v657_v42 = vadd.f32 %v1015_v33, %v618_v32  ;;  %v552_v43 = vadd.f32 %v868_v39, %v999_v18  ;;  %v543_v45 = vpop.f32.mrb[9].mxu1  ;;  %v853_v46 = vpop.f32.mrb[10].mxu0 }
  0xf8   : > { %688 = vst.msk [vmem:[%s1024_s13 + $0x20] sm:$0xff] %vm364_vm0, %v656_v30  ;;  %v480_v44 = vadd.f32 %v999_v18, %v479_v40  ;;  %704 = vst.msk [vmem:[%s1024_s13 + $0xa0] sm:$0xff] %vm364_vm0, %v672_v35  ;;  %v673_v47 = vadd.f32 %v1015_v33, %v634_v37  ;;  %v584_v48 = vmax.f32 %v488_v38, 0.0  ;;  %v544_v49 = vadd.f32 %v999_v18, %v543_v45  ;;  %v869_v51 = vpop.f32.mrb[10].mxu1  ;;  %v482_v52 = vpop.f32.mrb[11].mxu0 }
  0xf9   : > { %691 = vst.msk [vmem:[%s1024_s13 + $0x38] sm:$0xff] %vm364_vm0, %v659_v36  ;;  %v491_v50 = vadd.f32 %v853_v46, %v999_v18  ;;  %707 = vst.msk [vmem:[%s1024_s13 + $0xb8] sm:$0xff] %vm364_vm0, %v675_v41  ;;  %v600_v53 = vmax.f32 %v552_v43, 0.0  ;;  %v555_v55 = vadd.f32 %v869_v51, %v999_v18  ;;  %v483_v56 = vadd.f32 %v999_v18, %v482_v52  ;;  %v546_v57 = vpop.f32.mrb[11].mxu1 }
  0xfa   : > { %689 = vst.msk [vmem:[%s1024_s13 + $0x28] sm:$0xff] %vm364_vm0, %v657_v42  ;;  %v582_v54 = vmax.f32 %v480_v44, 0.0  ;;  %705 = vst.msk [vmem:[%s1024_s13 + $0xa8] sm:$0xff] %vm364_vm0, %v673_v47  ;;  %v623_v58 = vmul.f32 %v1005_v23, %v584_v48  ;;  %v598_v59 = vmax.f32 %v544_v49, 0.0  ;;  %v547_v61 = vadd.f32 %v999_v18, %v546_v57 }
  0xfb   : > { %v585_v60 = vmax.f32 %v491_v50, 0.0  ;;  %v639_v62 = vmul.f32 %v1005_v23, %v600_v53  ;;  %v601_v0 = vmax.f32 %v555_v55, 0.0  ;;  %v583_v1 = vmax.f32 %v483_v56, 0.0 }
  0xfc   : > { %v621_v63 = vmul.f32 %v1005_v23, %v582_v54  ;;  %v662_v2 = vadd.f32 %v1015_v33, %v623_v58  ;;  %v637_v3 = vmul.f32 %v1005_v23, %v598_v59  ;;  %v599_v5 = vmax.f32 %v547_v61, 0.0 }
  0xfd   : > { %v624_v4 = vmul.f32 %v1005_v23, %v585_v60  ;;  %v678_v6 = vadd.f32 %v1015_v33, %v639_v62  ;;  %v640_v8 = vmul.f32 %v1005_v23, %v601_v0  ;;  %v622_v9 = vmul.f32 %v1005_v23, %v583_v1  ;;  %v856_v10 = vpop.f32.mrb[12].mxu0 }
  0xfe   : > { %v660_v7 = vadd.f32 %v1015_v33, %v621_v63  ;;  %694 = vst.msk [vmem:[%s1024_s13 + $0x50] sm:$0xff] %vm364_vm0, %v662_v2  ;;  %v676_v11 = vadd.f32 %v1015_v33, %v637_v3  ;;  %v638_v13 = vmul.f32 %v1005_v23, %v599_v5  ;;  %v504_v14 = vadd.f32 %v856_v10, %v999_v18  ;;  %v872_v15 = vpop.f32.mrb[12].mxu1  ;;  %v495_v16 = vpop.f32.mrb[13].mxu0 }
  0xff   : > { %v663_v12 = vadd.f32 %v1015_v33, %v624_v4  ;;  %710 = vst.msk [vmem:[%s1024_s13 + $0xd0] sm:$0xff] %vm364_vm0, %v678_v6  ;;  %v679_v17 = vadd.f32 %v1015_v33, %v640_v8  ;;  %v661_v19 = vadd.f32 %v1015_v33, %v622_v9  ;;  %v568_v20 = vadd.f32 %v872_v15, %v999_v18  ;;  %v559_v22 = vpop.f32.mrb[13].mxu1  ;;  %v857_v24 = vpop.f32.mrb[14].mxu0 }
 0x100   : > { %692 = vst.msk [vmem:[%s1024_s13 + $0x40] sm:$0xff] %vm364_vm0, %v660_v7  ;;  %v496_v21 = vadd.f32 %v999_v18, %v495_v16  ;;  %708 = vst.msk [vmem:[%s1024_s13 + $0xc0] sm:$0xff] %vm364_vm0, %v676_v11  ;;  %v677_v25 = vadd.f32 %v1015_v33, %v638_v13  ;;  %v588_v26 = vmax.f32 %v504_v14, 0.0  ;;  %v560_v27 = vadd.f32 %v999_v18, %v559_v22  ;;  %v873_v29 = vpop.f32.mrb[14].mxu1  ;;  %v498_v30 = vpop.f32.mrb[15].mxu0 }
 0x101   : > { %695 = vst.msk [vmem:[%s1024_s13 + $0x58] sm:$0xff] %vm364_vm0, %v663_v12  ;;  %v507_v28 = vadd.f32 %v857_v24, %v999_v18  ;;  %711 = vst.msk [vmem:[%s1024_s13 + $0xd8] sm:$0xff] %vm364_vm0, %v679_v17  ;;  %v604_v31 = vmax.f32 %v568_v20, 0.0  ;;  %v571_v34 = vadd.f32 %v873_v29, %v999_v18  ;;  %v499_v35 = vadd.f32 %v999_v18, %v498_v30  ;;  %v562_v36 = vpop.f32.mrb[15].mxu1 }
 0x102   : > { %693 = vst.msk [vmem:[%s1024_s13 + $0x48] sm:$0xff] %vm364_vm0, %v661_v19  ;;  %v586_v32 = vmax.f32 %v496_v21, 0.0  ;;  %709 = vst.msk [vmem:[%s1024_s13 + $0xc8] sm:$0xff] %vm364_vm0, %v677_v25  ;;  %v627_v37 = vmul.f32 %v1005_v23, %v588_v26  ;;  %v602_v38 = vmax.f32 %v560_v27, 0.0  ;;  %v563_v40 = vadd.f32 %v999_v18, %v562_v36 }
 0x103   : > { %v589_v39 = vmax.f32 %v507_v28, 0.0  ;;  %v643_v41 = vmul.f32 %v1005_v23, %v604_v31  ;;  %v605_v43 = vmax.f32 %v571_v34, 0.0  ;;  %v587_v44 = vmax.f32 %v499_v35, 0.0 }
 0x104   : > { %v625_v42 = vmul.f32 %v1005_v23, %v586_v32  ;;  %v666_v45 = vadd.f32 %v1015_v33, %v627_v37  ;;  %v641_v46 = vmul.f32 %v1005_v23, %v602_v38  ;;  %v603_v48 = vmax.f32 %v563_v40, 0.0 }
 0x105   : > { %v628_v47 = vmul.f32 %v1005_v23, %v589_v39  ;;  %v682_v18 = vadd.f32 %v1015_v33, %v643_v41  ;;  %v644_v50 = vmul.f32 %v1005_v23, %v605_v43  ;;  %v626_v51 = vmul.f32 %v1005_v23, %v587_v44 }
 0x106   : > { %v664_v49 = vadd.f32 %v1015_v33, %v625_v42  ;;  %698 = vst.msk [vmem:[%s1024_s13 + $0x70] sm:$0xff] %vm364_vm0, %v666_v45  ;;  %v680_v52 = vadd.f32 %v1015_v33, %v641_v46  ;;  %v642_v54 = vmul.f32 %v1005_v23, %v603_v48 }
 0x107   : > { %v667_v53 = vadd.f32 %v1015_v33, %v628_v47  ;;  %714 = vst.msk [vmem:[%s1024_s13 + $0xf0] sm:$0xff] %vm364_vm0, %v682_v18  ;;  %v683_v55 = vadd.f32 %v1015_v33, %v644_v50  ;;  %v665_v56 = vadd.f32 %v1015_v33, %v626_v51 }
 0x108   : > { %696 = vst.msk [vmem:[%s1024_s13 + $0x60] sm:$0xff] %vm364_vm0, %v664_v49  ;;  %712 = vst.msk [vmem:[%s1024_s13 + $0xe0] sm:$0xff] %vm364_vm0, %v680_v52  ;;  %v681_v57 = vadd.f32 %v1015_v33, %v642_v54 }
 0x109   : > { %699 = vst.msk [vmem:[%s1024_s13 + $0x78] sm:$0xff] %vm364_vm0, %v667_v53  ;;  %715 = vst.msk [vmem:[%s1024_s13 + $0xf8] sm:$0xff] %vm364_vm0, %v683_v55 }
 0x10a   : > { %697 = vst.msk [vmem:[%s1024_s13 + $0x68] sm:$0xff] %vm364_vm0, %v665_v56  ;;  %713 = vst.msk [vmem:[%s1024_s13 + $0xe8] sm:$0xff] %vm364_vm0, %v681_v57 }
 0x10b PF: > { %s15_s18 = sadd.s32 1, %s910_s18  }
 0x10c   : > { %p12_p4 = scmp.ge.s32.totalorder %s15_s18, 4  }
 0x10e   :  { %14 = sbr.rel (!%p12_p4) target bundleno = 1 (0x1), region = 70 }

// kernel: _lambda_.31
= control target key start
LH: loop header
LB: loop body
LE: loop exit
PB: predicated region body
PF: predicated region fallthrough
CT: control target
= control target key end

     0   :  { %s2354_s18 = smov 0   ;;  %s3183_s0 = inlined_call_operand.vmem [shape: bf16[2048,32], index: 0, kind: input, shape index: {}]   ;;  %s3184_s1 = inlined_call_operand.vmem [shape: bf16[32,8], index: 1, kind: input, shape index: {}]   ;;  %s3185_s2 = inlined_call_operand.vmem [shape: f32[1,8], index: 2, kind: input, shape index: {}]   ;;  %s3186_s3 = inlined_call_operand.vmem [shape: f32[1,8], index: 3, kind: input, shape index: {}]   ;;  %s3187_s4 = inlined_call_operand.vmem [shape: f32[1,8], index: 4, kind: input, shape index: {}]   ;;  %s3188_s5 = inlined_call_operand.vmem [shape: f32[2048,8], index: 5, kind: output, shape index: {}]  }
   0x1 LB: > { %s1893_s19 = sadd.s32 4294967295, %s2322_s18   ;;  %p1897_p0 = scmp.ge.s32.totalorder %s2322_s18, 1  ;;  %s2322_s18 = sphi %s2354_s18, %s15_s18  }
   0x2   : > { %p188_p1 = scmp.lt.s32.totalorder %s2322_s18, 3 }
   0x4   : > { %p189_p2 = pnand %p1897_p0, %p188_p1 }
   0x5   : > { %v2247_v0 = vld [vmem:[%s3184_s1] sm:$0xff] (!%p189_p2)   ;;  %s1898_s22 = sshll.u32 (!%p189_p2), %s1893_s19, 7  ;;  %v2248_v1 = vld [vmem:[%s3184_s1 + $0x8] sm:$0xff] (!%p189_p2)   ;;  %vm700_vm0 = vcmask (!%p189_p2), 261120   ;;  %vm1708_vm1 = vcmask (!%p189_p2), 64512  }
   0x6   : > { %192 = sbr.rel (%p189_p2) target bundleno = 361 (0x169), region = 40  ;;  %p217_p3 = scmp.lt.s32.totalorder (!%p189_p2), %s1898_s22, 255  ;;  %2103 = vmatprep.subr.bf16.mxu0 (!%p189_p2), %v2247_v0  ;;  %2235 = vmatprep.subr.bf16.mxu1 (!%p189_p2), %v2247_v0 }
   0x7   : > { %2104 = vmatpush3.bf16.msra.mxu0 (!%p189_p2), %v2247_v0  ;;  %2237 = vmatpush3.bf16.msra.mxu1 (!%p189_p2), %v2247_v0 }
   0x8   : > { %2105 = vmatprep.subr.bf16.mxu0 (!%p189_p2), %v2248_v1  ;;  %2236 = vmatprep.subr.bf16.mxu1 (!%p189_p2), %v2248_v1 }
   0xb   : > { %2106 = vmatpush3.bf16.msra.mxu0 (!%p189_p2), %v2248_v1  ;;  %2238 = vmatpush3.bf16.msra.mxu1 (!%p189_p2), %v2248_v1 }
   0xd   : > { %s3190_s22 = smov (!%p217_p3, %s1898_s22), 255 }
   0xe   : > { %s1899_s25 = sshll.u32 %s3190_s22, 2  ;;  %s1901_s8 = sshll.u32 %s3190_s22, 3 }
   0xf   : > { %s2374_s28 = scalar_lea.vmem %s3183_s0, %s1899_s25  ;;  %s2529_s13 = scalar_lea.vmem %s3188_s5, %s1901_s8 }
  0x10   : > { %v2249_v2 = vld [vmem:[%s2374_s28] sm:$0xff]   ;;  %v2251_v4 = vld [vmem:[%s2374_s28 + $0x8] sm:$0xff]   ;;  %v2253_v6 = vld [vmem:[%s2374_s28 + $0x10] sm:$0xff]  }
  0x11   : > { %v2250_v3 = vld [vmem:[%s2374_s28 + $0x100] sm:$0xff]   ;;  %2107 = vmatprep.mubr.msk.bf16.mxu0 %vm700_vm0, %v2249_v2  ;;  %v2252_v5 = vld [vmem:[%s2374_s28 + $0x108] sm:$0xff]   ;;  %v2254_v7 = vld [vmem:[%s2374_s28 + $0x110] sm:$0xff]  }
  0x12   : > { %2171 = vmatprep.mubr.msk.bf16.mxu1 %vm700_vm0, %v2250_v3  ;;  %2108 = vmatmul.mubr.msk.bf16.vlgmr.msra.gmra.mrb[0].mxu0 %vm700_vm0, %v2251_v4  ;;  %v2255_v8 = vld [vmem:[%s2374_s28 + $0x18] sm:$0xff]   ;;  %v2257_v10 = vld [vmem:[%s2374_s28 + $0x20] sm:$0xff]   ;;  %v2259_v12 = vld [vmem:[%s2374_s28 + $0x28] sm:$0xff]  }
  0x13   : > { %2172 = vmatmul.mubr.msk.bf16.vlgmr.msra.gmra.mrb[0].mxu1 %vm700_vm0, %v2252_v5  ;;  %2111 = vmatprep.mubr.msk.bf16.mxu0 %vm700_vm0, %v2253_v6  ;;  %v2256_v9 = vld [vmem:[%s2374_s28 + $0x118] sm:$0xff]   ;;  %v2258_v11 = vld [vmem:[%s2374_s28 + $0x120] sm:$0xff]   ;;  %v2260_v13 = vld [vmem:[%s2374_s28 + $0x128] sm:$0xff]  }
  0x14   : > { %2175 = vmatprep.mubr.msk.bf16.mxu1 %vm700_vm0, %v2254_v7  ;;  %v2261_v14 = vld [vmem:[%s2374_s28 + $0x30] sm:$0xff]   ;;  %v2263_v16 = vld [vmem:[%s2374_s28 + $0x38] sm:$0xff]   ;;  %v2265_v18 = vld [vmem:[%s2374_s28 + $0x40] sm:$0xff]  }
  0x15   : > { %v2262_v15 = vld [vmem:[%s2374_s28 + $0x130] sm:$0xff]   ;;  %v2264_v17 = vld [vmem:[%s2374_s28 + $0x138] sm:$0xff]   ;;  %v2266_v19 = vld [vmem:[%s2374_s28 + $0x140] sm:$0xff]  }
  0x16   : > { %v2267_v20 = vld [vmem:[%s2374_s28 + $0x48] sm:$0xff]   ;;  %v2269_v22 = vld [vmem:[%s2374_s28 + $0x50] sm:$0xff]   ;;  %v2271_v24 = vld [vmem:[%s2374_s28 + $0x58] sm:$0xff]  }
  0x17   : > { %v2268_v21 = vld [vmem:[%s2374_s28 + $0x148] sm:$0xff]   ;;  %v2270_v23 = vld [vmem:[%s2374_s28 + $0x150] sm:$0xff]   ;;  %v2272_v25 = vld [vmem:[%s2374_s28 + $0x158] sm:$0xff]  }
  0x18   : > { %v2273_v26 = vld [vmem:[%s2374_s28 + $0x60] sm:$0xff]   ;;  %v2275_v28 = vld [vmem:[%s2374_s28 + $0x68] sm:$0xff]   ;;  %v2277_v30 = vld [vmem:[%s2374_s28 + $0x70] sm:$0xff]  }
  0x19   : > { %v2274_v27 = vld [vmem:[%s2374_s28 + $0x160] sm:$0xff]   ;;  %v2276_v29 = vld [vmem:[%s2374_s28 + $0x168] sm:$0xff]   ;;  %v2278_v31 = vld [vmem:[%s2374_s28 + $0x170] sm:$0xff]  }
  0x1a   : > { %2112 = vmatmul.mubr.msk.bf16.gmra.mrb[4].mxu0 %vm700_vm0, %v2255_v8  ;;  %v2279_v32 = vld [vmem:[%s2374_s28 + $0x78] sm:$0xff]   ;;  %v2281_v34 = vld [vmem:[%s2374_s28 + $0x80] sm:$0xff]   ;;  %v2283_v36 = vld [vmem:[%s2374_s28 + $0x88] sm:$0xff]  }
  0x1b   : > { %2176 = vmatmul.mubr.msk.bf16.gmra.mrb[4].mxu1 %vm700_vm0, %v2256_v9  ;;  %2115 = vmatprep.mubr.msk.bf16.mxu0 %vm700_vm0, %v2257_v10  ;;  %v2280_v33 = vld [vmem:[%s2374_s28 + $0x178] sm:$0xff]   ;;  %v2282_v35 = vld [vmem:[%s2374_s28 + $0x180] sm:$0xff]   ;;  %v2284_v37 = vld [vmem:[%s2374_s28 + $0x188] sm:$0xff]  }
  0x1c   : > { %2179 = vmatprep.mubr.msk.bf16.mxu1 %vm700_vm0, %v2258_v11  ;;  %v2285_v38 = vld [vmem:[%s2374_s28 + $0x90] sm:$0xff]   ;;  %v2287_v40 = vld [vmem:[%s2374_s28 + $0x98] sm:$0xff]   ;;  %v2289_v42 = vld [vmem:[%s2374_s28 + $0xa0] sm:$0xff]  }
  0x1d   : > { %v2286_v39 = vld [vmem:[%s2374_s28 + $0x190] sm:$0xff]   ;;  %v2288_v41 = vld [vmem:[%s2374_s28 + $0x198] sm:$0xff]   ;;  %v2290_v43 = vld [vmem:[%s2374_s28 + $0x1a0] sm:$0xff]  }
  0x1e   : > { %v2291_v44 = vld [vmem:[%s2374_s28 + $0xa8] sm:$0xff]   ;;  %v2293_v46 = vld [vmem:[%s2374_s28 + $0xb0] sm:$0xff]   ;;  %v2295_v48 = vld [vmem:[%s2374_s28 + $0xb8] sm:$0xff]  }
  0x1f   : > { %v2292_v45 = vld [vmem:[%s2374_s28 + $0x1a8] sm:$0xff]   ;;  %v2294_v47 = vld [vmem:[%s2374_s28 + $0x1b0] sm:$0xff]   ;;  %v2296_v49 = vld [vmem:[%s2374_s28 + $0x1b8] sm:$0xff]  }
  0x20   : > { %v2297_v50 = vld [vmem:[%s2374_s28 + $0xc0] sm:$0xff]   ;;  %v2299_v52 = vld [vmem:[%s2374_s28 + $0xc8] sm:$0xff]   ;;  %v2301_v54 = vld [vmem:[%s2374_s28 + $0xd0] sm:$0xff]  }
  0x21   : > { %v2298_v51 = vld [vmem:[%s2374_s28 + $0x1c0] sm:$0xff]   ;;  %v2300_v53 = vld [vmem:[%s2374_s28 + $0x1c8] sm:$0xff]   ;;  %v2302_v55 = vld [vmem:[%s2374_s28 + $0x1d0] sm:$0xff]  }
  0x22   : > { %2116 = vmatmul.mubr.msk.bf16.gmra.mrb[8].mxu0 %vm700_vm0, %v2259_v12  ;;  %v2303_v56 = vld [vmem:[%s2374_s28 + $0xd8] sm:$0xff]   ;;  %v2305_v58 = vld [vmem:[%s2374_s28 + $0xe0] sm:$0xff]   ;;  %v2307_v60 = vld [vmem:[%s2374_s28 + $0xe8] sm:$0xff]  }
  0x23   : > { %2180 = vmatmul.mubr.msk.bf16.gmra.mrb[8].mxu1 %vm700_vm0, %v2260_v13  ;;  %2119 = vmatprep.mubr.msk.bf16.mxu0 %vm700_vm0, %v2261_v14  ;;  %v2304_v57 = vld [vmem:[%s2374_s28 + $0x1d8] sm:$0xff]   ;;  %v2306_v59 = vld [vmem:[%s2374_s28 + $0x1e0] sm:$0xff]   ;;  %v2308_v61 = vld [vmem:[%s2374_s28 + $0x1e8] sm:$0xff]  }
  0x24   : > { %2183 = vmatprep.mubr.msk.bf16.mxu1 %vm700_vm0, %v2262_v15  ;;  %v2309_v62 = vld [vmem:[%s2374_s28 + $0xf0] sm:$0xff]   ;;  %v2311_v0 = vld [vmem:[%s2374_s28 + $0xf8] sm:$0xff]   ;;  %v2507_v2 = vld [vmem:[%s3185_s2] ss:$0 sm:$0xff] }
  0x25   : > { %v2310_v63 = vld [vmem:[%s2374_s28 + $0x1f0] sm:$0xff]   ;;  %v2312_v1 = vld [vmem:[%s2374_s28 + $0x1f8] sm:$0xff]   ;;  %v2512_v4 = vld [vmem:[%s3186_s3] ss:$0 sm:$0xff] }
  0x26   : > { %v2519_v8 = vld [vmem:[%s3187_s4] ss:$0 sm:$0xff] }
  0x2a   : > { %2120 = vmatmul.mubr.msk.bf16.gmra.mrb[12].mxu0 %vm700_vm0, %v2263_v16 }
  0x2b   : > { %2184 = vmatmul.mubr.msk.bf16.gmra.mrb[12].mxu1 %vm700_vm0, %v2264_v17  ;;  %2123 = vmatprep.mubr.msk.bf16.mxu0 %vm700_vm0, %v2265_v18 }
  0x2c   : > { %2187 = vmatprep.mubr.msk.bf16.mxu1 %vm700_vm0, %v2266_v19 }
  0x32   : > { %2124 = vmatmul.mubr.msk.bf16.gmra.mrb[16].mxu0 %vm700_vm0, %v2267_v20 }
  0x33   : > { %2188 = vmatmul.mubr.msk.bf16.gmra.mrb[16].mxu1 %vm700_vm0, %v2268_v21  ;;  %2127 = vmatprep.mubr.msk.bf16.mxu0 %vm700_vm0, %v2269_v22 }
  0x34   : > { %2191 = vmatprep.mubr.msk.bf16.mxu1 %vm700_vm0, %v2270_v23 }
  0x3a   : > { %2128 = vmatmul.mubr.msk.bf16.gmra.mrb[20].mxu0 %vm700_vm0, %v2271_v24 }
  0x3b   : > { %2192 = vmatmul.mubr.msk.bf16.gmra.mrb[20].mxu1 %vm700_vm0, %v2272_v25  ;;  %2131 = vmatprep.mubr.msk.bf16.mxu0 %vm700_vm0, %v2273_v26 }
  0x3c   : > { %2195 = vmatprep.mubr.msk.bf16.mxu1 %vm700_vm0, %v2274_v27 }
  0x42   : > { %2132 = vmatmul.mubr.msk.bf16.gmra.mrb[24].mxu0 %vm700_vm0, %v2275_v28 }
  0x43   : > { %2196 = vmatmul.mubr.msk.bf16.gmra.mrb[24].mxu1 %vm700_vm0, %v2276_v29  ;;  %2135 = vmatprep.mubr.msk.bf16.mxu0 %vm700_vm0, %v2277_v30 }
  0x44   : > { %2199 = vmatprep.mubr.msk.bf16.mxu1 %vm700_vm0, %v2278_v31 }
  0x4a   : > { %2136 = vmatmul.mubr.msk.bf16.gmra.mrb[28].mxu0 %vm700_vm0, %v2279_v32 }
  0x4b   : > { %2200 = vmatmul.mubr.msk.bf16.gmra.mrb[28].mxu1 %vm700_vm0, %v2280_v33  ;;  %2139 = vmatprep.mubr.msk.bf16.mxu0 %vm700_vm0, %v2281_v34 }
  0x4c   : > { %2203 = vmatprep.mubr.msk.bf16.mxu1 %vm700_vm0, %v2282_v35 }
  0x52   : > { %2140 = vmatmul.mubr.msk.bf16.gmra.mrb[32].mxu0 %vm700_vm0, %v2283_v36 }
  0x53   : > { %2204 = vmatmul.mubr.msk.bf16.gmra.mrb[32].mxu1 %vm700_vm0, %v2284_v37  ;;  %2143 = vmatprep.mubr.msk.bf16.mxu0 %vm700_vm0, %v2285_v38 }
  0x54   : > { %2207 = vmatprep.mubr.msk.bf16.mxu1 %vm700_vm0, %v2286_v39 }
  0x5a   : > { %2144 = vmatmul.mubr.msk.bf16.gmra.mrb[36].mxu0 %vm700_vm0, %v2287_v40 }
  0x5b   : > { %2208 = vmatmul.mubr.msk.bf16.gmra.mrb[36].mxu1 %vm700_vm0, %v2288_v41  ;;  %2147 = vmatprep.mubr.msk.bf16.mxu0 %vm700_vm0, %v2289_v42 }
  0x5c   : > { %2211 = vmatprep.mubr.msk.bf16.mxu1 %vm700_vm0, %v2290_v43 }
  0x62   : > { %2148 = vmatmul.mubr.msk.bf16.gmra.mrb[40].mxu0 %vm700_vm0, %v2291_v44 }
  0x63   : > { %2212 = vmatmul.mubr.msk.bf16.gmra.mrb[40].mxu1 %vm700_vm0, %v2292_v45  ;;  %2151 = vmatprep.mubr.msk.bf16.mxu0 %vm700_vm0, %v2293_v46 }
  0x64   : > { %2215 = vmatprep.mubr.msk.bf16.mxu1 %vm700_vm0, %v2294_v47 }
  0x6a   : > { %2152 = vmatmul.mubr.msk.bf16.gmra.mrb[44].mxu0 %vm700_vm0, %v2295_v48 }
  0x6b   : > { %2216 = vmatmul.mubr.msk.bf16.gmra.mrb[44].mxu1 %vm700_vm0, %v2296_v49  ;;  %2155 = vmatprep.mubr.msk.bf16.mxu0 %vm700_vm0, %v2297_v50 }
  0x6c   : > { %2219 = vmatprep.mubr.msk.bf16.mxu1 %vm700_vm0, %v2298_v51 }
  0x72   : > { %2156 = vmatmul.mubr.msk.bf16.gmra.mrb[48].mxu0 %vm700_vm0, %v2299_v52 }
  0x73   : > { %2220 = vmatmul.mubr.msk.bf16.gmra.mrb[48].mxu1 %vm700_vm0, %v2300_v53  ;;  %2159 = vmatprep.mubr.msk.bf16.mxu0 %vm700_vm0, %v2301_v54 }
  0x74   : > { %2223 = vmatprep.mubr.msk.bf16.mxu1 %vm700_vm0, %v2302_v55 }
  0x7a   : > { %2160 = vmatmul.mubr.msk.bf16.gmra.mrb[52].mxu0 %vm700_vm0, %v2303_v56 }
  0x7b   : > { %2224 = vmatmul.mubr.msk.bf16.gmra.mrb[52].mxu1 %vm700_vm0, %v2304_v57  ;;  %2163 = vmatprep.mubr.msk.bf16.mxu0 %vm700_vm0, %v2305_v58 }
  0x7c   : > { %2227 = vmatprep.mubr.msk.bf16.mxu1 %vm700_vm0, %v2306_v59 }
  0x82   : > { %2164 = vmatmul.mubr.msk.bf16.gmra.mrb[56].mxu0 %vm700_vm0, %v2307_v60 }
  0x83   : > { %2228 = vmatmul.mubr.msk.bf16.gmra.mrb[56].mxu1 %vm700_vm0, %v2308_v61  ;;  %2167 = vmatprep.mubr.msk.bf16.mxu0 %vm700_vm0, %v2309_v62 }
  0x84   : > { %2231 = vmatprep.mubr.msk.bf16.mxu1 %vm700_vm0, %v2310_v63 }
  0x8a   : > { %2168 = vmatmul.mubr.msk.bf16.gmra.mrb[60].mxu0 %vm700_vm0, %v2311_v0 }
  0x8b   : > { %2232 = vmatmul.mubr.msk.bf16.gmra.mrb[60].mxu1 %vm700_vm0, %v2312_v1 }
  0xe5   : > { %v2109_v3 = vpop.f32.mrb[0].mxu0 }
  0xe6   : > { %v936_v5 = vadd.f32 %v2109_v3, %v2507_v2  ;;  %v2173_v6 = vpop.f32.mrb[0].mxu1  ;;  %v927_v7 = vpop.f32.mrb[1].mxu0 }
  0xe7   : > { %v1192_v9 = vadd.f32 %v2173_v6, %v2507_v2  ;;  %v928_v10 = vadd.f32 %v2507_v2, %v927_v7  ;;  %v1183_v11 = vpop.f32.mrb[1].mxu1  ;;  %v2110_v12 = vpop.f32.mrb[2].mxu0 }
  0xe8   : > { %v1447_v13 = vmul.f32 %v2512_v4, %v936_v5  ;;  %v1184_v14 = vadd.f32 %v2507_v2, %v1183_v11  ;;  %v939_v15 = vadd.f32 %v2110_v12, %v2507_v2  ;;  %v2174_v16 = vpop.f32.mrb[2].mxu1  ;;  %v930_v17 = vpop.f32.mrb[3].mxu0 }
  0xe9   : > { %v1511_v18 = vmul.f32 %v2512_v4, %v1192_v9  ;;  %v1445_v19 = vmul.f32 %v2512_v4, %v928_v10  ;;  %v1195_v20 = vadd.f32 %v2174_v16, %v2507_v2  ;;  %v931_v21 = vadd.f32 %v2507_v2, %v930_v17  ;;  %v1186_v22 = vpop.f32.mrb[3].mxu1 }
  0xea   : > { %v1582_v23 = vadd.f32 %v2519_v8, %v1447_v13  ;;  %v1509_v24 = vmul.f32 %v2512_v4, %v1184_v14  ;;  %v1448_v25 = vmul.f32 %v2512_v4, %v939_v15  ;;  %v1187_v26 = vadd.f32 %v2507_v2, %v1186_v22 }
  0xeb   : > { %v1646_v27 = vadd.f32 %v2519_v8, %v1511_v18  ;;  %v1580_v28 = vadd.f32 %v2519_v8, %v1445_v19  ;;  %v1512_v29 = vmul.f32 %v2512_v4, %v1195_v20  ;;  %v1446_v30 = vmul.f32 %v2512_v4, %v931_v21 }
  0xec   : > { %1711 = vst.msk [vmem:[%s2529_s13 + $0x10] sm:$0xff] %vm1708_vm1, %v1582_v23  ;;  %v1644_v31 = vadd.f32 %v2519_v8, %v1509_v24  ;;  %v1583_v32 = vadd.f32 %v2519_v8, %v1448_v25  ;;  %v1510_v33 = vmul.f32 %v2512_v4, %v1187_v26 }
  0xed   : > { %1775 = vst.msk [vmem:[%s2529_s13 + $0x210] sm:$0xff] %vm1708_vm1, %v1646_v27  ;;  %1709 = vst.msk [vmem:[%s2529_s13] sm:$0xff] %vm1708_vm1, %v1580_v28  ;;  %v1647_v34 = vadd.f32 %v2519_v8, %v1512_v29  ;;  %v1581_v35 = vadd.f32 %v2519_v8, %v1446_v30  ;;  %v2113_v36 = vpop.f32.mrb[4].mxu0 }
  0xee   : > { %1773 = vst.msk [vmem:[%s2529_s13 + $0x200] sm:$0xff] %vm1708_vm1, %v1644_v31  ;;  %1712 = vst.msk [vmem:[%s2529_s13 + $0x18] sm:$0xff] %vm1708_vm1, %v1583_v32  ;;  %v1645_v37 = vadd.f32 %v2519_v8, %v1510_v33  ;;  %v952_v38 = vadd.f32 %v2113_v36, %v2507_v2  ;;  %v2177_v39 = vpop.f32.mrb[4].mxu1  ;;  %v943_v40 = vpop.f32.mrb[5].mxu0 }
  0xef   : > { %1776 = vst.msk [vmem:[%s2529_s13 + $0x218] sm:$0xff] %vm1708_vm1, %v1647_v34  ;;  %1710 = vst.msk [vmem:[%s2529_s13 + $0x8] sm:$0xff] %vm1708_vm1, %v1581_v35  ;;  %v1208_v41 = vadd.f32 %v2177_v39, %v2507_v2  ;;  %v944_v42 = vadd.f32 %v2507_v2, %v943_v40  ;;  %v1199_v43 = vpop.f32.mrb[5].mxu1  ;;  %v2114_v44 = vpop.f32.mrb[6].mxu0 }
  0xf0   : > { %1774 = vst.msk [vmem:[%s2529_s13 + $0x208] sm:$0xff] %vm1708_vm1, %v1645_v37  ;;  %v1451_v45 = vmul.f32 %v2512_v4, %v952_v38  ;;  %v1200_v46 = vadd.f32 %v2507_v2, %v1199_v43  ;;  %v955_v47 = vadd.f32 %v2114_v44, %v2507_v2  ;;  %v2178_v48 = vpop.f32.mrb[6].mxu1  ;;  %v946_v49 = vpop.f32.mrb[7].mxu0 }
  0xf1   : > { %v1515_v50 = vmul.f32 %v2512_v4, %v1208_v41  ;;  %v1449_v51 = vmul.f32 %v2512_v4, %v944_v42  ;;  %v1211_v52 = vadd.f32 %v2178_v48, %v2507_v2  ;;  %v947_v53 = vadd.f32 %v2507_v2, %v946_v49  ;;  %v1202_v54 = vpop.f32.mrb[7].mxu1 }
  0xf2   : > { %v1586_v55 = vadd.f32 %v2519_v8, %v1451_v45  ;;  %v1513_v56 = vmul.f32 %v2512_v4, %v1200_v46  ;;  %v1452_v57 = vmul.f32 %v2512_v4, %v955_v47  ;;  %v1203_v58 = vadd.f32 %v2507_v2, %v1202_v54 }
  0xf3   : > { %v1650_v59 = vadd.f32 %v2519_v8, %v1515_v50  ;;  %v1584_v60 = vadd.f32 %v2519_v8, %v1449_v51  ;;  %v1516_v61 = vmul.f32 %v2512_v4, %v1211_v52  ;;  %v1450_v62 = vmul.f32 %v2512_v4, %v947_v53 }
  0xf4   : > { %1715 = vst.msk [vmem:[%s2529_s13 + $0x30] sm:$0xff] %vm1708_vm1, %v1586_v55  ;;  %v1648_v63 = vadd.f32 %v2519_v8, %v1513_v56  ;;  %v1587_v0 = vadd.f32 %v2519_v8, %v1452_v57  ;;  %v1514_v1 = vmul.f32 %v2512_v4, %v1203_v58 }
  0xf5   : > { %1779 = vst.msk [vmem:[%s2529_s13 + $0x230] sm:$0xff] %vm1708_vm1, %v1650_v59  ;;  %1713 = vst.msk [vmem:[%s2529_s13 + $0x20] sm:$0xff] %vm1708_vm1, %v1584_v60  ;;  %v1651_v3 = vadd.f32 %v2519_v8, %v1516_v61  ;;  %v1585_v5 = vadd.f32 %v2519_v8, %v1450_v62  ;;  %v2117_v6 = vpop.f32.mrb[8].mxu0 }
  0xf6   : > { %1777 = vst.msk [vmem:[%s2529_s13 + $0x220] sm:$0xff] %vm1708_vm1, %v1648_v63  ;;  %1716 = vst.msk [vmem:[%s2529_s13 + $0x38] sm:$0xff] %vm1708_vm1, %v1587_v0  ;;  %v1649_v7 = vadd.f32 %v2519_v8, %v1514_v1  ;;  %v968_v9 = vadd.f32 %v2117_v6, %v2507_v2  ;;  %v2181_v10 = vpop.f32.mrb[8].mxu1  ;;  %v959_v11 = vpop.f32.mrb[9].mxu0 }
  0xf7   : > { %1780 = vst.msk [vmem:[%s2529_s13 + $0x238] sm:$0xff] %vm1708_vm1, %v1651_v3  ;;  %1714 = vst.msk [vmem:[%s2529_s13 + $0x28] sm:$0xff] %vm1708_vm1, %v1585_v5  ;;  %v1224_v12 = vadd.f32 %v2181_v10, %v2507_v2  ;;  %v960_v13 = vadd.f32 %v2507_v2, %v959_v11  ;;  %v1215_v14 = vpop.f32.mrb[9].mxu1  ;;  %v2118_v15 = vpop.f32.mrb[10].mxu0 }
  0xf8   : > { %1778 = vst.msk [vmem:[%s2529_s13 + $0x228] sm:$0xff] %vm1708_vm1, %v1649_v7  ;;  %v1455_v16 = vmul.f32 %v2512_v4, %v968_v9  ;;  %v1216_v17 = vadd.f32 %v2507_v2, %v1215_v14  ;;  %v971_v18 = vadd.f32 %v2118_v15, %v2507_v2  ;;  %v2182_v19 = vpop.f32.mrb[10].mxu1  ;;  %v962_v20 = vpop.f32.mrb[11].mxu0 }
  0xf9   : > { %v1519_v21 = vmul.f32 %v2512_v4, %v1224_v12  ;;  %v1453_v22 = vmul.f32 %v2512_v4, %v960_v13  ;;  %v1227_v23 = vadd.f32 %v2182_v19, %v2507_v2  ;;  %v963_v24 = vadd.f32 %v2507_v2, %v962_v20  ;;  %v1218_v25 = vpop.f32.mrb[11].mxu1 }
  0xfa   : > { %v1590_v26 = vadd.f32 %v2519_v8, %v1455_v16  ;;  %v1517_v27 = vmul.f32 %v2512_v4, %v1216_v17  ;;  %v1456_v28 = vmul.f32 %v2512_v4, %v971_v18  ;;  %v1219_v29 = vadd.f32 %v2507_v2, %v1218_v25 }
  0xfb   : > { %v1654_v30 = vadd.f32 %v2519_v8, %v1519_v21  ;;  %v1588_v31 = vadd.f32 %v2519_v8, %v1453_v22  ;;  %v1520_v32 = vmul.f32 %v2512_v4, %v1227_v23  ;;  %v1454_v33 = vmul.f32 %v2512_v4, %v963_v24 }
  0xfc   : > { %1719 = vst.msk [vmem:[%s2529_s13 + $0x50] sm:$0xff] %vm1708_vm1, %v1590_v26  ;;  %v1652_v34 = vadd.f32 %v2519_v8, %v1517_v27  ;;  %v1591_v35 = vadd.f32 %v2519_v8, %v1456_v28  ;;  %v1518_v36 = vmul.f32 %v2512_v4, %v1219_v29 }
  0xfd   : > { %1783 = vst.msk [vmem:[%s2529_s13 + $0x250] sm:$0xff] %vm1708_vm1, %v1654_v30  ;;  %1717 = vst.msk [vmem:[%s2529_s13 + $0x40] sm:$0xff] %vm1708_vm1, %v1588_v31  ;;  %v1655_v37 = vadd.f32 %v2519_v8, %v1520_v32  ;;  %v1589_v38 = vadd.f32 %v2519_v8, %v1454_v33  ;;  %v2121_v39 = vpop.f32.mrb[12].mxu0 }
  0xfe   : > { %1781 = vst.msk [vmem:[%s2529_s13 + $0x240] sm:$0xff] %vm1708_vm1, %v1652_v34  ;;  %1720 = vst.msk [vmem:[%s2529_s13 + $0x58] sm:$0xff] %vm1708_vm1, %v1591_v35  ;;  %v1653_v40 = vadd.f32 %v2519_v8, %v1518_v36  ;;  %v984_v41 = vadd.f32 %v2121_v39, %v2507_v2  ;;  %v2185_v42 = vpop.f32.mrb[12].mxu1  ;;  %v975_v43 = vpop.f32.mrb[13].mxu0 }
  0xff   : > { %1784 = vst.msk [vmem:[%s2529_s13 + $0x258] sm:$0xff] %vm1708_vm1, %v1655_v37  ;;  %1718 = vst.msk [vmem:[%s2529_s13 + $0x48] sm:$0xff] %vm1708_vm1, %v1589_v38  ;;  %v1240_v44 = vadd.f32 %v2185_v42, %v2507_v2  ;;  %v976_v45 = vadd.f32 %v2507_v2, %v975_v43  ;;  %v1231_v46 = vpop.f32.mrb[13].mxu1  ;;  %v2122_v47 = vpop.f32.mrb[14].mxu0 }
 0x100   : > { %1782 = vst.msk [vmem:[%s2529_s13 + $0x248] sm:$0xff] %vm1708_vm1, %v1653_v40  ;;  %v1459_v48 = vmul.f32 %v2512_v4, %v984_v41  ;;  %v1232_v49 = vadd.f32 %v2507_v2, %v1231_v46  ;;  %v987_v50 = vadd.f32 %v2122_v47, %v2507_v2  ;;  %v2186_v51 = vpop.f32.mrb[14].mxu1  ;;  %v978_v52 = vpop.f32.mrb[15].mxu0 }
 0x101   : > { %v1523_v53 = vmul.f32 %v2512_v4, %v1240_v44  ;;  %v1457_v54 = vmul.f32 %v2512_v4, %v976_v45  ;;  %v1243_v55 = vadd.f32 %v2186_v51, %v2507_v2  ;;  %v979_v56 = vadd.f32 %v2507_v2, %v978_v52  ;;  %v1234_v57 = vpop.f32.mrb[15].mxu1 }
 0x102   : > { %v1594_v58 = vadd.f32 %v2519_v8, %v1459_v48  ;;  %v1521_v59 = vmul.f32 %v2512_v4, %v1232_v49  ;;  %v1460_v60 = vmul.f32 %v2512_v4, %v987_v50  ;;  %v1235_v61 = vadd.f32 %v2507_v2, %v1234_v57 }
 0x103   : > { %v1658_v62 = vadd.f32 %v2519_v8, %v1523_v53  ;;  %v1592_v63 = vadd.f32 %v2519_v8, %v1457_v54  ;;  %v1524_v0 = vmul.f32 %v2512_v4, %v1243_v55  ;;  %v1458_v1 = vmul.f32 %v2512_v4, %v979_v56 }
 0x104   : > { %1723 = vst.msk [vmem:[%s2529_s13 + $0x70] sm:$0xff] %vm1708_vm1, %v1594_v58  ;;  %v1656_v3 = vadd.f32 %v2519_v8, %v1521_v59  ;;  %v1595_v5 = vadd.f32 %v2519_v8, %v1460_v60  ;;  %v1522_v6 = vmul.f32 %v2512_v4, %v1235_v61 }
 0x105   : > { %1787 = vst.msk [vmem:[%s2529_s13 + $0x270] sm:$0xff] %vm1708_vm1, %v1658_v62  ;;  %1721 = vst.msk [vmem:[%s2529_s13 + $0x60] sm:$0xff] %vm1708_vm1, %v1592_v63  ;;  %v1659_v7 = vadd.f32 %v2519_v8, %v1524_v0  ;;  %v1593_v9 = vadd.f32 %v2519_v8, %v1458_v1  ;;  %v2125_v10 = vpop.f32.mrb[16].mxu0 }
 0x106   : > { %1785 = vst.msk [vmem:[%s2529_s13 + $0x260] sm:$0xff] %vm1708_vm1, %v1656_v3  ;;  %1724 = vst.msk [vmem:[%s2529_s13 + $0x78] sm:$0xff] %vm1708_vm1, %v1595_v5  ;;  %v1657_v11 = vadd.f32 %v2519_v8, %v1522_v6  ;;  %v1000_v12 = vadd.f32 %v2125_v10, %v2507_v2  ;;  %v2189_v13 = vpop.f32.mrb[16].mxu1  ;;  %v991_v14 = vpop.f32.mrb[17].mxu0 }
 0x107   : > { %1788 = vst.msk [vmem:[%s2529_s13 + $0x278] sm:$0xff] %vm1708_vm1, %v1659_v7  ;;  %1722 = vst.msk [vmem:[%s2529_s13 + $0x68] sm:$0xff] %vm1708_vm1, %v1593_v9  ;;  %v1256_v15 = vadd.f32 %v2189_v13, %v2507_v2  ;;  %v992_v16 = vadd.f32 %v2507_v2, %v991_v14  ;;  %v1247_v17 = vpop.f32.mrb[17].mxu1  ;;  %v2126_v18 = vpop.f32.mrb[18].mxu0 }
 0x108   : > { %1786 = vst.msk [vmem:[%s2529_s13 + $0x268] sm:$0xff] %vm1708_vm1, %v1657_v11  ;;  %v1463_v19 = vmul.f32 %v2512_v4, %v1000_v12  ;;  %v1248_v20 = vadd.f32 %v2507_v2, %v1247_v17  ;;  %v1003_v21 = vadd.f32 %v2126_v18, %v2507_v2  ;;  %v2190_v22 = vpop.f32.mrb[18].mxu1  ;;  %v994_v23 = vpop.f32.mrb[19].mxu0 }
 0x109   : > { %v1527_v24 = vmul.f32 %v2512_v4, %v1256_v15  ;;  %v1461_v25 = vmul.f32 %v2512_v4, %v992_v16  ;;  %v1259_v26 = vadd.f32 %v2190_v22, %v2507_v2  ;;  %v995_v27 = vadd.f32 %v2507_v2, %v994_v23  ;;  %v1250_v28 = vpop.f32.mrb[19].mxu1 }
 0x10a   : > { %v1598_v29 = vadd.f32 %v2519_v8, %v1463_v19  ;;  %v1525_v30 = vmul.f32 %v2512_v4, %v1248_v20  ;;  %v1464_v31 = vmul.f32 %v2512_v4, %v1003_v21  ;;  %v1251_v32 = vadd.f32 %v2507_v2, %v1250_v28 }
 0x10b   : > { %v1662_v33 = vadd.f32 %v2519_v8, %v1527_v24  ;;  %v1596_v34 = vadd.f32 %v2519_v8, %v1461_v25  ;;  %v1528_v35 = vmul.f32 %v2512_v4, %v1259_v26  ;;  %v1462_v36 = vmul.f32 %v2512_v4, %v995_v27 }
 0x10c   : > { %1727 = vst.msk [vmem:[%s2529_s13 + $0x90] sm:$0xff] %vm1708_vm1, %v1598_v29  ;;  %v1660_v37 = vadd.f32 %v2519_v8, %v1525_v30  ;;  %v1599_v38 = vadd.f32 %v2519_v8, %v1464_v31  ;;  %v1526_v39 = vmul.f32 %v2512_v4, %v1251_v32 }
 0x10d   : > { %1791 = vst.msk [vmem:[%s2529_s13 + $0x290] sm:$0xff] %vm1708_vm1, %v1662_v33  ;;  %1725 = vst.msk [vmem:[%s2529_s13 + $0x80] sm:$0xff] %vm1708_vm1, %v1596_v34  ;;  %v1663_v40 = vadd.f32 %v2519_v8, %v1528_v35  ;;  %v1597_v41 = vadd.f32 %v2519_v8, %v1462_v36  ;;  %v2129_v42 = vpop.f32.mrb[20].mxu0 }
 0x10e   : > { %1789 = vst.msk [vmem:[%s2529_s13 + $0x280] sm:$0xff] %vm1708_vm1, %v1660_v37  ;;  %1728 = vst.msk [vmem:[%s2529_s13 + $0x98] sm:$0xff] %vm1708_vm1, %v1599_v38  ;;  %v1661_v43 = vadd.f32 %v2519_v8, %v1526_v39  ;;  %v1016_v44 = vadd.f32 %v2129_v42, %v2507_v2  ;;  %v2193_v45 = vpop.f32.mrb[20].mxu1  ;;  %v1007_v46 = vpop.f32.mrb[21].mxu0 }
 0x10f   : > { %1792 = vst.msk [vmem:[%s2529_s13 + $0x298] sm:$0xff] %vm1708_vm1, %v1663_v40  ;;  %1726 = vst.msk [vmem:[%s2529_s13 + $0x88] sm:$0xff] %vm1708_vm1, %v1597_v41  ;;  %v1272_v47 = vadd.f32 %v2193_v45, %v2507_v2  ;;  %v1008_v48 = vadd.f32 %v2507_v2, %v1007_v46  ;;  %v1263_v49 = vpop.f32.mrb[21].mxu1  ;;  %v2130_v50 = vpop.f32.mrb[22].mxu0 }
 0x110   : > { %1790 = vst.msk [vmem:[%s2529_s13 + $0x288] sm:$0xff] %vm1708_vm1, %v1661_v43  ;;  %v1467_v51 = vmul.f32 %v2512_v4, %v1016_v44  ;;  %v1264_v52 = vadd.f32 %v2507_v2, %v1263_v49  ;;  %v1019_v53 = vadd.f32 %v2130_v50, %v2507_v2  ;;  %v2194_v54 = vpop.f32.mrb[22].mxu1  ;;  %v1010_v55 = vpop.f32.mrb[23].mxu0 }
 0x111   : > { %v1531_v56 = vmul.f32 %v2512_v4, %v1272_v47  ;;  %v1465_v57 = vmul.f32 %v2512_v4, %v1008_v48  ;;  %v1275_v58 = vadd.f32 %v2194_v54, %v2507_v2  ;;  %v1011_v59 = vadd.f32 %v2507_v2, %v1010_v55  ;;  %v1266_v60 = vpop.f32.mrb[23].mxu1 }
 0x112   : > { %v1602_v61 = vadd.f32 %v2519_v8, %v1467_v51  ;;  %v1529_v62 = vmul.f32 %v2512_v4, %v1264_v52  ;;  %v1468_v63 = vmul.f32 %v2512_v4, %v1019_v53  ;;  %v1267_v0 = vadd.f32 %v2507_v2, %v1266_v60 }
 0x113   : > { %v1666_v1 = vadd.f32 %v2519_v8, %v1531_v56  ;;  %v1600_v3 = vadd.f32 %v2519_v8, %v1465_v57  ;;  %v1532_v5 = vmul.f32 %v2512_v4, %v1275_v58  ;;  %v1466_v6 = vmul.f32 %v2512_v4, %v1011_v59 }
 0x114   : > { %1731 = vst.msk [vmem:[%s2529_s13 + $0xb0] sm:$0xff] %vm1708_vm1, %v1602_v61  ;;  %v1664_v7 = vadd.f32 %v2519_v8, %v1529_v62  ;;  %v1603_v9 = vadd.f32 %v2519_v8, %v1468_v63  ;;  %v1530_v10 = vmul.f32 %v2512_v4, %v1267_v0 }
 0x115   : > { %1795 = vst.msk [vmem:[%s2529_s13 + $0x2b0] sm:$0xff] %vm1708_vm1, %v1666_v1  ;;  %1729 = vst.msk [vmem:[%s2529_s13 + $0xa0] sm:$0xff] %vm1708_vm1, %v1600_v3  ;;  %v1667_v11 = vadd.f32 %v2519_v8, %v1532_v5  ;;  %v1601_v12 = vadd.f32 %v2519_v8, %v1466_v6  ;;  %v2133_v13 = vpop.f32.mrb[24].mxu0 }
 0x116   : > { %1793 = vst.msk [vmem:[%s2529_s13 + $0x2a0] sm:$0xff] %vm1708_vm1, %v1664_v7  ;;  %1732 = vst.msk [vmem:[%s2529_s13 + $0xb8] sm:$0xff] %vm1708_vm1, %v1603_v9  ;;  %v1665_v14 = vadd.f32 %v2519_v8, %v1530_v10  ;;  %v1032_v15 = vadd.f32 %v2133_v13, %v2507_v2  ;;  %v2197_v16 = vpop.f32.mrb[24].mxu1  ;;  %v1023_v17 = vpop.f32.mrb[25].mxu0 }
 0x117   : > { %1796 = vst.msk [vmem:[%s2529_s13 + $0x2b8] sm:$0xff] %vm1708_vm1, %v1667_v11  ;;  %1730 = vst.msk [vmem:[%s2529_s13 + $0xa8] sm:$0xff] %vm1708_vm1, %v1601_v12  ;;  %v1288_v18 = vadd.f32 %v2197_v16, %v2507_v2  ;;  %v1024_v19 = vadd.f32 %v2507_v2, %v1023_v17  ;;  %v1279_v20 = vpop.f32.mrb[25].mxu1  ;;  %v2134_v21 = vpop.f32.mrb[26].mxu0 }
 0x118   : > { %1794 = vst.msk [vmem:[%s2529_s13 + $0x2a8] sm:$0xff] %vm1708_vm1, %v1665_v14  ;;  %v1471_v22 = vmul.f32 %v2512_v4, %v1032_v15  ;;  %v1280_v23 = vadd.f32 %v2507_v2, %v1279_v20  ;;  %v1035_v24 = vadd.f32 %v2134_v21, %v2507_v2  ;;  %v2198_v25 = vpop.f32.mrb[26].mxu1  ;;  %v1026_v26 = vpop.f32.mrb[27].mxu0 }
 0x119   : > { %v1535_v27 = vmul.f32 %v2512_v4, %v1288_v18  ;;  %v1469_v28 = vmul.f32 %v2512_v4, %v1024_v19  ;;  %v1291_v29 = vadd.f32 %v2198_v25, %v2507_v2  ;;  %v1027_v30 = vadd.f32 %v2507_v2, %v1026_v26  ;;  %v1282_v31 = vpop.f32.mrb[27].mxu1 }
 0x11a   : > { %v1606_v32 = vadd.f32 %v2519_v8, %v1471_v22  ;;  %v1533_v33 = vmul.f32 %v2512_v4, %v1280_v23  ;;  %v1472_v34 = vmul.f32 %v2512_v4, %v1035_v24  ;;  %v1283_v35 = vadd.f32 %v2507_v2, %v1282_v31 }
 0x11b   : > { %v1670_v36 = vadd.f32 %v2519_v8, %v1535_v27  ;;  %v1604_v37 = vadd.f32 %v2519_v8, %v1469_v28  ;;  %v1536_v38 = vmul.f32 %v2512_v4, %v1291_v29  ;;  %v1470_v39 = vmul.f32 %v2512_v4, %v1027_v30 }
 0x11c   : > { %1735 = vst.msk [vmem:[%s2529_s13 + $0xd0] sm:$0xff] %vm1708_vm1, %v1606_v32  ;;  %v1668_v40 = vadd.f32 %v2519_v8, %v1533_v33  ;;  %v1607_v41 = vadd.f32 %v2519_v8, %v1472_v34  ;;  %v1534_v42 = vmul.f32 %v2512_v4, %v1283_v35 }
 0x11d   : > { %1799 = vst.msk [vmem:[%s2529_s13 + $0x2d0] sm:$0xff] %vm1708_vm1, %v1670_v36  ;;  %1733 = vst.msk [vmem:[%s2529_s13 + $0xc0] sm:$0xff] %vm1708_vm1, %v1604_v37  ;;  %v1671_v43 = vadd.f32 %v2519_v8, %v1536_v38  ;;  %v1605_v44 = vadd.f32 %v2519_v8, %v1470_v39  ;;  %v2137_v45 = vpop.f32.mrb[28].mxu0 }
 0x11e   : > { %1797 = vst.msk [vmem:[%s2529_s13 + $0x2c0] sm:$0xff] %vm1708_vm1, %v1668_v40  ;;  %1736 = vst.msk [vmem:[%s2529_s13 + $0xd8] sm:$0xff] %vm1708_vm1, %v1607_v41  ;;  %v1669_v46 = vadd.f32 %v2519_v8, %v1534_v42  ;;  %v1048_v47 = vadd.f32 %v2137_v45, %v2507_v2  ;;  %v2201_v48 = vpop.f32.mrb[28].mxu1  ;;  %v1039_v49 = vpop.f32.mrb[29].mxu0 }
 0x11f   : > { %1800 = vst.msk [vmem:[%s2529_s13 + $0x2d8] sm:$0xff] %vm1708_vm1, %v1671_v43  ;;  %1734 = vst.msk [vmem:[%s2529_s13 + $0xc8] sm:$0xff] %vm1708_vm1, %v1605_v44  ;;  %v1304_v50 = vadd.f32 %v2201_v48, %v2507_v2  ;;  %v1040_v51 = vadd.f32 %v2507_v2, %v1039_v49  ;;  %v1295_v52 = vpop.f32.mrb[29].mxu1  ;;  %v2138_v53 = vpop.f32.mrb[30].mxu0 }
 0x120   : > { %1798 = vst.msk [vmem:[%s2529_s13 + $0x2c8] sm:$0xff] %vm1708_vm1, %v1669_v46  ;;  %v1475_v54 = vmul.f32 %v2512_v4, %v1048_v47  ;;  %v1296_v55 = vadd.f32 %v2507_v2, %v1295_v52  ;;  %v1051_v56 = vadd.f32 %v2138_v53, %v2507_v2  ;;  %v2202_v57 = vpop.f32.mrb[30].mxu1  ;;  %v1042_v58 = vpop.f32.mrb[31].mxu0 }
 0x121   : > { %v1539_v59 = vmul.f32 %v2512_v4, %v1304_v50  ;;  %v1473_v60 = vmul.f32 %v2512_v4, %v1040_v51  ;;  %v1307_v61 = vadd.f32 %v2202_v57, %v2507_v2  ;;  %v1043_v62 = vadd.f32 %v2507_v2, %v1042_v58  ;;  %v1298_v63 = vpop.f32.mrb[31].mxu1 }
 0x122   : > { %v1610_v0 = vadd.f32 %v2519_v8, %v1475_v54  ;;  %v1537_v1 = vmul.f32 %v2512_v4, %v1296_v55  ;;  %v1476_v3 = vmul.f32 %v2512_v4, %v1051_v56  ;;  %v1299_v5 = vadd.f32 %v2507_v2, %v1298_v63 }
 0x123   : > { %v1674_v6 = vadd.f32 %v2519_v8, %v1539_v59  ;;  %v1608_v7 = vadd.f32 %v2519_v8, %v1473_v60  ;;  %v1540_v9 = vmul.f32 %v2512_v4, %v1307_v61  ;;  %v1474_v10 = vmul.f32 %v2512_v4, %v1043_v62 }
 0x124   : > { %1739 = vst.msk [vmem:[%s2529_s13 + $0xf0] sm:$0xff] %vm1708_vm1, %v1610_v0  ;;  %v1672_v11 = vadd.f32 %v2519_v8, %v1537_v1  ;;  %v1611_v12 = vadd.f32 %v2519_v8, %v1476_v3  ;;  %v1538_v13 = vmul.f32 %v2512_v4, %v1299_v5 }
 0x125   : > { %1803 = vst.msk [vmem:[%s2529_s13 + $0x2f0] sm:$0xff] %vm1708_vm1, %v1674_v6  ;;  %1737 = vst.msk [vmem:[%s2529_s13 + $0xe0] sm:$0xff] %vm1708_vm1, %v1608_v7  ;;  %v1675_v14 = vadd.f32 %v2519_v8, %v1540_v9  ;;  %v1609_v15 = vadd.f32 %v2519_v8, %v1474_v10  ;;  %v2141_v16 = vpop.f32.mrb[32].mxu0 }
 0x126   : > { %1801 = vst.msk [vmem:[%s2529_s13 + $0x2e0] sm:$0xff] %vm1708_vm1, %v1672_v11  ;;  %1740 = vst.msk [vmem:[%s2529_s13 + $0xf8] sm:$0xff] %vm1708_vm1, %v1611_v12  ;;  %v1673_v17 = vadd.f32 %v2519_v8, %v1538_v13  ;;  %v1064_v18 = vadd.f32 %v2141_v16, %v2507_v2  ;;  %v2205_v19 = vpop.f32.mrb[32].mxu1  ;;  %v1055_v20 = vpop.f32.mrb[33].mxu0 }
 0x127   : > { %1804 = vst.msk [vmem:[%s2529_s13 + $0x2f8] sm:$0xff] %vm1708_vm1, %v1675_v14  ;;  %1738 = vst.msk [vmem:[%s2529_s13 + $0xe8] sm:$0xff] %vm1708_vm1, %v1609_v15  ;;  %v1320_v21 = vadd.f32 %v2205_v19, %v2507_v2  ;;  %v1056_v22 = vadd.f32 %v2507_v2, %v1055_v20  ;;  %v1311_v23 = vpop.f32.mrb[33].mxu1  ;;  %v2142_v24 = vpop.f32.mrb[34].mxu0 }
 0x128   : > { %1802 = vst.msk [vmem:[%s2529_s13 + $0x2e8] sm:$0xff] %vm1708_vm1, %v1673_v17  ;;  %v1479_v25 = vmul.f32 %v2512_v4, %v1064_v18  ;;  %v1312_v26 = vadd.f32 %v2507_v2, %v1311_v23  ;;  %v1067_v27 = vadd.f32 %v2142_v24, %v2507_v2  ;;  %v2206_v28 = vpop.f32.mrb[34].mxu1  ;;  %v1058_v29 = vpop.f32.mrb[35].mxu0 }
 0x129   : > { %v1543_v30 = vmul.f32 %v2512_v4, %v1320_v21  ;;  %v1477_v31 = vmul.f32 %v2512_v4, %v1056_v22  ;;  %v1323_v32 = vadd.f32 %v2206_v28, %v2507_v2  ;;  %v1059_v33 = vadd.f32 %v2507_v2, %v1058_v29  ;;  %v1314_v34 = vpop.f32.mrb[35].mxu1 }
 0x12a   : > { %v1614_v35 = vadd.f32 %v2519_v8, %v1479_v25  ;;  %v1541_v36 = vmul.f32 %v2512_v4, %v1312_v26  ;;  %v1480_v37 = vmul.f32 %v2512_v4, %v1067_v27  ;;  %v1315_v38 = vadd.f32 %v2507_v2, %v1314_v34 }
 0x12b   : > { %v1678_v39 = vadd.f32 %v2519_v8, %v1543_v30  ;;  %v1612_v40 = vadd.f32 %v2519_v8, %v1477_v31  ;;  %v1544_v41 = vmul.f32 %v2512_v4, %v1323_v32  ;;  %v1478_v42 = vmul.f32 %v2512_v4, %v1059_v33 }
 0x12c   : > { %1743 = vst.msk [vmem:[%s2529_s13 + $0x110] sm:$0xff] %vm1708_vm1, %v1614_v35  ;;  %v1676_v43 = vadd.f32 %v2519_v8, %v1541_v36  ;;  %v1615_v44 = vadd.f32 %v2519_v8, %v1480_v37  ;;  %v1542_v45 = vmul.f32 %v2512_v4, %v1315_v38 }
 0x12d   : > { %1807 = vst.msk [vmem:[%s2529_s13 + $0x310] sm:$0xff] %vm1708_vm1, %v1678_v39  ;;  %1741 = vst.msk [vmem:[%s2529_s13 + $0x100] sm:$0xff] %vm1708_vm1, %v1612_v40  ;;  %v1679_v46 = vadd.f32 %v2519_v8, %v1544_v41  ;;  %v1613_v47 = vadd.f32 %v2519_v8, %v1478_v42  ;;  %v2145_v48 = vpop.f32.mrb[36].mxu0 }
 0x12e   : > { %1805 = vst.msk [vmem:[%s2529_s13 + $0x300] sm:$0xff] %vm1708_vm1, %v1676_v43  ;;  %1744 = vst.msk [vmem:[%s2529_s13 + $0x118] sm:$0xff] %vm1708_vm1, %v1615_v44  ;;  %v1677_v49 = vadd.f32 %v2519_v8, %v1542_v45  ;;  %v1080_v50 = vadd.f32 %v2145_v48, %v2507_v2  ;;  %v2209_v51 = vpop.f32.mrb[36].mxu1  ;;  %v1071_v52 = vpop.f32.mrb[37].mxu0 }
 0x12f   : > { %1808 = vst.msk [vmem:[%s2529_s13 + $0x318] sm:$0xff] %vm1708_vm1, %v1679_v46  ;;  %1742 = vst.msk [vmem:[%s2529_s13 + $0x108] sm:$0xff] %vm1708_vm1, %v1613_v47  ;;  %v1336_v53 = vadd.f32 %v2209_v51, %v2507_v2  ;;  %v1072_v54 = vadd.f32 %v2507_v2, %v1071_v52  ;;  %v1327_v55 = vpop.f32.mrb[37].mxu1  ;;  %v2146_v56 = vpop.f32.mrb[38].mxu0 }
 0x130   : > { %1806 = vst.msk [vmem:[%s2529_s13 + $0x308] sm:$0xff] %vm1708_vm1, %v1677_v49  ;;  %v1483_v57 = vmul.f32 %v2512_v4, %v1080_v50  ;;  %v1328_v58 = vadd.f32 %v2507_v2, %v1327_v55  ;;  %v1083_v59 = vadd.f32 %v2146_v56, %v2507_v2  ;;  %v2210_v60 = vpop.f32.mrb[38].mxu1  ;;  %v1074_v61 = vpop.f32.mrb[39].mxu0 }
 0x131   : > { %v1547_v62 = vmul.f32 %v2512_v4, %v1336_v53  ;;  %v1481_v63 = vmul.f32 %v2512_v4, %v1072_v54  ;;  %v1339_v0 = vadd.f32 %v2210_v60, %v2507_v2  ;;  %v1075_v1 = vadd.f32 %v2507_v2, %v1074_v61  ;;  %v1330_v3 = vpop.f32.mrb[39].mxu1 }
 0x132   : > { %v1618_v5 = vadd.f32 %v2519_v8, %v1483_v57  ;;  %v1545_v6 = vmul.f32 %v2512_v4, %v1328_v58  ;;  %v1484_v7 = vmul.f32 %v2512_v4, %v1083_v59  ;;  %v1331_v9 = vadd.f32 %v2507_v2, %v1330_v3 }
 0x133   : > { %v1682_v10 = vadd.f32 %v2519_v8, %v1547_v62  ;;  %v1616_v11 = vadd.f32 %v2519_v8, %v1481_v63  ;;  %v1548_v12 = vmul.f32 %v2512_v4, %v1339_v0  ;;  %v1482_v13 = vmul.f32 %v2512_v4, %v1075_v1 }
 0x134   : > { %1747 = vst.msk [vmem:[%s2529_s13 + $0x130] sm:$0xff] %vm1708_vm1, %v1618_v5  ;;  %v1680_v14 = vadd.f32 %v2519_v8, %v1545_v6  ;;  %v1619_v15 = vadd.f32 %v2519_v8, %v1484_v7  ;;  %v1546_v16 = vmul.f32 %v2512_v4, %v1331_v9 }
 0x135   : > { %1811 = vst.msk [vmem:[%s2529_s13 + $0x330] sm:$0xff] %vm1708_vm1, %v1682_v10  ;;  %1745 = vst.msk [vmem:[%s2529_s13 + $0x120] sm:$0xff] %vm1708_vm1, %v1616_v11  ;;  %v1683_v17 = vadd.f32 %v2519_v8, %v1548_v12  ;;  %v1617_v18 = vadd.f32 %v2519_v8, %v1482_v13  ;;  %v2149_v19 = vpop.f32.mrb[40].mxu0 }
 0x136   : > { %1809 = vst.msk [vmem:[%s2529_s13 + $0x320] sm:$0xff] %vm1708_vm1, %v1680_v14  ;;  %1748 = vst.msk [vmem:[%s2529_s13 + $0x138] sm:$0xff] %vm1708_vm1, %v1619_v15  ;;  %v1681_v20 = vadd.f32 %v2519_v8, %v1546_v16  ;;  %v1096_v21 = vadd.f32 %v2149_v19, %v2507_v2  ;;  %v2213_v22 = vpop.f32.mrb[40].mxu1  ;;  %v1087_v23 = vpop.f32.mrb[41].mxu0 }
 0x137   : > { %1812 = vst.msk [vmem:[%s2529_s13 + $0x338] sm:$0xff] %vm1708_vm1, %v1683_v17  ;;  %1746 = vst.msk [vmem:[%s2529_s13 + $0x128] sm:$0xff] %vm1708_vm1, %v1617_v18  ;;  %v1352_v24 = vadd.f32 %v2213_v22, %v2507_v2  ;;  %v1088_v25 = vadd.f32 %v2507_v2, %v1087_v23  ;;  %v1343_v26 = vpop.f32.mrb[41].mxu1  ;;  %v2150_v27 = vpop.f32.mrb[42].mxu0 }
 0x138   : > { %1810 = vst.msk [vmem:[%s2529_s13 + $0x328] sm:$0xff] %vm1708_vm1, %v1681_v20  ;;  %v1487_v28 = vmul.f32 %v2512_v4, %v1096_v21  ;;  %v1344_v29 = vadd.f32 %v2507_v2, %v1343_v26  ;;  %v1099_v30 = vadd.f32 %v2150_v27, %v2507_v2  ;;  %v2214_v31 = vpop.f32.mrb[42].mxu1  ;;  %v1090_v32 = vpop.f32.mrb[43].mxu0 }
 0x139   : > { %v1551_v33 = vmul.f32 %v2512_v4, %v1352_v24  ;;  %v1485_v34 = vmul.f32 %v2512_v4, %v1088_v25  ;;  %v1355_v35 = vadd.f32 %v2214_v31, %v2507_v2  ;;  %v1091_v36 = vadd.f32 %v2507_v2, %v1090_v32  ;;  %v1346_v37 = vpop.f32.mrb[43].mxu1 }
 0x13a   : > { %v1622_v38 = vadd.f32 %v2519_v8, %v1487_v28  ;;  %v1549_v39 = vmul.f32 %v2512_v4, %v1344_v29  ;;  %v1488_v40 = vmul.f32 %v2512_v4, %v1099_v30  ;;  %v1347_v41 = vadd.f32 %v2507_v2, %v1346_v37 }
 0x13b   : > { %v1686_v42 = vadd.f32 %v2519_v8, %v1551_v33  ;;  %v1620_v43 = vadd.f32 %v2519_v8, %v1485_v34  ;;  %v1552_v44 = vmul.f32 %v2512_v4, %v1355_v35  ;;  %v1486_v45 = vmul.f32 %v2512_v4, %v1091_v36 }
 0x13c   : > { %1751 = vst.msk [vmem:[%s2529_s13 + $0x150] sm:$0xff] %vm1708_vm1, %v1622_v38  ;;  %v1684_v46 = vadd.f32 %v2519_v8, %v1549_v39  ;;  %v1623_v47 = vadd.f32 %v2519_v8, %v1488_v40  ;;  %v1550_v48 = vmul.f32 %v2512_v4, %v1347_v41 }
 0x13d   : > { %1815 = vst.msk [vmem:[%s2529_s13 + $0x350] sm:$0xff] %vm1708_vm1, %v1686_v42  ;;  %1749 = vst.msk [vmem:[%s2529_s13 + $0x140] sm:$0xff] %vm1708_vm1, %v1620_v43  ;;  %v1687_v49 = vadd.f32 %v2519_v8, %v1552_v44  ;;  %v1621_v50 = vadd.f32 %v2519_v8, %v1486_v45  ;;  %v2153_v51 = vpop.f32.mrb[44].mxu0 }
 0x13e   : > { %1813 = vst.msk [vmem:[%s2529_s13 + $0x340] sm:$0xff] %vm1708_vm1, %v1684_v46  ;;  %1752 = vst.msk [vmem:[%s2529_s13 + $0x158] sm:$0xff] %vm1708_vm1, %v1623_v47  ;;  %v1685_v52 = vadd.f32 %v2519_v8, %v1550_v48  ;;  %v1112_v53 = vadd.f32 %v2153_v51, %v2507_v2  ;;  %v2217_v54 = vpop.f32.mrb[44].mxu1  ;;  %v1103_v55 = vpop.f32.mrb[45].mxu0 }
 0x13f   : > { %1816 = vst.msk [vmem:[%s2529_s13 + $0x358] sm:$0xff] %vm1708_vm1, %v1687_v49  ;;  %1750 = vst.msk [vmem:[%s2529_s13 + $0x148] sm:$0xff] %vm1708_vm1, %v1621_v50  ;;  %v1368_v56 = vadd.f32 %v2217_v54, %v2507_v2  ;;  %v1104_v57 = vadd.f32 %v2507_v2, %v1103_v55  ;;  %v1359_v58 = vpop.f32.mrb[45].mxu1  ;;  %v2154_v59 = vpop.f32.mrb[46].mxu0 }
 0x140   : > { %1814 = vst.msk [vmem:[%s2529_s13 + $0x348] sm:$0xff] %vm1708_vm1, %v1685_v52  ;;  %v1491_v60 = vmul.f32 %v2512_v4, %v1112_v53  ;;  %v1360_v61 = vadd.f32 %v2507_v2, %v1359_v58  ;;  %v1115_v62 = vadd.f32 %v2154_v59, %v2507_v2  ;;  %v2218_v63 = vpop.f32.mrb[46].mxu1  ;;  %v1106_v0 = vpop.f32.mrb[47].mxu0  ;;  %v3041_v52 = vld [vmem:[%s3187_s4] ss:$0 sm:$0xff] }
 0x141   : > { %v1555_v1 = vmul.f32 %v2512_v4, %v1368_v56  ;;  %v1489_v3 = vmul.f32 %v2512_v4, %v1104_v57  ;;  %v1371_v5 = vadd.f32 %v2218_v63, %v2507_v2  ;;  %v1107_v6 = vadd.f32 %v2507_v2, %v1106_v0  ;;  %v1362_v7 = vpop.f32.mrb[47].mxu1  ;;  %v3052_v56 = vld [vmem:[%s3185_s2] ss:$0 sm:$0xff] }
 0x142   : > { %v1626_v9 = vadd.f32 %v2519_v8, %v1491_v60  ;;  %v1553_v10 = vmul.f32 %v2512_v4, %v1360_v61  ;;  %v1492_v11 = vmul.f32 %v2512_v4, %v1115_v62  ;;  %v1363_v12 = vadd.f32 %v2507_v2, %v1362_v7 }
 0x143   : > { %v1690_v13 = vadd.f32 %v2519_v8, %v1555_v1  ;;  %v1624_v14 = vadd.f32 %v2519_v8, %v1489_v3  ;;  %v1556_v15 = vmul.f32 %v2512_v4, %v1371_v5  ;;  %v1490_v16 = vmul.f32 %v2512_v4, %v1107_v6 }
 0x144   : > { %1755 = vst.msk [vmem:[%s2529_s13 + $0x170] sm:$0xff] %vm1708_vm1, %v1626_v9  ;;  %v1688_v17 = vadd.f32 %v2519_v8, %v1553_v10  ;;  %v1627_v18 = vadd.f32 %v2519_v8, %v1492_v11  ;;  %v1554_v19 = vmul.f32 %v2512_v4, %v1363_v12 }
 0x145   : > { %1819 = vst.msk [vmem:[%s2529_s13 + $0x370] sm:$0xff] %vm1708_vm1, %v1690_v13  ;;  %1753 = vst.msk [vmem:[%s2529_s13 + $0x160] sm:$0xff] %vm1708_vm1, %v1624_v14  ;;  %v1691_v20 = vadd.f32 %v2519_v8, %v1556_v15  ;;  %v1625_v21 = vadd.f32 %v2519_v8, %v1490_v16  ;;  %v2157_v22 = vpop.f32.mrb[48].mxu0 }
 0x146   : > { %1817 = vst.msk [vmem:[%s2529_s13 + $0x360] sm:$0xff] %vm1708_vm1, %v1688_v17  ;;  %1756 = vst.msk [vmem:[%s2529_s13 + $0x178] sm:$0xff] %vm1708_vm1, %v1627_v18  ;;  %v1689_v23 = vadd.f32 %v2519_v8, %v1554_v19  ;;  %v1128_v24 = vadd.f32 %v2157_v22, %v2507_v2  ;;  %v2221_v25 = vpop.f32.mrb[48].mxu1  ;;  %v1119_v26 = vpop.f32.mrb[49].mxu0 }
 0x147   : > { %1820 = vst.msk [vmem:[%s2529_s13 + $0x378] sm:$0xff] %vm1708_vm1, %v1691_v20  ;;  %1754 = vst.msk [vmem:[%s2529_s13 + $0x168] sm:$0xff] %vm1708_vm1, %v1625_v21  ;;  %v1384_v27 = vadd.f32 %v2221_v25, %v2507_v2  ;;  %v1120_v28 = vadd.f32 %v2507_v2, %v1119_v26  ;;  %v1375_v29 = vpop.f32.mrb[49].mxu1  ;;  %v2158_v30 = vpop.f32.mrb[50].mxu0 }
 0x148   : > { %1818 = vst.msk [vmem:[%s2529_s13 + $0x368] sm:$0xff] %vm1708_vm1, %v1689_v23  ;;  %v1495_v31 = vmul.f32 %v2512_v4, %v1128_v24  ;;  %v1376_v32 = vadd.f32 %v2507_v2, %v1375_v29  ;;  %v1131_v33 = vadd.f32 %v2158_v30, %v2507_v2  ;;  %v2222_v34 = vpop.f32.mrb[50].mxu1  ;;  %v1122_v35 = vpop.f32.mrb[51].mxu0 }
 0x149   : > { %v1559_v36 = vmul.f32 %v2512_v4, %v1384_v27  ;;  %v1493_v37 = vmul.f32 %v2512_v4, %v1120_v28  ;;  %v1387_v38 = vadd.f32 %v2222_v34, %v2507_v2  ;;  %v1123_v39 = vadd.f32 %v2507_v2, %v1122_v35  ;;  %v1378_v40 = vpop.f32.mrb[51].mxu1 }
 0x14a   : > { %v1630_v41 = vadd.f32 %v2519_v8, %v1495_v31  ;;  %v1557_v42 = vmul.f32 %v2512_v4, %v1376_v32  ;;  %v1496_v43 = vmul.f32 %v2512_v4, %v1131_v33  ;;  %v1379_v44 = vadd.f32 %v2507_v2, %v1378_v40  ;;  %v3030_v2 = vld [vmem:[%s3186_s3] ss:$0 sm:$0xff] }
 0x14b   : > { %v1694_v45 = vadd.f32 %v2519_v8, %v1559_v36  ;;  %v1628_v46 = vadd.f32 %v2519_v8, %v1493_v37  ;;  %v1560_v47 = vmul.f32 %v2512_v4, %v1387_v38  ;;  %v1494_v48 = vmul.f32 %v2512_v4, %v1123_v39 }
 0x14c   : > { %1759 = vst.msk [vmem:[%s2529_s13 + $0x190] sm:$0xff] %vm1708_vm1, %v1630_v41  ;;  %v1692_v49 = vadd.f32 %v2519_v8, %v1557_v42  ;;  %v1631_v50 = vadd.f32 %v2519_v8, %v1496_v43  ;;  %v1558_v51 = vmul.f32 %v3030_v2, %v1379_v44 }
 0x14d   : > { %1823 = vst.msk [vmem:[%s2529_s13 + $0x390] sm:$0xff] %vm1708_vm1, %v1694_v45  ;;  %1757 = vst.msk [vmem:[%s2529_s13 + $0x180] sm:$0xff] %vm1708_vm1, %v1628_v46  ;;  %v1695_v4 = vadd.f32 %v2519_v8, %v1560_v47  ;;  %v1629_v53 = vadd.f32 %v3041_v52, %v1494_v48  ;;  %v2161_v54 = vpop.f32.mrb[52].mxu0 }
 0x14e   : > { %1821 = vst.msk [vmem:[%s2529_s13 + $0x380] sm:$0xff] %vm1708_vm1, %v1692_v49  ;;  %1760 = vst.msk [vmem:[%s2529_s13 + $0x198] sm:$0xff] %vm1708_vm1, %v1631_v50  ;;  %v1693_v55 = vadd.f32 %v3041_v52, %v1558_v51  ;;  %v1144_v8 = vadd.f32 %v3052_v56, %v2161_v54  ;;  %v2225_v57 = vpop.f32.mrb[52].mxu1  ;;  %v1135_v58 = vpop.f32.mrb[53].mxu0 }
 0x14f   : > { %1824 = vst.msk [vmem:[%s2529_s13 + $0x398] sm:$0xff] %vm1708_vm1, %v1695_v4  ;;  %1758 = vst.msk [vmem:[%s2529_s13 + $0x188] sm:$0xff] %vm1708_vm1, %v1629_v53  ;;  %v1400_v59 = vadd.f32 %v3052_v56, %v2225_v57  ;;  %v1136_v60 = vadd.f32 %v3052_v56, %v1135_v58  ;;  %v1391_v61 = vpop.f32.mrb[53].mxu1  ;;  %v2162_v62 = vpop.f32.mrb[54].mxu0 }
 0x150   : > { %1822 = vst.msk [vmem:[%s2529_s13 + $0x388] sm:$0xff] %vm1708_vm1, %v1693_v55  ;;  %v1499_v63 = vmul.f32 %v3030_v2, %v1144_v8  ;;  %v1392_v0 = vadd.f32 %v3052_v56, %v1391_v61  ;;  %v1147_v1 = vadd.f32 %v3052_v56, %v2162_v62  ;;  %v2226_v3 = vpop.f32.mrb[54].mxu1  ;;  %v1138_v5 = vpop.f32.mrb[55].mxu0 }
 0x151   : > { %v1563_v6 = vmul.f32 %v3030_v2, %v1400_v59  ;;  %v1497_v7 = vmul.f32 %v3030_v2, %v1136_v60  ;;  %v1403_v9 = vadd.f32 %v3052_v56, %v2226_v3  ;;  %v1139_v10 = vadd.f32 %v3052_v56, %v1138_v5  ;;  %v1394_v11 = vpop.f32.mrb[55].mxu1 }
 0x152   : > { %v1634_v12 = vadd.f32 %v3041_v52, %v1499_v63  ;;  %v1561_v13 = vmul.f32 %v3030_v2, %v1392_v0  ;;  %v1500_v14 = vmul.f32 %v3030_v2, %v1147_v1  ;;  %v1395_v15 = vadd.f32 %v3052_v56, %v1394_v11 }
 0x153   : > { %v1698_v16 = vadd.f32 %v3041_v52, %v1563_v6  ;;  %v1632_v17 = vadd.f32 %v3041_v52, %v1497_v7  ;;  %v1564_v18 = vmul.f32 %v3030_v2, %v1403_v9  ;;  %v1498_v19 = vmul.f32 %v3030_v2, %v1139_v10 }
 0x154   : > { %1763 = vst.msk [vmem:[%s2529_s13 + $0x1b0] sm:$0xff] %vm1708_vm1, %v1634_v12  ;;  %v1696_v20 = vadd.f32 %v3041_v52, %v1561_v13  ;;  %v1635_v21 = vadd.f32 %v3041_v52, %v1500_v14  ;;  %v1562_v22 = vmul.f32 %v3030_v2, %v1395_v15 }
 0x155   : > { %1827 = vst.msk [vmem:[%s2529_s13 + $0x3b0] sm:$0xff] %vm1708_vm1, %v1698_v16  ;;  %1761 = vst.msk [vmem:[%s2529_s13 + $0x1a0] sm:$0xff] %vm1708_vm1, %v1632_v17  ;;  %v1699_v23 = vadd.f32 %v3041_v52, %v1564_v18  ;;  %v1633_v24 = vadd.f32 %v3041_v52, %v1498_v19  ;;  %v2165_v25 = vpop.f32.mrb[56].mxu0 }
 0x156   : > { %1825 = vst.msk [vmem:[%s2529_s13 + $0x3a0] sm:$0xff] %vm1708_vm1, %v1696_v20  ;;  %1764 = vst.msk [vmem:[%s2529_s13 + $0x1b8] sm:$0xff] %vm1708_vm1, %v1635_v21  ;;  %v1697_v26 = vadd.f32 %v3041_v52, %v1562_v22  ;;  %v1160_v27 = vadd.f32 %v3052_v56, %v2165_v25  ;;  %v2229_v28 = vpop.f32.mrb[56].mxu1  ;;  %v1151_v29 = vpop.f32.mrb[57].mxu0 }
 0x157   : > { %1828 = vst.msk [vmem:[%s2529_s13 + $0x3b8] sm:$0xff] %vm1708_vm1, %v1699_v23  ;;  %1762 = vst.msk [vmem:[%s2529_s13 + $0x1a8] sm:$0xff] %vm1708_vm1, %v1633_v24  ;;  %v1416_v30 = vadd.f32 %v3052_v56, %v2229_v28  ;;  %v1152_v31 = vadd.f32 %v3052_v56, %v1151_v29  ;;  %v1407_v32 = vpop.f32.mrb[57].mxu1  ;;  %v2166_v33 = vpop.f32.mrb[58].mxu0 }
 0x158   : > { %1826 = vst.msk [vmem:[%s2529_s13 + $0x3a8] sm:$0xff] %vm1708_vm1, %v1697_v26  ;;  %v1503_v34 = vmul.f32 %v3030_v2, %v1160_v27  ;;  %v1408_v35 = vadd.f32 %v3052_v56, %v1407_v32  ;;  %v1163_v36 = vadd.f32 %v3052_v56, %v2166_v33  ;;  %v2230_v37 = vpop.f32.mrb[58].mxu1  ;;  %v1154_v38 = vpop.f32.mrb[59].mxu0 }
 0x159   : > { %v1567_v39 = vmul.f32 %v3030_v2, %v1416_v30  ;;  %v1501_v40 = vmul.f32 %v3030_v2, %v1152_v31  ;;  %v1419_v41 = vadd.f32 %v3052_v56, %v2230_v37  ;;  %v1155_v42 = vadd.f32 %v3052_v56, %v1154_v38  ;;  %v1410_v43 = vpop.f32.mrb[59].mxu1 }
 0x15a   : > { %v1638_v44 = vadd.f32 %v3041_v52, %v1503_v34  ;;  %v1565_v45 = vmul.f32 %v3030_v2, %v1408_v35  ;;  %v1504_v46 = vmul.f32 %v3030_v2, %v1163_v36  ;;  %v1411_v47 = vadd.f32 %v3052_v56, %v1410_v43 }
 0x15b   : > { %v1702_v48 = vadd.f32 %v3041_v52, %v1567_v39  ;;  %v1636_v49 = vadd.f32 %v3041_v52, %v1501_v40  ;;  %v1568_v50 = vmul.f32 %v3030_v2, %v1419_v41  ;;  %v1502_v51 = vmul.f32 %v3030_v2, %v1155_v42 }
 0x15c   : > { %1767 = vst.msk [vmem:[%s2529_s13 + $0x1d0] sm:$0xff] %vm1708_vm1, %v1638_v44  ;;  %v1700_v4 = vadd.f32 %v3041_v52, %v1565_v45  ;;  %v1639_v53 = vadd.f32 %v3041_v52, %v1504_v46  ;;  %v1566_v54 = vmul.f32 %v3030_v2, %v1411_v47 }
 0x15d   : > { %1831 = vst.msk [vmem:[%s2529_s13 + $0x3d0] sm:$0xff] %vm1708_vm1, %v1702_v48  ;;  %1765 = vst.msk [vmem:[%s2529_s13 + $0x1c0] sm:$0xff] %vm1708_vm1, %v1636_v49  ;;  %v1703_v55 = vadd.f32 %v3041_v52, %v1568_v50  ;;  %v1637_v8 = vadd.f32 %v3041_v52, %v1502_v51  ;;  %v2169_v57 = vpop.f32.mrb[60].mxu0 }
 0x15e   : > { %1829 = vst.msk [vmem:[%s2529_s13 + $0x3c0] sm:$0xff] %vm1708_vm1, %v1700_v4  ;;  %1768 = vst.msk [vmem:[%s2529_s13 + $0x1d8] sm:$0xff] %vm1708_vm1, %v1639_v53  ;;  %v1701_v58 = vadd.f32 %v3041_v52, %v1566_v54  ;;  %v1176_v59 = vadd.f32 %v3052_v56, %v2169_v57  ;;  %v2233_v60 = vpop.f32.mrb[60].mxu1  ;;  %v1167_v61 = vpop.f32.mrb[61].mxu0 }
 0x15f   : > { %1832 = vst.msk [vmem:[%s2529_s13 + $0x3d8] sm:$0xff] %vm1708_vm1, %v1703_v55  ;;  %1766 = vst.msk [vmem:[%s2529_s13 + $0x1c8] sm:$0xff] %vm1708_vm1, %v1637_v8  ;;  %v1432_v62 = vadd.f32 %v3052_v56, %v2233_v60  ;;  %v1168_v63 = vadd.f32 %v3052_v56, %v1167_v61  ;;  %v1423_v0 = vpop.f32.mrb[61].mxu1  ;;  %v2170_v1 = vpop.f32.mrb[62].mxu0 }
 0x160   : > { %1830 = vst.msk [vmem:[%s2529_s13 + $0x3c8] sm:$0xff] %vm1708_vm1, %v1701_v58  ;;  %v1507_v3 = vmul.f32 %v3030_v2, %v1176_v59  ;;  %v1424_v5 = vadd.f32 %v3052_v56, %v1423_v0  ;;  %v1179_v6 = vadd.f32 %v3052_v56, %v2170_v1  ;;  %v2234_v7 = vpop.f32.mrb[62].mxu1  ;;  %v1170_v9 = vpop.f32.mrb[63].mxu0 }
 0x161   : > { %v1571_v10 = vmul.f32 %v3030_v2, %v1432_v62  ;;  %v1505_v11 = vmul.f32 %v3030_v2, %v1168_v63  ;;  %v1435_v12 = vadd.f32 %v3052_v56, %v2234_v7  ;;  %v1171_v13 = vadd.f32 %v3052_v56, %v1170_v9  ;;  %v1426_v14 = vpop.f32.mrb[63].mxu1 }
 0x162   : > { %v1642_v15 = vadd.f32 %v3041_v52, %v1507_v3  ;;  %v1569_v16 = vmul.f32 %v3030_v2, %v1424_v5  ;;  %v1508_v17 = vmul.f32 %v3030_v2, %v1179_v6  ;;  %v1427_v18 = vadd.f32 %v3052_v56, %v1426_v14 }
 0x163   : > { %v1706_v19 = vadd.f32 %v3041_v52, %v1571_v10  ;;  %v1640_v20 = vadd.f32 %v3041_v52, %v1505_v11  ;;  %v1572_v21 = vmul.f32 %v3030_v2, %v1435_v12  ;;  %v1506_v22 = vmul.f32 %v3030_v2, %v1171_v13 }
 0x164   : > { %1771 = vst.msk [vmem:[%s2529_s13 + $0x1f0] sm:$0xff] %vm1708_vm1, %v1642_v15  ;;  %v1704_v23 = vadd.f32 %v3041_v52, %v1569_v16  ;;  %v1643_v24 = vadd.f32 %v3041_v52, %v1508_v17  ;;  %v1570_v25 = vmul.f32 %v3030_v2, %v1427_v18 }
 0x165   : > { %1835 = vst.msk [vmem:[%s2529_s13 + $0x3f0] sm:$0xff] %vm1708_vm1, %v1706_v19  ;;  %1769 = vst.msk [vmem:[%s2529_s13 + $0x1e0] sm:$0xff] %vm1708_vm1, %v1640_v20  ;;  %v1707_v56 = vadd.f32 %v3041_v52, %v1572_v21  ;;  %v1641_v26 = vadd.f32 %v3041_v52, %v1506_v22 }
 0x166   : > { %1833 = vst.msk [vmem:[%s2529_s13 + $0x3e0] sm:$0xff] %vm1708_vm1, %v1704_v23  ;;  %1772 = vst.msk [vmem:[%s2529_s13 + $0x1f8] sm:$0xff] %vm1708_vm1, %v1643_v24  ;;  %v1705_v27 = vadd.f32 %v3041_v52, %v1570_v25 }
 0x167   : > { %1836 = vst.msk [vmem:[%s2529_s13 + $0x3f8] sm:$0xff] %vm1708_vm1, %v1707_v56  ;;  %1770 = vst.msk [vmem:[%s2529_s13 + $0x1e8] sm:$0xff] %vm1708_vm1, %v1641_v26 }
 0x168   : > { %1834 = vst.msk [vmem:[%s2529_s13 + $0x3e8] sm:$0xff] %vm1708_vm1, %v1705_v27 }
 0x169 PF: > { %s15_s18 = sadd.s32 1, %s2322_s18  }
 0x16a   : > { %p12_p4 = scmp.ge.s32.totalorder %s15_s18, 4  }
 0x16c   :  { %14 = sbr.rel (!%p12_p4) target bundleno = 1 (0x1), region = 70 }

</bundles_post_ra>
